<compile_context>
chip_gen: v6e
topology: v6e:2x2x1
jax: 0.10.0
libtpu: 0.0.40
codegen_flags: <defaults>
</compile_context>

<pallas_src>
import jax
import jax.numpy as jnp
import numpy as np
from jax.experimental import pallas as pl
from jax.experimental.pallas import tpu as pltpu


def _round_up(x, m):
    return (x + m - 1) // m * m


# ------------------------------ Pallas kernel ------------------------------ #
def _make_up_doubleconv_kernel(H, W, C2, C1, CP):
    """Fused concat + pad + (Conv3x3+BN+ReLU) x2 for one batch element."""
    Cin = C2 + C1

    def kernel(x2_ref, x1_ref, w1_ref, s1_ref, b1_ref,
               w2_ref, s2_ref, b2_ref, o_ref, xp2, xp1, hpad):
        cdt = xp2.dtype

        # Zero the halo scratches every grid step: with "parallel" semantics a
        # megacore may hand a core only a subset of steps, so one-time init
        # keyed on program_id would be unsafe.
        xp2[...] = jnp.zeros_like(xp2)
        xp1[...] = jnp.zeros_like(xp1)
        hpad[...] = jnp.zeros_like(hpad)

        # Fused channel-concat + conv halo zero-padding, entirely in VMEM.
        xp2[1:H + 1, 1:W + 1, :] = x2_ref[0]
        xp1[1:H + 1, 1:W + 1, :] = x1_ref[0]

        # ---- conv1 + BN1 + ReLU: single im2col matmul, K = 9*(C2+C1) ----
        cols = []
        for dy in range(3):
            for dx in range(3):
                cols.append(xp2[dy:dy + H, dx:dx + W, :].reshape(H * W, C2))
                cols.append(xp1[dy:dy + H, dx:dx + W, :].reshape(H * W, C1))
        patch1 = jnp.concatenate(cols, axis=-1)                # (H*W, 9*Cin)
        h = jnp.dot(patch1, w1_ref[...], preferred_element_type=jnp.float32)
        h = jnp.maximum(h * s1_ref[...] + b1_ref[...], 0.0)    # (H*W, CP) f32

        # Intermediate stays in VMEM; re-pad spatially for the second conv.
        hpad[1:H + 1, 1:W + 1, :] = h.reshape(H, W, CP).astype(cdt)

        # ---- conv2 + BN2 + ReLU: single im2col matmul, K = 9*CP ----
        cols2 = [hpad[dy:dy + H, dx:dx + W, :].reshape(H * W, CP)
                 for dy in range(3) for dx in range(3)]
        patch2 = jnp.concatenate(cols2, axis=-1)               # (H*W, 9*CP)
        y = jnp.dot(patch2, w2_ref[...], preferred_element_type=jnp.float32)
        o_ref[0] = jnp.maximum(y * s2_ref[...] + b2_ref[...], 0.0)

    return kernel


def up_double_conv(x2, x1, params, *, eps=1e-5, use_bf16=False):
    """Fused concat([x2, x1]) + DoubleConv.  x2, x1: NHWC, same spatial size."""
    N, H, W, C2 = x2.shape
    C1 = x1.shape[-1]
    Cin = C2 + C1
    w1, b1 = params['w1'], params['b1']
    w2, b2 = params['w2'], params['b2']
    Cout = w1.shape[-1]
    CP = _round_up(Cout, 128)            # lane-dense padded channel count
    cdt = jnp.bfloat16 if use_bf16 else jnp.float32

    # Fold BatchNorm (inference / running stats) into per-channel scale & bias.
    def fold(g, be, m, v, cb):
        s = g / jnp.sqrt(v + eps)
        return s, (cb - m) * s + be

    s1, bb1 = fold(params['g1'], params['be1'], params['m1'], params['v1'], b1)
    s2, bb2 = fold(params['g2'], params['be2'], params['m2'], params['v2'], b2)

    def pad_c(a):                         # zero-pad last dim up to CP
        return jnp.pad(a, [(0, 0)] * (a.ndim - 1) + [(0, CP - a.shape[-1])])

    w1p = pad_c(w1.reshape(9 * Cin, Cout)).astype(cdt)                # (9*Cin, CP)
    w2p = (jnp.zeros((3, 3, CP, CP), cdt)
           .at[:, :, :Cout, :Cout].set(w2.astype(cdt))
           .reshape(9 * CP, CP))                                      # (9*CP, CP)
    s1p = pad_c(s1).reshape(1, CP).astype(jnp.float32)
    b1p = pad_c(bb1).reshape(1, CP).astype(jnp.float32)
    s2p = pad_c(s2).reshape(1, CP).astype(jnp.float32)
    b2p = pad_c(bb2).reshape(1, CP).astype(jnp.float32)

    kernel = _make_up_doubleconv_kernel(H, W, C2, C1, CP)
    out = pl.pallas_call(
        kernel,
        out_shape=jax.ShapeDtypeStruct((N, H * W, CP), jnp.float32),
        grid=(N,),
        in_specs=[
            pl.BlockSpec((1, H, W, C2), lambda n: (n, 0, 0, 0)),
            pl.BlockSpec((1, H, W, C1), lambda n: (n, 0, 0, 0)),
            pl.BlockSpec((9 * Cin, CP), lambda n: (0, 0)),
            pl.BlockSpec((1, CP), lambda n: (0, 0)),
            pl.BlockSpec((1, CP), lambda n: (0, 0)),
            pl.BlockSpec((9 * CP, CP), lambda n: (0, 0)),
            pl.BlockSpec((1, CP), lambda n: (0, 0)),
            pl.BlockSpec((1, CP), lambda n: (0, 0)),
        ],
        out_specs=pl.BlockSpec((1, H * W, CP), lambda n: (n, 0, 0)),
        scratch_shapes=[
            pltpu.VMEM((H + 2, W + 2, C2), cdt),   # zero-padded skip input
            pltpu.VMEM((H + 2, W + 2, C1), cdt),   # zero-padded upsampled input
            pltpu.VMEM((H + 2, W + 2, CP), cdt),   # zero-padded intermediate
        ],
        compiler_params=pltpu.CompilerParams(
            dimension_semantics=("parallel",),
            vmem_limit_bytes=32 * 1024 * 1024,
        ),
    )(x2.astype(cdt), x1.astype(cdt), w1p, s1p, b1p, w2p, s2p, b2p)

    return out[:, :, :Cout].reshape(N, H, W, Cout)


# --------------------------------- JAX glue -------------------------------- #
def _interp_matrix_align_corners(n_in, n_out):
    """Dense 1-D bilinear interpolation matrix (align_corners=True)."""
    if n_in == 1:
        return jnp.ones((n_out, 1), jnp.float32)
    src = jnp.arange(n_out, dtype=jnp.float32) * ((n_in - 1) / (n_out - 1))
    lo = jnp.floor(src).astype(jnp.int32)
    hi = jnp.minimum(lo + 1, n_in - 1)
    f = (src - lo.astype(jnp.float32))[:, None]
    return ((1.0 - f) * jax.nn.one_hot(lo, n_in, dtype=jnp.float32)
            + f * jax.nn.one_hot(hi, n_in, dtype=jnp.float32))


def _upsample2x_bilinear_matmul(x):
    """nn.Upsample(scale_factor=2, mode='bilinear', align_corners=True), NHWC.

    Expressed as two small dense interpolation matmuls (no gathers)."""
    N, H, W, C = x.shape
    My = _interp_matrix_align_corners(H, 2 * H)
    Mx = _interp_matrix_align_corners(W, 2 * W)
    hp = jax.lax.Precision.HIGHEST
    x = jnp.einsum('Hh,nhwc->nHwc', My, x, precision=hp)
    x = jnp.einsum('Ww,nhwc->nhWc', Mx, x, precision=hp)
    return x


def up_forward(params, x1_nchw, x2_nchw, *, use_bf16=False):
    """Forward of Up(in_channels, out_channels, bilinear=True).  NCHW in/out."""
    x1 = jnp.transpose(x1_nchw, (0, 2, 3, 1)).astype(jnp.float32)   # NHWC
    x2 = jnp.transpose(x2_nchw, (0, 2, 3, 1)).astype(jnp.float32)
    x1 = _upsample2x_bilinear_matmul(x1)
    diffY = x2.shape[1] - x1.shape[1]
    diffX = x2.shape[2] - x1.shape[2]
    # TODO(synk): negative diffs (cropping) not handled; UNet shapes keep them >= 0.
    x1 = jnp.pad(x1, ((0, 0),
                      (diffY // 2, diffY - diffY // 2),
                      (diffX // 2, diffX - diffX // 2),
                      (0, 0)))
    out = up_double_conv(x2, x1, params, use_bf16=use_bf16)   # concat fused in-kernel
    return jnp.transpose(out, (0, 3, 1, 2))                   # back to NCHW


# ----------------------------- pure-JAX reference --------------------------- #
def _upsample2x_bilinear_gather_ref(x):
    N, H, W, C = x.shape
    Ho, Wo = 2 * H, 2 * W

    def coords(n_in, n_out):
        if n_in == 1:
            src = jnp.zeros((n_out,), jnp.float32)
        else:
            src = jnp.arange(n_out, dtype=jnp.float32) * ((n_in - 1) / (n_out - 1))
        lo = jnp.floor(src).astype(jnp.int32)
        hi = jnp.minimum(lo + 1, n_in - 1)
        return lo, hi, src - lo.astype(jnp.float32)

    y0, y1, fy = coords(H, Ho)
    x0, x1, fx = coords(W, Wo)
    rows = x[:, y0] * (1.0 - fy)[None, :, None, None] + \
           x[:, y1] * fy[None, :, None, None]
    return rows[:, :, x0] * (1.0 - fx)[None, None, :, None] + \
           rows[:, :, x1] * fx[None, None, :, None]


def _ref_conv_bn_relu(x, w, b, g, be, m, v, eps=1e-5):
    y = jax.lax.conv_general_dilated(
        x, w, window_strides=(1, 1), padding='SAME',
        dimension_numbers=('NHWC', 'HWIO', 'NHWC'))
    y = g * (y + b - m) / jnp.sqrt(v + eps) + be
    return jnp.maximum(y, 0.0)


def up_forward_ref(params, x1_nchw, x2_nchw):
    x1 = jnp.transpose(x1_nchw, (0, 2, 3, 1)).astype(jnp.float32)
    x2 = jnp.transpose(x2_nchw, (0, 2, 3, 1)).astype(jnp.float32)
    x1 = _upsample2x_bilinear_gather_ref(x1)
    x = jnp.concatenate([x2, x1], axis=-1)
    h = _ref_conv_bn_relu(x, params['w1'], params['b1'],
                          params['g1'], params['be1'], params['m1'], params['v1'])
    h = _ref_conv_bn_relu(h, params['w2'], params['b2'],
                          params['g2'], params['be2'], params['m2'], params['v2'])
    return jnp.transpose(h, (0, 3, 1, 2))


# ------------------------------------ main ---------------------------------- #
if __name__ == "__main__":
    key = jax.random.PRNGKey(0)
    in_channels, out_channels = 8, 4
    N, H2, W2 = 2, 16, 16
    k = jax.random.split(key, 8)

    # x1 is the low-res feature map (in_channels//2 ch), x2 the skip connection.
    x1 = jax.random.normal(k[0], (N, in_channels // 2, H2 // 2, W2 // 2), jnp.float32)
    x2 = jax.random.normal(k[1], (N, in_channels // 2, H2, W2), jnp.float32)

    def bn_params(kk, c):
        kg, kb, km, kv = jax.random.split(kk, 4)
        return (jax.random.normal(kg, (c,), jnp.float32) * 0.1 + 1.0,      # gamma
                jax.random.normal(kb, (c,), jnp.float32) * 0.1,            # beta
                jax.random.normal(km, (c,), jnp.float32) * 0.1,            # running_mean
                jnp.abs(jax.random.normal(kv, (c,), jnp.float32)) + 0.5)   # running_var

    w1 = jax.random.normal(k[2], (3, 3, in_channels, out_channels), jnp.float32) * 0.1
    b1 = jax.random.normal(k[3], (out_channels,), jnp.float32) * 0.1
    g1, be1, m1, v1 = bn_params(k[4], out_channels)
    w2 = jax.random.normal(k[5], (3, 3, out_channels, out_channels), jnp.float32) * 0.1
    b2 = jax.random.normal(k[6], (out_channels,), jnp.float32) * 0.1
    g2, be2, m2, v2 = bn_params(k[7], out_channels)

    params = dict(w1=w1, b1=b1, g1=g1, be1=be1, m1=m1, v1=v1,
                  w2=w2, b2=b2, g2=g2, be2=be2, m2=m2, v2=v2)

    out = jax.block_until_ready(jax.jit(up_forward)(params, x1, x2))
    ref = jax.block_until_ready(up_forward_ref(params, x1, x2))
    if not np.allclose(np.asarray(out), np.asarray(ref), atol=1e-4, rtol=1e-4):
        raise AssertionError("Pallas Up kernel does not match JAX reference")

    print("KERNEL_OK")
</pallas_src>

<mosaic_0001>
module attributes {stable_mosaic.version = 11 : i64} {
  func.func @kernel(%arg0: i32, %arg1: memref<1x16x16x4xf32, #tpu.memory_space<vmem>>, %arg2: memref<1x16x16x4xf32, #tpu.memory_space<vmem>>, %arg3: memref<72x128xf32, #tpu.memory_space<vmem>>, %arg4: memref<1x128xf32, #tpu.memory_space<vmem>>, %arg5: memref<1x128xf32, #tpu.memory_space<vmem>>, %arg6: memref<1152x128xf32, #tpu.memory_space<vmem>>, %arg7: memref<1x128xf32, #tpu.memory_space<vmem>>, %arg8: memref<1x128xf32, #tpu.memory_space<vmem>>, %arg9: memref<1x256x128xf32, #tpu.memory_space<vmem>>, %arg10: memref<18x18x4xf32, #tpu.memory_space<vmem>>, %arg11: memref<18x18x4xf32, #tpu.memory_space<vmem>>, %arg12: memref<18x18x128xf32, #tpu.memory_space<vmem>>) attributes {dimension_semantics = [#tpu.dimension_semantics<parallel>], iteration_bounds = array<i64: 2>, scalar_prefetch = 0 : i64, scratch_operands = 3 : i64, tpu.core_type = #tpu.core_type<tc>, window_params = [{transform_indices = @transform_0, window_bounds = array<i64: 1, 16, 16, 4>}, {transform_indices = @transform_1, window_bounds = array<i64: 1, 16, 16, 4>}, {pipeline_mode = #tpu.pipeline_mode<synchronous>, transform_indices = @transform_2, window_bounds = array<i64: 72, 128>}, {pipeline_mode = #tpu.pipeline_mode<synchronous>, transform_indices = @transform_3, window_bounds = array<i64: 1, 128>}, {pipeline_mode = #tpu.pipeline_mode<synchronous>, transform_indices = @transform_4, window_bounds = array<i64: 1, 128>}, {pipeline_mode = #tpu.pipeline_mode<synchronous>, transform_indices = @transform_5, window_bounds = array<i64: 1152, 128>}, {pipeline_mode = #tpu.pipeline_mode<synchronous>, transform_indices = @transform_6, window_bounds = array<i64: 1, 128>}, {pipeline_mode = #tpu.pipeline_mode<synchronous>, transform_indices = @transform_7, window_bounds = array<i64: 1, 128>}, {transform_indices = @transform_8, window_bounds = array<i64: 1, 256, 128>}]} {
    %cst = arith.constant 0.000000e+00 : f32
    %0 = vector.broadcast %cst : f32 to vector<18x18x4xf32>
    %c0 = arith.constant 0 : index
    %c0_0 = arith.constant 0 : index
    %c0_1 = arith.constant 0 : index
    %1 = vector.load %arg10[%c0, %c0_0, %c0_1] : memref<18x18x4xf32, #tpu.memory_space<vmem>>, vector<18x18x4xf32>
    tpu.vector_store %arg10[%c0, %c0_0, %c0_1], %0 {strides = array<i32>} : memref<18x18x4xf32, #tpu.memory_space<vmem>>, vector<18x18x4xf32>,
    %cst_2 = arith.constant 0.000000e+00 : f32
    %2 = vector.broadcast %cst_2 : f32 to vector<18x18x4xf32>
    %c0_3 = arith.constant 0 : index
    %c0_4 = arith.constant 0 : index
    %c0_5 = arith.constant 0 : index
    %3 = vector.load %arg11[%c0_3, %c0_4, %c0_5] : memref<18x18x4xf32, #tpu.memory_space<vmem>>, vector<18x18x4xf32>
    tpu.vector_store %arg11[%c0_3, %c0_4, %c0_5], %2 {strides = array<i32>} : memref<18x18x4xf32, #tpu.memory_space<vmem>>, vector<18x18x4xf32>,
    %cst_6 = arith.constant 0.000000e+00 : f32
    %4 = vector.broadcast %cst_6 : f32 to vector<18x18x128xf32>
    %c0_7 = arith.constant 0 : index
    %c0_8 = arith.constant 0 : index
    %c0_9 = arith.constant 0 : index
    %5 = vector.load %arg12[%c0_7, %c0_8, %c0_9] : memref<18x18x128xf32, #tpu.memory_space<vmem>>, vector<18x18x128xf32>
    tpu.vector_store %arg12[%c0_7, %c0_8, %c0_9], %4 {strides = array<i32>} : memref<18x18x128xf32, #tpu.memory_space<vmem>>, vector<18x18x128xf32>,
    %c0_10 = arith.constant 0 : index
    %c0_11 = arith.constant 0 : index
    %c0_12 = arith.constant 0 : index
    %c0_13 = arith.constant 0 : index
    %6 = vector.load %arg1[%c0_10, %c0_11, %c0_12, %c0_13] : memref<1x16x16x4xf32, #tpu.memory_space<vmem>>, vector<1x16x16x4xf32>
    %7 = vector.shape_cast %6 : vector<1x16x16x4xf32> to vector<16x16x4xf32>
    %c1 = arith.constant 1 : index
    %c1_14 = arith.constant 1 : index
    %c0_15 = arith.constant 0 : index
    %8 = vector.load %arg10[%c1, %c1_14, %c0_15] : memref<18x18x4xf32, #tpu.memory_space<vmem>>, vector<16x16x4xf32>
    tpu.vector_store %arg10[%c1, %c1_14, %c0_15], %7 {strides = array<i32>} : memref<18x18x4xf32, #tpu.memory_space<vmem>>, vector<16x16x4xf32>,
    %c0_16 = arith.constant 0 : index
    %c0_17 = arith.constant 0 : index
    %c0_18 = arith.constant 0 : index
    %c0_19 = arith.constant 0 : index
    %9 = vector.load %arg2[%c0_16, %c0_17, %c0_18, %c0_19] : memref<1x16x16x4xf32, #tpu.memory_space<vmem>>, vector<1x16x16x4xf32>
    %10 = vector.shape_cast %9 : vector<1x16x16x4xf32> to vector<16x16x4xf32>
    %c1_20 = arith.constant 1 : index
    %c1_21 = arith.constant 1 : index
    %c0_22 = arith.constant 0 : index
    %11 = vector.load %arg11[%c1_20, %c1_21, %c0_22] : memref<18x18x4xf32, #tpu.memory_space<vmem>>, vector<16x16x4xf32>
    tpu.vector_store %arg11[%c1_20, %c1_21, %c0_22], %10 {strides = array<i32>} : memref<18x18x4xf32, #tpu.memory_space<vmem>>, vector<16x16x4xf32>,
    %c0_23 = arith.constant 0 : index
    %c0_24 = arith.constant 0 : index
    %c0_25 = arith.constant 0 : index
    %12 = vector.load %arg10[%c0_23, %c0_24, %c0_25] : memref<18x18x4xf32, #tpu.memory_space<vmem>>, vector<16x16x4xf32>
    %13 = vector.shape_cast %12 : vector<16x16x4xf32> to vector<256x4xf32>
    %c0_26 = arith.constant 0 : index
    %c0_27 = arith.constant 0 : index
    %c0_28 = arith.constant 0 : index
    %14 = vector.load %arg11[%c0_26, %c0_27, %c0_28] : memref<18x18x4xf32, #tpu.memory_space<vmem>>, vector<16x16x4xf32>
    %15 = vector.shape_cast %14 : vector<16x16x4xf32> to vector<256x4xf32>
    %c0_29 = arith.constant 0 : index
    %c1_30 = arith.constant 1 : index
    %c0_31 = arith.constant 0 : index
    %16 = vector.load %arg10[%c0_29, %c1_30, %c0_31] : memref<18x18x4xf32, #tpu.memory_space<vmem>>, vector<16x16x4xf32>
    %17 = vector.shape_cast %16 : vector<16x16x4xf32> to vector<256x4xf32>
    %c0_32 = arith.constant 0 : index
    %c1_33 = arith.constant 1 : index
    %c0_34 = arith.constant 0 : index
    %18 = vector.load %arg11[%c0_32, %c1_33, %c0_34] : memref<18x18x4xf32, #tpu.memory_space<vmem>>, vector<16x16x4xf32>
    %19 = vector.shape_cast %18 : vector<16x16x4xf32> to vector<256x4xf32>
    %c0_35 = arith.constant 0 : index
    %c2 = arith.constant 2 : index
    %c0_36 = arith.constant 0 : index
    %20 = vector.load %arg10[%c0_35, %c2, %c0_36] : memref<18x18x4xf32, #tpu.memory_space<vmem>>, vector<16x16x4xf32>
    %21 = vector.shape_cast %20 : vector<16x16x4xf32> to vector<256x4xf32>
    %c0_37 = arith.constant 0 : index
    %c2_38 = arith.constant 2 : index
    %c0_39 = arith.constant 0 : index
    %22 = vector.load %arg11[%c0_37, %c2_38, %c0_39] : memref<18x18x4xf32, #tpu.memory_space<vmem>>, vector<16x16x4xf32>
    %23 = vector.shape_cast %22 : vector<16x16x4xf32> to vector<256x4xf32>
    %c1_40 = arith.constant 1 : index
    %c0_41 = arith.constant 0 : index
    %c0_42 = arith.constant 0 : index
    %24 = vector.load %arg10[%c1_40, %c0_41, %c0_42] : memref<18x18x4xf32, #tpu.memory_space<vmem>>, vector<16x16x4xf32>
    %25 = vector.shape_cast %24 : vector<16x16x4xf32> to vector<256x4xf32>
    %c1_43 = arith.constant 1 : index
    %c0_44 = arith.constant 0 : index
    %c0_45 = arith.constant 0 : index
    %26 = vector.load %arg11[%c1_43, %c0_44, %c0_45] : memref<18x18x4xf32, #tpu.memory_space<vmem>>, vector<16x16x4xf32>
    %27 = vector.shape_cast %26 : vector<16x16x4xf32> to vector<256x4xf32>
    %c1_46 = arith.constant 1 : index
    %c1_47 = arith.constant 1 : index
    %c0_48 = arith.constant 0 : index
    %28 = vector.load %arg10[%c1_46, %c1_47, %c0_48] : memref<18x18x4xf32, #tpu.memory_space<vmem>>, vector<16x16x4xf32>
    %29 = vector.shape_cast %28 : vector<16x16x4xf32> to vector<256x4xf32>
    %c1_49 = arith.constant 1 : index
    %c1_50 = arith.constant 1 : index
    %c0_51 = arith.constant 0 : index
    %30 = vector.load %arg11[%c1_49, %c1_50, %c0_51] : memref<18x18x4xf32, #tpu.memory_space<vmem>>, vector<16x16x4xf32>
    %31 = vector.shape_cast %30 : vector<16x16x4xf32> to vector<256x4xf32>
    %c1_52 = arith.constant 1 : index
    %c2_53 = arith.constant 2 : index
    %c0_54 = arith.constant 0 : index
    %32 = vector.load %arg10[%c1_52, %c2_53, %c0_54] : memref<18x18x4xf32, #tpu.memory_space<vmem>>, vector<16x16x4xf32>
    %33 = vector.shape_cast %32 : vector<16x16x4xf32> to vector<256x4xf32>
    %c1_55 = arith.constant 1 : index
    %c2_56 = arith.constant 2 : index
    %c0_57 = arith.constant 0 : index
    %34 = vector.load %arg11[%c1_55, %c2_56, %c0_57] : memref<18x18x4xf32, #tpu.memory_space<vmem>>, vector<16x16x4xf32>
    %35 = vector.shape_cast %34 : vector<16x16x4xf32> to vector<256x4xf32>
    %c2_58 = arith.constant 2 : index
    %c0_59 = arith.constant 0 : index
    %c0_60 = arith.constant 0 : index
    %36 = vector.load %arg10[%c2_58, %c0_59, %c0_60] : memref<18x18x4xf32, #tpu.memory_space<vmem>>, vector<16x16x4xf32>
    %37 = vector.shape_cast %36 : vector<16x16x4xf32> to vector<256x4xf32>
    %c2_61 = arith.constant 2 : index
    %c0_62 = arith.constant 0 : index
    %c0_63 = arith.constant 0 : index
    %38 = vector.load %arg11[%c2_61, %c0_62, %c0_63] : memref<18x18x4xf32, #tpu.memory_space<vmem>>, vector<16x16x4xf32>
    %39 = vector.shape_cast %38 : vector<16x16x4xf32> to vector<256x4xf32>
    %c2_64 = arith.constant 2 : index
    %c1_65 = arith.constant 1 : index
    %c0_66 = arith.constant 0 : index
    %40 = vector.load %arg10[%c2_64, %c1_65, %c0_66] : memref<18x18x4xf32, #tpu.memory_space<vmem>>, vector<16x16x4xf32>
    %41 = vector.shape_cast %40 : vector<16x16x4xf32> to vector<256x4xf32>
    %c2_67 = arith.constant 2 : index
    %c1_68 = arith.constant 1 : index
    %c0_69 = arith.constant 0 : index
    %42 = vector.load %arg11[%c2_67, %c1_68, %c0_69] : memref<18x18x4xf32, #tpu.memory_space<vmem>>, vector<16x16x4xf32>
    %43 = vector.shape_cast %42 : vector<16x16x4xf32> to vector<256x4xf32>
    %c2_70 = arith.constant 2 : index
    %c2_71 = arith.constant 2 : index
    %c0_72 = arith.constant 0 : index
    %44 = vector.load %arg10[%c2_70, %c2_71, %c0_72] : memref<18x18x4xf32, #tpu.memory_space<vmem>>, vector<16x16x4xf32>
    %45 = vector.shape_cast %44 : vector<16x16x4xf32> to vector<256x4xf32>
    %c2_73 = arith.constant 2 : index
    %c2_74 = arith.constant 2 : index
    %c0_75 = arith.constant 0 : index
    %46 = vector.load %arg11[%c2_73, %c2_74, %c0_75] : memref<18x18x4xf32, #tpu.memory_space<vmem>>, vector<16x16x4xf32>
    %47 = vector.shape_cast %46 : vector<16x16x4xf32> to vector<256x4xf32>
    %48 = tpu.concatenate %13, %15, %17, %19, %21, %23, %25, %27, %29, %31, %33, %35, %37, %39, %41, %43 in 1 : vector<256x4xf32>, vector<256x4xf32>, vector<256x4xf32>, vector<256x4xf32>, vector<256x4xf32>, vector<256x4xf32>, vector<256x4xf32>, vector<256x4xf32>, vector<256x4xf32>, vector<256x4xf32>, vector<256x4xf32>, vector<256x4xf32>, vector<256x4xf32>, vector<256x4xf32>, vector<256x4xf32>, vector<256x4xf32> -> vector<256x64xf32>
    %49 = tpu.concatenate %45, %47 in 1 : vector<256x4xf32>, vector<256x4xf32> -> vector<256x8xf32>
    %50 = tpu.concatenate %48, %49 in 1 : vector<256x64xf32>, vector<256x8xf32> -> vector<256x72xf32>
    %c0_76 = arith.constant 0 : index
    %c0_77 = arith.constant 0 : index
    %51 = vector.load %arg3[%c0_76, %c0_77] : memref<72x128xf32, #tpu.memory_space<vmem>>, vector<72x128xf32>
    %cst_78 = arith.constant dense<0.000000e+00> : vector<256x128xf32>
    %52 = tpu.matmul %50, %51, %cst_78 {dimension_numbers = #tpu.dot_dimension_numbers<[1], [0], [0], [1], [0, 0, 1, 1], [], []>} : vector<256x72xf32>, vector<72x128xf32>, vector<256x128xf32> -> vector<256x128xf32>
    %c0_79 = arith.constant 0 : index
    %c0_80 = arith.constant 0 : index
    %53 = vector.load %arg4[%c0_79, %c0_80] : memref<1x128xf32, #tpu.memory_space<vmem>>, vector<1x128xf32>
    %54 = vector.broadcast %53 : vector<1x128xf32> to vector<256x128xf32>
    %55 = arith.mulf %52, %54 : vector<256x128xf32>
    %c0_81 = arith.constant 0 : index
    %c0_82 = arith.constant 0 : index
    %56 = vector.load %arg5[%c0_81, %c0_82] : memref<1x128xf32, #tpu.memory_space<vmem>>, vector<1x128xf32>
    %57 = vector.broadcast %56 : vector<1x128xf32> to vector<256x128xf32>
    %58 = arith.addf %55, %57 : vector<256x128xf32>
    %cst_83 = arith.constant 0.000000e+00 : f32
    %59 = vector.broadcast %cst_83 : f32 to vector<256x128xf32>
    %60 = arith.maximumf %58, %59 : vector<256x128xf32>
    %61 = vector.shape_cast %60 : vector<256x128xf32> to vector<16x16x128xf32>
    %c1_84 = arith.constant 1 : index
    %c1_85 = arith.constant 1 : index
    %c0_86 = arith.constant 0 : index
    %62 = vector.load %arg12[%c1_84, %c1_85, %c0_86] : memref<18x18x128xf32, #tpu.memory_space<vmem>>, vector<16x16x128xf32>
    tpu.vector_store %arg12[%c1_84, %c1_85, %c0_86], %61 {strides = array<i32>} : memref<18x18x128xf32, #tpu.memory_space<vmem>>, vector<16x16x128xf32>,
    %c0_87 = arith.constant 0 : index
    %c0_88 = arith.constant 0 : index
    %c0_89 = arith.constant 0 : index
    %63 = vector.load %arg12[%c0_87, %c0_88, %c0_89] : memref<18x18x128xf32, #tpu.memory_space<vmem>>, vector<16x16x128xf32>
    %64 = vector.shape_cast %63 : vector<16x16x128xf32> to vector<256x128xf32>
    %c0_90 = arith.constant 0 : index
    %c1_91 = arith.constant 1 : index
    %c0_92 = arith.constant 0 : index
    %65 = vector.load %arg12[%c0_90, %c1_91, %c0_92] : memref<18x18x128xf32, #tpu.memory_space<vmem>>, vector<16x16x128xf32>
    %66 = vector.shape_cast %65 : vector<16x16x128xf32> to vector<256x128xf32>
    %c0_93 = arith.constant 0 : index
    %c2_94 = arith.constant 2 : index
    %c0_95 = arith.constant 0 : index
    %67 = vector.load %arg12[%c0_93, %c2_94, %c0_95] : memref<18x18x128xf32, #tpu.memory_space<vmem>>, vector<16x16x128xf32>
    %68 = vector.shape_cast %67 : vector<16x16x128xf32> to vector<256x128xf32>
    %c1_96 = arith.constant 1 : index
    %c0_97 = arith.constant 0 : index
    %c0_98 = arith.constant 0 : index
    %69 = vector.load %arg12[%c1_96, %c0_97, %c0_98] : memref<18x18x128xf32, #tpu.memory_space<vmem>>, vector<16x16x128xf32>
    %70 = vector.shape_cast %69 : vector<16x16x128xf32> to vector<256x128xf32>
    %c1_99 = arith.constant 1 : index
    %c1_100 = arith.constant 1 : index
    %c0_101 = arith.constant 0 : index
    %71 = vector.load %arg12[%c1_99, %c1_100, %c0_101] : memref<18x18x128xf32, #tpu.memory_space<vmem>>, vector<16x16x128xf32>
    %72 = vector.shape_cast %71 : vector<16x16x128xf32> to vector<256x128xf32>
    %c1_102 = arith.constant 1 : index
    %c2_103 = arith.constant 2 : index
    %c0_104 = arith.constant 0 : index
    %73 = vector.load %arg12[%c1_102, %c2_103, %c0_104] : memref<18x18x128xf32, #tpu.memory_space<vmem>>, vector<16x16x128xf32>
    %74 = vector.shape_cast %73 : vector<16x16x128xf32> to vector<256x128xf32>
    %c2_105 = arith.constant 2 : index
    %c0_106 = arith.constant 0 : index
    %c0_107 = arith.constant 0 : index
    %75 = vector.load %arg12[%c2_105, %c0_106, %c0_107] : memref<18x18x128xf32, #tpu.memory_space<vmem>>, vector<16x16x128xf32>
    %76 = vector.shape_cast %75 : vector<16x16x128xf32> to vector<256x128xf32>
    %c2_108 = arith.constant 2 : index
    %c1_109 = arith.constant 1 : index
    %c0_110 = arith.constant 0 : index
    %77 = vector.load %arg12[%c2_108, %c1_109, %c0_110] : memref<18x18x128xf32, #tpu.memory_space<vmem>>, vector<16x16x128xf32>
    %78 = vector.shape_cast %77 : vector<16x16x128xf32> to vector<256x128xf32>
    %c2_111 = arith.constant 2 : index
    %c2_112 = arith.constant 2 : index
    %c0_113 = arith.constant 0 : index
    %79 = vector.load %arg12[%c2_111, %c2_112, %c0_113] : memref<18x18x128xf32, #tpu.memory_space<vmem>>, vector<16x16x128xf32>
    %80 = vector.shape_cast %79 : vector<16x16x128xf32> to vector<256x128xf32>
    %81 = tpu.concatenate %64, %66, %68, %70, %72, %74, %76, %78, %80 in 1 : vector<256x128xf32>, vector<256x128xf32>, vector<256x128xf32>, vector<256x128xf32>, vector<256x128xf32>, vector<256x128xf32>, vector<256x128xf32>, vector<256x128xf32>, vector<256x128xf32> -> vector<256x1152xf32>
    %c0_114 = arith.constant 0 : index
    %c0_115 = arith.constant 0 : index
    %82 = vector.load %arg6[%c0_114, %c0_115] : memref<1152x128xf32, #tpu.memory_space<vmem>>, vector<1152x128xf32>
    %cst_116 = arith.constant dense<0.000000e+00> : vector<256x128xf32>
    %83 = tpu.matmul %81, %82, %cst_116 {dimension_numbers = #tpu.dot_dimension_numbers<[1], [0], [0], [1], [0, 0, 1, 1], [], []>} : vector<256x1152xf32>, vector<1152x128xf32>, vector<256x128xf32> -> vector<256x128xf32>
    %c0_117 = arith.constant 0 : index
    %c0_118 = arith.constant 0 : index
    %84 = vector.load %arg7[%c0_117, %c0_118] : memref<1x128xf32, #tpu.memory_space<vmem>>, vector<1x128xf32>
    %85 = vector.broadcast %84 : vector<1x128xf32> to vector<256x128xf32>
    %86 = arith.mulf %83, %85 : vector<256x128xf32>
    %c0_119 = arith.constant 0 : index
    %c0_120 = arith.constant 0 : index
    %87 = vector.load %arg8[%c0_119, %c0_120] : memref<1x128xf32, #tpu.memory_space<vmem>>, vector<1x128xf32>
    %88 = vector.broadcast %87 : vector<1x128xf32> to vector<256x128xf32>
    %89 = arith.addf %86, %88 : vector<256x128xf32>
    %cst_121 = arith.constant 0.000000e+00 : f32
    %90 = vector.broadcast %cst_121 : f32 to vector<256x128xf32>
    %91 = arith.maximumf %89, %90 : vector<256x128xf32>
    %c0_122 = arith.constant 0 : index
    %c0_123 = arith.constant 0 : index
    %c0_124 = arith.constant 0 : index
    %92 = vector.load %arg9[%c0_122, %c0_123, %c0_124] : memref<1x256x128xf32, #tpu.memory_space<vmem>>, vector<1x256x128xf32>
    %93 = vector.shape_cast %92 : vector<1x256x128xf32> to vector<256x128xf32>
    %94 = vector.shape_cast %91 : vector<256x128xf32> to vector<1x256x128xf32>
    tpu.vector_store %arg9[%c0_122, %c0_123, %c0_124], %94 {strides = array<i32>} : memref<1x256x128xf32, #tpu.memory_space<vmem>>, vector<1x256x128xf32>,
    return
  }
  func.func @transform_0(%arg0: i32) -> (i32, i32, i32, i32) {
    %c0_i32 = arith.constant 0 : i32
    %c0_i32_0 = arith.constant 0 : i32
    %c0_i32_1 = arith.constant 0 : i32
    %c0_i32_2 = arith.constant 0 : i32
    return %arg0, %c0_i32, %c0_i32_0, %c0_i32_1 : i32, i32, i32, i32
  }
  func.func @transform_1(%arg0: i32) -> (i32, i32, i32, i32) {
    %c0_i32 = arith.constant 0 : i32
    %c0_i32_0 = arith.constant 0 : i32
    %c0_i32_1 = arith.constant 0 : i32
    %c0_i32_2 = arith.constant 0 : i32
    return %arg0, %c0_i32, %c0_i32_0, %c0_i32_1 : i32, i32, i32, i32
  }
  func.func @transform_2(%arg0: i32) -> (i32, i32) {
    %c0_i32 = arith.constant 0 : i32
    %c0_i32_0 = arith.constant 0 : i32
    %c0_i32_1 = arith.constant 0 : i32
    return %c0_i32, %c0_i32_0 : i32, i32
  }
  func.func @transform_3(%arg0: i32) -> (i32, i32) {
    %c0_i32 = arith.constant 0 : i32
    %c0_i32_0 = arith.constant 0 : i32
    %c0_i32_1 = arith.constant 0 : i32
    return %c0_i32, %c0_i32_0 : i32, i32
  }
  func.func @transform_4(%arg0: i32) -> (i32, i32) {
    %c0_i32 = arith.constant 0 : i32
    %c0_i32_0 = arith.constant 0 : i32
    %c0_i32_1 = arith.constant 0 : i32
    return %c0_i32, %c0_i32_0 : i32, i32
  }
  func.func @transform_5(%arg0: i32) -> (i32, i32) {
    %c0_i32 = arith.constant 0 : i32
    %c0_i32_0 = arith.constant 0 : i32
    %c0_i32_1 = arith.constant 0 : i32
    return %c0_i32, %c0_i32_0 : i32, i32
  }
  func.func @transform_6(%arg0: i32) -> (i32, i32) {
    %c0_i32 = arith.constant 0 : i32
    %c0_i32_0 = arith.constant 0 : i32
    %c0_i32_1 = arith.constant 0 : i32
    return %c0_i32, %c0_i32_0 : i32, i32
  }
  func.func @transform_7(%arg0: i32) -> (i32, i32) {
    %c0_i32 = arith.constant 0 : i32
    %c0_i32_0 = arith.constant 0 : i32
    %c0_i32_1 = arith.constant 0 : i32
    return %c0_i32, %c0_i32_0 : i32, i32
  }
  func.func @transform_8(%arg0: i32) -> (i32, i32, i32) {
    %c0_i32 = arith.constant 0 : i32
    %c0_i32_0 = arith.constant 0 : i32
    %c0_i32_1 = arith.constant 0 : i32
    return %arg0, %c0_i32, %c0_i32_0 : i32, i32, i32
  }
}

</mosaic_0001>

<bundles_post_ra>
// kernel: up_forward.1
= control target key start
LH: loop header
LB: loop body
LE: loop exit
PB: predicated region body
PF: predicated region fallthrough
CT: control target
= control target key end

     0   :  { %s6612_s27 = smov 0   ;;  %s11034_s0 = inlined_call_operand.vmem [shape: f32[2,16,16,4], index: 0, kind: input, shape index: {}]   ;;  %s11035_s1 = inlined_call_operand.vmem [shape: f32[2,16,16,4], index: 1, kind: input, shape index: {}]   ;;  %s11036_s2 = inlined_call_operand.vmem [shape: f32[72,128], index: 2, kind: input, shape index: {}]   ;;  %s11037_s3 = inlined_call_operand.vmem [shape: f32[1,128], index: 3, kind: input, shape index: {}]   ;;  %s11038_s4 = inlined_call_operand.vmem [shape: f32[1,128], index: 4, kind: input, shape index: {}]   ;;  %s11039_s5 = inlined_call_operand.vmem [shape: f32[1152,128], index: 5, kind: input, shape index: {}]   ;;  %s11040_s6 = inlined_call_operand.vmem [shape: f32[1,128], index: 6, kind: input, shape index: {}]   ;;  %s11041_s7 = inlined_call_operand.vmem [shape: f32[1,128], index: 7, kind: input, shape index: {}]   ;;  %s11042_s8 = inlined_call_operand.vmem [shape: f32[2,256,128], index: 8, kind: output, shape index: {}]  }
   0x1 LB: > { %s6174_s28 = sadd.s32 4294967295, %s6548_s27   ;;  %p6178_p0 = scmp.ge.s32.totalorder %s6548_s27, 1  ;;  %s6548_s27 = sphi %s6612_s27, %s18_s27  }
   0x2   : > { %p272_p1 = scmp.lt.s32.totalorder %s6548_s27, 3 }
   0x4   : > { %p273_p2 = pnand %p6178_p0, %p272_p1 }
   0x6   : > { %276 = sbr.rel (%p273_p2) target bundleno = 1872 (0x750), region = 52 }
   0xb   : > { %vm326_vm0 = vcmask 31744   ;;  %p6622_p3 = scmp.lt.s32.totalorder %s6174_s28, 1  ;;  %vm329_vm1 = vcmask 25600   ;;  %v6550_v0 = vmov 0.0   ;;  %s6551_s12 = smov 4   ;;  %vm3150_vm2 = vcmask 64512  }
   0xc   : > { %382 = vst.msk [vmem:[#allocation3] sm:$0xff] %vm326_vm0, %v6550_v0  ;;  %327 = vst.msk [vmem:[#allocation2] sm:$0xff] %vm326_vm0, %v6550_v0  ;;  %4840 = vmatprep.subr.mxu1 %v6550_v0  ;;  %s6552_s16 = smov 8   ;;  %s6553_s17 = smov 12   ;;  %vm11045_vm3 = vcmask 97280   ;;  %vm3216_vm4 = vcmask 130048  }
   0xd   : > { %328 = vst.msk [vmem:[#allocation2 + $0x8] sm:$0xff] %vm326_vm0, %v6550_v0  ;;  %331 = vst.msk [vmem:[#allocation2 + $0x18] sm:$0xff] %vm326_vm0, %v6550_v0  ;;  %s11392_s28 = smov (!%p6622_p3, %s6174_s28), 1  ;;  %s6554_s18 = smov 16   ;;  %vm3249_vm5 = vcmask 162816   ;;  %vm11043_vm6 = vcmask 195584  }
   0xe   : > { %332 = vst.msk [vmem:[#allocation2 + $0x20] sm:$0xff] %vm326_vm0, %v6550_v0  ;;  %334 = vst.msk [vmem:[#allocation2 + $0x30] sm:$0xff] %vm326_vm0, %v6550_v0  ;;  %s6901_s30 = sshll.u32 %s11392_s28, 8  ;;  %s6555_s19 = smov 20   ;;  %vm3315_vm7 = vcmask 228352   ;;  %vm3348_vm8 = vcmask 261120  }
   0xf   : > { %335 = vst.msk [vmem:[#allocation2 + $0x38] sm:$0xff] %vm326_vm0, %v6550_v0  ;;  %337 = vst.msk [vmem:[#allocation2 + $0x48] sm:$0xff] %vm326_vm0, %v6550_v0  ;;  %s6907_s11 = scalar_lea.vmem %s11035_s1, %s6901_s30  ;;  %s6970_s15 = scalar_lea.vmem %s11034_s0, %s6901_s30  ;;  %vm3381_vm9 = vcmask 293888   ;;  %vm3414_vm10 = vcmask 326656   ;;  %vm3447_vm11 = vcmask 359424   ;;  %vm3480_vm12 = vcmask 392192  }
  0x10   : > { %338 = vst.msk [vmem:[#allocation2 + $0x50] sm:$0xff] %vm326_vm0, %v6550_v0  ;;  %340 = vst.msk [vmem:[#allocation2 + $0x60] sm:$0xff] %vm326_vm0, %v6550_v0  ;;  %v555_v1 = vld [vmem:[%s6907_s11] sm:$0xff]  ;;  %v557_v2 = vld [vmem:[%s6907_s11 + $0x10] sm:$0xff]  ;;  %s6556_s20 = smov 24   ;;  %s6557_s21 = smov 28  }
  0x11   : > { %341 = vst.msk [vmem:[#allocation2 + $0x68] sm:$0xff] %vm326_vm0, %v6550_v0  ;;  %343 = vst.msk [vmem:[#allocation2 + $0x78] sm:$0xff] %vm326_vm0, %v6550_v0  ;;  %v556_v3 = vld [vmem:[%s6907_s11 + $0x8] sm:$0xff]  ;;  %v559_v4 = vld [vmem:[%s6907_s11 + $0x20] sm:$0xff]  ;;  %s6558_s22 = smov 32   ;;  %s6559_s23 = smov 36  }
  0x12   : > { %344 = vst.msk [vmem:[#allocation2 + $0x80] sm:$0xff] %vm326_vm0, %v6550_v0  ;;  %346 = vst.msk [vmem:[#allocation2 + $0x90] sm:$0xff] %vm326_vm0, %v6550_v0  ;;  %v558_v5 = vld [vmem:[%s6907_s11 + $0x18] sm:$0xff]  ;;  %v561_v6 = vld [vmem:[%s6907_s11 + $0x30] sm:$0xff]  ;;  %s6560_s24 = smov 40   ;;  %s6561_s25 = smov 44  }
  0x13   : > { %347 = vst.msk [vmem:[#allocation2 + $0x98] sm:$0xff] %vm326_vm0, %v6550_v0  ;;  %349 = vst.msk [vmem:[#allocation2 + $0xa8] sm:$0xff] %vm326_vm0, %v6550_v0  ;;  %v652_v7 = vld [vmem:[#allocation3] sm:$0xff]  ;;  %v560_v9 = vld [vmem:[%s6907_s11 + $0x28] sm:$0xff]  ;;  %s6562_s26 = smov 48   ;;  %s6563_s28 = smov 52  }
  0x14   : > { %350 = vst.msk [vmem:[#allocation2 + $0xb0] sm:$0xff] %vm326_vm0, %v6550_v0  ;;  %352 = vst.msk [vmem:[#allocation2 + $0xc0] sm:$0xff] %vm326_vm0, %v6550_v0  ;;  %1230 = vrot.lane.b32.xlu0 %v652_v7, %s6551_s12  ;;  %v563_v10 = vld [vmem:[%s6907_s11 + $0x40] sm:$0xff]  ;;  %v562_v11 = vld [vmem:[%s6907_s11 + $0x38] sm:$0xff]  ;;  %s6564_s29 = smov 56   ;;  %vm3513_vm13 = vcmask 424960  }
  0x15   : > { %353 = vst.msk [vmem:[#allocation2 + $0xc8] sm:$0xff] %vm326_vm0, %v6550_v0  ;;  %355 = vst.msk [vmem:[#allocation2 + $0xd8] sm:$0xff] %vm326_vm0, %v6550_v0  ;;  %v565_v12 = vld [vmem:[%s6907_s11 + $0x50] sm:$0xff]  ;;  %v564_v13 = vld [vmem:[%s6907_s11 + $0x48] sm:$0xff]  ;;  %vm3546_vm14 = vcmask 457728   ;;  %vm3579_vm15 = vcmask 490496  }
  0x16   : > { %356 = vst.msk [vmem:[#allocation2 + $0xe0] sm:$0xff] %vm326_vm0, %v6550_v0  ;;  %358 = vst.msk [vmem:[#allocation2 + $0xf0] sm:$0xff] %vm326_vm0, %v6550_v0  ;;  %v567_v14 = vld [vmem:[%s6907_s11 + $0x60] sm:$0xff]  ;;  %v566_v15 = vld [vmem:[%s6907_s11 + $0x58] sm:$0xff] }
  0x17   : > { %359 = vst.msk [vmem:[#allocation2 + $0xf8] sm:$0xff] %vm326_vm0, %v6550_v0  ;;  %361 = vst.msk [vmem:[#allocation2 + $0x108] sm:$0xff] %vm326_vm0, %v6550_v0  ;;  %v569_v16 = vld [vmem:[%s6907_s11 + $0x70] sm:$0xff]  ;;  %v568_v17 = vld [vmem:[%s6907_s11 + $0x68] sm:$0xff] }
  0x18   : > { %362 = vst.msk [vmem:[#allocation2 + $0x110] sm:$0xff] %vm326_vm0, %v6550_v0  ;;  %364 = vst.msk [vmem:[#allocation2 + $0x120] sm:$0xff] %vm326_vm0, %v6550_v0  ;;  %v571_v18 = vld [vmem:[%s6907_s11 + $0x80] sm:$0xff]  ;;  %v570_v19 = vld [vmem:[%s6907_s11 + $0x78] sm:$0xff] }
  0x19   : > { %365 = vst.msk [vmem:[#allocation2 + $0x128] sm:$0xff] %vm326_vm0, %v6550_v0  ;;  %367 = vst.msk [vmem:[#allocation2 + $0x138] sm:$0xff] %vm326_vm0, %v6550_v0  ;;  %v573_v20 = vld [vmem:[%s6907_s11 + $0x90] sm:$0xff]  ;;  %v572_v21 = vld [vmem:[%s6907_s11 + $0x88] sm:$0xff] }
  0x1a   : > { %368 = vst.msk [vmem:[#allocation2 + $0x140] sm:$0xff] %vm326_vm0, %v6550_v0  ;;  %370 = vst.msk [vmem:[#allocation2 + $0x150] sm:$0xff] %vm326_vm0, %v6550_v0  ;;  %v575_v22 = vld [vmem:[%s6907_s11 + $0xa0] sm:$0xff]  ;;  %v574_v23 = vld [vmem:[%s6907_s11 + $0x98] sm:$0xff] }
  0x1b   : > { %371 = vst.msk [vmem:[#allocation2 + $0x158] sm:$0xff] %vm326_vm0, %v6550_v0  ;;  %373 = vst.msk [vmem:[#allocation2 + $0x168] sm:$0xff] %vm326_vm0, %v6550_v0  ;;  %v577_v24 = vld [vmem:[%s6907_s11 + $0xb0] sm:$0xff]  ;;  %v576_v28 = vld [vmem:[%s6907_s11 + $0xa8] sm:$0xff] }
  0x1c   : > { %374 = vst.msk [vmem:[#allocation2 + $0x170] sm:$0xff] %vm326_vm0, %v6550_v0  ;;  %376 = vst.msk [vmem:[#allocation2 + $0x180] sm:$0xff] %vm326_vm0, %v6550_v0  ;;  %v579_v29 = vld [vmem:[%s6907_s11 + $0xc0] sm:$0xff]  ;;  %v578_v33 = vld [vmem:[%s6907_s11 + $0xb8] sm:$0xff] }
  0x1d   : > { %377 = vst.msk [vmem:[#allocation2 + $0x188] sm:$0xff] %vm326_vm0, %v6550_v0  ;;  %379 = vst.msk [vmem:[#allocation2 + $0x198] sm:$0xff] %vm326_vm0, %v6550_v0  ;;  %v581_v34 = vld [vmem:[%s6907_s11 + $0xd0] sm:$0xff]  ;;  %v580_v35 = vld [vmem:[%s6907_s11 + $0xc8] sm:$0xff] }
  0x1e   : > { %380 = vst.msk [vmem:[#allocation2 + $0x1a0] sm:$0xff] %vm326_vm0, %v6550_v0  ;;  %383 = vst.msk [vmem:[#allocation3 + $0x8] sm:$0xff] %vm326_vm0, %v6550_v0  ;;  %v583_v36 = vld [vmem:[%s6907_s11 + $0xe0] sm:$0xff]  ;;  %v582_v37 = vld [vmem:[%s6907_s11 + $0xd8] sm:$0xff] }
  0x1f   : > { %385 = vst.msk [vmem:[#allocation3 + $0x18] sm:$0xff] %vm326_vm0, %v6550_v0  ;;  %386 = vst.msk [vmem:[#allocation3 + $0x20] sm:$0xff] %vm326_vm0, %v6550_v0  ;;  %v584_v39 = vld [vmem:[%s6907_s11 + $0xe8] sm:$0xff]  ;;  %v490_v41 = vld [vmem:[%s6970_s15] sm:$0xff] }
  0x20   : > { %388 = vst.msk [vmem:[#allocation3 + $0x30] sm:$0xff] %vm326_vm0, %v6550_v0  ;;  %389 = vst.msk [vmem:[#allocation3 + $0x38] sm:$0xff] %vm326_vm0, %v6550_v0  ;;  %v492_v42 = vld [vmem:[%s6970_s15 + $0x10] sm:$0xff]  ;;  %v491_v44 = vld [vmem:[%s6970_s15 + $0x8] sm:$0xff] }
  0x21   : > { %391 = vst.msk [vmem:[#allocation3 + $0x48] sm:$0xff] %vm326_vm0, %v6550_v0  ;;  %392 = vst.msk [vmem:[#allocation3 + $0x50] sm:$0xff] %vm326_vm0, %v6550_v0  ;;  %v494_v45 = vld [vmem:[%s6970_s15 + $0x20] sm:$0xff]  ;;  %v493_v46 = vld [vmem:[%s6970_s15 + $0x18] sm:$0xff] }
  0x22   : > { %394 = vst.msk [vmem:[#allocation3 + $0x60] sm:$0xff] %vm326_vm0, %v6550_v0  ;;  %395 = vst.msk [vmem:[#allocation3 + $0x68] sm:$0xff] %vm326_vm0, %v6550_v0  ;;  %v496_v47 = vld [vmem:[%s6970_s15 + $0x30] sm:$0xff]  ;;  %v495_v48 = vld [vmem:[%s6970_s15 + $0x28] sm:$0xff] }
  0x23   : > { %397 = vst.msk [vmem:[#allocation3 + $0x78] sm:$0xff] %vm326_vm0, %v6550_v0  ;;  %398 = vst.msk [vmem:[#allocation3 + $0x80] sm:$0xff] %vm326_vm0, %v6550_v0  ;;  %v498_v49 = vld [vmem:[%s6970_s15 + $0x40] sm:$0xff]  ;;  %v497_v50 = vld [vmem:[%s6970_s15 + $0x38] sm:$0xff] }
  0x24   : > { %400 = vst.msk [vmem:[#allocation3 + $0x90] sm:$0xff] %vm326_vm0, %v6550_v0  ;;  %401 = vst.msk [vmem:[#allocation3 + $0x98] sm:$0xff] %vm326_vm0, %v6550_v0  ;;  %v500_v51 = vld [vmem:[%s6970_s15 + $0x50] sm:$0xff]  ;;  %v499_v52 = vld [vmem:[%s6970_s15 + $0x48] sm:$0xff] }
  0x25   : > { %403 = vst.msk [vmem:[#allocation3 + $0xa8] sm:$0xff] %vm326_vm0, %v6550_v0  ;;  %404 = vst.msk [vmem:[#allocation3 + $0xb0] sm:$0xff] %vm326_vm0, %v6550_v0  ;;  %v653_v8 = vld [vmem:[#allocation3 + $0x8] sm:$0xff]  ;;  %v502_v53 = vld [vmem:[%s6970_s15 + $0x60] sm:$0xff] }
  0x26   : > { %406 = vst.msk [vmem:[#allocation3 + $0xc0] sm:$0xff] %vm326_vm0, %v6550_v0  ;;  %407 = vst.msk [vmem:[#allocation3 + $0xc8] sm:$0xff] %vm326_vm0, %v6550_v0  ;;  %1232 = vrot.lane.b32.xlu0 %v653_v8, %s6551_s12  ;;  %v501_v54 = vld [vmem:[%s6970_s15 + $0x58] sm:$0xff]  ;;  %v504_v55 = vld [vmem:[%s6970_s15 + $0x70] sm:$0xff] }
  0x27   : > { %409 = vst.msk [vmem:[#allocation3 + $0xd8] sm:$0xff] %vm326_vm0, %v6550_v0  ;;  %410 = vst.msk [vmem:[#allocation3 + $0xe0] sm:$0xff] %vm326_vm0, %v6550_v0  ;;  %v503_v57 = vld [vmem:[%s6970_s15 + $0x68] sm:$0xff]  ;;  %v506_v59 = vld [vmem:[%s6970_s15 + $0x80] sm:$0xff] }
  0x28   : > { %412 = vst.msk [vmem:[#allocation3 + $0xf0] sm:$0xff] %vm326_vm0, %v6550_v0  ;;  %413 = vst.msk [vmem:[#allocation3 + $0xf8] sm:$0xff] %vm326_vm0, %v6550_v0  ;;  %v505_v60 = vld [vmem:[%s6970_s15 + $0x78] sm:$0xff]  ;;  %v508_v61 = vld [vmem:[%s6970_s15 + $0x90] sm:$0xff] }
  0x29   : > { %415 = vst.msk [vmem:[#allocation3 + $0x108] sm:$0xff] %vm326_vm0, %v6550_v0  ;;  %416 = vst.msk [vmem:[#allocation3 + $0x110] sm:$0xff] %vm326_vm0, %v6550_v0  ;;  %v514_v7 = vld [vmem:[%s6970_s15 + $0xc0] sm:$0xff] }
  0x2a   : > { %418 = vst.msk [vmem:[#allocation3 + $0x120] sm:$0xff] %vm326_vm0, %v6550_v0  ;;  %419 = vst.msk [vmem:[#allocation3 + $0x128] sm:$0xff] %vm326_vm0, %v6550_v0 }
  0x2b   : > { %421 = vst.msk [vmem:[#allocation3 + $0x138] sm:$0xff] %vm326_vm0, %v6550_v0  ;;  %422 = vst.msk [vmem:[#allocation3 + $0x140] sm:$0xff] %vm326_vm0, %v6550_v0 }
  0x2c   : > { %424 = vst.msk [vmem:[#allocation3 + $0x150] sm:$0xff] %vm326_vm0, %v6550_v0  ;;  %425 = vst.msk [vmem:[#allocation3 + $0x158] sm:$0xff] %vm326_vm0, %v6550_v0 }
  0x2d   : > { %427 = vst.msk [vmem:[#allocation3 + $0x168] sm:$0xff] %vm326_vm0, %v6550_v0  ;;  %428 = vst.msk [vmem:[#allocation3 + $0x170] sm:$0xff] %vm326_vm0, %v6550_v0 }
  0x2e   : > { %430 = vst.msk [vmem:[#allocation3 + $0x180] sm:$0xff] %vm326_vm0, %v6550_v0  ;;  %431 = vst.msk [vmem:[#allocation3 + $0x188] sm:$0xff] %vm326_vm0, %v6550_v0 }
  0x2f   : > { %433 = vst.msk [vmem:[#allocation3 + $0x198] sm:$0xff] %vm326_vm0, %v6550_v0  ;;  %434 = vst.msk [vmem:[#allocation3 + $0x1a0] sm:$0xff] %vm326_vm0, %v6550_v0 }
  0x30   : > { %436 = vst [vmem:[#allocation4] sm:$0xff] %v6550_v0  ;;  %437 = vst [vmem:[#allocation4 + $0x8] sm:$0xff] %v6550_v0 }
  0x31   : > { %438 = vst [vmem:[#allocation4 + $0x10] sm:$0x3] %v6550_v0  ;;  %439 = vst [vmem:[#allocation4 + $0x18] sm:$0xff] %v6550_v0 }
  0x32   : > { %440 = vst [vmem:[#allocation4 + $0x20] sm:$0xff] %v6550_v0  ;;  %441 = vst [vmem:[#allocation4 + $0x28] sm:$0x3] %v6550_v0 }
  0x33   : > { %442 = vst [vmem:[#allocation4 + $0x30] sm:$0xff] %v6550_v0  ;;  %443 = vst [vmem:[#allocation4 + $0x38] sm:$0xff] %v6550_v0 }
  0x34   : > { %444 = vst [vmem:[#allocation4 + $0x40] sm:$0x3] %v6550_v0  ;;  %445 = vst [vmem:[#allocation4 + $0x48] sm:$0xff] %v6550_v0 }
  0x35   : > { %446 = vst [vmem:[#allocation4 + $0x50] sm:$0xff] %v6550_v0  ;;  %447 = vst [vmem:[#allocation4 + $0x58] sm:$0x3] %v6550_v0 }
  0x36   : > { %448 = vst [vmem:[#allocation4 + $0x60] sm:$0xff] %v6550_v0  ;;  %449 = vst [vmem:[#allocation4 + $0x68] sm:$0xff] %v6550_v0 }
  0x37   : > { %450 = vst [vmem:[#allocation4 + $0x70] sm:$0x3] %v6550_v0  ;;  %451 = vst [vmem:[#allocation4 + $0x78] sm:$0xff] %v6550_v0 }
  0x38   : > { %452 = vst [vmem:[#allocation4 + $0x80] sm:$0xff] %v6550_v0  ;;  %453 = vst [vmem:[#allocation4 + $0x88] sm:$0x3] %v6550_v0 }
  0x39   : > { %454 = vst [vmem:[#allocation4 + $0x90] sm:$0xff] %v6550_v0  ;;  %455 = vst [vmem:[#allocation4 + $0x98] sm:$0xff] %v6550_v0 }
  0x3a   : > { %456 = vst [vmem:[#allocation4 + $0xa0] sm:$0x3] %v6550_v0  ;;  %457 = vst [vmem:[#allocation4 + $0xa8] sm:$0xff] %v6550_v0 }
  0x3b   : > { %458 = vst [vmem:[#allocation4 + $0xb0] sm:$0xff] %v6550_v0  ;;  %459 = vst [vmem:[#allocation4 + $0xb8] sm:$0x3] %v6550_v0 }
  0x3c   : > { %460 = vst [vmem:[#allocation4 + $0xc0] sm:$0xff] %v6550_v0  ;;  %461 = vst [vmem:[#allocation4 + $0xc8] sm:$0xff] %v6550_v0 }
  0x3d   : > { %462 = vst [vmem:[#allocation4 + $0xd0] sm:$0x3] %v6550_v0  ;;  %463 = vst [vmem:[#allocation4 + $0xd8] sm:$0xff] %v6550_v0 }
  0x3e   : > { %464 = vst [vmem:[#allocation4 + $0xe0] sm:$0xff] %v6550_v0  ;;  %465 = vst [vmem:[#allocation4 + $0xe8] sm:$0x3] %v6550_v0 }
  0x3f   : > { %466 = vst [vmem:[#allocation4 + $0xf0] sm:$0xff] %v6550_v0  ;;  %467 = vst [vmem:[#allocation4 + $0xf8] sm:$0xff] %v6550_v0 }
  0x40   : > { %468 = vst [vmem:[#allocation4 + $0x100] sm:$0x3] %v6550_v0  ;;  %469 = vst [vmem:[#allocation4 + $0x108] sm:$0xff] %v6550_v0 }
  0x41   : > { %470 = vst [vmem:[#allocation4 + $0x110] sm:$0xff] %v6550_v0  ;;  %471 = vst [vmem:[#allocation4 + $0x118] sm:$0x3] %v6550_v0 }
  0x42   : > { %472 = vst [vmem:[#allocation4 + $0x120] sm:$0xff] %v6550_v0  ;;  %473 = vst [vmem:[#allocation4 + $0x128] sm:$0xff] %v6550_v0 }
  0x43   : > { %474 = vst [vmem:[#allocation4 + $0x130] sm:$0x3] %v6550_v0  ;;  %475 = vst [vmem:[#allocation4 + $0x138] sm:$0xff] %v6550_v0 }
  0x44   : > { %476 = vst [vmem:[#allocation4 + $0x140] sm:$0xff] %v6550_v0  ;;  %477 = vst [vmem:[#allocation4 + $0x148] sm:$0x3] %v6550_v0 }
  0x45   : > { %478 = vst [vmem:[#allocation4 + $0x150] sm:$0xff] %v6550_v0  ;;  %479 = vst [vmem:[#allocation4 + $0x158] sm:$0xff] %v6550_v0 }
  0x46   : > { %480 = vst [vmem:[#allocation4 + $0x160] sm:$0x3] %v6550_v0  ;;  %481 = vst [vmem:[#allocation4 + $0x168] sm:$0xff] %v6550_v0 }
  0x47   : > { %482 = vst [vmem:[#allocation4 + $0x170] sm:$0xff] %v6550_v0  ;;  %483 = vst [vmem:[#allocation4 + $0x178] sm:$0x3] %v6550_v0 }
  0x48   : > { %484 = vst [vmem:[#allocation4 + $0x180] sm:$0xff] %v6550_v0  ;;  %485 = vst [vmem:[#allocation4 + $0x188] sm:$0xff] %v6550_v0 }
  0x49   : > { %486 = vst [vmem:[#allocation4 + $0x190] sm:$0x3] %v6550_v0  ;;  %487 = vst [vmem:[#allocation4 + $0x198] sm:$0xff] %v6550_v0 }
  0x4a   : > { %488 = vst [vmem:[#allocation4 + $0x1a0] sm:$0xff] %v6550_v0  ;;  %489 = vst [vmem:[#allocation4 + $0x1a8] sm:$0x3] %v6550_v0 }
  0x4b   : > { %387 = vst.msk [vmem:[#allocation3 + $0x28] sm:$0x3] %vm329_vm1, %v6550_v0  ;;  %330 = vst.msk [vmem:[#allocation2 + $0x10] sm:$0x3] %vm329_vm1, %v6550_v0 }
  0x4c   : > { %333 = vst.msk [vmem:[#allocation2 + $0x28] sm:$0x3] %vm329_vm1, %v6550_v0  ;;  %336 = vst.msk [vmem:[#allocation2 + $0x40] sm:$0x3] %vm329_vm1, %v6550_v0 }
  0x4d   : > { %339 = vst.msk [vmem:[#allocation2 + $0x58] sm:$0x3] %vm329_vm1, %v6550_v0  ;;  %342 = vst.msk [vmem:[#allocation2 + $0x70] sm:$0x3] %vm329_vm1, %v6550_v0 }
  0x4e   : > { %345 = vst.msk [vmem:[#allocation2 + $0x88] sm:$0x3] %vm329_vm1, %v6550_v0  ;;  %348 = vst.msk [vmem:[#allocation2 + $0xa0] sm:$0x3] %vm329_vm1, %v6550_v0 }
  0x4f   : > { %351 = vst.msk [vmem:[#allocation2 + $0xb8] sm:$0x3] %vm329_vm1, %v6550_v0  ;;  %354 = vst.msk [vmem:[#allocation2 + $0xd0] sm:$0x3] %vm329_vm1, %v6550_v0 }
  0x50   : > { %357 = vst.msk [vmem:[#allocation2 + $0xe8] sm:$0x3] %vm329_vm1, %v6550_v0  ;;  %360 = vst.msk [vmem:[#allocation2 + $0x100] sm:$0x3] %vm329_vm1, %v6550_v0 }
  0x51   : > { %363 = vst.msk [vmem:[#allocation2 + $0x118] sm:$0x3] %vm329_vm1, %v6550_v0  ;;  %366 = vst.msk [vmem:[#allocation2 + $0x130] sm:$0x3] %vm329_vm1, %v6550_v0 }
  0x52   : > { %369 = vst.msk [vmem:[#allocation2 + $0x148] sm:$0x3] %vm329_vm1, %v6550_v0  ;;  %372 = vst.msk [vmem:[#allocation2 + $0x160] sm:$0x3] %vm329_vm1, %v6550_v0 }
  0x53   : > { %375 = vst.msk [vmem:[#allocation2 + $0x178] sm:$0x3] %vm329_vm1, %v6550_v0  ;;  %378 = vst.msk [vmem:[#allocation2 + $0x190] sm:$0x3] %vm329_vm1, %v6550_v0 }
  0x54   : > { %381 = vst.msk [vmem:[#allocation2 + $0x1a8] sm:$0x3] %vm329_vm1, %v6550_v0  ;;  %384 = vst.msk [vmem:[#allocation3 + $0x10] sm:$0x3] %vm329_vm1, %v6550_v0 }
  0x55   : > { %390 = vst.msk [vmem:[#allocation3 + $0x40] sm:$0x3] %vm329_vm1, %v6550_v0  ;;  %393 = vst.msk [vmem:[#allocation3 + $0x58] sm:$0x3] %vm329_vm1, %v6550_v0 }
  0x56   : > { %396 = vst.msk [vmem:[#allocation3 + $0x70] sm:$0x3] %vm329_vm1, %v6550_v0  ;;  %399 = vst.msk [vmem:[#allocation3 + $0x88] sm:$0x3] %vm329_vm1, %v6550_v0 }
  0x57   : > { %402 = vst.msk [vmem:[#allocation3 + $0xa0] sm:$0x3] %vm329_vm1, %v6550_v0  ;;  %405 = vst.msk [vmem:[#allocation3 + $0xb8] sm:$0x3] %vm329_vm1, %v6550_v0 }
  0x58   : > { %408 = vst.msk [vmem:[#allocation3 + $0xd0] sm:$0x3] %vm329_vm1, %v6550_v0  ;;  %411 = vst.msk [vmem:[#allocation3 + $0xe8] sm:$0x3] %vm329_vm1, %v6550_v0 }
  0x59   : > { %414 = vst.msk [vmem:[#allocation3 + $0x100] sm:$0x3] %vm329_vm1, %v6550_v0  ;;  %417 = vst.msk [vmem:[#allocation3 + $0x118] sm:$0x3] %vm329_vm1, %v6550_v0 }
  0x5a   : > { %420 = vst.msk [vmem:[#allocation3 + $0x130] sm:$0x3] %vm329_vm1, %v6550_v0  ;;  %423 = vst.msk [vmem:[#allocation3 + $0x148] sm:$0x3] %vm329_vm1, %v6550_v0 }
  0x5b   : > { %426 = vst.msk [vmem:[#allocation3 + $0x160] sm:$0x3] %vm329_vm1, %v6550_v0  ;;  %429 = vst.msk [vmem:[#allocation3 + $0x178] sm:$0x3] %vm329_vm1, %v6550_v0 }
  0x5c   : > { %432 = vst.msk [vmem:[#allocation3 + $0x190] sm:$0x3] %vm329_vm1, %v6550_v0  ;;  %435 = vst.msk [vmem:[#allocation3 + $0x1a8] sm:$0x3] %vm329_vm1, %v6550_v0  ;;  %vm3900_vm1 = vcmask 523264  }
  0x5d   : > { %588 = vst.msk [vmem:[#allocation3 + $0x19] sm:$0xff] %vm326_vm0, %v555_v1  ;;  %590 = vst.msk [vmem:[#allocation3 + $0x31] sm:$0xff] %vm326_vm0, %v557_v2  ;;  %v507_v1 = vld [vmem:[%s6970_s15 + $0x88] sm:$0xff]  ;;  %v510_v2 = vld [vmem:[%s6970_s15 + $0xa0] sm:$0xff] }
  0x5e   : > { %589 = vst.msk [vmem:[#allocation3 + $0x21] sm:$0xff] %vm326_vm0, %v556_v3  ;;  %592 = vst.msk [vmem:[#allocation3 + $0x49] sm:$0xff] %vm326_vm0, %v559_v4  ;;  %v509_v3 = vld [vmem:[%s6970_s15 + $0x98] sm:$0xff]  ;;  %v512_v4 = vld [vmem:[%s6970_s15 + $0xb0] sm:$0xff] }
  0x5f   : > { %591 = vst.msk [vmem:[#allocation3 + $0x39] sm:$0xff] %vm326_vm0, %v558_v5  ;;  %594 = vst.msk [vmem:[#allocation3 + $0x61] sm:$0xff] %vm326_vm0, %v561_v6  ;;  %v511_v6 = vld [vmem:[%s6970_s15 + $0xa8] sm:$0xff] }
  0x60   : > { %593 = vst.msk [vmem:[#allocation3 + $0x51] sm:$0xff] %vm326_vm0, %v560_v9  ;;  %596 = vst.msk [vmem:[#allocation3 + $0x79] sm:$0xff] %vm326_vm0, %v563_v10  ;;  %v513_v9 = vld [vmem:[%s6970_s15 + $0xb8] sm:$0xff]  ;;  %v516_v10 = vld [vmem:[%s6970_s15 + $0xd0] sm:$0xff] }
  0x61   : > { %595 = vst.msk [vmem:[#allocation3 + $0x69] sm:$0xff] %vm326_vm0, %v562_v11  ;;  %598 = vst.msk [vmem:[#allocation3 + $0x91] sm:$0xff] %vm326_vm0, %v565_v12  ;;  %v515_v11 = vld [vmem:[%s6970_s15 + $0xc8] sm:$0xff] }
  0x62   : > { %597 = vst.msk [vmem:[#allocation3 + $0x81] sm:$0xff] %vm326_vm0, %v564_v13  ;;  %600 = vst.msk [vmem:[#allocation3 + $0xa9] sm:$0xff] %vm326_vm0, %v567_v14  ;;  %v518_v13 = vld [vmem:[%s6970_s15 + $0xe0] sm:$0xff]  ;;  %v517_v14 = vld [vmem:[%s6970_s15 + $0xd8] sm:$0xff] }
  0x63   : > { %599 = vst.msk [vmem:[#allocation3 + $0x99] sm:$0xff] %vm326_vm0, %v566_v15  ;;  %602 = vst.msk [vmem:[#allocation3 + $0xc1] sm:$0xff] %vm326_vm0, %v569_v16  ;;  %v519_v16 = vld [vmem:[%s6970_s15 + $0xe8] sm:$0xff] }
  0x64   : > { %601 = vst.msk [vmem:[#allocation3 + $0xb1] sm:$0xff] %vm326_vm0, %v568_v17  ;;  %604 = vst.msk [vmem:[#allocation3 + $0xd9] sm:$0xff] %vm326_vm0, %v571_v18  ;;  %v654_v25 = vld [vmem:[#allocation3 + $0x18] sm:$0xff]  ;;  %v656_v26 = vld [vmem:[#allocation3 + $0x30] sm:$0xff] }
  0x65   : > { %603 = vst.msk [vmem:[#allocation3 + $0xc9] sm:$0xff] %vm326_vm0, %v570_v19  ;;  %606 = vst.msk [vmem:[#allocation3 + $0xf1] sm:$0xff] %vm326_vm0, %v573_v20  ;;  %1234 = vrot.lane.b32.xlu1 %v654_v25, %s6551_s12  ;;  %v655_v27 = vld [vmem:[#allocation3 + $0x20] sm:$0xff]  ;;  %1238 = vrot.lane.b32.xlu0 %v656_v26, %s6551_s12  ;;  %v658_v30 = vld [vmem:[#allocation3 + $0x48] sm:$0xff] }
  0x66   : > { %605 = vst.msk [vmem:[#allocation3 + $0xe1] sm:$0xff] %vm326_vm0, %v572_v21  ;;  %608 = vst.msk [vmem:[#allocation3 + $0x109] sm:$0xff] %vm326_vm0, %v575_v22  ;;  %v657_v31 = vld [vmem:[#allocation3 + $0x38] sm:$0xff]  ;;  %v660_v32 = vld [vmem:[#allocation3 + $0x60] sm:$0xff] }
  0x67   : > { %607 = vst.msk [vmem:[#allocation3 + $0xf9] sm:$0xff] %vm326_vm0, %v574_v23  ;;  %610 = vst.msk [vmem:[#allocation3 + $0x121] sm:$0xff] %vm326_vm0, %v577_v24  ;;  %v659_v38 = vld [vmem:[#allocation3 + $0x50] sm:$0xff]  ;;  %v662_v40 = vld [vmem:[#allocation3 + $0x78] sm:$0xff] }
  0x68   : > { %609 = vst.msk [vmem:[#allocation3 + $0x111] sm:$0xff] %vm326_vm0, %v576_v28  ;;  %612 = vst.msk [vmem:[#allocation3 + $0x139] sm:$0xff] %vm326_vm0, %v579_v29  ;;  %v661_v43 = vld [vmem:[#allocation3 + $0x68] sm:$0xff]  ;;  %v664_v56 = vld [vmem:[#allocation3 + $0x90] sm:$0xff] }
  0x69   : > { %1236 = vrot.lane.b32.xlu1 %v655_v27, %s6551_s12  ;;  %1242 = vrot.lane.b32.xlu0 %v658_v30, %s6551_s12  ;;  %611 = vst.msk [vmem:[#allocation3 + $0x129] sm:$0xff] %vm326_vm0, %v578_v33  ;;  %614 = vst.msk [vmem:[#allocation3 + $0x151] sm:$0xff] %vm326_vm0, %v581_v34  ;;  %v663_v58 = vld [vmem:[#allocation3 + $0x80] sm:$0xff]  ;;  %v666_v62 = vld [vmem:[#allocation3 + $0xa8] sm:$0xff] }
  0x6a   : > { %613 = vst.msk [vmem:[#allocation3 + $0x141] sm:$0xff] %vm326_vm0, %v580_v35  ;;  %616 = vst.msk [vmem:[#allocation3 + $0x169] sm:$0xff] %vm326_vm0, %v583_v36  ;;  %v665_v63 = vld [vmem:[#allocation3 + $0x98] sm:$0xff]  ;;  %v668_v0 = vld [vmem:[#allocation3 + $0xc0] sm:$0xff] }
  0x6b   : > { %615 = vst.msk [vmem:[#allocation3 + $0x159] sm:$0xff] %vm326_vm0, %v582_v37  ;;  %617 = vst.msk [vmem:[#allocation3 + $0x171] sm:$0xff] %vm326_vm0, %v584_v39  ;;  %v667_v5 = vld [vmem:[#allocation3 + $0xb0] sm:$0xff]  ;;  %v670_v8 = vld [vmem:[#allocation3 + $0xd8] sm:$0xff] }
  0x6c   : > { %523 = vst.msk [vmem:[#allocation2 + $0x19] sm:$0xff] %vm326_vm0, %v490_v41  ;;  %525 = vst.msk [vmem:[#allocation2 + $0x31] sm:$0xff] %vm326_vm0, %v492_v42  ;;  %v669_v12 = vld [vmem:[#allocation3 + $0xc8] sm:$0xff]  ;;  %v672_v15 = vld [vmem:[#allocation3 + $0xf0] sm:$0xff] }
  0x6d   : > { %1240 = vrot.lane.b32.xlu1 %v657_v31, %s6551_s12  ;;  %1246 = vrot.lane.b32.xlu0 %v660_v32, %s6551_s12  ;;  %524 = vst.msk [vmem:[#allocation2 + $0x21] sm:$0xff] %vm326_vm0, %v491_v44  ;;  %527 = vst.msk [vmem:[#allocation2 + $0x49] sm:$0xff] %vm326_vm0, %v494_v45  ;;  %v671_v17 = vld [vmem:[#allocation3 + $0xe0] sm:$0xff]  ;;  %v674_v18 = vld [vmem:[#allocation3 + $0x108] sm:$0xff] }
  0x6e   : > { %526 = vst.msk [vmem:[#allocation2 + $0x39] sm:$0xff] %vm326_vm0, %v493_v46  ;;  %529 = vst.msk [vmem:[#allocation2 + $0x61] sm:$0xff] %vm326_vm0, %v496_v47  ;;  %v673_v19 = vld [vmem:[#allocation3 + $0xf8] sm:$0xff]  ;;  %v676_v20 = vld [vmem:[#allocation3 + $0x120] sm:$0xff] }
  0x6f   : > { %528 = vst.msk [vmem:[#allocation2 + $0x51] sm:$0xff] %vm326_vm0, %v495_v48  ;;  %531 = vst.msk [vmem:[#allocation2 + $0x79] sm:$0xff] %vm326_vm0, %v498_v49  ;;  %v675_v21 = vld [vmem:[#allocation3 + $0x110] sm:$0xff]  ;;  %v678_v22 = vld [vmem:[#allocation3 + $0x138] sm:$0xff] }
  0x70   : > { %530 = vst.msk [vmem:[#allocation2 + $0x69] sm:$0xff] %vm326_vm0, %v497_v50  ;;  %533 = vst.msk [vmem:[#allocation2 + $0x91] sm:$0xff] %vm326_vm0, %v500_v51  ;;  %v677_v23 = vld [vmem:[#allocation3 + $0x128] sm:$0xff]  ;;  %v680_v24 = vld [vmem:[#allocation3 + $0x150] sm:$0xff] }
  0x71   : > { %1244 = vrot.lane.b32.xlu1 %v659_v38, %s6551_s12  ;;  %1250 = vrot.lane.b32.xlu0 %v662_v40, %s6551_s12  ;;  %532 = vst.msk [vmem:[#allocation2 + $0x81] sm:$0xff] %vm326_vm0, %v499_v52  ;;  %535 = vst.msk [vmem:[#allocation2 + $0xa9] sm:$0xff] %vm326_vm0, %v502_v53  ;;  %v679_v25 = vld [vmem:[#allocation3 + $0x140] sm:$0xff]  ;;  %v682_v26 = vld [vmem:[#allocation3 + $0x168] sm:$0xff] }
  0x72   : > { %534 = vst.msk [vmem:[#allocation2 + $0x99] sm:$0xff] %vm326_vm0, %v501_v54  ;;  %537 = vst.msk [vmem:[#allocation2 + $0xc1] sm:$0xff] %vm326_vm0, %v504_v55  ;;  %v681_v27 = vld [vmem:[#allocation3 + $0x158] sm:$0xff]  ;;  %v683_v29 = vld [vmem:[#allocation3 + $0x170] sm:$0xff] }
  0x73   : > { %536 = vst.msk [vmem:[#allocation2 + $0xb1] sm:$0xff] %vm326_vm0, %v503_v57  ;;  %539 = vst.msk [vmem:[#allocation2 + $0xd9] sm:$0xff] %vm326_vm0, %v506_v59  ;;  %v684_v28 = vld [vmem:[#allocation2 + $0x1] sm:$0xff]  ;;  %v686_v30 = vld [vmem:[#allocation2 + $0x19] sm:$0xff] }
  0x74   : > { %538 = vst.msk [vmem:[#allocation2 + $0xc9] sm:$0xff] %vm326_vm0, %v505_v60  ;;  %541 = vst.msk [vmem:[#allocation2 + $0xf1] sm:$0xff] %vm326_vm0, %v508_v61  ;;  %v685_v31 = vld [vmem:[#allocation2 + $0x9] sm:$0xff]  ;;  %v688_v32 = vld [vmem:[#allocation2 + $0x31] sm:$0xff] }
  0x75   : > { %1248 = vrot.lane.b32.xlu1 %v661_v43, %s6551_s12  ;;  %1254 = vrot.lane.b32.xlu0 %v664_v56, %s6551_s12  ;;  %540 = vst.msk [vmem:[#allocation2 + $0xe1] sm:$0xff] %vm326_vm0, %v507_v1  ;;  %543 = vst.msk [vmem:[#allocation2 + $0x109] sm:$0xff] %vm326_vm0, %v510_v2  ;;  %v687_v33 = vld [vmem:[#allocation2 + $0x21] sm:$0xff]  ;;  %v690_v34 = vld [vmem:[#allocation2 + $0x49] sm:$0xff] }
  0x76   : > { %542 = vst.msk [vmem:[#allocation2 + $0xf9] sm:$0xff] %vm326_vm0, %v509_v3  ;;  %545 = vst.msk [vmem:[#allocation2 + $0x121] sm:$0xff] %vm326_vm0, %v512_v4  ;;  %v689_v35 = vld [vmem:[#allocation2 + $0x39] sm:$0xff]  ;;  %v692_v36 = vld [vmem:[#allocation2 + $0x61] sm:$0xff] }
  0x77   : > { %544 = vst.msk [vmem:[#allocation2 + $0x111] sm:$0xff] %vm326_vm0, %v511_v6  ;;  %547 = vst.msk [vmem:[#allocation2 + $0x139] sm:$0xff] %vm326_vm0, %v514_v7  ;;  %v691_v37 = vld [vmem:[#allocation2 + $0x51] sm:$0xff]  ;;  %v694_v38 = vld [vmem:[#allocation2 + $0x79] sm:$0xff] }
  0x78   : > { %546 = vst.msk [vmem:[#allocation2 + $0x129] sm:$0xff] %vm326_vm0, %v513_v9  ;;  %549 = vst.msk [vmem:[#allocation2 + $0x151] sm:$0xff] %vm326_vm0, %v516_v10  ;;  %v693_v39 = vld [vmem:[#allocation2 + $0x69] sm:$0xff]  ;;  %v696_v40 = vld [vmem:[#allocation2 + $0x91] sm:$0xff] }
  0x79   : > { %1252 = vrot.lane.b32.xlu1 %v663_v58, %s6551_s12  ;;  %1258 = vrot.lane.b32.xlu0 %v666_v62, %s6551_s12  ;;  %548 = vst.msk [vmem:[#allocation2 + $0x141] sm:$0xff] %vm326_vm0, %v515_v11  ;;  %551 = vst.msk [vmem:[#allocation2 + $0x169] sm:$0xff] %vm326_vm0, %v518_v13  ;;  %v695_v41 = vld [vmem:[#allocation2 + $0x81] sm:$0xff]  ;;  %v698_v42 = vld [vmem:[#allocation2 + $0xa9] sm:$0xff] }
  0x7a   : > { %550 = vst.msk [vmem:[#allocation2 + $0x159] sm:$0xff] %vm326_vm0, %v517_v14  ;;  %552 = vst.msk [vmem:[#allocation2 + $0x171] sm:$0xff] %vm326_vm0, %v519_v16  ;;  %v697_v43 = vld [vmem:[#allocation2 + $0x99] sm:$0xff]  ;;  %v700_v44 = vld [vmem:[#allocation2 + $0xc1] sm:$0xff] }
  0x7b   : > { %v699_v45 = vld [vmem:[#allocation2 + $0xb1] sm:$0xff]  ;;  %v702_v46 = vld [vmem:[#allocation2 + $0xd9] sm:$0xff]  ;;  %v701_v47 = vld [vmem:[#allocation2 + $0xc9] sm:$0xff] }
  0x7c   : > { %v704_v48 = vld [vmem:[#allocation2 + $0xf1] sm:$0xff]  ;;  %v703_v49 = vld [vmem:[#allocation2 + $0xe1] sm:$0xff]  ;;  %v706_v50 = vld [vmem:[#allocation2 + $0x109] sm:$0xff] }
  0x7d   : > { %1256 = vrot.lane.b32.xlu1 %v665_v63, %s6551_s12  ;;  %1262 = vrot.lane.b32.xlu0 %v668_v0, %s6551_s12  ;;  %v705_v51 = vld [vmem:[#allocation2 + $0xf9] sm:$0xff]  ;;  %v708_v52 = vld [vmem:[#allocation2 + $0x121] sm:$0xff]  ;;  %v716_v1 = vld [vmem:[#allocation3 + $0x1] sm:$0xff] }
  0x7e   : > { %v707_v53 = vld [vmem:[#allocation2 + $0x111] sm:$0xff]  ;;  %v710_v54 = vld [vmem:[#allocation2 + $0x139] sm:$0xff]  ;;  %v7122_v9 = vld [vmem:[#allocation3 + $0x31] sm:$0xff] }
  0x7f   : > { %v709_v56 = vld [vmem:[#allocation2 + $0x129] sm:$0xff]  ;;  %v712_v57 = vld [vmem:[#allocation2 + $0x151] sm:$0xff]  ;;  %v717_v7 = vld [vmem:[#allocation3 + $0x9] sm:$0xff] }
  0x80   : > { %v711_v59 = vld [vmem:[#allocation2 + $0x141] sm:$0xff]  ;;  %v714_v61 = vld [vmem:[#allocation2 + $0x169] sm:$0xff]  ;;  %v7127_v11 = vld [vmem:[#allocation3 + $0x21] sm:$0xff] }
  0x81   : > { %1260 = vrot.lane.b32.xlu1 %v667_v5, %s6551_s12  ;;  %1266 = vrot.lane.b32.xlu0 %v670_v8, %s6551_s12  ;;  %v713_v63 = vld [vmem:[#allocation2 + $0x159] sm:$0xff]  ;;  %v715_v3 = vld [vmem:[#allocation2 + $0x171] sm:$0xff]  ;;  %v7113_v5 = vld [vmem:[#allocation3 + $0x19] sm:$0xff] }
  0x82   : > { %v722_v13 = vld [vmem:[#allocation3 + $0x49] sm:$0xff] }
  0x85   : > { %1264 = vrot.lane.b32.xlu1 %v669_v12, %s6551_s12  ;;  %1270 = vrot.lane.b32.xlu0 %v672_v15, %s6551_s12  ;;  %v7137_v15 = vld [vmem:[#allocation3 + $0x39] sm:$0xff] }
  0x86   : > { %v7091_v55 = vpop.permute.xlu0 %1230 }
  0x89   : > { %1268 = vrot.lane.b32.xlu1 %v671_v17, %s6551_s12  ;;  %1274 = vrot.lane.b32.xlu0 %v674_v18, %s6551_s12  ;;  %v724_v17 = vld [vmem:[#allocation3 + $0x61] sm:$0xff] }
  0x8d   : > { %1272 = vrot.lane.b32.xlu1 %v673_v19, %s6551_s12  ;;  %1278 = vrot.lane.b32.xlu0 %v676_v20, %s6551_s12  ;;  %v723_v19 = vld [vmem:[#allocation3 + $0x51] sm:$0xff] }
  0x91   : > { %1276 = vrot.lane.b32.xlu1 %v675_v21, %s6551_s12  ;;  %1282 = vrot.lane.b32.xlu0 %v678_v22, %s6551_s12  ;;  %v726_v21 = vld [vmem:[#allocation3 + $0x79] sm:$0xff] }
  0x95   : > { %1280 = vrot.lane.b32.xlu1 %v677_v23, %s6551_s12  ;;  %1286 = vrot.lane.b32.xlu0 %v680_v24, %s6551_s12  ;;  %v725_v23 = vld [vmem:[#allocation3 + $0x69] sm:$0xff] }
  0x98   : > { %v7095_v58 = vpop.permute.xlu0 %1232 }
  0x99   : > { %1284 = vrot.lane.b32.xlu1 %v679_v25, %s6551_s12  ;;  %1290 = vrot.lane.b32.xlu0 %v682_v26, %s6551_s12  ;;  %v728_v25 = vld [vmem:[#allocation3 + $0x91] sm:$0xff] }
  0x9d   : > { %1288 = vrot.lane.b32.xlu1 %v681_v27, %s6551_s12  ;;  %1358 = vrot.lane.b32.xlu0 %v684_v28, %s6552_s16  ;;  %v727_v27 = vld [vmem:[#allocation3 + $0x81] sm:$0xff] }
  0xa1   : > { %1292 = vrot.lane.b32.xlu1 %v683_v29, %s6551_s12  ;;  %1362 = vrot.lane.b32.xlu0 %v686_v30, %s6552_s16  ;;  %v730_v29 = vld [vmem:[#allocation3 + $0xa9] sm:$0xff] }
  0xa5   : > { %1360 = vrot.lane.b32.xlu1 %v685_v31, %s6552_s16  ;;  %1366 = vrot.lane.b32.xlu0 %v688_v32, %s6552_s16  ;;  %v729_v31 = vld [vmem:[#allocation3 + $0x99] sm:$0xff] }
  0xa9   : > { %1364 = vrot.lane.b32.xlu1 %v687_v33, %s6552_s16  ;;  %1370 = vrot.lane.b32.xlu0 %v690_v34, %s6552_s16  ;;  %v732_v33 = vld [vmem:[#allocation3 + $0xc1] sm:$0xff] }
  0xad   : > { %1368 = vrot.lane.b32.xlu1 %v689_v35, %s6552_s16  ;;  %1374 = vrot.lane.b32.xlu0 %v692_v36, %s6552_s16  ;;  %v731_v35 = vld [vmem:[#allocation3 + $0xb1] sm:$0xff] }
  0xb1   : > { %1372 = vrot.lane.b32.xlu1 %v691_v37, %s6552_s16  ;;  %1378 = vrot.lane.b32.xlu0 %v694_v38, %s6552_s16  ;;  %v734_v37 = vld [vmem:[#allocation3 + $0xd9] sm:$0xff] }
  0xb5   : > { %1376 = vrot.lane.b32.xlu1 %v693_v39, %s6552_s16  ;;  %1382 = vrot.lane.b32.xlu0 %v696_v40, %s6552_s16  ;;  %v733_v39 = vld [vmem:[#allocation3 + $0xc9] sm:$0xff] }
  0xb9   : > { %1380 = vrot.lane.b32.xlu1 %v695_v41, %s6552_s16  ;;  %1386 = vrot.lane.b32.xlu0 %v698_v42, %s6552_s16  ;;  %v736_v41 = vld [vmem:[#allocation3 + $0xf1] sm:$0xff] }
  0xbd   : > { %1384 = vrot.lane.b32.xlu1 %v697_v43, %s6552_s16  ;;  %1390 = vrot.lane.b32.xlu0 %v700_v44, %s6552_s16  ;;  %v735_v43 = vld [vmem:[#allocation3 + $0xe1] sm:$0xff] }
  0xc1   : > { %1388 = vrot.lane.b32.xlu1 %v699_v45, %s6552_s16  ;;  %1394 = vrot.lane.b32.xlu0 %v702_v46, %s6552_s16  ;;  %v738_v45 = vld [vmem:[#allocation3 + $0x109] sm:$0xff] }
  0xc5   : > { %1392 = vrot.lane.b32.xlu1 %v701_v47, %s6552_s16  ;;  %1398 = vrot.lane.b32.xlu0 %v704_v48, %s6552_s16  ;;  %v737_v47 = vld [vmem:[#allocation3 + $0xf9] sm:$0xff] }
  0xc9   : > { %1396 = vrot.lane.b32.xlu1 %v703_v49, %s6552_s16  ;;  %1402 = vrot.lane.b32.xlu0 %v706_v50, %s6552_s16  ;;  %v740_v49 = vld [vmem:[#allocation3 + $0x121] sm:$0xff] }
  0xcd   : > { %1400 = vrot.lane.b32.xlu1 %v705_v51, %s6552_s16  ;;  %1406 = vrot.lane.b32.xlu0 %v708_v52, %s6552_s16  ;;  %v739_v51 = vld [vmem:[#allocation3 + $0x111] sm:$0xff] }
  0xd1   : > { %1404 = vrot.lane.b32.xlu1 %v707_v53, %s6552_s16  ;;  %1410 = vrot.lane.b32.xlu0 %v710_v54, %s6552_s16  ;;  %v742_v53 = vld [vmem:[#allocation3 + $0x139] sm:$0xff] }
  0xd5   : > { %1408 = vrot.lane.b32.xlu1 %v709_v56, %s6552_s16  ;;  %1414 = vrot.lane.b32.xlu0 %v712_v57, %s6552_s16  ;;  %v741_v56 = vld [vmem:[#allocation3 + $0x129] sm:$0xff] }
  0xd7   : > { %v7098_v60 = vpop.permute.xlu1 %1234  ;;  %v7101_v62 = vpop.permute.xlu0 %1238 }
  0xd9   : > { %1412 = vrot.lane.b32.xlu1 %v711_v59, %s6552_s16  ;;  %1418 = vrot.lane.b32.xlu0 %v714_v61, %s6552_s16  ;;  %v744_v59 = vld [vmem:[#allocation3 + $0x151] sm:$0xff] }
  0xdb   : > { %v7104_v0 = vpop.permute.xlu1 %1236  ;;  %v7107_v2 = vpop.permute.xlu0 %1242 }
  0xdc   : > { %11047 = vst [vmem:[#allocation5_spill] sm:$0xff] %v7107_v2  ;;  %v1185_v2 = vld [vmem:[#allocation3 + $0x112] sm:$0xff] }
  0xdd   : > { %1416 = vrot.lane.b32.xlu1 %v713_v63, %s6552_s16  ;;  %1486 = vrot.lane.b32.xlu0 %v716_v1, %s6553_s17  ;;  %v743_v63 = vld [vmem:[#allocation3 + $0x141] sm:$0xff] }
  0xdf   : > { %v7110_v4 = vpop.permute.xlu1 %1240  ;;  %v7115_v6 = vpop.permute.xlu0 %1246 }
  0xe0   : > { %11048 = vst [vmem:[#allocation6_spill] sm:$0xff] %v7110_v4  ;;  %11049 = vst [vmem:[#allocation7_spill] sm:$0xff] %v7115_v6 }
  0xe1   : > { %1420 = vrot.lane.b32.xlu1 %v715_v3, %s6552_s16  ;;  %1490 = vrot.lane.b32.xlu0 %v7113_v5, %s6553_s17  ;;  %v746_v3 = vld [vmem:[#allocation3 + $0x169] sm:$0xff] }
  0xe3   : > { %v7118_v8 = vpop.permute.xlu1 %1244  ;;  %v7124_v10 = vpop.permute.xlu0 %1250 }
  0xe4   : > { %11050 = vst [vmem:[#allocation8_spill] sm:$0xff] %v7118_v8  ;;  %11051 = vst [vmem:[#allocation9_spill] sm:$0xff] %v7124_v10  ;;  %v876_v10 = vld [vmem:[#allocation2 + $0x19] sm:$0xff] }
  0xe5   : > { %1488 = vrot.lane.b32.xlu1 %v717_v7, %s6553_s17  ;;  %1494 = vrot.lane.b32.xlu0 %v7122_v9, %s6553_s17 }
  0xe7   : > { %v7129_v12 = vpop.permute.xlu1 %1248  ;;  %v7133_v14 = vpop.permute.xlu0 %1254 }
  0xe8   : > { %11052 = vst [vmem:[#allocation10_spill] sm:$0xff] %v7129_v12  ;;  %11053 = vst [vmem:[#allocation11_spill] sm:$0xff] %v7133_v14 }
  0xe9   : > { %1492 = vrot.lane.b32.xlu1 %v7127_v11, %s6553_s17  ;;  %1498 = vrot.lane.b32.xlu0 %v722_v13, %s6553_s17  ;;  %v745_v13 = vld [vmem:[#allocation3 + $0x159] sm:$0xff] }
  0xeb   : > { %v7139_v16 = vpop.permute.xlu1 %1252  ;;  %v7142_v18 = vpop.permute.xlu0 %1258 }
  0xec   : > { %11054 = vst [vmem:[#allocation12_spill] sm:$0xff] %v7139_v16  ;;  %11055 = vst [vmem:[#allocation13_spill] sm:$0xff] %v7142_v18  ;;  %v7391_v18 = vld [vmem:[#allocation3 + $0x62] sm:$0xff] }
  0xed   : > { %1496 = vrot.lane.b32.xlu1 %v7137_v15, %s6553_s17  ;;  %1502 = vrot.lane.b32.xlu0 %v724_v17, %s6553_s17  ;;  %v7467_v16 = vld [vmem:[#allocation2 + $0x18] sm:$0xff] }
  0xef   : > { %v7146_v20 = vpop.permute.xlu1 %1256  ;;  %v7149_v22 = vpop.permute.xlu0 %1262 }
  0xf0   : > { %11056 = vst [vmem:[#allocation14_spill] sm:$0xff] %v7146_v20  ;;  %11057 = vst [vmem:[#allocation15_spill] sm:$0xff] %v7149_v22  ;;  %v790_v20 = vld [vmem:[#allocation3 + $0x7a] sm:$0xff] }
  0xf1   : > { %1500 = vrot.lane.b32.xlu1 %v723_v19, %s6553_s17  ;;  %1506 = vrot.lane.b32.xlu0 %v726_v21, %s6553_s17  ;;  %v748_v19 = vld [vmem:[#allocation2 + $0x2] sm:$0xff] }
  0xf3   : > { %v7152_v24 = vpop.permute.xlu1 %1260  ;;  %v7155_v26 = vpop.permute.xlu0 %1266 }
  0xf4   : > { %11058 = vst [vmem:[#allocation16_spill] sm:$0xff] %v7152_v24  ;;  %11059 = vst [vmem:[#allocation17_spill] sm:$0xff] %v7155_v26  ;;  %v7355_v26 = vld [vmem:[#allocation3 + $0x22] sm:$0xff]  ;;  %v7385_v24 = vld [vmem:[#allocation3 + $0x52] sm:$0xff] }
  0xf5   : > { %1504 = vrot.lane.b32.xlu1 %v725_v23, %s6553_s17  ;;  %1510 = vrot.lane.b32.xlu0 %v728_v25, %s6553_s17  ;;  %v747_v23 = vld [vmem:[#allocation3 + $0x171] sm:$0xff] }
  0xf7   : > { %v7158_v28 = vpop.permute.xlu1 %1264  ;;  %v7161_v30 = vpop.permute.xlu0 %1270 }
  0xf8   : > { %11060 = vst [vmem:[#allocation18_spill] sm:$0xff] %v7158_v28  ;;  %11061 = vst [vmem:[#allocation19_spill] sm:$0xff] %v7161_v30 }
  0xf9   : > { %1508 = vrot.lane.b32.xlu1 %v727_v27, %s6553_s17  ;;  %1514 = vrot.lane.b32.xlu0 %v730_v29, %s6553_s17  ;;  %v7221_v27 = vld [vmem:[#allocation2 + $0x1a] sm:$0xff] }
  0xfb   : > { %v7164_v32 = vpop.permute.xlu1 %1268  ;;  %v7167_v34 = vpop.permute.xlu0 %1274 }
  0xfc   : > { %11062 = vst [vmem:[#allocation20_spill] sm:$0xff] %v7164_v32  ;;  %11063 = vst [vmem:[#allocation21_spill] sm:$0xff] %v7167_v34  ;;  %v765_v34 = vld [vmem:[#allocation2 + $0xca] sm:$0xff]  ;;  %v781_v32 = vld [vmem:[#allocation3 + $0xa] sm:$0xff] }
  0xfd   : > { %1512 = vrot.lane.b32.xlu1 %v729_v31, %s6553_s17  ;;  %1518 = vrot.lane.b32.xlu0 %v732_v33, %s6553_s17  ;;  %v749_v31 = vld [vmem:[#allocation2 + $0xa] sm:$0xff] }
  0xff   : > { %v7170_v36 = vpop.permute.xlu1 %1272  ;;  %v7173_v38 = vpop.permute.xlu0 %1278 }
 0x100   : > { %11064 = vst [vmem:[#allocation22_spill] sm:$0xff] %v7170_v36  ;;  %11065 = vst [vmem:[#allocation23_spill] sm:$0xff] %v7173_v38  ;;  %v763_v38 = vld [vmem:[#allocation2 + $0xb2] sm:$0xff] }
 0x101   : > { %1516 = vrot.lane.b32.xlu1 %v731_v35, %s6553_s17  ;;  %1522 = vrot.lane.b32.xlu0 %v734_v37, %s6553_s17  ;;  %v7230_v35 = vld [vmem:[#allocation2 + $0x32] sm:$0xff] }
 0x103   : > { %v7176_v40 = vpop.permute.xlu1 %1276  ;;  %v7179_v42 = vpop.permute.xlu0 %1282 }
 0x104   : > { %11066 = vst [vmem:[#allocation24_spill] sm:$0xff] %v7176_v40  ;;  %11067 = vst [vmem:[#allocation25_spill] sm:$0xff] %v7179_v42 }
 0x105   : > { %1520 = vrot.lane.b32.xlu1 %v733_v39, %s6553_s17  ;;  %1526 = vrot.lane.b32.xlu0 %v736_v41, %s6553_s17  ;;  %v7235_v39 = vld [vmem:[#allocation2 + $0x22] sm:$0xff] }
 0x107   : > { %v7182_v44 = vpop.permute.xlu1 %1280  ;;  %v7185_v46 = vpop.permute.xlu0 %1286 }
 0x108   : > { %11068 = vst [vmem:[#allocation26_spill] sm:$0xff] %v7182_v44  ;;  %11069 = vst [vmem:[#allocation27_spill] sm:$0xff] %v7185_v46 }
 0x109   : > { %1524 = vrot.lane.b32.xlu1 %v735_v43, %s6553_s17  ;;  %1530 = vrot.lane.b32.xlu0 %v738_v45, %s6553_s17  ;;  %v7241_v43 = vld [vmem:[#allocation2 + $0x4a] sm:$0xff] }
 0x10b   : > { %v7188_v48 = vpop.permute.xlu1 %1284  ;;  %v7191_v50 = vpop.permute.xlu0 %1290 }
 0x10c   : > { %11070 = vst [vmem:[#allocation28_spill] sm:$0xff] %v7188_v48  ;;  %11071 = vst [vmem:[#allocation29_spill] sm:$0xff] %v7191_v50  ;;  %v761_v48 = vld [vmem:[#allocation2 + $0x9a] sm:$0xff] }
 0x10d   : > { %1528 = vrot.lane.b32.xlu1 %v737_v47, %s6553_s17  ;;  %1534 = vrot.lane.b32.xlu0 %v740_v49, %s6553_s17  ;;  %v7247_v47 = vld [vmem:[#allocation2 + $0x3a] sm:$0xff] }
 0x10f   : > { %v7194_v52 = vpop.permute.xlu1 %1288  ;;  %v7197_v54 = vpop.permute.xlu0 %1358 }
 0x110   : > { %11072 = vst [vmem:[#allocation30_spill] sm:$0xff] %v7194_v52  ;;  %v762_v52 = vld [vmem:[#allocation2 + $0xaa] sm:$0xff] }
 0x111   : > { %1532 = vrot.lane.b32.xlu1 %v739_v51, %s6553_s17  ;;  %1538 = vrot.lane.b32.xlu0 %v742_v53, %s6553_s17  ;;  %v7253_v51 = vld [vmem:[#allocation2 + $0x62] sm:$0xff] }
 0x113   : > { %v7200_v57 = vpop.permute.xlu1 %1292  ;;  %v7204_v61 = vpop.permute.xlu0 %1362 }
 0x114   : > { %11073 = vst [vmem:[#allocation31_spill] sm:$0xff] %v7200_v57  ;;  %v759_v57 = vld [vmem:[#allocation2 + $0x82] sm:$0xff] }
 0x115   : > { %1536 = vrot.lane.b32.xlu1 %v741_v56, %s6553_s17  ;;  %1542 = vrot.lane.b32.xlu0 %v744_v59, %s6553_s17  ;;  %v7259_v56 = vld [vmem:[#allocation2 + $0x52] sm:$0xff] }
 0x117   : > { %v7206_v1 = vpop.permute.xlu1 %1360  ;;  %v7210_v7 = vpop.permute.xlu0 %1366 }
 0x119   : > { %1540 = vrot.lane.b32.xlu1 %v743_v63, %s6553_s17  ;;  %1546 = vrot.lane.b32.xlu0 %v746_v3, %s6553_s17  ;;  %v758_v63 = vld [vmem:[#allocation2 + $0x7a] sm:$0xff] }
 0x11b   : > { %v7212_v17 = vpop.permute.xlu1 %1364  ;;  %v7216_v21 = vpop.permute.xlu0 %1370 }
 0x11c   : > { %11074 = vst [vmem:[#allocation32_spill] sm:$0xff] %v7216_v21 }
 0x11d   : > { %1544 = vrot.lane.b32.xlu1 %v745_v13, %s6553_s17  ;;  %1614 = vrot.lane.b32.xlu0 %v748_v19, %s6554_s18  ;;  %v7269_v13 = vld [vmem:[#allocation2 + $0x6a] sm:$0xff] }
 0x11f   : > { %v7218_v25 = vpop.permute.xlu1 %1368  ;;  %v7224_v29 = vpop.permute.xlu0 %1374 }
 0x120   : > { %11075 = vst [vmem:[#allocation33_spill] sm:$0xff] %v7218_v25  ;;  %11076 = vst [vmem:[#allocation34_spill] sm:$0xff] %v7224_v29 }
 0x121   : > { %1548 = vrot.lane.b32.xlu1 %v747_v23, %s6553_s17  ;;  %1618 = vrot.lane.b32.xlu0 %v7221_v27, %s6554_s18  ;;  %v760_v23 = vld [vmem:[#allocation2 + $0x92] sm:$0xff]  ;;  %s6565_s17 = smov 60  }
 0x123   : > { %v7226_v33 = vpop.permute.xlu1 %1372  ;;  %v7233_v37 = vpop.permute.xlu0 %1378 }
 0x124   : > { %11077 = vst [vmem:[#allocation35_spill] sm:$0xff] %v7226_v33  ;;  %11078 = vst [vmem:[#allocation36_spill] sm:$0xff] %v7233_v37 }
 0x125   : > { %1616 = vrot.lane.b32.xlu1 %v749_v31, %s6554_s18  ;;  %1622 = vrot.lane.b32.xlu0 %v7230_v35, %s6554_s18 }
 0x127   : > { %v7237_v41 = vpop.permute.xlu1 %1376  ;;  %v7245_v45 = vpop.permute.xlu0 %1382 }
 0x128   : > { %11079 = vst [vmem:[#allocation37_spill] sm:$0xff] %v7237_v41  ;;  %11080 = vst [vmem:[#allocation38_spill] sm:$0xff] %v7245_v45  ;;  %v792_v45 = vld [vmem:[#allocation3 + $0x92] sm:$0xff] }
 0x129   : > { %1620 = vrot.lane.b32.xlu1 %v7235_v39, %s6554_s18  ;;  %1626 = vrot.lane.b32.xlu0 %v7241_v43, %s6554_s18 }
 0x12b   : > { %v7249_v49 = vpop.permute.xlu1 %1380  ;;  %v7257_v53 = vpop.permute.xlu0 %1386 }
 0x12c   : > { %11081 = vst [vmem:[#allocation39_spill] sm:$0xff] %v7249_v49  ;;  %11082 = vst [vmem:[#allocation40_spill] sm:$0xff] %v7257_v53 }
 0x12d   : > { %1624 = vrot.lane.b32.xlu1 %v7247_v47, %s6554_s18  ;;  %1630 = vrot.lane.b32.xlu0 %v7253_v51, %s6554_s18 }
 0x12f   : > { %v7261_v59 = vpop.permute.xlu1 %1384  ;;  %v7267_v3 = vpop.permute.xlu0 %1390 }
 0x130   : > { %11083 = vst [vmem:[#allocation41_spill] sm:$0xff] %v7261_v59  ;;  %11084 = vst [vmem:[#allocation42_spill] sm:$0xff] %v7267_v3 }
 0x131   : > { %1628 = vrot.lane.b32.xlu1 %v7259_v56, %s6554_s18  ;;  %1634 = vrot.lane.b32.xlu0 %v758_v63, %s6554_s18  ;;  %v764_v63 = vld [vmem:[#allocation2 + $0xc2] sm:$0xff] }
 0x133   : > { %v7271_v19 = vpop.permute.xlu1 %1388  ;;  %v7276_v31 = vpop.permute.xlu0 %1394 }
 0x134   : > { %11085 = vst [vmem:[#allocation43_spill] sm:$0xff] %v7271_v19  ;;  %11086 = vst [vmem:[#allocation44_spill] sm:$0xff] %v7276_v31 }
 0x135   : > { %1632 = vrot.lane.b32.xlu1 %v7269_v13, %s6554_s18  ;;  %1638 = vrot.lane.b32.xlu0 %v760_v23, %s6554_s18  ;;  %v766_v23 = vld [vmem:[#allocation2 + $0xda] sm:$0xff] }
 0x137   : > { %v7278_v50 = vpop.permute.xlu1 %1392  ;;  %v7282_v46 = vpop.permute.xlu0 %1398 }
 0x138   : > { %11087 = vst [vmem:[#allocation45_spill] sm:$0xff] %v7278_v50  ;;  %11088 = vst [vmem:[#allocation46_spill] sm:$0xff] %v7282_v46  ;;  %v7365_v50 = vld [vmem:[#allocation3 + $0x3a] sm:$0xff] }
 0x139   : > { %1636 = vrot.lane.b32.xlu1 %v759_v57, %s6554_s18  ;;  %1642 = vrot.lane.b32.xlu0 %v762_v52, %s6554_s18  ;;  %v768_v52 = vld [vmem:[#allocation2 + $0xf2] sm:$0xff] }
 0x13b   : > { %v7284_v42 = vpop.permute.xlu1 %1396  ;;  %v7288_v44 = vpop.permute.xlu0 %1402 }
 0x13c   : > { %11089 = vst [vmem:[#allocation47_spill] sm:$0xff] %v7284_v42  ;;  %11090 = vst [vmem:[#allocation48_spill] sm:$0xff] %v7288_v44  ;;  %v767_v44 = vld [vmem:[#allocation2 + $0xe2] sm:$0xff] }
 0x13d   : > { %1640 = vrot.lane.b32.xlu1 %v761_v48, %s6554_s18  ;;  %1646 = vrot.lane.b32.xlu0 %v764_v63, %s6554_s18  ;;  %v770_v63 = vld [vmem:[#allocation2 + $0x10a] sm:$0xff] }
 0x13f   : > { %v7290_v40 = vpop.permute.xlu1 %1400  ;;  %v7294_v57 = vpop.permute.xlu0 %1406 }
 0x140   : > { %11091 = vst [vmem:[#allocation49_spill] sm:$0xff] %v7290_v40  ;;  %11092 = vst [vmem:[#allocation50_spill] sm:$0xff] %v7294_v57  ;;  %v769_v57 = vld [vmem:[#allocation2 + $0xfa] sm:$0xff] }
 0x141   : > { %1644 = vrot.lane.b32.xlu1 %v763_v38, %s6554_s18  ;;  %1650 = vrot.lane.b32.xlu0 %v766_v23, %s6554_s18  ;;  %v772_v23 = vld [vmem:[#allocation2 + $0x122] sm:$0xff] }
 0x143   : > { %v7296_v36 = vpop.permute.xlu1 %1404  ;;  %v7300_v48 = vpop.permute.xlu0 %1410 }
 0x144   : > { %11093 = vst [vmem:[#allocation51_spill] sm:$0xff] %v7296_v36  ;;  %11094 = vst [vmem:[#allocation52_spill] sm:$0xff] %v7300_v48  ;;  %v771_v48 = vld [vmem:[#allocation2 + $0x112] sm:$0xff] }
 0x145   : > { %1648 = vrot.lane.b32.xlu1 %v765_v34, %s6554_s18  ;;  %1654 = vrot.lane.b32.xlu0 %v768_v52, %s6554_s18  ;;  %v774_v52 = vld [vmem:[#allocation2 + $0x13a] sm:$0xff] }
 0x147   : > { %v7302_v46 = vpop.permute.xlu1 %1408  ;;  %v7306_v38 = vpop.permute.xlu0 %1414 }
 0x148   : > { %11095 = vst [vmem:[#allocation53_spill] sm:$0xff] %v7302_v46  ;;  %11096 = vst [vmem:[#allocation54_spill] sm:$0xff] %v7306_v38  ;;  %v773_v38 = vld [vmem:[#allocation2 + $0x12a] sm:$0xff] }
 0x149   : > { %1652 = vrot.lane.b32.xlu1 %v767_v44, %s6554_s18  ;;  %1658 = vrot.lane.b32.xlu0 %v770_v63, %s6554_s18  ;;  %v776_v63 = vld [vmem:[#allocation2 + $0x152] sm:$0xff] }
 0x14b   : > { %v7308_v40 = vpop.permute.xlu1 %1412  ;;  %v7312_v34 = vpop.permute.xlu0 %1418 }
 0x14c   : > { %11097 = vst [vmem:[#allocation55_spill] sm:$0xff] %v7308_v40  ;;  %11098 = vst [vmem:[#allocation56_spill] sm:$0xff] %v7312_v34  ;;  %v775_v34 = vld [vmem:[#allocation2 + $0x142] sm:$0xff] }
 0x14d   : > { %1656 = vrot.lane.b32.xlu1 %v769_v57, %s6554_s18  ;;  %1662 = vrot.lane.b32.xlu0 %v772_v23, %s6554_s18  ;;  %v778_v23 = vld [vmem:[#allocation2 + $0x16a] sm:$0xff] }
 0x14f   : > { %v7314_v36 = vpop.permute.xlu1 %1416  ;;  %v7318_v44 = vpop.permute.xlu0 %1486 }
 0x150   : > { %11099 = vst [vmem:[#allocation57_spill] sm:$0xff] %v7314_v36  ;;  %v777_v36 = vld [vmem:[#allocation2 + $0x15a] sm:$0xff] }
 0x151   : > { %1660 = vrot.lane.b32.xlu1 %v771_v48, %s6554_s18  ;;  %1666 = vrot.lane.b32.xlu0 %v774_v52, %s6554_s18  ;;  %v780_v52 = vld [vmem:[#allocation3 + $0x2] sm:$0xff] }
 0x153   : > { %v7320_v46 = vpop.permute.xlu1 %1420  ;;  %v7324_v57 = vpop.permute.xlu0 %1490 }
 0x154   : > { %11100 = vst [vmem:[#allocation58_spill] sm:$0xff] %v7320_v46  ;;  %v779_v46 = vld [vmem:[#allocation2 + $0x172] sm:$0xff] }
 0x155   : > { %1664 = vrot.lane.b32.xlu1 %v773_v38, %s6554_s18  ;;  %1670 = vrot.lane.b32.xlu0 %v776_v63, %s6554_s18  ;;  %v7341_v63 = vld [vmem:[#allocation3 + $0x1a] sm:$0xff] }
 0x157   : > { %v7326_v40 = vpop.permute.xlu1 %1488  ;;  %v7330_v48 = vpop.permute.xlu0 %1494 }
 0x159   : > { %1668 = vrot.lane.b32.xlu1 %v775_v34, %s6554_s18  ;;  %1674 = vrot.lane.b32.xlu0 %v778_v23, %s6554_s18 }
 0x15b   : > { %v7332_v30 = vpop.permute.xlu1 %1492  ;;  %v7336_v38 = vpop.permute.xlu0 %1498 }
 0x15c   : > { %11101 = vst [vmem:[#allocation59_spill] sm:$0xff] %v7336_v38 }
 0x15d   : > { %1672 = vrot.lane.b32.xlu1 %v777_v36, %s6554_s18  ;;  %1742 = vrot.lane.b32.xlu0 %v780_v52, %s6555_s19  ;;  %v7350_v36 = vld [vmem:[#allocation3 + $0x32] sm:$0xff] }
 0x15f   : > { %v7338_v42 = vpop.permute.xlu1 %1496  ;;  %v7344_v34 = vpop.permute.xlu0 %1502 }
 0x160   : > { %11102 = vst [vmem:[#allocation60_spill] sm:$0xff] %v7338_v42  ;;  %11103 = vst [vmem:[#allocation61_spill] sm:$0xff] %v7344_v34  ;;  %v1106_v42 = vld [vmem:[#allocation3 + $0x61] sm:$0xff] }
 0x161   : > { %1676 = vrot.lane.b32.xlu1 %v779_v46, %s6554_s18  ;;  %1746 = vrot.lane.b32.xlu0 %v7341_v63, %s6555_s19  ;;  %s6566_s18 = smov 64  }
 0x163   : > { %v7346_v31 = vpop.permute.xlu1 %1500  ;;  %v7353_v23 = vpop.permute.xlu0 %1506 }
 0x164   : > { %11104 = vst [vmem:[#allocation62_spill] sm:$0xff] %v7346_v31  ;;  %11105 = vst [vmem:[#allocation63_spill] sm:$0xff] %v7353_v23  ;;  %v844_v23 = vld [vmem:[#allocation3 + $0x18] sm:$0xff] }
 0x165   : > { %1744 = vrot.lane.b32.xlu1 %v781_v32, %s6555_s19  ;;  %1750 = vrot.lane.b32.xlu0 %v7350_v36, %s6555_s19  ;;  %v7371_v32 = vld [vmem:[#allocation3 + $0x4a] sm:$0xff] }
 0x167   : > { %v7357_v52 = vpop.permute.xlu1 %1504  ;;  %v7363_v46 = vpop.permute.xlu0 %1510 }
 0x168   : > { %11106 = vst [vmem:[#allocation64_spill] sm:$0xff] %v7357_v52  ;;  %11107 = vst [vmem:[#allocation65_spill] sm:$0xff] %v7363_v46  ;;  %v791_v46 = vld [vmem:[#allocation3 + $0x82] sm:$0xff] }
 0x169   : > { %1748 = vrot.lane.b32.xlu1 %v7355_v26, %s6555_s19  ;;  %3644 = vrot.lane.b32.xlu0 %v7350_v36, %s6551_s12  ;;  %v845_v52 = vld [vmem:[#allocation3 + $0x20] sm:$0xff] }
 0x16b   : > { %v7367_v28 = vpop.permute.xlu1 %1508  ;;  %v7375_v3 = vpop.permute.xlu0 %1514 }
 0x16c   : > { %11108 = vst [vmem:[#allocation66_spill] sm:$0xff] %v7367_v28  ;;  %11109 = vst [vmem:[#allocation67_spill] sm:$0xff] %v7375_v3  ;;  %v793_v28 = vld [vmem:[#allocation3 + $0x9a] sm:$0xff] }
 0x16d   : > { %1752 = vrot.lane.b32.xlu1 %v7365_v50, %s6555_s19  ;;  %1754 = vrot.lane.b32.xlu0 %v7371_v32, %s6555_s19 }
 0x16f   : > { %v7377_v22 = vpop.permute.xlu1 %1512  ;;  %v7383_v19 = vpop.permute.xlu0 %1518 }
 0x170   : > { %11110 = vst [vmem:[#allocation68_spill] sm:$0xff] %v7377_v22  ;;  %11111 = vst [vmem:[#allocation69_spill] sm:$0xff] %v7383_v19 }
 0x171   : > { %3646 = vrot.lane.b32.xlu1 %v7365_v50, %s6551_s12  ;;  %3648 = vrot.lane.b32.xlu0 %v7371_v32, %s6551_s12 }
 0x173   : > { %v7387_v53 = vpop.permute.xlu1 %1516  ;;  %v7395_v3 = vpop.permute.xlu0 %1522 }
 0x174   : > { %11112 = vst [vmem:[#allocation70_spill] sm:$0xff] %v7387_v53  ;;  %11113 = vst [vmem:[#allocation71_spill] sm:$0xff] %v7395_v3  ;;  %v7405_v53 = vld [vmem:[#allocation3 + $0x6a] sm:$0xff] }
 0x175   : > { %1756 = vrot.lane.b32.xlu1 %v7385_v24, %s6555_s19  ;;  %1758 = vrot.lane.b32.xlu0 %v7391_v18, %s6555_s19 }
 0x177   : > { %v7397_v22 = vpop.permute.xlu1 %1520  ;;  %v7403_v19 = vpop.permute.xlu0 %1526 }
 0x178   : > { %11114 = vst [vmem:[#allocation72_spill] sm:$0xff] %v7397_v22  ;;  %11115 = vst [vmem:[#allocation73_spill] sm:$0xff] %v7403_v19 }
 0x179   : > { %3650 = vrot.lane.b32.xlu1 %v7385_v24, %s6551_s12  ;;  %3652 = vrot.lane.b32.xlu0 %v7391_v18, %s6551_s12 }
 0x17b   : > { %v7407_v59 = vpop.permute.xlu1 %1524  ;;  %v7413_v3 = vpop.permute.xlu0 %1530 }
 0x17c   : > { %11116 = vst [vmem:[#allocation74_spill] sm:$0xff] %v7407_v59  ;;  %11117 = vst [vmem:[#allocation75_spill] sm:$0xff] %v7413_v3 }
 0x17d   : > { %1760 = vrot.lane.b32.xlu1 %v7405_v53, %s6555_s19  ;;  %1762 = vrot.lane.b32.xlu0 %v790_v20, %s6555_s19 }
 0x17f   : > { %v7415_v22 = vpop.permute.xlu1 %1528  ;;  %v7420_v19 = vpop.permute.xlu0 %1534 }
 0x180   : > { %11118 = vst [vmem:[#allocation76_spill] sm:$0xff] %v7415_v22  ;;  %11119 = vst [vmem:[#allocation77_spill] sm:$0xff] %v7420_v19 }
 0x181   : > { %3654 = vrot.lane.b32.xlu1 %v7405_v53, %s6551_s12  ;;  %3656 = vrot.lane.b32.xlu0 %v790_v20, %s6551_s12 }
 0x183   : > { %v7422_v59 = vpop.permute.xlu1 %1532  ;;  %v7426_v14 = vpop.permute.xlu0 %1538 }
 0x184   : > { %11120 = vst [vmem:[#allocation78_spill] sm:$0xff] %v7422_v59  ;;  %11121 = vst [vmem:[#allocation79_spill] sm:$0xff] %v7426_v14  ;;  %v794_v59 = vld [vmem:[#allocation3 + $0xaa] sm:$0xff] }
 0x185   : > { %1764 = vrot.lane.b32.xlu1 %v791_v46, %s6555_s19  ;;  %1766 = vrot.lane.b32.xlu0 %v792_v45, %s6555_s19 }
 0x187   : > { %v7428_v3 = vpop.permute.xlu1 %1536  ;;  %v7432_v22 = vpop.permute.xlu0 %1542 }
 0x188   : > { %11122 = vst [vmem:[#allocation80_spill] sm:$0xff] %v7428_v3  ;;  %11123 = vst [vmem:[#allocation81_spill] sm:$0xff] %v7432_v22 }
 0x189   : > { %3658 = vrot.lane.b32.xlu1 %v791_v46, %s6551_s12  ;;  %3660 = vrot.lane.b32.xlu0 %v792_v45, %s6551_s12  ;;  %v795_v46 = vld [vmem:[#allocation3 + $0xb2] sm:$0xff] }
 0x18b   : > { %v7434_v19 = vpop.permute.xlu1 %1540  ;;  %v7438_v20 = vpop.permute.xlu0 %1546 }
 0x18c   : > { %11124 = vst [vmem:[#allocation82_spill] sm:$0xff] %v7434_v19  ;;  %11125 = vst [vmem:[#allocation83_spill] sm:$0xff] %v7438_v20  ;;  %v796_v19 = vld [vmem:[#allocation3 + $0xc2] sm:$0xff] }
 0x18d   : > { %1768 = vrot.lane.b32.xlu1 %v793_v28, %s6555_s19  ;;  %1770 = vrot.lane.b32.xlu0 %v794_v59, %s6555_s19 }
 0x18f   : > { %v7440_v49 = vpop.permute.xlu1 %1544  ;;  %v7444_v14 = vpop.permute.xlu0 %1614 }
 0x190   : > { %11126 = vst [vmem:[#allocation84_spill] sm:$0xff] %v7440_v49 }
 0x191   : > { %3662 = vrot.lane.b32.xlu1 %v793_v28, %s6551_s12  ;;  %3664 = vrot.lane.b32.xlu0 %v794_v59, %s6551_s12  ;;  %v797_v28 = vld [vmem:[#allocation3 + $0xca] sm:$0xff] }
 0x193   : > { %v7446_v22 = vpop.permute.xlu1 %1548  ;;  %v7450_v45 = vpop.permute.xlu0 %1618 }
 0x194   : > { %11127 = vst [vmem:[#allocation85_spill] sm:$0xff] %v7446_v22 }
 0x195   : > { %1772 = vrot.lane.b32.xlu1 %v795_v46, %s6555_s19  ;;  %1774 = vrot.lane.b32.xlu0 %v796_v19, %s6555_s19 }
 0x197   : > { %v7452_v3 = vpop.permute.xlu1 %1616  ;;  %v7456_v20 = vpop.permute.xlu0 %1622 }
 0x198   : > { %11128 = vst [vmem:[#allocation86_spill] sm:$0xff] %v7456_v20 }
 0x199   : > { %3666 = vrot.lane.b32.xlu1 %v795_v46, %s6551_s12  ;;  %3668 = vrot.lane.b32.xlu0 %v796_v19, %s6551_s12  ;;  %v7476_v19 = vld [vmem:[#allocation2 + $0x20] sm:$0xff] }
 0x19b   : > { %v7458_v49 = vpop.permute.xlu1 %1620  ;;  %v7462_v59 = vpop.permute.xlu0 %1626 }
 0x19c   : > { %11129 = vst [vmem:[#allocation87_spill] sm:$0xff] %v7462_v59 }
 0x19d   : > { %1776 = vrot.lane.b32.xlu1 %v797_v28, %s6555_s19  ;;  %3670 = vrot.lane.b32.xlu0 %v797_v28, %s6551_s12 }
 0x19f   : > { %v7464_v22 = vpop.permute.xlu1 %1624  ;;  %v7471_v46 = vpop.permute.xlu0 %1630 }
 0x1a0   : > { %11130 = vst [vmem:[#allocation88_spill] sm:$0xff] %v7464_v22  ;;  %11131 = vst [vmem:[#allocation89_spill] sm:$0xff] %v7471_v46  ;;  %v877_v46 = vld [vmem:[#allocation2 + $0x21] sm:$0xff] }
 0x1a1   : > { %1870 = vrot.lane.b32.xlu1 %v7467_v16, %s6556_s20  ;;  %1998 = vrot.lane.b32.xlu0 %v844_v23, %s6557_s21 }
 0x1a3   : > { %v7473_v37 = vpop.permute.xlu1 %1628  ;;  %v7480_v28 = vpop.permute.xlu0 %1634 }
 0x1a4   : > { %11132 = vst [vmem:[#allocation90_spill] sm:$0xff] %v7473_v37  ;;  %11133 = vst [vmem:[#allocation91_spill] sm:$0xff] %v7480_v28  ;;  %v1183_v37 = vld [vmem:[#allocation3 + $0xfa] sm:$0xff] }
 0x1a5   : > { %1872 = vrot.lane.b32.xlu1 %v7476_v19, %s6556_s20  ;;  %2126 = vrot.lane.b32.xlu0 %v876_v10, %s6558_s22 }
 0x1a7   : > { %v7482_v41 = vpop.permute.xlu1 %1632  ;;  %v7486_v12 = vpop.permute.xlu0 %1638 }
 0x1a8   : > { %11134 = vst [vmem:[#allocation92_spill] sm:$0xff] %v7482_v41  ;;  %11135 = vst [vmem:[#allocation93_spill] sm:$0xff] %v7486_v12  ;;  %v911_v12 = vld [vmem:[#allocation3 + $0x39] sm:$0xff] }
 0x1a9   : > { %2000 = vrot.lane.b32.xlu1 %v845_v52, %s6557_s21  ;;  %2254 = vrot.lane.b32.xlu0 %v7113_v5, %s6559_s23 }
 0x1ab   : > { %v7488_v23 = vpop.permute.xlu1 %1636  ;;  %v7493_v28 = vpop.permute.xlu0 %1642 }
 0x1ac   : > { %11136 = vst [vmem:[#allocation94_spill] sm:$0xff] %v7488_v23  ;;  %11137 = vst [vmem:[#allocation95_spill] sm:$0xff] %v7493_v28 }
 0x1ad   : > { %2128 = vrot.lane.b32.xlu1 %v877_v46, %s6558_s22  ;;  %2382 = vrot.lane.b32.xlu0 %v7221_v27, %s6560_s24  ;;  %v624_v46 = vld [vmem:[#allocation2 + $0x30] sm:$0xff] }
 0x1af   : > { %v7495_v34 = vpop.permute.xlu1 %1640  ;;  %v7501_v10 = vpop.permute.xlu0 %1646 }
 0x1b0   : > { %11138 = vst [vmem:[#allocation96_spill] sm:$0xff] %v7495_v34  ;;  %11139 = vst [vmem:[#allocation97_spill] sm:$0xff] %v7501_v10 }
 0x1b1   : > { %2256 = vrot.lane.b32.xlu1 %v7127_v11, %s6559_s23  ;;  %2510 = vrot.lane.b32.xlu0 %v7341_v63, %s6561_s25  ;;  %v1038_v11 = vld [vmem:[#allocation3 + $0x30] sm:$0xff] }
 0x1b3   : > { %v7503_v52 = vpop.permute.xlu1 %1644  ;;  %v7509_v5 = vpop.permute.xlu0 %1650 }
 0x1b4   : > { %11140 = vst [vmem:[#allocation98_spill] sm:$0xff] %v7503_v52  ;;  %11141 = vst [vmem:[#allocation99_spill] sm:$0xff] %v7509_v5  ;;  %v1180_v5 = vld [vmem:[#allocation3 + $0xda] sm:$0xff] }
 0x1b5   : > { %2384 = vrot.lane.b32.xlu1 %v7235_v39, %s6560_s24  ;;  %2638 = vrot.lane.b32.xlu0 %v624_v46, %s6562_s26  ;;  %v625_v39 = vld [vmem:[#allocation2 + $0x38] sm:$0xff] }
 0x1b6   : > { %v1070_v52 = vld [vmem:[#allocation2 + $0x31] sm:$0xff] }
 0x1b7   : > { %v7511_v28 = vpop.permute.xlu1 %1648  ;;  %v7516_v27 = vpop.permute.xlu0 %1654 }
 0x1b8   : > { %11142 = vst [vmem:[#allocation100_spill] sm:$0xff] %v7511_v28  ;;  %11143 = vst [vmem:[#allocation101_spill] sm:$0xff] %v7516_v27  ;;  %v1039_v27 = vld [vmem:[#allocation3 + $0x38] sm:$0xff] }
 0x1b9   : > { %2512 = vrot.lane.b32.xlu1 %v7355_v26, %s6561_s25  ;;  %2766 = vrot.lane.b32.xlu0 %v1038_v11, %s6563_s28 }
 0x1bb   : > { %v7518_v10 = vpop.permute.xlu1 %1652  ;;  %v7522_v63 = vpop.permute.xlu0 %1658 }
 0x1bc   : > { %11144 = vst [vmem:[#allocation102_spill] sm:$0xff] %v7518_v10  ;;  %11145 = vst [vmem:[#allocation103_spill] sm:$0xff] %v7522_v63  ;;  %v1181_v63 = vld [vmem:[#allocation3 + $0xe2] sm:$0xff] }
 0x1bd   : > { %2640 = vrot.lane.b32.xlu1 %v625_v39, %s6562_s26  ;;  %1874 = vrot.lane.b32.xlu0 %v624_v46, %s6556_s20  ;;  %v3941_v46 = vld [vmem:[%s11036_s2 + $0x40] sm:$0xff] }
 0x1be   : > { %6315 = vmatprep.subr.mxu0 %v3941_v46 }
 0x1bf   : > { %v7524_v28 = vpop.permute.xlu1 %1656  ;;  %v7528_v26 = vpop.permute.xlu0 %1662  ;;  %6316 = vmatpush3.msra.mxu0 %v3941_v46 }
 0x1c0   : > { %11146 = vst [vmem:[#allocation104_spill] sm:$0xff] %v7524_v28  ;;  %11147 = vst [vmem:[#allocation105_spill] sm:$0xff] %v7528_v26  ;;  %v3940_v26 = vld [vmem:[%s11036_s2 + $0x38] sm:$0xff] }
 0x1c1   : > { %3672 = vrot.lane.b32.xlu1 %v1180_v5, %s6551_s12  ;;  %2894 = vrot.lane.b32.xlu0 %v1070_v52, %s6564_s29  ;;  %v1071_v5 = vld [vmem:[#allocation2 + $0x39] sm:$0xff] }
 0x1c2   : > { %6317 = vmatprep.subr.mxu0 %v3940_v26 }
 0x1c3   : > { %v7530_v10 = vpop.permute.xlu1 %1660  ;;  %v7534_v34 = vpop.permute.xlu0 %1666  ;;  %6318 = vmatpush3.msra.mxu0 %v3940_v26  ;;  %v3937_v26 = vld [vmem:[%s11036_s2 + $0x20] sm:$0xff] }
 0x1c4   : > { %11148 = vst [vmem:[#allocation106_spill] sm:$0xff] %v7530_v10  ;;  %11149 = vst [vmem:[#allocation107_spill] sm:$0xff] %v7534_v34  ;;  %v3939_v34 = vld [vmem:[%s11036_s2 + $0x30] sm:$0xff] }
 0x1c5   : > { %2768 = vrot.lane.b32.xlu1 %v1039_v27, %s6563_s28  ;;  %1876 = vrot.lane.b32.xlu0 %v625_v39, %s6556_s20  ;;  %v3938_v39 = vld [vmem:[%s11036_s2 + $0x28] sm:$0xff] }
 0x1c6   : > { %6319 = vmatprep.subr.mxu0 %v3939_v34 }
 0x1c7   : > { %v7539_v28 = vpop.permute.xlu1 %1664  ;;  %v7546_v10 = vpop.permute.xlu0 %1670  ;;  %6320 = vmatpush3.msra.mxu0 %v3939_v34 }
 0x1c8   : > { %11150 = vst [vmem:[#allocation108_spill] sm:$0xff] %v7539_v28  ;;  %11151 = vst [vmem:[#allocation109_spill] sm:$0xff] %v7546_v10  ;;  %6321 = vmatprep.subr.mxu0 %v3938_v39  ;;  %v3936_v10 = vld [vmem:[%s11036_s2 + $0x18] sm:$0xff] }
 0x1c9   : > { %3674 = vrot.lane.b32.xlu1 %v1181_v63, %s6551_s12  ;;  %2896 = vrot.lane.b32.xlu0 %v1071_v5, %s6564_s29 }
 0x1ca   : > { %6322 = vmatpush3.msra.mxu0 %v3938_v39 }
 0x1cb   : > { %v7551_v28 = vpop.permute.xlu1 %1668  ;;  %v7558_v63 = vpop.permute.xlu0 %1674  ;;  %6323 = vmatprep.subr.mxu0 %v3937_v26 }
 0x1cc   : > { %11152 = vst [vmem:[#allocation110_spill] sm:$0xff] %v7551_v28  ;;  %11153 = vst [vmem:[#allocation111_spill] sm:$0xff] %v7558_v63  ;;  %6324 = vmatpush3.msra.mxu0 %v3937_v26 }
 0x1cd   : > { %2002 = vrot.lane.b32.xlu1 %v1038_v11, %s6557_s21  ;;  %2004 = vrot.lane.b32.xlu0 %v1039_v27, %s6557_s21  ;;  %v3935_v11 = vld [vmem:[%s11036_s2 + $0x10] sm:$0xff]  ;;  %v3934_v27 = vld [vmem:[%s11036_s2 + $0x8] sm:$0xff] }
 0x1ce   : > { %6325 = vmatprep.subr.mxu0 %v3936_v10 }
 0x1cf   : > { %v7563_v46 = vpop.permute.xlu1 %1672  ;;  %v7571_v34 = vpop.permute.xlu0 %1742  ;;  %6326 = vmatpush3.msra.mxu0 %v3936_v10  ;;  %v3933_v10 = vld [vmem:[%s11036_s2] sm:$0xff] }
 0x1d0   : > { %11154 = vst [vmem:[#allocation112_spill] sm:$0xff] %v7563_v46  ;;  %6327 = vmatprep.subr.mxu0 %v3935_v11 }
 0x1d1   : > { %3022 = vrot.lane.b32.xlu1 %v7122_v9, %s6565_s17  ;;  %3024 = vrot.lane.b32.xlu0 %v7137_v15, %s6565_s17 }
 0x1d2   : > { %6328 = vmatpush3.msra.mxu0 %v3935_v11 }
 0x1d3   : > { %v7576_v39 = vpop.permute.xlu1 %1676  ;;  %v7584_v9 = vpop.permute.xlu0 %1746  ;;  %6329 = vmatprep.subr.mxu0 %v3934_v27 }
 0x1d4   : > { %11155 = vst [vmem:[#allocation113_spill] sm:$0xff] %v7576_v39  ;;  %6330 = vmatpush3.msra.mxu0 %v3934_v27  ;;  %v7594_v39 = vld [vmem:[#allocation4] sm:$0xff] }
 0x1d5   : > { %2130 = vrot.lane.b32.xlu1 %v1070_v52, %s6558_s22  ;;  %2132 = vrot.lane.b32.xlu0 %v1071_v5, %s6558_s22  ;;  %v910_v5 = vld [vmem:[#allocation3 + $0x31] sm:$0xff] }
 0x1d6   : > { %6331 = vmatprep.subr.mxu0 %v3933_v10 }
 0x1d7   : > { %v7589_v26 = vpop.permute.xlu1 %1744  ;;  %6332 = vmatpush3.msra.mxu0 %v3933_v10  ;;  %v7592_v15 = vpop.permute.xlu0 %1750 }
 0x1d8   : > { %11156 = vst [vmem:[#allocation114_spill] sm:$0xff] %v7592_v15  ;;  %5065 = vmatprep.subr.mxu0 %v7594_v39 }
 0x1db   : > { %v7597_v52 = vpop.permute.xlu1 %1748  ;;  %v3645_v11 = vpop.permute.xlu0 %3644 }
 0x1dc   : > { %v3740_v27 = vsel %vm326_vm0, %v7230_v35, %v3645_v11 }
 0x1dd   : > { %3804 = vrot.lane.b32.xlu1 %v3740_v27, %s6566_s18 }
 0x1df   : > { %v7601_v63 = vpop.permute.xlu1 %1752  ;;  %v7604_v46 = vpop.permute.xlu0 %1754 }
 0x1e0   : > { %11157 = vst [vmem:[#allocation115_spill] sm:$0xff] %v7601_v63  ;;  %11158 = vst [vmem:[#allocation116_spill] sm:$0xff] %v7604_v46 }
 0x1e1   : > { %2258 = vrot.lane.b32.xlu1 %v910_v5, %s6559_s23 }
 0x1e3   : > { %v3647_v10 = vpop.permute.xlu1 %3646  ;;  %v3649_v23 = vpop.permute.xlu0 %3648 }
 0x1e4   : > { %v3741_v28 = vsel %vm326_vm0, %v7247_v47, %v3647_v10 }
 0x1e5   : > { %3806 = vrot.lane.b32.xlu0 %v3741_v28, %s6566_s18  ;;  %2260 = vrot.lane.b32.xlu1 %v911_v12, %s6559_s23  ;;  %v1007_v28 = vld [vmem:[#allocation2 + $0x48] sm:$0xff]  ;;  %v1008_v12 = vld [vmem:[#allocation2 + $0x50] sm:$0xff] }
 0x1e7   : > { %v7610_v41 = vpop.permute.xlu1 %1756  ;;  %v7615_v11 = vpop.permute.xlu0 %1758 }
 0x1e8   : > { %11159 = vst [vmem:[#allocation117_spill] sm:$0xff] %v7610_v41  ;;  %11160 = vst [vmem:[#allocation118_spill] sm:$0xff] %v7615_v11  ;;  %v1040_v11 = vld [vmem:[#allocation3 + $0x48] sm:$0xff] }
 0x1e9   : > { %2386 = vrot.lane.b32.xlu0 %v7230_v35, %s6560_s24  ;;  %2388 = vrot.lane.b32.xlu1 %v7247_v47, %s6560_s24  ;;  %v1182_v47 = vld [vmem:[#allocation3 + $0xf2] sm:$0xff] }
 0x1eb   : > { %v3651_v27 = vpop.permute.xlu1 %3650  ;;  %v7621_v5 = vpop.permute.xlu0 %3652 }
 0x1ed   : > { %2514 = vrot.lane.b32.xlu0 %v7350_v36, %s6561_s25  ;;  %2516 = vrot.lane.b32.xlu1 %v7365_v50, %s6561_s25  ;;  %v1041_v50 = vld [vmem:[#allocation3 + $0x50] sm:$0xff] }
 0x1ef   : > { %v7623_v10 = vpop.permute.xlu1 %1760  ;;  %v7628_v35 = vpop.permute.xlu0 %1762 }
 0x1f0   : > { %11161 = vst [vmem:[#allocation119_spill] sm:$0xff] %v7623_v10  ;;  %11162 = vst [vmem:[#allocation120_spill] sm:$0xff] %v7628_v35  ;;  %v1072_v35 = vld [vmem:[#allocation2 + $0x49] sm:$0xff] }
 0x1f1   : > { %2642 = vrot.lane.b32.xlu0 %v1007_v28, %s6562_s26  ;;  %2644 = vrot.lane.b32.xlu1 %v1008_v12, %s6562_s26 }
 0x1f3   : > { %v7630_v29 = vpop.permute.xlu1 %3654  ;;  %v7634_v36 = vpop.permute.xlu0 %3656 }
 0x1f5   : > { %2770 = vrot.lane.b32.xlu0 %v1040_v11, %s6563_s28  ;;  %3676 = vrot.lane.b32.xlu1 %v1182_v47, %s6551_s12 }
 0x1f7   : > { %v7636_v6 = vpop.permute.xlu1 %1764  ;;  %v7640_v10 = vpop.permute.xlu0 %1766 }
 0x1f8   : > { %11163 = vst [vmem:[#allocation121_spill] sm:$0xff] %v7636_v6  ;;  %11164 = vst [vmem:[#allocation122_spill] sm:$0xff] %v7640_v10  ;;  %v1104_v6 = vld [vmem:[#allocation3 + $0x49] sm:$0xff] }
 0x1f9   : > { %1878 = vrot.lane.b32.xlu0 %v1007_v28, %s6556_s20  ;;  %2772 = vrot.lane.b32.xlu1 %v1041_v50, %s6563_s28  ;;  %v1073_v28 = vld [vmem:[#allocation2 + $0x51] sm:$0xff] }
 0x1fb   : > { %v7642_v41 = vpop.permute.xlu1 %3658  ;;  %v7646_v31 = vpop.permute.xlu0 %3660 }
 0x1fd   : > { %2898 = vrot.lane.b32.xlu0 %v1072_v35, %s6564_s29  ;;  %3678 = vrot.lane.b32.xlu1 %v1183_v37, %s6551_s12 }
 0x1ff   : > { %v7648_v33 = vpop.permute.xlu1 %1768  ;;  %v7652_v47 = vpop.permute.xlu0 %1770 }
 0x200   : > { %11165 = vst [vmem:[#allocation123_spill] sm:$0xff] %v7648_v33  ;;  %11166 = vst [vmem:[#allocation124_spill] sm:$0xff] %v7652_v47  ;;  %v3742_v33 = vsel %vm326_vm0, %v7241_v43, %v3649_v23 }
 0x201   : > { %1880 = vrot.lane.b32.xlu0 %v1008_v12, %s6556_s20  ;;  %2006 = vrot.lane.b32.xlu1 %v1040_v11, %s6557_s21  ;;  %v1105_v12 = vld [vmem:[#allocation3 + $0x51] sm:$0xff] }
 0x203   : > { %v7654_v10 = vpop.permute.xlu1 %3662  ;;  %v7658_v8 = vpop.permute.xlu0 %3664 }
 0x204   : > { %11167 = vst [vmem:[#allocation125_spill] sm:$0xff] %v7658_v8 }
 0x205   : > { %2900 = vrot.lane.b32.xlu0 %v1073_v28, %s6564_s29  ;;  %3026 = vrot.lane.b32.xlu1 %v1104_v6, %s6565_s17 }
 0x207   : > { %v7660_v46 = vpop.permute.xlu1 %1772  ;;  %v7664_v37 = vpop.permute.xlu0 %1774 }
 0x208   : > { %11168 = vst [vmem:[#allocation126_spill] sm:$0xff] %v7660_v46  ;;  %11169 = vst [vmem:[#allocation127_spill] sm:$0xff] %v7664_v37 }
 0x209   : > { %2008 = vrot.lane.b32.xlu0 %v1041_v50, %s6557_s21  ;;  %2134 = vrot.lane.b32.xlu1 %v1072_v35, %s6558_s22  ;;  %v3743_v35 = vsel %vm326_vm0, %v7259_v56, %v3651_v27  ;;  %v1009_v27 = vld [vmem:[#allocation2 + $0x60] sm:$0xff] }
 0x20b   : > { %v7666_v47 = vpop.permute.xlu1 %3666  ;;  %v7670_v11 = vpop.permute.xlu0 %3668 }
 0x20c   : > { %11170 = vst [vmem:[#allocation128_spill] sm:$0xff] %v7666_v47  ;;  %11171 = vst [vmem:[#allocation129_spill] sm:$0xff] %v7670_v11  ;;  %v1074_v47 = vld [vmem:[#allocation2 + $0x61] sm:$0xff] }
 0x20d   : > { %3028 = vrot.lane.b32.xlu0 %v1105_v12, %s6565_s17  ;;  %3808 = vrot.lane.b32.xlu1 %v3742_v33, %s6566_s18 }
 0x20f   : > { %v7674_v59 = vpop.permute.xlu1 %1776  ;;  %v7678_v50 = vpop.permute.xlu0 %3670 }
 0x210   : > { %11172 = vst [vmem:[#allocation130_spill] sm:$0xff] %v7674_v59  ;;  %11173 = vst [vmem:[#allocation131_spill] sm:$0xff] %v7678_v50  ;;  %v1042_v59 = vld [vmem:[#allocation3 + $0x60] sm:$0xff] }
 0x211   : > { %2136 = vrot.lane.b32.xlu0 %v1073_v28, %s6558_s22  ;;  %2262 = vrot.lane.b32.xlu1 %v1104_v6, %s6559_s23 }
 0x213   : > { %v7680_v37 = vpop.permute.xlu1 %1870  ;;  %v7686_v46 = vpop.permute.xlu0 %1998 }
 0x215   : > { %3810 = vrot.lane.b32.xlu0 %v3743_v35, %s6566_s18  ;;  %2264 = vrot.lane.b32.xlu1 %v1105_v12, %s6559_s23  ;;  %v1010_v12 = vld [vmem:[#allocation2 + $0x68] sm:$0xff] }
 0x217   : > { %v7688_v23 = vpop.permute.xlu1 %1872  ;;  %v7693_v33 = vpop.permute.xlu0 %2126 }
 0x219   : > { %2390 = vrot.lane.b32.xlu0 %v7241_v43, %s6560_s24  ;;  %2392 = vrot.lane.b32.xlu1 %v7259_v56, %s6560_s24  ;;  %v1184_v56 = vld [vmem:[#allocation3 + $0x10a] sm:$0xff] }
 0x21b   : > { %v7695_v28 = vpop.permute.xlu1 %2000  ;;  %v7701_v6 = vpop.permute.xlu0 %2254 }
 0x21d   : > { %2518 = vrot.lane.b32.xlu0 %v7371_v32, %s6561_s25  ;;  %2520 = vrot.lane.b32.xlu1 %v7385_v24, %s6561_s25  ;;  %v1043_v24 = vld [vmem:[#allocation3 + $0x68] sm:$0xff] }
 0x21f   : > { %v7703_v35 = vpop.permute.xlu1 %2128  ;;  %v7708_v43 = vpop.permute.xlu0 %2382 }
 0x221   : > { %2646 = vrot.lane.b32.xlu0 %v1009_v27, %s6562_s26  ;;  %2648 = vrot.lane.b32.xlu1 %v1010_v12, %s6562_s26 }
 0x223   : > { %v7710_v50 = vpop.permute.xlu1 %2256  ;;  %v7714_v32 = vpop.permute.xlu0 %2510 }
 0x225   : > { %2774 = vrot.lane.b32.xlu0 %v1042_v59, %s6563_s28  ;;  %3680 = vrot.lane.b32.xlu1 %v1184_v56, %s6551_s12 }
 0x227   : > { %v7716_v11 = vpop.permute.xlu1 %2384  ;;  %v7720_v38 = vpop.permute.xlu0 %2638 }
 0x229   : > { %1882 = vrot.lane.b32.xlu0 %v1009_v27, %s6556_s20  ;;  %2776 = vrot.lane.b32.xlu1 %v1043_v24, %s6563_s28  ;;  %v1075_v27 = vld [vmem:[#allocation2 + $0x69] sm:$0xff] }
 0x22b   : > { %v7722_v21 = vpop.permute.xlu1 %2512  ;;  %v7726_v8 = vpop.permute.xlu0 %2766 }
 0x22d   : > { %2902 = vrot.lane.b32.xlu0 %v1074_v47, %s6564_s29  ;;  %3682 = vrot.lane.b32.xlu1 %v1185_v2, %s6551_s12  ;;  %v1107_v2 = vld [vmem:[#allocation3 + $0x69] sm:$0xff] }
 0x22f   : > { %v7728_v63 = vpop.permute.xlu1 %2640  ;;  %v7732_v56 = vpop.permute.xlu0 %1874 }
 0x231   : > { %1884 = vrot.lane.b32.xlu0 %v1010_v12, %s6556_s20  ;;  %2010 = vrot.lane.b32.xlu1 %v1042_v59, %s6557_s21  ;;  %v620_v59 = vld [vmem:[#allocation2] sm:$0xff] }
 0x233   : > { %v7734_v22 = vpop.permute.xlu1 %3672  ;;  %v7738_v25 = vpop.permute.xlu0 %2894 }
 0x234   : > { %11174 = vst [vmem:[#allocation132_spill] sm:$0xff] %v7734_v22  ;;  %v3744_v22 = vsel %vm326_vm0, %v7253_v51, %v7621_v5 }
 0x235   : > { %2904 = vrot.lane.b32.xlu0 %v1075_v27, %s6564_s29  ;;  %3030 = vrot.lane.b32.xlu1 %v1106_v42, %s6565_s17 }
 0x237   : > { %v7740_v4 = vpop.permute.xlu1 %2768  ;;  %v7744_v12 = vpop.permute.xlu0 %1876 }
 0x239   : > { %2012 = vrot.lane.b32.xlu0 %v1043_v24, %s6557_s21  ;;  %2138 = vrot.lane.b32.xlu1 %v1074_v47, %s6558_s22  ;;  %v3118_v24 = vsel %vm326_vm0, %v620_v59, %v7091_v55 }
 0x23a   : > { %v3151_v47 = vsel %vm3150_vm2, %v3118_v24, %v7197_v54  ;;  %v621_v54 = vld [vmem:[#allocation2 + $0x8] sm:$0xff] }
 0x23b   : > { %v7746_v15 = vpop.permute.xlu1 %3674  ;;  %v7756_v20 = vpop.permute.xlu0 %2896  ;;  %v3184_v51 = vsel %vm11045_vm3, %v3151_v47, %v7318_v44  ;;  %v946_v44 = vld [vmem:[#allocation2 + $0x62] sm:$0xff] }
 0x23c   : > { %11175 = vst [vmem:[#allocation133_spill] sm:$0xff] %v7746_v15  ;;  %v3217_v55 = vsel %vm3216_vm4, %v3184_v51, %v7444_v14  ;;  %v947_v14 = vld [vmem:[#allocation2 + $0x6a] sm:$0xff]  ;;  %v1012_v51 = vld [vmem:[#allocation2 + $0x80] sm:$0xff] }
 0x23d   : > { %3032 = vrot.lane.b32.xlu0 %v1107_v2, %s6565_s17  ;;  %3812 = vrot.lane.b32.xlu1 %v3744_v22, %s6566_s18  ;;  %v3745_v22 = vsel %vm326_vm0, %v7269_v13, %v7630_v29  ;;  %v3250_v5 = vsel %vm3249_vm5, %v3217_v55, %v7571_v34  ;;  %v3119_v29 = vsel %vm326_vm0, %v621_v54, %v7095_v58 }
 0x23e   : > { %v3152_v34 = vsel %vm3150_vm2, %v3119_v29, %v7206_v1 }
 0x23f   : > { %v7758_v15 = vpop.permute.xlu1 %2002 }
 0x241   : > { %2140 = vrot.lane.b32.xlu0 %v1075_v27, %s6558_s22  ;;  %2266 = vrot.lane.b32.xlu1 %v1106_v42, %s6559_s23  ;;  %v3283_v27 = vsel %vm11043_vm6, %v3250_v5, %v7680_v37  ;;  %v7776_v42 = vpop.permute.xlu0 %2004  ;;  %v1186_v5 = vld [vmem:[#allocation3 + $0x122] sm:$0xff] }
 0x242   : > { %v3316_v13 = vsel %vm3315_vm7, %v3283_v27, %v7686_v46 }
 0x243   : > { %v3023_v59 = vpop.permute.xlu1 %3022  ;;  %v3349_v37 = vsel %vm3348_vm8, %v3316_v13, %v7693_v33 }
 0x244   : > { %v3382_v24 = vsel %vm3381_vm9, %v3349_v37, %v7701_v6 }
 0x245   : > { %3814 = vrot.lane.b32.xlu0 %v3745_v22, %s6566_s18  ;;  %2268 = vrot.lane.b32.xlu1 %v1107_v2, %s6559_s23  ;;  %v3185_v2 = vsel %vm11045_vm3, %v3152_v34, %v7326_v40  ;;  %v3415_v46 = vsel %vm3414_vm10, %v3382_v24, %v7708_v43  ;;  %v3025_v40 = vpop.permute.xlu0 %3024  ;;  %v1011_v43 = vld [vmem:[#allocation2 + $0x78] sm:$0xff]  ;;  %v1044_v22 = vld [vmem:[#allocation3 + $0x78] sm:$0xff] }
 0x246   : > { %v3218_v58 = vsel %vm3216_vm4, %v3185_v2, %v7452_v3  ;;  %v3448_v33 = vsel %vm3447_vm11, %v3415_v46, %v7714_v32  ;;  %v4711_v34 = vld [vmem:[%s11039_s5 + $0x78] sm:$0xff]  ;;  %v4710_v2 = vld [vmem:[%s11039_s5 + $0x70] sm:$0xff]  ;;  %v1077_v46 = vld [vmem:[#allocation2 + $0x81] sm:$0xff] }
 0x247   : > { %v3251_v1 = vsel %vm3249_vm5, %v3218_v58, %v7589_v26  ;;  %v7801_v47 = vpop.permute.xlu1 %2130  ;;  %v3481_v6 = vsel %vm3480_vm12, %v3448_v33, %v7720_v38  ;;  %4841 = vmatpush1.msra.mxu1 %v4711_v34  ;;  %v4709_v58 = vld [vmem:[%s11039_s5 + $0x68] sm:$0xff]  ;;  %v4708_v33 = vld [vmem:[%s11039_s5 + $0x60] sm:$0xff] }
 0x248   : > { %v3284_v3 = vsel %vm11043_vm6, %v3251_v1, %v7688_v23  ;;  %v3514_v32 = vsel %vm3513_vm13, %v3481_v6, %v7726_v8  ;;  %vm11044_vm6 = vcmask 588800   ;;  %4842 = vmatprep.subr.mxu1 %v7594_v39  ;;  %v4707_v6 = vld [vmem:[%s11039_s5 + $0x58] sm:$0xff] }
 0x249   : > { %2394 = vrot.lane.b32.xlu0 %v946_v44, %s6560_s24  ;;  %2396 = vrot.lane.b32.xlu1 %v947_v14, %s6560_s24  ;;  %v3317_v26 = vsel %vm3315_vm7, %v3284_v3, %v7695_v28  ;;  %v3547_v23 = vsel %vm3546_vm14, %v3514_v32, %v7738_v25  ;;  %v7828_v25 = vpop.permute.xlu0 %2132  ;;  %v1045_v14 = vld [vmem:[#allocation3 + $0x80] sm:$0xff] }
 0x24a   : > { %v3580_v28 = vsel %vm3579_vm15, %v3547_v23, %v3023_v59  ;;  %4843 = vmatpush1.msra.mxu1 %v4710_v2  ;;  %v1109_v23 = vld [vmem:[#allocation3 + $0x81] sm:$0xff]  ;;  %v949_v2 = vld [vmem:[#allocation2 + $0x82] sm:$0xff] }
 0x24b   : > { %4844 = vmatprep.subr.mxu1 %v7594_v39 }
 0x24c   : > { %4845 = vmatpush1.msra.mxu1 %v4709_v58 }
 0x24d   : > { %2522 = vrot.lane.b32.xlu0 %v7391_v18, %s6561_s25  ;;  %2524 = vrot.lane.b32.xlu1 %v7405_v53, %s6561_s25  ;;  %v3350_v18 = vsel %vm3348_vm8, %v3317_v26, %v7703_v35  ;;  %v4706_v26 = vld [vmem:[%s11039_s5 + $0x50] sm:$0xff] }
 0x24e   : > { %v3383_v38 = vsel %vm3381_vm9, %v3350_v18, %v7710_v50  ;;  %4846 = vmatprep.subr.mxu1 %v7594_v39  ;;  %v4705_v18 = vld [vmem:[%s11039_s5 + $0x48] sm:$0xff] }
 0x24f   : > { %v3805_v55 = vpop.permute.xlu1 %3804  ;;  %v3416_v8 = vsel %vm3414_vm10, %v3383_v38, %v7716_v11  ;;  %4847 = vmatpush1.msra.mxu1 %v4708_v33  ;;  %v4704_v38 = vld [vmem:[%s11039_s5 + $0x40] sm:$0xff] }
 0x250   : > { %v3901_v53 = vsel %vm3900_vm1, %v3580_v28, %v3805_v55  ;;  %v3449_v35 = vsel %vm3447_vm11, %v3416_v8, %v7722_v21  ;;  %4848 = vmatprep.subr.mxu1 %v7594_v39  ;;  %v4703_v55 = vld [vmem:[%s11039_s5 + $0x38] sm:$0xff] }
 0x251   : > { %2650 = vrot.lane.b32.xlu0 %v1011_v43, %s6562_s26  ;;  %2652 = vrot.lane.b32.xlu1 %v1012_v51, %s6562_s26  ;;  %v3482_v50 = vsel %vm3480_vm12, %v3449_v35, %v7728_v63  ;;  %v6519_v8 = vld [vmem:[#allocation2 + $0x7a] sm:$0xff]  ;;  %v4702_v35 = vld [vmem:[%s11039_s5 + $0x30] sm:$0xff] }
 0x252   : > { %6333 = vmatprep.mubr.msk.f32.mxu0 %vm11044_vm6, %v3901_v53  ;;  %v3515_v54 = vsel %vm3513_vm13, %v3482_v50, %v7740_v4  ;;  %v1076_v4 = vld [vmem:[#allocation2 + $0x79] sm:$0xff]  ;;  %4849 = vmatpush1.msra.mxu1 %v4707_v6  ;;  %v3746_v53 = vsel %vm326_vm0, %v6519_v8, %v7634_v36  ;;  %v4701_v36 = vld [vmem:[%s11039_s5 + $0x28] sm:$0xff] }
 0x253   : > { %v7836_v11 = vpop.permute.xlu1 %2258  ;;  %v3548_v21 = vsel %vm3546_vm14, %v3515_v54, %v7756_v20  ;;  %v1187_v20 = vld [vmem:[#allocation3 + $0x12a] sm:$0xff]  ;;  %4850 = vmatprep.subr.mxu1 %v7594_v39 }
 0x254   : > { %v3581_v27 = vsel %vm3579_vm15, %v3548_v21, %v3025_v40  ;;  %v1108_v40 = vld [vmem:[#allocation3 + $0x79] sm:$0xff]  ;;  %4851 = vmatpush1.msra.mxu1 %v4706_v26  ;;  %v4700_v21 = vld [vmem:[%s11039_s5 + $0x20] sm:$0xff] }
 0x255   : > { %2778 = vrot.lane.b32.xlu0 %v1044_v22, %s6563_s28  ;;  %3684 = vrot.lane.b32.xlu1 %v1186_v5, %s6551_s12  ;;  %v3120_v5 = vsel %vm326_vm0, %v7467_v16, %v7098_v60 }
 0x256   : > { %4852 = vmatprep.subr.mxu1 %v7594_v39 }
 0x257   : > { %v3807_v44 = vpop.permute.xlu0 %3806  ;;  %v7844_v63 = vpop.permute.xlu1 %2260  ;;  %4853 = vmatpush1.msra.mxu1 %v4705_v18 }
 0x258   : > { %v3902_v59 = vsel %vm3900_vm1, %v3581_v27, %v3807_v44  ;;  %4854 = vmatprep.subr.mxu1 %v7594_v39  ;;  %v3153_v27 = vsel %vm3150_vm2, %v3120_v5, %v7204_v61  ;;  %v6520_v44 = vld [vmem:[#allocation2 + $0x82] sm:$0xff] }
 0x259   : > { %1886 = vrot.lane.b32.xlu0 %v1011_v43, %s6556_s20  ;;  %6334 = vmatmul.mubr.msk.f32.vlgmr.msra.gmra.mxu0 %vm11044_vm6, %v3902_v59  ;;  %v3747_v59 = vsel %vm326_vm0, %v6520_v44, %v7642_v41  ;;  %v3186_v60 = vsel %vm11045_vm3, %v3153_v27, %v7324_v57  ;;  %vm11176_vm6 = vcmask 195584   ;;  %v1046_v5 = vld [vmem:[#allocation3 + $0x90] sm:$0xff]  ;;  %v1188_v44 = vld [vmem:[#allocation3 + $0x13a] sm:$0xff] }
 0x25a   : > { %2780 = vrot.lane.b32.xlu1 %v1045_v14, %s6563_s28  ;;  %4855 = vmatpush1.msra.mxu1 %v4704_v38  ;;  %v3219_v61 = vsel %vm3216_vm4, %v3186_v60, %v7450_v45  ;;  %v3121_v45 = vsel %vm326_vm0, %v7476_v19, %v7104_v0  ;;  %v4724_v27 = vld [vmem:[%s11039_s5 + $0xe0] sm:$0xff]  ;;  %v4723_v60 = vld [vmem:[%s11039_s5 + $0xd8] sm:$0xff] }
 0x25b   : > { %v7849_v29 = vpop.permute.xlu0 %2386  ;;  %v7851_v13 = vpop.permute.xlu1 %2388  ;;  %4856 = vmatprep.subr.mxu1 %v7594_v39  ;;  %v3252_v41 = vsel %vm3249_vm5, %v3219_v61, %v7584_v9 }
 0x25c   : > { %4857 = vmatpush1.msra.mxu1 %v4703_v55  ;;  %v3285_v34 = vsel %vm11176_vm6, %v3252_v41, %v7732_v56  ;;  %v3154_v56 = vsel %vm3150_vm2, %v3121_v45, %v7212_v17  ;;  %v4696_v17 = vld [vmem:[%s11039_s5] sm:$0xff]  ;;  %v1047_v41 = vld [vmem:[#allocation3 + $0x98] sm:$0xff] }
 0x25d   : > { %2906 = vrot.lane.b32.xlu0 %v1076_v4, %s6564_s29  ;;  %4858 = vmatprep.subr.mxu1 %v7594_v39  ;;  %v3318_v9 = vsel %vm3315_vm7, %v3285_v34, %v7758_v15  ;;  %v3187_v0 = vsel %vm11045_vm3, %v3154_v56, %v7332_v30  ;;  %v981_v30 = vld [vmem:[#allocation3 + $0x82] sm:$0xff]  ;;  %v4720_v45 = vld [vmem:[%s11039_s5 + $0xc0] sm:$0xff] }
 0x25e   : > { %3686 = vrot.lane.b32.xlu1 %v1187_v20, %s6551_s12  ;;  %4859 = vmatpush1.msra.mxu1 %v4702_v35  ;;  %v4698_v20 = vld [vmem:[%s11039_s5 + $0x10] sm:$0xff]  ;;  %v3351_v33 = vsel %vm3348_vm8, %v3318_v9, %v7801_v47  ;;  %v3220_v47 = vsel %vm3216_vm4, %v3187_v0, %v7458_v49  ;;  %v4727_v49 = vld [vmem:[%s11039_s5 + $0xf8] sm:$0xff] }
 0x25f   : > { %v7858_v37 = vpop.permute.xlu0 %2514  ;;  %v7864_v24 = vpop.permute.xlu1 %2516  ;;  %4860 = vmatprep.subr.mxu1 %v7594_v39  ;;  %v3384_v19 = vsel %vm3381_vm9, %v3351_v33, %v7836_v11  ;;  %v3253_v11 = vsel %vm3249_vm5, %v3220_v47, %v7597_v52  ;;  %v1013_v52 = vld [vmem:[#allocation2 + $0x90] sm:$0xff]  ;;  %v586_v33 = vld [vmem:[%s6907_s11 + $0xf8] sm:$0xff] }
 0x260   : > { %4861 = vmatpush1.msra.mxu1 %v4701_v36  ;;  %v3417_v6 = vsel %vm3414_vm10, %v3384_v19, %v7849_v29  ;;  %v3286_v29 = vsel %vm11176_vm6, %v3253_v11, %v7744_v12  ;;  %v4726_v12 = vld [vmem:[%s11039_s5 + $0xf0] sm:$0xff]  ;;  %v4725_v36 = vld [vmem:[%s11039_s5 + $0xe8] sm:$0xff]  ;;  %vm11177_vm6 = vcmask 588800   ;;  %619 = vst.msk [vmem:[#allocation3 + $0x189] sm:$0xff] %vm326_vm0, %v586_v33  ;;  %v1079_v47 = vld [vmem:[#allocation2 + $0x99] sm:$0xff] }
 0x261   : > { %1888 = vrot.lane.b32.xlu0 %v1012_v51, %s6556_s20  ;;  %4862 = vmatprep.subr.mxu1 %v7594_v39  ;;  %v3450_v26 = vsel %vm3447_vm11, %v3417_v6, %v7858_v37  ;;  %v3319_v37 = vsel %vm3315_vm7, %v3286_v29, %v7776_v42  ;;  %v1078_v34 = vld [vmem:[#allocation2 + $0x91] sm:$0xff]  ;;  %v1110_v11 = vld [vmem:[#allocation3 + $0x91] sm:$0xff] }
 0x262   : > { %2014 = vrot.lane.b32.xlu1 %v1044_v22, %s6557_s21  ;;  %4863 = vmatpush1.msra.mxu1 %v4700_v21  ;;  %v1189_v9 = vld [vmem:[#allocation3 + $0x142] sm:$0xff] }
 0x263   : > { %v7872_v1 = vpop.permute.xlu0 %2642  ;;  %v7878_v3 = vpop.permute.xlu1 %2644  ;;  %4864 = vmatprep.subr.mxu1 %v7594_v39  ;;  %v585_v56 = vld [vmem:[%s6907_s11 + $0xf0] sm:$0xff] }
 0x264   : > { %v4718_v0 = vld [vmem:[%s11039_s5 + $0xb0] sm:$0xff]  ;;  %618 = vst.msk [vmem:[#allocation3 + $0x181] sm:$0xff] %vm326_vm0, %v585_v56 }
 0x265   : > { %2908 = vrot.lane.b32.xlu0 %v1077_v46, %s6564_s29 }
 0x266   : > { %3034 = vrot.lane.b32.xlu1 %v1108_v40, %s6565_s17 }
 0x267   : > { %v7886_v43 = vpop.permute.xlu0 %2770  ;;  %v7892_v32 = vpop.permute.xlu1 %3676 }
 0x269   : > { %2016 = vrot.lane.b32.xlu0 %v1045_v14, %s6557_s21  ;;  %v4699_v14 = vld [vmem:[%s11039_s5 + $0x18] sm:$0xff] }
 0x26a   : > { %2142 = vrot.lane.b32.xlu1 %v1076_v4, %s6558_s22  ;;  %v948_v4 = vld [vmem:[#allocation2 + $0x7a] sm:$0xff]  ;;  %4865 = vmatpush1.msra.mxu1 %v4699_v14 }
 0x26b   : > { %v7900_v51 = vpop.permute.xlu0 %1878  ;;  %v7906_v28 = vpop.permute.xlu1 %2772  ;;  %4866 = vmatprep.subr.mxu1 %v7594_v39 }
 0x26c   : > { %4867 = vmatpush1.msra.mxu1 %v4698_v20 }
 0x26d   : > { %3036 = vrot.lane.b32.xlu0 %v1109_v23, %s6565_s17  ;;  %4868 = vmatprep.subr.mxu1 %v7594_v39 }
 0x26e   : > { %3816 = vrot.lane.b32.xlu1 %v3746_v53, %s6566_s18  ;;  %v1014_v53 = vld [vmem:[#allocation2 + $0x98] sm:$0xff] }
 0x26f   : > { %v7916_v22 = vpop.permute.xlu0 %2898  ;;  %v7922_v50 = vpop.permute.xlu1 %3678 }
 0x271   : > { %2144 = vrot.lane.b32.xlu0 %v1077_v46, %s6558_s22  ;;  %v4697_v46 = vld [vmem:[%s11039_s5 + $0x8] sm:$0xff] }
 0x272   : > { %2270 = vrot.lane.b32.xlu1 %v1108_v40, %s6559_s23  ;;  %v980_v40 = vld [vmem:[#allocation3 + $0x7a] sm:$0xff]  ;;  %4869 = vmatpush1.msra.mxu1 %v4697_v46  ;;  %v4719_v46 = vld [vmem:[%s11039_s5 + $0xb8] sm:$0xff] }
 0x273   : > { %v7933_v54 = vpop.permute.xlu0 %1880  ;;  %v7945_v16 = vpop.permute.xlu1 %2006  ;;  %4870 = vmatprep.subr.mxu1 %v7594_v39 }
 0x274   : > { %4871 = vmatpush1.msra.mxu1 %v4696_v17  ;;  %v4717_v17 = vld [vmem:[%s11039_s5 + $0xa8] sm:$0xff] }
 0x275   : > { %3818 = vrot.lane.b32.xlu0 %v3747_v59, %s6566_s18  ;;  %4872 = vmatprep.subr.mxu1 %v7594_v39 }
 0x276   : > { %2272 = vrot.lane.b32.xlu1 %v1109_v23, %s6559_s23  ;;  %v3483_v23 = vsel %vm3480_vm12, %v3450_v26, %v7872_v1  ;;  %4873 = vmatpush2.msra.mxu1 %v4727_v49  ;;  %v3352_v1 = vsel %vm3348_vm8, %v3319_v37, %v7828_v25  ;;  %v4715_v49 = vld [vmem:[%s11039_s5 + $0x98] sm:$0xff]  ;;  %v4713_v37 = vld [vmem:[%s11039_s5 + $0x88] sm:$0xff] }
 0x277   : > { %v7957_v57 = vpop.permute.xlu0 %2900  ;;  %v3027_v58 = vpop.permute.xlu1 %3026  ;;  %v3516_v38 = vsel %vm3513_vm13, %v3483_v23, %v7886_v43  ;;  %4874 = vmatprep.subr.mxu1 %v7594_v39  ;;  %v3385_v42 = vsel %vm3381_vm9, %v3352_v1, %v7844_v63  ;;  %v4714_v23 = vld [vmem:[%s11039_s5 + $0x90] sm:$0xff]  ;;  %v4439_v1 = vld [vmem:[#allocation4 + $0x1] sm:$0xff] }
 0x278   : > { %v3549_v8 = vsel %vm3546_vm14, %v3516_v38, %v7916_v22  ;;  %4875 = vmatpush2.msra.mxu1 %v4726_v12  ;;  %v3418_v25 = vsel %vm3414_vm10, %v3385_v42, %v7851_v13  ;;  %v1111_v38 = vld [vmem:[#allocation3 + $0x99] sm:$0xff]  ;;  %v4712_v12 = vld [vmem:[%s11039_s5 + $0x80] sm:$0xff]  ;;  %4904 = vmatprep.mubr.f32.mxu1 %v4439_v1 }
 0x279   : > { %2398 = vrot.lane.b32.xlu0 %v948_v4, %s6560_s24  ;;  %v3582_v43 = vsel %vm3579_vm15, %v3549_v8, %v3027_v58  ;;  %4876 = vmatprep.subr.mxu1 %v7594_v39  ;;  %v3451_v63 = vsel %vm3447_vm11, %v3418_v25, %v7864_v24  ;;  %v6522_v25 = vld [vmem:[#allocation2 + $0x30] sm:$0xff] }
 0x27a   : > { %2400 = vrot.lane.b32.xlu1 %v949_v2, %s6560_s24  ;;  %4877 = vmatpush2.msra.mxu1 %v4725_v36  ;;  %v3484_v13 = vsel %vm3480_vm12, %v3451_v63, %v7878_v3  ;;  %v6523_v63 = vld [vmem:[#allocation2 + $0x9a] sm:$0xff] }
 0x27b   : > { %v7984_v15 = vpop.permute.xlu0 %2008  ;;  %v7998_v18 = vpop.permute.xlu1 %2134  ;;  %4878 = vmatprep.subr.mxu1 %v7594_v39  ;;  %v3517_v59 = vsel %vm3513_vm13, %v3484_v13, %v7906_v28  ;;  %v4722_v28 = vld [vmem:[%s11039_s5 + $0xd0] sm:$0xff] }
 0x27c   : > { %4879 = vmatpush2.msra.mxu1 %v4724_v27  ;;  %v3550_v14 = vsel %vm3546_vm14, %v3517_v59, %v7957_v57  ;;  %v4721_v57 = vld [vmem:[%s11039_s5 + $0xc8] sm:$0xff]  ;;  %v3749_v27 = vsel %vm326_vm0, %v6523_v63, %v7654_v10 }
 0x27d   : > { %2526 = vrot.lane.b32.xlu0 %v980_v40, %s6561_s25  ;;  %4880 = vmatprep.subr.mxu1 %v7594_v39 }
 0x27e   : > { %2528 = vrot.lane.b32.xlu1 %v981_v30, %s6561_s25  ;;  %4881 = vmatpush2.msra.mxu1 %v4723_v60  ;;  %v4716_v30 = vld [vmem:[%s11039_s5 + $0xa0] sm:$0xff]  ;;  %v950_v60 = vld [vmem:[#allocation2 + $0x92] sm:$0xff] }
 0x27f   : > { %v3029_v55 = vpop.permute.xlu0 %3028  ;;  %v3809_v35 = vpop.permute.xlu1 %3808  ;;  %4882 = vmatprep.subr.mxu1 %v7594_v39 }
 0x280   : > { %v3903_v22 = vsel %vm3900_vm1, %v3582_v43, %v3809_v35  ;;  %v3583_v3 = vsel %vm3579_vm15, %v3550_v14, %v3029_v55  ;;  %4883 = vmatpush2.msra.mxu1 %v4722_v28  ;;  %v4440_v35 = vld [vmem:[#allocation4 + $0x9] sm:$0xff]  ;;  %v11179_v14 = vld [vmem:[#allocation114_spill] sm:$0xff] }
 0x281   : > { %2654 = vrot.lane.b32.xlu0 %v1013_v52, %s6562_s26  ;;  %6336 = vmatprep.mubr.msk.f32.mxu0 %vm11177_vm6, %v3903_v22  ;;  %v3122_v22 = vsel %vm326_vm0, %v6522_v25, %v7101_v62  ;;  %v11178_v62 = vld [vmem:[#allocation86_spill] sm:$0xff]  ;;  %v1190_v25 = vld [vmem:[#allocation3 + $0x152] sm:$0xff] }
 0x282   : > { %2656 = vrot.lane.b32.xlu1 %v1014_v53, %s6562_s26  ;;  %4884 = vmatprep.subr.mxu1 %v7594_v39 }
 0x283   : > { %v8036_v21 = vpop.permute.xlu0 %2136  ;;  %v8047_v24 = vpop.permute.xlu1 %2262  ;;  %4885 = vmatpush2.msra.mxu1 %v4721_v57  ;;  %v11182_v57 = vld [vmem:[#allocation33_spill] sm:$0xff] }
 0x284   : > { %4886 = vmatprep.subr.mxu1 %v7594_v39 }
 0x285   : > { %2782 = vrot.lane.b32.xlu0 %v1046_v5, %s6563_s28  ;;  %4887 = vmatpush2.msra.mxu1 %v4720_v45 }
 0x286   : > { %3688 = vrot.lane.b32.xlu1 %v1188_v44, %s6551_s12  ;;  %4888 = vmatprep.subr.mxu1 %v7594_v39 }
 0x287   : > { %v3811_v61 = vpop.permute.xlu0 %3810  ;;  %v8063_v20 = vpop.permute.xlu1 %2264  ;;  %4889 = vmatpush2.msra.mxu1 %v4719_v46  ;;  %v11183_v46 = vld [vmem:[#allocation60_spill] sm:$0xff] }
 0x288   : > { %v3904_v4 = vsel %vm3900_vm1, %v3583_v3, %v3811_v61  ;;  %4890 = vmatprep.subr.mxu1 %v7594_v39  ;;  %v951_v3 = vld [vmem:[#allocation2 + $0x9a] sm:$0xff] }
 0x289   : > { %1890 = vrot.lane.b32.xlu0 %v1013_v52, %s6556_s20  ;;  %6337 = vmatmul.mubr.msk.f32.gmra.mxu0 %vm11177_vm6, %v3904_v4  ;;  %vm11180_vm6 = vcmask 195584   ;;  %v6524_v61 = vld [vmem:[#allocation2 + $0x38] sm:$0xff] }
 0x28a   : > { %2784 = vrot.lane.b32.xlu1 %v1047_v41, %s6563_s28  ;;  %4891 = vmatpush2.msra.mxu1 %v4718_v0 }
 0x28b   : > { %v8071_v2 = vpop.permute.xlu0 %2390  ;;  %v8077_v58 = vpop.permute.xlu1 %2392  ;;  %4892 = vmatprep.subr.mxu1 %v7594_v39 }
 0x28c   : > { %4893 = vmatpush2.msra.mxu1 %v4717_v17 }
 0x28d   : > { %2910 = vrot.lane.b32.xlu0 %v1078_v34, %s6564_s29  ;;  %4894 = vmatprep.subr.mxu1 %v7594_v39 }
 0x28e   : > { %3690 = vrot.lane.b32.xlu1 %v1189_v9, %s6551_s12  ;;  %4895 = vmatpush2.msra.mxu1 %v4716_v30  ;;  %v982_v9 = vld [vmem:[#allocation3 + $0x92] sm:$0xff] }
 0x28f   : > { %v8087_v40 = vpop.permute.xlu0 %2518  ;;  %v8095_v19 = vpop.permute.xlu1 %2520  ;;  %4896 = vmatprep.subr.mxu1 %v7594_v39  ;;  %v11185_v30 = vld [vmem:[#allocation115_spill] sm:$0xff] }
 0x290   : > { %4897 = vmatpush2.msra.mxu1 %v4715_v49 }
 0x291   : > { %1892 = vrot.lane.b32.xlu0 %v1014_v53, %s6556_s20  ;;  %4898 = vmatprep.subr.mxu1 %v7594_v39  ;;  %v6521_v53 = vld [vmem:[#allocation2 + $0x92] sm:$0xff] }
 0x292   : > { %2018 = vrot.lane.b32.xlu1 %v1046_v5, %s6557_s21  ;;  %4899 = vmatpush2.msra.mxu1 %v4714_v23  ;;  %v3748_v42 = vsel %vm326_vm0, %v6521_v53, %v7646_v31  ;;  %v3155_v5 = vsel %vm3150_vm2, %v3122_v22, %v7210_v7  ;;  %v1016_v53 = vld [vmem:[#allocation2 + $0xb0] sm:$0xff] }
 0x293   : > { %v8103_v6 = vpop.permute.xlu0 %2646  ;;  %v8109_v26 = vpop.permute.xlu1 %2648  ;;  %4900 = vmatprep.subr.mxu1 %v7594_v39  ;;  %v3188_v13 = vsel %vm11045_vm3, %v3155_v5, %v7330_v48  ;;  %v11181_v48 = vld [vmem:[#allocation6_spill] sm:$0xff] }
 0x294   : > { %4901 = vmatpush2.msra.mxu1 %v4713_v37  ;;  %v3221_v59 = vsel %vm3216_vm4, %v3188_v13, %v11178_v62  ;;  %v3123_v28 = vsel %vm326_vm0, %v6524_v61, %v11181_v48  ;;  %v1015_v37 = vld [vmem:[#allocation2 + $0xa8] sm:$0xff]  ;;  %v1049_v13 = vld [vmem:[#allocation3 + $0xb0] sm:$0xff] }
 0x295   : > { %2912 = vrot.lane.b32.xlu0 %v1079_v47, %s6564_s29  ;;  %4902 = vmatprep.subr.mxu1 %v7594_v39 }
 0x296   : > { %3038 = vrot.lane.b32.xlu1 %v1110_v11, %s6565_s17  ;;  %4903 = vmatpush2.msra.mxu1 %v4712_v12 }
 0x297   : > { %v8117_v29 = vpop.permute.xlu0 %2774  ;;  %v8123_v52 = vpop.permute.xlu1 %3680  ;;  %4905 = vmatmul.mubr.f32.vlgmr.msra.gmra.mxu1 %v7594_v39  ;;  %5290 = vmatprep.subr.mxu1 %v7594_v39 }
 0x298   : > { %4909 = vmatprep.mubr.f32.mxu1 %v4440_v35  ;;  %v1048_v35 = vld [vmem:[#allocation3 + $0xa8] sm:$0xff] }
 0x299   : > { %2020 = vrot.lane.b32.xlu0 %v1047_v41, %s6557_s21 }
 0x29a   : > { %2146 = vrot.lane.b32.xlu1 %v1078_v34, %s6558_s22  ;;  %v3156_v34 = vsel %vm3150_vm2, %v3123_v28, %v11182_v57 }
 0x29b   : > { %v8131_v55 = vpop.permute.xlu0 %1882  ;;  %v8137_v8 = vpop.permute.xlu1 %2776  ;;  %4910 = vmatmul.mubr.f32.gmra.mxu1 %v7594_v39  ;;  %v3254_v39 = vsel %vm3249_vm5, %v3221_v59, %v11179_v14  ;;  %v1191_v59 = vld [vmem:[#allocation3 + $0x15a] sm:$0xff] }
 0x29c   : > { %v3287_v10 = vsel %vm11180_vm6, %v3254_v39, %v7900_v51  ;;  %v3189_v51 = vsel %vm11045_vm3, %v3156_v34, %v11183_v46  ;;  %v6525_v34 = vld [vmem:[#allocation2 + $0xaa] sm:$0xff] }
 0x29d   : > { %3040 = vrot.lane.b32.xlu0 %v1111_v38, %s6565_s17  ;;  %v3320_v4 = vsel %vm3315_vm7, %v3287_v10, %v7945_v16  ;;  %v11184_v16 = vld [vmem:[#allocation88_spill] sm:$0xff] }
 0x29e   : > { %3820 = vrot.lane.b32.xlu1 %v3748_v42, %s6566_s18  ;;  %v3353_v45 = vsel %vm3348_vm8, %v3320_v4, %v7998_v18  ;;  %v3222_v0 = vsel %vm3216_vm4, %v3189_v51, %v11184_v16  ;;  %v1113_v4 = vld [vmem:[#allocation3 + $0xb1] sm:$0xff]  ;;  %v11188_v16 = vld [vmem:[#allocation5_spill] sm:$0xff] }
 0x29f   : > { %v2903_v43 = vpop.permute.xlu0 %2902  ;;  %v8146_v36 = vpop.permute.xlu1 %3682  ;;  %v3386_v56 = vsel %vm3381_vm9, %v3353_v45, %v8047_v24  ;;  %v3255_v18 = vsel %vm3249_vm5, %v3222_v0, %v11185_v30  ;;  %v11187_v45 = vld [vmem:[#allocation125_spill] sm:$0xff]  ;;  %v626_v51 = vld [vmem:[#allocation2 + $0x48] sm:$0xff] }
 0x2a0   : > { %v3419_v17 = vsel %vm3414_vm10, %v3386_v56, %v8071_v2  ;;  %v3288_v24 = vsel %vm11180_vm6, %v3255_v18, %v7933_v54  ;;  %vm11186_vm6 = vcmask 588800   ;;  %v3124_v0 = vsel %vm326_vm0, %v626_v51, %v11188_v16  ;;  %v6526_v18 = vld [vmem:[#allocation2 + $0xb2] sm:$0xff] }
 0x2a1   : > { %2148 = vrot.lane.b32.xlu0 %v1079_v47, %s6558_s22  ;;  %v983_v47 = vld [vmem:[#allocation3 + $0x9a] sm:$0xff]  ;;  %v3321_v2 = vsel %vm3315_vm7, %v3288_v24, %v7984_v15 }
 0x2a2   : > { %2274 = vrot.lane.b32.xlu1 %v1110_v11, %s6559_s23  ;;  %v3452_v11 = vsel %vm3447_vm11, %v3419_v17, %v8087_v40  ;;  %v3354_v12 = vsel %vm3348_vm8, %v3321_v2, %v8036_v21 }
 0x2a3   : > { %v8152_v31 = vpop.permute.xlu0 %1884  ;;  %v8161_v44 = vpop.permute.xlu1 %2010  ;;  %v3485_v23 = vsel %vm3480_vm12, %v3452_v11, %v8103_v6  ;;  %v3387_v54 = vsel %vm3381_vm9, %v3354_v12, %v8063_v20  ;;  %v11190_v11 = vld [vmem:[#allocation128_spill] sm:$0xff] }
 0x2a4   : > { %v3420_v15 = vsel %vm3414_vm10, %v3387_v54, %v8077_v58  ;;  %v3751_v24 = vsel %vm326_vm0, %v6526_v18, %v11190_v11  ;;  %v1050_v18 = vld [vmem:[#allocation3 + $0xc0] sm:$0xff]  ;;  %v1192_v11 = vld [vmem:[#allocation3 + $0x16a] sm:$0xff] }
 0x2a5   : > { %3822 = vrot.lane.b32.xlu0 %v3749_v27, %s6566_s18  ;;  %v3453_v21 = vsel %vm3447_vm11, %v3420_v15, %v8095_v19  ;;  %v953_v15 = vld [vmem:[#allocation2 + $0xb2] sm:$0xff] }
 0x2a6   : > { %2276 = vrot.lane.b32.xlu1 %v1111_v38, %s6559_s23  ;;  %v3518_v38 = vsel %vm3513_vm13, %v3485_v23, %v8117_v29  ;;  %v3486_v20 = vsel %vm3480_vm12, %v3453_v21, %v8109_v26  ;;  %v1080_v26 = vld [vmem:[#allocation2 + $0xa9] sm:$0xff]  ;;  %v11191_v23 = vld [vmem:[#allocation59_spill] sm:$0xff] }
 0x2a7   : > { %v2905_v7 = vpop.permute.xlu0 %2904  ;;  %v3031_v41 = vpop.permute.xlu1 %3030  ;;  %v3551_v1 = vsel %vm3546_vm14, %v3518_v38, %v2903_v43  ;;  %v3519_v22 = vsel %vm3513_vm13, %v3486_v20, %v8137_v8  ;;  %v627_v38 = vld [vmem:[#allocation2 + $0x50] sm:$0xff] }
 0x2a8   : > { %v3584_v6 = vsel %vm3579_vm15, %v3551_v1, %v3031_v41  ;;  %v3552_v5 = vsel %vm3546_vm14, %v3519_v22, %v2905_v7  ;;  %v1081_v7 = vld [vmem:[#allocation2 + $0xb1] sm:$0xff] }
 0x2a9   : > { %2402 = vrot.lane.b32.xlu0 %v950_v60, %s6560_s24  ;;  %v952_v1 = vld [vmem:[#allocation2 + $0xaa] sm:$0xff] }
 0x2aa   : > { %2404 = vrot.lane.b32.xlu1 %v951_v3, %s6560_s24  ;;  %v1112_v3 = vld [vmem:[#allocation3 + $0xa9] sm:$0xff] }
 0x2ab   : > { %v8185_v33 = vpop.permute.xlu0 %2012  ;;  %v8195_v49 = vpop.permute.xlu1 %2138 }
 0x2ad   : > { %2530 = vrot.lane.b32.xlu0 %v982_v9, %s6561_s25  ;;  %v3750_v9 = vsel %vm326_vm0, %v6525_v34, %v11187_v45 }
 0x2ae   : > { %2532 = vrot.lane.b32.xlu1 %v983_v47, %s6561_s25  ;;  %v11189_v47 = vld [vmem:[#allocation32_spill] sm:$0xff] }
 0x2af   : > { %v3033_v40 = vpop.permute.xlu0 %3032  ;;  %v3813_v42 = vpop.permute.xlu1 %3812  ;;  %v3157_v30 = vsel %vm3150_vm2, %v3124_v0, %v11189_v47  ;;  %v1018_v47 = vld [vmem:[#allocation2 + $0xc8] sm:$0xff] }
 0x2b0   : > { %v3905_v29 = vsel %vm3900_vm1, %v3584_v6, %v3813_v42  ;;  %v3585_v19 = vsel %vm3579_vm15, %v3552_v5, %v3033_v40  ;;  %v11192_v40 = vld [vmem:[#allocation87_spill] sm:$0xff] }
 0x2b1   : > { %2658 = vrot.lane.b32.xlu0 %v1015_v37, %s6562_s26  ;;  %6339 = vmatprep.mubr.msk.f32.mxu0 %vm11186_vm6, %v3905_v29  ;;  %v11195_v29 = vld [vmem:[#allocation8_spill] sm:$0xff] }
 0x2b2   : > { %2660 = vrot.lane.b32.xlu1 %v1016_v53, %s6562_s26 }
 0x2b3   : > { %v8220_v43 = vpop.permute.xlu0 %2140  ;;  %v8227_v58 = vpop.permute.xlu1 %2266 }
 0x2b5   : > { %2786 = vrot.lane.b32.xlu0 %v1048_v35, %s6563_s28 }
 0x2b6   : > { %3692 = vrot.lane.b32.xlu1 %v1190_v25, %s6551_s12  ;;  %v11196_v25 = vld [vmem:[#allocation35_spill] sm:$0xff] }
 0x2b7   : > { %v3815_v63 = vpop.permute.xlu0 %3814  ;;  %v8234_v62 = vpop.permute.xlu1 %2268 }
 0x2b8   : > { %v3906_v27 = vsel %vm3900_vm1, %v3585_v19, %v3815_v63  ;;  %v984_v19 = vld [vmem:[#allocation3 + $0xaa] sm:$0xff] }
 0x2b9   : > { %1894 = vrot.lane.b32.xlu0 %v1015_v37, %s6556_s20  ;;  %6340 = vmatmul.mubr.msk.f32.gmra.mxu0 %vm11186_vm6, %v3906_v27  ;;  %v3190_v37 = vsel %vm11045_vm3, %v3157_v30, %v11191_v23  ;;  %vm11194_vm6 = vcmask 195584   ;;  %v11197_v63 = vld [vmem:[#allocation62_spill] sm:$0xff] }
 0x2ba   : > { %2788 = vrot.lane.b32.xlu1 %v1049_v13, %s6563_s28  ;;  %v3223_v12 = vsel %vm3216_vm4, %v3190_v37, %v11192_v40  ;;  %v1051_v40 = vld [vmem:[#allocation3 + $0xc8] sm:$0xff] }
 0x2bb   : > { %v2395_v8 = vpop.permute.xlu0 %2394  ;;  %v8239_v60 = vpop.permute.xlu1 %2396 }
 0x2bd   : > { %2914 = vrot.lane.b32.xlu0 %v1080_v26, %s6564_s29 }
 0x2be   : > { %3694 = vrot.lane.b32.xlu1 %v1191_v59, %s6551_s12 }
 0x2bf   : > { %v2523_v14 = vpop.permute.xlu0 %2522  ;;  %v8243_v39 = vpop.permute.xlu1 %2524 }
 0x2c1   : > { %1896 = vrot.lane.b32.xlu0 %v1016_v53, %s6556_s20  ;;  %v11193_v53 = vld [vmem:[#allocation116_spill] sm:$0xff] }
 0x2c2   : > { %2022 = vrot.lane.b32.xlu1 %v1048_v35, %s6557_s21  ;;  %v3256_v54 = vsel %vm3249_vm5, %v3223_v12, %v11193_v53  ;;  %v3125_v35 = vsel %vm326_vm0, %v627_v38, %v11195_v29  ;;  %v1114_v29 = vld [vmem:[#allocation3 + $0xc1] sm:$0xff] }
 0x2c3   : > { %v2651_v10 = vpop.permute.xlu0 %2650  ;;  %v8247_v61 = vpop.permute.xlu1 %2652  ;;  %v3289_v42 = vsel %vm11194_vm6, %v3256_v54, %v8131_v55  ;;  %v3158_v22 = vsel %vm3150_vm2, %v3125_v35, %v11196_v25  ;;  %v1115_v25 = vld [vmem:[#allocation3 + $0xc9] sm:$0xff] }
 0x2c4   : > { %v3322_v21 = vsel %vm3315_vm7, %v3289_v42, %v8161_v44  ;;  %v3191_v55 = vsel %vm11045_vm3, %v3158_v22, %v11197_v63  ;;  %v11198_v44 = vld [vmem:[#allocation90_spill] sm:$0xff]  ;;  %v1083_v42 = vld [vmem:[#allocation2 + $0xc9] sm:$0xff] }
 0x2c5   : > { %2916 = vrot.lane.b32.xlu0 %v1081_v7, %s6564_s29  ;;  %v3355_v5 = vsel %vm3348_vm8, %v3322_v21, %v8195_v49  ;;  %v11201_v63 = vld [vmem:[#allocation129_spill] sm:$0xff] }
 0x2c6   : > { %3042 = vrot.lane.b32.xlu1 %v1112_v3, %s6565_s17  ;;  %v3388_v27 = vsel %vm3381_vm9, %v3355_v5, %v8227_v58 }
 0x2c7   : > { %v2779_v48 = vpop.permute.xlu0 %2778  ;;  %v8251_v28 = vpop.permute.xlu1 %3684  ;;  %v3421_v59 = vsel %vm3414_vm10, %v3388_v27, %v2395_v8 }
 0x2c9   : > { %2024 = vrot.lane.b32.xlu0 %v1049_v13, %s6557_s21 }
 0x2ca   : > { %2150 = vrot.lane.b32.xlu1 %v1080_v26, %s6558_s22  ;;  %v3224_v26 = vsel %vm3216_vm4, %v3191_v55, %v11198_v44  ;;  %v628_v44 = vld [vmem:[#allocation2 + $0x60] sm:$0xff] }
 0x2cb   : > { %v8255_v41 = vpop.permute.xlu0 %1886 }
 0x2cc   : > { %v8257_v57 = vpop.permute.xlu1 %2780 }
 0x2cd   : > { %3044 = vrot.lane.b32.xlu0 %v1113_v4, %s6565_s17 }
 0x2ce   : > { %3824 = vrot.lane.b32.xlu1 %v3750_v9, %s6566_s18  ;;  %v1017_v9 = vld [vmem:[#allocation2 + $0xc0] sm:$0xff] }
 0x2cf   : > { %v2907_v46 = vpop.permute.xlu0 %2906 }
 0x2d0   : > { %v8263_v56 = vpop.permute.xlu1 %3686 }
 0x2d1   : > { %2152 = vrot.lane.b32.xlu0 %v1081_v7, %s6558_s22  ;;  %v985_v7 = vld [vmem:[#allocation3 + $0xb2] sm:$0xff] }
 0x2d2   : > { %2278 = vrot.lane.b32.xlu1 %v1112_v3, %s6559_s23  ;;  %v11199_v3 = vld [vmem:[#allocation117_spill] sm:$0xff] }
 0x2d3   : > { %v8269_v17 = vpop.permute.xlu0 %1888  ;;  %v3257_v49 = vsel %vm3249_vm5, %v3224_v26, %v11199_v3  ;;  %v11202_v3 = vld [vmem:[#allocation7_spill] sm:$0xff] }
 0x2d4   : > { %v8277_v2 = vpop.permute.xlu1 %2014  ;;  %v3290_v58 = vsel %vm11194_vm6, %v3257_v49, %v8152_v31  ;;  %vm11200_vm6 = vcmask 588800   ;;  %v3126_v49 = vsel %vm326_vm0, %v628_v44, %v11202_v3  ;;  %v1019_v3 = vld [vmem:[#allocation2 + $0xd8] sm:$0xff] }
 0x2d5   : > { %3826 = vrot.lane.b32.xlu0 %v3751_v24, %s6566_s18  ;;  %v3323_v51 = vsel %vm3315_vm7, %v3290_v58, %v8185_v33  ;;  %v11203_v58 = vld [vmem:[#allocation34_spill] sm:$0xff] }
 0x2d6   : > { %2280 = vrot.lane.b32.xlu1 %v1113_v4, %s6559_s23  ;;  %v3454_v4 = vsel %vm3447_vm11, %v3421_v59, %v2523_v14  ;;  %v3356_v14 = vsel %vm3348_vm8, %v3323_v51, %v8220_v43  ;;  %v520_v59 = vld [vmem:[%s6970_s15 + $0xf0] sm:$0xff]  ;;  %v11204_v51 = vld [vmem:[#allocation131_spill] sm:$0xff] }
 0x2d7   : > { %v2909_v6 = vpop.permute.xlu0 %2908  ;;  %v3487_v45 = vsel %vm3480_vm12, %v3454_v4, %v2651_v10  ;;  %v3389_v31 = vsel %vm3381_vm9, %v3356_v14, %v8234_v62  ;;  %553 = vst.msk [vmem:[#allocation2 + $0x181] sm:$0xff] %vm326_vm0, %v520_v59 }
 0x2d8   : > { %v3035_v20 = vpop.permute.xlu1 %3034  ;;  %v3520_v8 = vsel %vm3513_vm13, %v3487_v45, %v2779_v48  ;;  %v3422_v33 = vsel %vm3414_vm10, %v3389_v31, %v8239_v60  ;;  %v3159_v45 = vsel %vm3150_vm2, %v3126_v49, %v11203_v58  ;;  %v11206_v31 = vld [vmem:[#allocation89_spill] sm:$0xff] }
 0x2d9   : > { %2406 = vrot.lane.b32.xlu0 %v952_v1, %s6560_s24  ;;  %v3553_v0 = vsel %vm3546_vm14, %v3520_v8, %v2907_v46  ;;  %v3455_v43 = vsel %vm3447_vm11, %v3422_v33, %v8243_v39  ;;  %v1193_v1 = vld [vmem:[#allocation3 + $0x172] sm:$0xff]  ;;  %v11207_v33 = vld [vmem:[#allocation118_spill] sm:$0xff] }
 0x2da   : > { %2408 = vrot.lane.b32.xlu1 %v953_v15, %s6560_s24  ;;  %v3586_v10 = vsel %vm3579_vm15, %v3553_v0, %v3035_v20  ;;  %v3488_v62 = vsel %vm3480_vm12, %v3455_v43, %v8247_v61  ;;  %v1082_v61 = vld [vmem:[#allocation2 + $0xc1] sm:$0xff] }
 0x2db   : > { %v8301_v13 = vpop.permute.xlu0 %2016  ;;  %v3521_v24 = vsel %vm3513_vm13, %v3488_v62, %v8257_v57  ;;  %v955_v62 = vld [vmem:[#allocation2 + $0xca] sm:$0xff] }
 0x2dc   : > { %v8309_v34 = vpop.permute.xlu1 %2142  ;;  %v3554_v23 = vsel %vm3546_vm14, %v3521_v24, %v2909_v6 }
 0x2dd   : > { %2534 = vrot.lane.b32.xlu0 %v984_v19, %s6561_s25  ;;  %v6527_v19 = vld [vmem:[#allocation2 + $0xc2] sm:$0xff] }
 0x2de   : > { %2536 = vrot.lane.b32.xlu1 %v985_v7, %s6561_s25  ;;  %v3752_v55 = vsel %vm326_vm0, %v6527_v19, %v11201_v63  ;;  %v521_v7 = vld [vmem:[%s6970_s15 + $0xf8] sm:$0xff] }
 0x2df   : > { %v3037_v16 = vpop.permute.xlu0 %3036  ;;  %554 = vst.msk [vmem:[#allocation2 + $0x189] sm:$0xff] %vm326_vm0, %v521_v7  ;;  %v987_v63 = vld [vmem:[#allocation3 + $0xca] sm:$0xff] }
 0x2e0   : > { %v3817_v30 = vpop.permute.xlu1 %3816  ;;  %v3587_v39 = vsel %vm3579_vm15, %v3554_v23, %v3037_v16  ;;  %v11205_v16 = vld [vmem:[#allocation61_spill] sm:$0xff] }
 0x2e1   : > { %2662 = vrot.lane.b32.xlu0 %v1017_v9, %s6562_s26  ;;  %v3907_v48 = vsel %vm3900_vm1, %v3586_v10, %v3817_v30  ;;  %v3192_v14 = vsel %vm11045_vm3, %v3159_v45, %v11205_v16  ;;  %v954_v30 = vld [vmem:[#allocation2 + $0xc2] sm:$0xff]  ;;  %v1194_v16 = vld [vmem:[#allocation3 + $0x182] sm:$0xff] }
 0x2e2   : > { %2664 = vrot.lane.b32.xlu1 %v1018_v47, %s6562_s26  ;;  %6342 = vmatprep.mubr.msk.f32.mxu0 %vm11200_vm6, %v3907_v48  ;;  %v3225_v10 = vsel %vm3216_vm4, %v3192_v14, %v11206_v31 }
 0x2e3   : > { %v8332_v46 = vpop.permute.xlu0 %2144  ;;  %v3258_v48 = vsel %vm3249_vm5, %v3225_v10, %v11207_v33  ;;  %v8467_v10 = vld [vmem:[%s11037_s3] ss:$0 sm:$0xff] }
 0x2e4   : > { %v8339_v60 = vpop.permute.xlu1 %2270 }
 0x2e5   : > { %2790 = vrot.lane.b32.xlu0 %v1050_v18, %s6563_s28 }
 0x2e6   : > { %3696 = vrot.lane.b32.xlu1 %v1192_v11, %s6551_s12  ;;  %v11209_v11 = vld [vmem:[#allocation10_spill] sm:$0xff] }
 0x2e7   : > { %v3819_v37 = vpop.permute.xlu0 %3818 }
 0x2e8   : > { %v3908_v38 = vsel %vm3900_vm1, %v3587_v39, %v3819_v37  ;;  %v8346_v12 = vpop.permute.xlu1 %2272  ;;  %v11210_v37 = vld [vmem:[#allocation37_spill] sm:$0xff] }
 0x2e9   : > { %1898 = vrot.lane.b32.xlu0 %v1017_v9, %s6556_s20  ;;  %6343 = vmatmul.mubr.msk.f32.gmra.mxu0 %vm11200_vm6, %v3908_v38  ;;  %v6528_v9 = vld [vmem:[#allocation2 + $0xca] sm:$0xff]  ;;  %vm11208_vm6 = vcmask 195584  }
 0x2ea   : > { %2792 = vrot.lane.b32.xlu1 %v1051_v40, %s6563_s28  ;;  %v3753_v8 = vsel %vm326_vm0, %v6528_v9, %v11204_v51  ;;  %v3291_v43 = vsel %vm11208_vm6, %v3258_v48, %v8255_v41  ;;  %v1020_v9 = vld [vmem:[#allocation2 + $0xe0] sm:$0xff] }
 0x2eb   : > { %v8351_v57 = vpop.permute.xlu0 %2398  ;;  %v3324_v23 = vsel %vm3315_vm7, %v3291_v43, %v8277_v2  ;;  %v11212_v2 = vld [vmem:[#allocation92_spill] sm:$0xff]  ;;  %v8475_v48 = vld [vmem:[%s11038_s4] ss:$0 sm:$0xff] }
 0x2ec   : > { %v8353_v53 = vpop.permute.xlu1 %2400  ;;  %v1084_v43 = vld [vmem:[#allocation2 + $0xd9] sm:$0xff] }
 0x2ed   : > { %2918 = vrot.lane.b32.xlu0 %v1082_v61, %s6564_s29 }
 0x2ee   : > { %3698 = vrot.lane.b32.xlu1 %v1193_v1, %s6551_s12  ;;  %v11211_v1 = vld [vmem:[#allocation64_spill] sm:$0xff] }
 0x2ef   : > { %v2527_v54 = vpop.permute.xlu0 %2526 }
 0x2f0   : > { %v8357_v6 = vpop.permute.xlu1 %2528 }
 0x2f1   : > { %1900 = vrot.lane.b32.xlu0 %v1018_v47, %s6556_s20  ;;  %v629_v47 = vld [vmem:[#allocation2 + $0x68] sm:$0xff] }
 0x2f2   : > { %2026 = vrot.lane.b32.xlu1 %v1050_v18, %s6557_s21  ;;  %v3127_v24 = vsel %vm326_vm0, %v629_v47, %v11209_v11 }
 0x2f3   : > { %v2655_v15 = vpop.permute.xlu0 %2654  ;;  %v3160_v38 = vsel %vm3150_vm2, %v3127_v24, %v11210_v37 }
 0x2f4   : > { %v8361_v35 = vpop.permute.xlu1 %2656  ;;  %v3193_v41 = vsel %vm11045_vm3, %v3160_v38, %v11211_v1 }
 0x2f5   : > { %2920 = vrot.lane.b32.xlu0 %v1083_v42, %s6564_s29 }
 0x2f6   : > { %3046 = vrot.lane.b32.xlu1 %v1114_v29, %s6565_s17 }
 0x2f7   : > { %v2783_v21 = vpop.permute.xlu0 %2782 }
 0x2f8   : > { %v8365_v20 = vpop.permute.xlu1 %3688 }
 0x2f9   : > { %2028 = vrot.lane.b32.xlu0 %v1051_v40, %s6557_s21  ;;  %v3357_v40 = vsel %vm3348_vm8, %v3324_v23, %v8309_v34 }
 0x2fa   : > { %2154 = vrot.lane.b32.xlu1 %v1082_v61, %s6558_s22  ;;  %v986_v61 = vld [vmem:[#allocation3 + $0xc2] sm:$0xff] }
 0x2fb   : > { %v8369_v22 = vpop.permute.xlu0 %1890 }
 0x2fc   : > { %v8371_v5 = vpop.permute.xlu1 %2784 }
 0x2fd   : > { %3048 = vrot.lane.b32.xlu0 %v1115_v25, %s6565_s17 }
 0x2fe   : > { %3828 = vrot.lane.b32.xlu1 %v3752_v55, %s6566_s18  ;;  %v11213_v55 = vld [vmem:[#allocation119_spill] sm:$0xff] }
 0x2ff   : > { %v2911_v27 = vpop.permute.xlu0 %2910 }
 0x300   : > { %v8377_v26 = vpop.permute.xlu1 %3690 }
 0x301   : > { %2156 = vrot.lane.b32.xlu0 %v1083_v42, %s6558_s22  ;;  %v3390_v42 = vsel %vm3381_vm9, %v3357_v40, %v8339_v60 }
 0x302   : > { %2282 = vrot.lane.b32.xlu1 %v1114_v29, %s6559_s23  ;;  %v3423_v19 = vsel %vm3414_vm10, %v3390_v42, %v8351_v57  ;;  %v1085_v42 = vld [vmem:[#allocation2 + $0xe1] sm:$0xff] }
 0x303   : > { %v8387_v4 = vpop.permute.xlu0 %1892  ;;  %v3456_v44 = vsel %vm3447_vm11, %v3423_v19, %v2527_v54 }
 0x304   : > { %v8395_v0 = vpop.permute.xlu1 %2018  ;;  %v3489_v7 = vsel %vm3480_vm12, %v3456_v44, %v2655_v15  ;;  %v1117_v44 = vld [vmem:[#allocation3 + $0xe1] sm:$0xff] }
 0x305   : > { %3830 = vrot.lane.b32.xlu0 %v3753_v8, %s6566_s18  ;;  %v3522_v57 = vsel %vm3513_vm13, %v3489_v7, %v2783_v21  ;;  %v1052_v8 = vld [vmem:[#allocation3 + $0xd8] sm:$0xff] }
 0x306   : > { %2284 = vrot.lane.b32.xlu1 %v1115_v25, %s6559_s23  ;;  %v3226_v25 = vsel %vm3216_vm4, %v3193_v41, %v11212_v2  ;;  %v3555_v45 = vsel %vm3546_vm14, %v3522_v57, %v2911_v27  ;;  %v11215_v57 = vld [vmem:[#allocation132_spill] sm:$0xff] }
 0x307   : > { %v2913_v18 = vpop.permute.xlu0 %2912  ;;  %v3259_v34 = vsel %vm3249_vm5, %v3226_v25, %v11213_v55  ;;  %v1116_v25 = vld [vmem:[#allocation3 + $0xd9] sm:$0xff] }
 0x308   : > { %v3039_v39 = vpop.permute.xlu1 %3038  ;;  %v3292_v60 = vsel %vm11208_vm6, %v3259_v34, %v8269_v17  ;;  %vm11214_vm6 = vcmask 588800  }
 0x309   : > { %2410 = vrot.lane.b32.xlu0 %v954_v30, %s6560_s24  ;;  %v3325_v49 = vsel %vm3315_vm7, %v3292_v60, %v8301_v13  ;;  %v3588_v15 = vsel %vm3579_vm15, %v3555_v45, %v3039_v39  ;;  %v1053_v30 = vld [vmem:[#allocation3 + $0xe0] sm:$0xff]  ;;  %v1195_v39 = vld [vmem:[#allocation3 + $0x18a] sm:$0xff] }
 0x30a   : > { %2412 = vrot.lane.b32.xlu1 %v955_v62, %s6560_s24  ;;  %v3358_v54 = vsel %vm3348_vm8, %v3325_v49, %v8332_v46  ;;  %v6529_v49 = vld [vmem:[#allocation2 + $0xda] sm:$0xff] }
 0x30b   : > { %v8419_v29 = vpop.permute.xlu0 %2020  ;;  %v3391_v17 = vsel %vm3381_vm9, %v3358_v54, %v8346_v12  ;;  %v630_v45 = vld [vmem:[#allocation2 + $0x78] sm:$0xff] }
 0x30c   : > { %v8428_v59 = vpop.permute.xlu1 %2146  ;;  %v3424_v13 = vsel %vm3414_vm10, %v3391_v17, %v8353_v53  ;;  %v11216_v17 = vld [vmem:[#allocation9_spill] sm:$0xff] }
 0x30d   : > { %2538 = vrot.lane.b32.xlu0 %v986_v61, %s6561_s25  ;;  %v3457_v46 = vsel %vm3447_vm11, %v3424_v13, %v8357_v6  ;;  %v11217_v13 = vld [vmem:[#allocation36_spill] sm:$0xff] }
 0x30e   : > { %2540 = vrot.lane.b32.xlu1 %v987_v63, %s6561_s25  ;;  %v3490_v12 = vsel %vm3480_vm12, %v3457_v46, %v8361_v35  ;;  %v11218_v46 = vld [vmem:[#allocation133_spill] sm:$0xff] }
 0x30f   : > { %v3041_v58 = vpop.permute.xlu0 %3040  ;;  %v3523_v14 = vsel %vm3513_vm13, %v3490_v12, %v8371_v5 }
 0x310   : > { %v3821_v51 = vpop.permute.xlu1 %3820  ;;  %v3556_v47 = vsel %vm3546_vm14, %v3523_v14, %v2913_v18 }
 0x311   : > { %2666 = vrot.lane.b32.xlu0 %v1019_v3, %s6562_s26  ;;  %v3909_v21 = vsel %vm3900_vm1, %v3588_v15, %v3821_v51  ;;  %v3589_v6 = vsel %vm3579_vm15, %v3556_v47, %v3041_v58  ;;  %v3754_v58 = vsel %vm326_vm0, %v6529_v49, %v11215_v57  ;;  %v3128_v15 = vsel %vm326_vm0, %v630_v45, %v11216_v17  ;;  %v989_v45 = vld [vmem:[#allocation3 + $0xe2] sm:$0xff] }
 0x312   : > { %2668 = vrot.lane.b32.xlu1 %v1020_v9, %s6562_s26  ;;  %6345 = vmatprep.mubr.msk.f32.mxu0 %vm11214_vm6, %v3909_v21  ;;  %v3161_v21 = vsel %vm3150_vm2, %v3128_v15, %v11217_v13  ;;  %v11227_v17 = vld [vmem:[#allocation121_spill] sm:$0xff] }
 0x313   : > { %v8451_v27 = vpop.permute.xlu0 %2148 }
 0x314   : > { %v8458_v53 = vpop.permute.xlu1 %2274 }
 0x315   : > { %2794 = vrot.lane.b32.xlu0 %v1052_v8, %s6563_s28 }
 0x316   : > { %3700 = vrot.lane.b32.xlu1 %v1194_v16, %s6551_s12  ;;  %v11219_v16 = vld [vmem:[#allocation63_spill] sm:$0xff] }
 0x317   : > { %v3823_v31 = vpop.permute.xlu0 %3822  ;;  %v3194_v14 = vsel %vm11045_vm3, %v3161_v21, %v11219_v16 }
 0x318   : > { %v3910_v35 = vsel %vm3900_vm1, %v3589_v6, %v3823_v31  ;;  %v8470_v5 = vpop.permute.xlu1 %2276  ;;  %v631_v6 = vld [vmem:[#allocation2 + $0x80] sm:$0xff] }
 0x319   : > { %v6335_v33 = vpop.f32.mrf.mxu0  ;;  %1902 = vrot.lane.b32.xlu0 %v1019_v3, %s6556_s20  ;;  %6346 = vmatmul.mubr.msk.f32.gmra.mxu0 %vm11214_vm6, %v3910_v35  ;;  %v11220_v31 = vld [vmem:[#allocation91_spill] sm:$0xff]  ;;  %vm11222_vm6 = vcmask 195584  }
 0x31a   : > { %v4272_v18 = vmul.f32 %v6335_v33, %v8467_v10  ;;  %2796 = vrot.lane.b32.xlu1 %v1053_v30, %s6563_s28  ;;  %v3227_v35 = vsel %vm3216_vm4, %v3194_v14, %v11220_v31  ;;  %v11221_v33 = vld [vmem:[#allocation120_spill] sm:$0xff] }
 0x31b   : > { %v4105_v62 = vpop.f32.mrf.mxu0  ;;  %v8481_v11 = vpop.permute.xlu0 %2402 }
 0x31c   : > { %v4311_v24 = vadd.f32 %v8475_v48, %v4272_v18  ;;  %v4271_v23 = vmul.f32 %v8467_v10, %v4105_v62  ;;  %v8485_v37 = vpop.permute.xlu1 %2404  ;;  %v3260_v18 = vsel %vm3249_vm5, %v3227_v35, %v11221_v33 }
 0x31d   : > { %2922 = vrot.lane.b32.xlu0 %v1084_v43, %s6564_s29  ;;  %v3293_v62 = vsel %vm11222_vm6, %v3260_v18, %v8369_v22 }
 0x31e   : > { %v4343_v38 = vmax.f32 %v4311_v24, 0.0  ;;  %v4310_v40 = vadd.f32 %v8475_v48, %v4271_v23  ;;  %3702 = vrot.lane.b32.xlu1 %v1195_v39, %s6551_s12  ;;  %v957_v24 = vld [vmem:[#allocation2 + $0xe2] sm:$0xff] }
 0x31f   : > { %v8490_v61 = vpop.permute.xlu0 %2530  ;;  %v11223_v23 = vld [vmem:[#allocation12_spill] sm:$0xff] }
 0x320   : > { %4376 = vst [vmem:[#allocation4 + $0x21] sm:$0xff] %v4343_v38  ;;  %v4342_v1 = vmax.f32 %v4310_v40, 0.0  ;;  %v8492_v41 = vpop.permute.xlu1 %2532  ;;  %v3129_v39 = vsel %vm326_vm0, %v631_v6, %v11223_v23  ;;  %v1022_v6 = vld [vmem:[#allocation2 + $0xf8] sm:$0xff] }
 0x321   : > { %1904 = vrot.lane.b32.xlu0 %v1020_v9, %s6556_s20 }
 0x322   : > { %4375 = vst [vmem:[#allocation4 + $0x19] sm:$0xff] %v4342_v1  ;;  %4914 = vmatprep.mubr.f32.mxu1 %v4342_v1  ;;  %2030 = vrot.lane.b32.xlu1 %v1052_v8, %s6557_s21  ;;  %v6530_v8 = vld [vmem:[#allocation2 + $0xe2] sm:$0xff] }
 0x323   : > { %v2659_v2 = vpop.permute.xlu0 %2658  ;;  %v3755_v12 = vsel %vm326_vm0, %v6530_v8, %v11218_v46  ;;  %v11224_v1 = vld [vmem:[#allocation39_spill] sm:$0xff]  ;;  %v1021_v8 = vld [vmem:[#allocation2 + $0xf0] sm:$0xff] }
 0x324   : > { %v8496_v19 = vpop.permute.xlu1 %2660 }
 0x325   : > { %2924 = vrot.lane.b32.xlu0 %v1085_v42, %s6564_s29 }
 0x326   : > { %3050 = vrot.lane.b32.xlu1 %v1116_v25, %s6565_s17 }
 0x327   : > { %v2787_v63 = vpop.permute.xlu0 %2786 }
 0x328   : > { %v8500_v55 = vpop.permute.xlu1 %3692 }
 0x329   : > { %2032 = vrot.lane.b32.xlu0 %v1053_v30, %s6557_s21  ;;  %v4409_v34 = vld [vmem:[#allocation4 + $0x18] sm:$0xff]  ;;  %v4410_v3 = vld [vmem:[#allocation4 + $0x20] sm:$0xff] }
 0x32a   : > { %4915 = vmatmul.mubr.f32.gmra.mxu1 %v4409_v34  ;;  %2158 = vrot.lane.b32.xlu1 %v1084_v43, %s6558_s22  ;;  %v956_v30 = vld [vmem:[#allocation2 + $0xda] sm:$0xff]  ;;  %v988_v34 = vld [vmem:[#allocation3 + $0xda] sm:$0xff] }
 0x32b   : > { %v8504_v60 = vpop.permute.xlu0 %1894  ;;  %4919 = vmatprep.mubr.f32.mxu1 %v4343_v38  ;;  %v3326_v38 = vsel %vm3315_vm7, %v3293_v62, %v8395_v0  ;;  %v11226_v0 = vld [vmem:[#allocation94_spill] sm:$0xff] }
 0x32c   : > { %v8506_v7 = vpop.permute.xlu1 %2788 }
 0x32d   : > { %3052 = vrot.lane.b32.xlu0 %v1117_v44, %s6565_s17 }
 0x32e   : > { %4920 = vmatmul.mubr.f32.gmra.mxu1 %v4410_v3  ;;  %3832 = vrot.lane.b32.xlu1 %v3754_v58, %s6566_s18 }
 0x32f   : > { %v2915_v54 = vpop.permute.xlu0 %2914 }
 0x330   : > { %v8512_v9 = vpop.permute.xlu1 %3694 }
 0x331   : > { %2160 = vrot.lane.b32.xlu0 %v1085_v42, %s6558_s22  ;;  %v3162_v42 = vsel %vm3150_vm2, %v3129_v39, %v11224_v1 }
 0x332   : > { %2286 = vrot.lane.b32.xlu1 %v1116_v25, %s6559_s23  ;;  %v3359_v25 = vsel %vm3348_vm8, %v3326_v38, %v8428_v59 }
 0x333   : > { %v8518_v51 = vpop.permute.xlu0 %1896  ;;  %v3392_v3 = vsel %vm3381_vm9, %v3359_v25, %v8458_v53 }
 0x334   : > { %v8526_v47 = vpop.permute.xlu1 %2022  ;;  %v3425_v58 = vsel %vm3414_vm10, %v3392_v3, %v8481_v11  ;;  %v1087_v3 = vld [vmem:[#allocation2 + $0xf9] sm:$0xff] }
 0x335   : > { %3834 = vrot.lane.b32.xlu0 %v3755_v12, %s6566_s18  ;;  %v3458_v15 = vsel %vm3447_vm11, %v3425_v58, %v8490_v61 }
 0x336   : > { %2288 = vrot.lane.b32.xlu1 %v1117_v44, %s6559_s23  ;;  %v11225_v44 = vld [vmem:[#allocation66_spill] sm:$0xff]  ;;  %v3491_v21 = vsel %vm3480_vm12, %v3458_v15, %v2659_v2  ;;  %v1119_v15 = vld [vmem:[#allocation3 + $0xf9] sm:$0xff] }
 0x337   : > { %v2917_v43 = vpop.permute.xlu0 %2916  ;;  %v3195_v22 = vsel %vm11045_vm3, %v3162_v42, %v11225_v44  ;;  %v3524_v46 = vsel %vm3513_vm13, %v3491_v21, %v2787_v63 }
 0x338   : > { %v3043_v40 = vpop.permute.xlu1 %3042  ;;  %v3228_v57 = vsel %vm3216_vm4, %v3195_v22, %v11226_v0  ;;  %v3557_v16 = vsel %vm3546_vm14, %v3524_v46, %v2915_v54  ;;  %v1054_v54 = vld [vmem:[#allocation3 + $0xf0] sm:$0xff] }
 0x339   : > { %2414 = vrot.lane.b32.xlu0 %v956_v30, %s6560_s24  ;;  %v3261_v59 = vsel %vm3249_vm5, %v3228_v57, %v11227_v17  ;;  %v1118_v57 = vld [vmem:[#allocation3 + $0xf1] sm:$0xff] }
 0x33a   : > { %2416 = vrot.lane.b32.xlu1 %v957_v24, %s6560_s24  ;;  %v3294_v53 = vsel %vm11222_vm6, %v3261_v59, %v8387_v4  ;;  %v3590_v4 = vsel %vm3579_vm15, %v3557_v16, %v3043_v40  ;;  %vm11228_vm6 = vcmask 588800   ;;  %v1055_v24 = vld [vmem:[#allocation3 + $0xf8] sm:$0xff]  ;;  %v1086_v40 = vld [vmem:[#allocation2 + $0xf1] sm:$0xff]  ;;  %v1151_v16 = vld [vmem:[#allocation2 + $0xfa] sm:$0xff] }
 0x33b   : > { %v8550_v49 = vpop.permute.xlu0 %2024  ;;  %v3327_v11 = vsel %vm3315_vm7, %v3294_v53, %v8419_v29  ;;  %v1150_v53 = vld [vmem:[#allocation2 + $0xf2] sm:$0xff] }
 0x33c   : > { %v8560_v13 = vpop.permute.xlu1 %2150  ;;  %v3360_v61 = vsel %vm3348_vm8, %v3327_v11, %v8451_v27  ;;  %v3756_v46 = vsel %vm326_vm0, %v1150_v53, %v7892_v32  ;;  %v11230_v32 = vld [vmem:[#allocation38_spill] sm:$0xff]  ;;  %v990_v53 = vld [vmem:[#allocation3 + $0xf2] sm:$0xff] }
 0x33d   : > { %2542 = vrot.lane.b32.xlu0 %v988_v34, %s6561_s25  ;;  %v3393_v14 = vsel %vm3381_vm9, %v3360_v61, %v8470_v5  ;;  %v632_v61 = vld [vmem:[#allocation2 + $0x90] sm:$0xff] }
 0x33e   : > { %2544 = vrot.lane.b32.xlu1 %v989_v45, %s6561_s25  ;;  %v3426_v29 = vsel %vm3414_vm10, %v3393_v14, %v8485_v37 }
 0x33f   : > { %v3045_v12 = vpop.permute.xlu0 %3044  ;;  %v3459_v31 = vsel %vm3447_vm11, %v3426_v29, %v8492_v41 }
 0x340   : > { %v3825_v2 = vpop.permute.xlu1 %3824  ;;  %v3492_v5 = vsel %vm3480_vm12, %v3459_v31, %v8496_v19  ;;  %v3757_v31 = vsel %vm326_vm0, %v1151_v16, %v7922_v50 }
 0x341   : > { %2670 = vrot.lane.b32.xlu0 %v1021_v8, %s6562_s26  ;;  %v3911_v63 = vsel %vm3900_vm1, %v3590_v4, %v3825_v2  ;;  %v3525_v35 = vsel %vm3513_vm13, %v3492_v5, %v8506_v7  ;;  %v11229_v2 = vld [vmem:[#allocation11_spill] sm:$0xff] }
 0x342   : > { %1778 = vrot.lane.b32.xlu1 %v988_v34, %s6555_s19  ;;  %6348 = vmatprep.mubr.msk.f32.mxu0 %vm11228_vm6, %v3911_v63  ;;  %v3558_v30 = vsel %vm3546_vm14, %v3525_v35, %v2917_v43  ;;  %v3130_v29 = vsel %vm326_vm0, %v632_v61, %v11229_v2 }
 0x343   : > { %v8583_v27 = vpop.permute.xlu0 %2152  ;;  %v3591_v41 = vsel %vm3579_vm15, %v3558_v30, %v3045_v12 }
 0x344   : > { %v8590_v37 = vpop.permute.xlu1 %2278 }
 0x345   : > { %2672 = vrot.lane.b32.xlu0 %v1022_v6, %s6562_s26 }
 0x346   : > { %2798 = vrot.lane.b32.xlu1 %v1054_v54, %s6563_s28 }
 0x347   : > { %v3827_v33 = vpop.permute.xlu0 %3826 }
 0x348   : > { %v3912_v18 = vsel %vm3900_vm1, %v3591_v41, %v3827_v33  ;;  %v8597_v62 = vpop.permute.xlu1 %2280  ;;  %v633_v41 = vld [vmem:[#allocation2 + $0x98] sm:$0xff]  ;;  %v11232_v33 = vld [vmem:[#allocation93_spill] sm:$0xff] }
 0x349   : > { %1780 = vrot.lane.b32.xlu0 %v989_v45, %s6555_s19  ;;  %v6338_v19 = vpop.f32.mrf.mxu0  ;;  %6349 = vmatmul.mubr.msk.f32.gmra.mxu0 %vm11228_vm6, %v3912_v18  ;;  %vm11234_vm6 = vcmask 195584  }
 0x34a   : > { %v4274_v7 = vmul.f32 %v6338_v19, %v8467_v10  ;;  %1906 = vrot.lane.b32.xlu1 %v1021_v8, %s6556_s20  ;;  %v958_v19 = vld [vmem:[#allocation2 + $0xf2] sm:$0xff] }
 0x34b   : > { %v8603_v43 = vpop.permute.xlu0 %2406  ;;  %v4115_v23 = vpop.f32.mrf.mxu0 }
 0x34c   : > { %v4313_v39 = vadd.f32 %v8475_v48, %v4274_v7  ;;  %v4273_v38 = vmul.f32 %v8467_v10, %v4115_v23  ;;  %v8607_v1 = vpop.permute.xlu1 %2408 }
 0x34d   : > { %2800 = vrot.lane.b32.xlu0 %v1055_v24, %s6563_s28 }
 0x34e   : > { %v4345_v42 = vmax.f32 %v4313_v39, 0.0  ;;  %v4312_v25 = vadd.f32 %v8475_v48, %v4273_v38  ;;  %2926 = vrot.lane.b32.xlu1 %v1086_v40, %s6564_s29  ;;  %v959_v38 = vld [vmem:[#allocation2 + $0xfa] sm:$0xff] }
 0x34f   : > { %v8612_v34 = vpop.permute.xlu0 %2534 }
 0x350   : > { %4378 = vst [vmem:[#allocation4 + $0x39] sm:$0xff] %v4345_v42  ;;  %v4344_v44 = vmax.f32 %v4312_v25, 0.0  ;;  %v8614_v22 = vpop.permute.xlu1 %2536 }
 0x351   : > { %1908 = vrot.lane.b32.xlu0 %v1022_v6, %s6556_s20  ;;  %v3163_v6 = vsel %vm3150_vm2, %v3130_v29, %v11230_v32  ;;  %v991_v29 = vld [vmem:[#allocation3 + $0xfa] sm:$0xff]  ;;  %v11239_v32 = vld [vmem:[#allocation123_spill] sm:$0xff] }
 0x352   : > { %4377 = vst [vmem:[#allocation4 + $0x31] sm:$0xff] %v4344_v44  ;;  %4924 = vmatprep.mubr.f32.mxu1 %v4344_v44  ;;  %2034 = vrot.lane.b32.xlu1 %v1054_v54, %s6557_s21  ;;  %v11231_v54 = vld [vmem:[#allocation65_spill] sm:$0xff] }
 0x353   : > { %v8618_v0 = vpop.permute.xlu0 %2662  ;;  %v3196_v35 = vsel %vm11045_vm3, %v3163_v6, %v11231_v54  ;;  %v1023_v54 = vld [vmem:[#allocation2 + $0x108] sm:$0xff] }
 0x354   : > { %v8620_v58 = vpop.permute.xlu1 %2664  ;;  %v3229_v18 = vsel %vm3216_vm4, %v3196_v35, %v11232_v33 }
 0x355   : > { %2928 = vrot.lane.b32.xlu0 %v1087_v3, %s6564_s29 }
 0x356   : > { %3054 = vrot.lane.b32.xlu1 %v1118_v57, %s6565_s17 }
 0x357   : > { %v8624_v45 = vpop.permute.xlu0 %2790  ;;  %v8641_v4 = vpop.f32.mrf.mxu1 }
 0x358   : > { %v8626_v17 = vpop.permute.xlu1 %3696 }
 0x359   : > { %2036 = vrot.lane.b32.xlu0 %v1055_v24, %s6557_s21  ;;  %v4411_v59 = vld [vmem:[#allocation4 + $0x30] sm:$0xff]  ;;  %v4412_v11 = vld [vmem:[#allocation4 + $0x38] sm:$0xff]  ;;  %v4908_v5 = vpop.f32.mrf.mxu1 }
 0x35a   : > { %4925 = vmatmul.mubr.f32.gmra.mxu1 %v4411_v59  ;;  %2162 = vrot.lane.b32.xlu1 %v1086_v40, %s6558_s22  ;;  %v11233_v24 = vld [vmem:[#allocation122_spill] sm:$0xff] }
 0x35b   : > { %v8630_v21 = vpop.permute.xlu0 %1898  ;;  %4929 = vmatprep.mubr.f32.mxu1 %v4345_v42  ;;  %v8659_v7 = vpop.f32.mrf.mxu1  ;;  %v3262_v23 = vsel %vm3249_vm5, %v3229_v18, %v11233_v24  ;;  %v11235_v42 = vld [vmem:[#allocation14_spill] sm:$0xff] }
 0x35c   : > { %v8632_v8 = vpop.permute.xlu1 %2792  ;;  %v3295_v39 = vsel %vm11234_vm6, %v3262_v23, %v8504_v60  ;;  %v3131_v25 = vsel %vm326_vm0, %v633_v41, %v11235_v42 }
 0x35d   : > { %3056 = vrot.lane.b32.xlu0 %v1119_v15, %s6565_s17  ;;  %v4913_v40 = vpop.f32.mrf.mxu1  ;;  %v3328_v44 = vsel %vm3315_vm7, %v3295_v39, %v8526_v47  ;;  %v11238_v47 = vld [vmem:[#allocation96_spill] sm:$0xff] }
 0x35e   : > { %4930 = vmatmul.mubr.f32.gmra.mxu1 %v4412_v11  ;;  %3836 = vrot.lane.b32.xlu1 %v3756_v46, %s6566_s18  ;;  %v11237_v11 = vld [vmem:[#allocation68_spill] sm:$0xff] }
 0x35f   : > { %v2919_v12 = vpop.permute.xlu0 %2918 }
 0x360   : > { %v8638_v14 = vpop.permute.xlu1 %3698 }
 0x361   : > { %2164 = vrot.lane.b32.xlu0 %v1087_v3, %s6558_s22 }
 0x362   : > { %2290 = vrot.lane.b32.xlu1 %v1118_v57, %s6559_s23  ;;  %v11236_v57 = vld [vmem:[#allocation41_spill] sm:$0xff] }
 0x363   : > { %v8646_v63 = vpop.permute.xlu0 %1900  ;;  %v3164_v59 = vsel %vm3150_vm2, %v3131_v25, %v11236_v57  ;;  %v1057_v25 = vld [vmem:[#allocation3 + $0x110] sm:$0xff] }
 0x364   : > { %v8654_v30 = vpop.permute.xlu1 %2026  ;;  %v3197_v60 = vsel %vm11045_vm3, %v3164_v59, %v11237_v11  ;;  %v1088_v59 = vld [vmem:[#allocation2 + $0x109] sm:$0xff] }
 0x365   : > { %3838 = vrot.lane.b32.xlu0 %v3757_v31, %s6566_s18  ;;  %v3230_v16 = vsel %vm3216_vm4, %v3197_v60, %v11238_v47 }
 0x366   : > { %2292 = vrot.lane.b32.xlu1 %v1119_v15, %s6559_s23  ;;  %v3361_v15 = vsel %vm3348_vm8, %v3328_v44, %v8560_v13  ;;  %v3263_v13 = vsel %vm3249_vm5, %v3230_v16, %v11239_v32  ;;  %v1089_v16 = vld [vmem:[#allocation2 + $0x111] sm:$0xff] }
 0x367   : > { %v2921_v50 = vpop.permute.xlu0 %2920  ;;  %v3394_v46 = vsel %vm3381_vm9, %v3361_v15, %v8590_v37  ;;  %v3296_v37 = vsel %vm11234_vm6, %v3263_v13, %v8518_v51  ;;  %vm11240_vm6 = vcmask 588800  }
 0x368   : > { %v3047_v3 = vpop.permute.xlu1 %3046  ;;  %v3427_v2 = vsel %vm3414_vm10, %v3394_v46, %v8603_v43  ;;  %v3329_v43 = vsel %vm3315_vm7, %v3296_v37, %v8550_v49 }
 0x369   : > { %2418 = vrot.lane.b32.xlu0 %v958_v19, %s6560_s24  ;;  %v3460_v6 = vsel %vm3447_vm11, %v3427_v2, %v8612_v34  ;;  %v3362_v41 = vsel %vm3348_vm8, %v3329_v43, %v8583_v27  ;;  %v1024_v19 = vld [vmem:[#allocation2 + $0x110] sm:$0xff] }
 0x36a   : > { %2420 = vrot.lane.b32.xlu1 %v959_v38, %s6560_s24  ;;  %v3493_v5 = vsel %vm3480_vm12, %v3460_v6, %v8618_v0  ;;  %v3395_v51 = vsel %vm3381_vm9, %v3362_v41, %v8597_v62 }
 0x36b   : > { %v8680_v61 = vpop.permute.xlu0 %2028  ;;  %v3526_v35 = vsel %vm3513_vm13, %v3493_v5, %v8624_v45  ;;  %v3428_v49 = vsel %vm3414_vm10, %v3395_v51, %v8607_v1  ;;  %v1121_v5 = vld [vmem:[#allocation3 + $0x111] sm:$0xff] }
 0x36c   : > { %v8690_v31 = vpop.permute.xlu1 %2154  ;;  %v3559_v33 = vsel %vm3546_vm14, %v3526_v35, %v2919_v12  ;;  %v3461_v24 = vsel %vm3447_vm11, %v3428_v49, %v8614_v22  ;;  %v1056_v12 = vld [vmem:[#allocation3 + $0x108] sm:$0xff]  ;;  %v634_v51 = vld [vmem:[#allocation2 + $0xa8] sm:$0xff]  ;;  %v11241_v49 = vld [vmem:[#allocation13_spill] sm:$0xff] }
 0x36d   : > { %2546 = vrot.lane.b32.xlu0 %v990_v53, %s6561_s25  ;;  %v3592_v0 = vsel %vm3579_vm15, %v3559_v33, %v3047_v3  ;;  %v3494_v62 = vsel %vm3480_vm12, %v3461_v24, %v8620_v58  ;;  %v11242_v24 = vld [vmem:[#allocation40_spill] sm:$0xff] }
 0x36e   : > { %2548 = vrot.lane.b32.xlu1 %v991_v29, %s6561_s25  ;;  %v3527_v23 = vsel %vm3513_vm13, %v3494_v62, %v8632_v8 }
 0x36f   : > { %v3049_v34 = vpop.permute.xlu0 %3048  ;;  %v3560_v39 = vsel %vm3546_vm14, %v3527_v23, %v2921_v50 }
 0x370   : > { %v3829_v18 = vpop.permute.xlu1 %3828  ;;  %v3593_v22 = vsel %vm3579_vm15, %v3560_v39, %v3049_v34 }
 0x371   : > { %2674 = vrot.lane.b32.xlu0 %v1023_v54, %s6562_s26  ;;  %v3913_v45 = vsel %vm3900_vm1, %v3592_v0, %v3829_v18  ;;  %v1153_v0 = vld [vmem:[#allocation2 + $0x112] sm:$0xff] }
 0x372   : > { %1782 = vrot.lane.b32.xlu1 %v990_v53, %s6555_s19  ;;  %6351 = vmatprep.mubr.msk.f32.mxu0 %vm11240_vm6, %v3913_v45  ;;  %v3132_v45 = vsel %vm326_vm0, %v634_v51, %v11241_v49  ;;  %v3759_v62 = vsel %vm326_vm0, %v1153_v0, %v8146_v36  ;;  %v993_v0 = vld [vmem:[#allocation3 + $0x112] sm:$0xff]  ;;  %v11251_v49 = vld [vmem:[#allocation126_spill] sm:$0xff] }
 0x373   : > { %v8715_v27 = vpop.permute.xlu0 %2156 }
 0x374   : > { %v8722_v1 = vpop.permute.xlu1 %2282 }
 0x375   : > { %2676 = vrot.lane.b32.xlu0 %v1024_v19, %s6562_s26 }
 0x376   : > { %2802 = vrot.lane.b32.xlu1 %v1056_v12, %s6563_s28 }
 0x377   : > { %v3831_v38 = vpop.permute.xlu0 %3830 }
 0x378   : > { %v3914_v40 = vsel %vm3900_vm1, %v3593_v22, %v3831_v38  ;;  %v8729_v42 = vpop.permute.xlu1 %2284  ;;  %v635_v22 = vld [vmem:[#allocation2 + $0xb0] sm:$0xff]  ;;  %v11244_v38 = vld [vmem:[#allocation95_spill] sm:$0xff] }
 0x379   : > { %1784 = vrot.lane.b32.xlu0 %v991_v29, %s6555_s19  ;;  %v6341_v58 = vpop.f32.mrf.mxu0  ;;  %6352 = vmatmul.mubr.msk.f32.gmra.mxu0 %vm11240_vm6, %v3914_v40  ;;  %v1120_v29 = vld [vmem:[#allocation3 + $0x109] sm:$0xff]  ;;  %vm11246_vm6 = vcmask 195584  }
 0x37a   : > { %v4276_v8 = vmul.f32 %v6341_v58, %v8467_v10  ;;  %1910 = vrot.lane.b32.xlu1 %v1023_v54, %s6556_s20  ;;  %v1152_v54 = vld [vmem:[#allocation2 + $0x10a] sm:$0xff] }
 0x37b   : > { %v8735_v50 = vpop.permute.xlu0 %2410  ;;  %v4125_v44 = vpop.f32.mrf.mxu0  ;;  %v3758_v41 = vsel %vm326_vm0, %v1152_v54, %v8123_v52  ;;  %v3165_v52 = vsel %vm3150_vm2, %v3132_v45, %v11242_v24  ;;  %v960_v58 = vld [vmem:[#allocation2 + $0x10a] sm:$0xff] }
 0x37c   : > { %v4315_v3 = vadd.f32 %v8475_v48, %v4276_v8  ;;  %v4275_v57 = vmul.f32 %v8467_v10, %v4125_v44  ;;  %v8739_v15 = vpop.permute.xlu1 %2412  ;;  %v11245_v8 = vld [vmem:[#allocation124_spill] sm:$0xff] }
 0x37d   : > { %2804 = vrot.lane.b32.xlu0 %v1057_v25, %s6563_s28 }
 0x37e   : > { %v4347_v53 = vmax.f32 %v4315_v3, 0.0  ;;  %v4314_v11 = vadd.f32 %v8475_v48, %v4275_v57  ;;  %2930 = vrot.lane.b32.xlu1 %v1088_v59, %s6564_s29  ;;  %v961_v3 = vld [vmem:[#allocation2 + $0x112] sm:$0xff]  ;;  %v11247_v57 = vld [vmem:[#allocation16_spill] sm:$0xff] }
 0x37f   : > { %v8744_v60 = vpop.permute.xlu0 %2538 }
 0x380   : > { %4380 = vst [vmem:[#allocation4 + $0x51] sm:$0xff] %v4347_v53  ;;  %v4346_v46 = vmax.f32 %v4314_v11, 0.0  ;;  %v8746_v47 = vpop.permute.xlu1 %2540 }
 0x381   : > { %1912 = vrot.lane.b32.xlu0 %v1024_v19, %s6556_s20 }
 0x382   : > { %4379 = vst [vmem:[#allocation4 + $0x49] sm:$0xff] %v4346_v46  ;;  %4934 = vmatprep.mubr.f32.mxu1 %v4346_v46  ;;  %2038 = vrot.lane.b32.xlu1 %v1056_v12, %s6557_s21  ;;  %v11243_v12 = vld [vmem:[#allocation67_spill] sm:$0xff] }
 0x383   : > { %v2667_v2 = vpop.permute.xlu0 %2666  ;;  %v3198_v23 = vsel %vm11045_vm3, %v3165_v52, %v11243_v12  ;;  %v11248_v46 = vld [vmem:[#allocation43_spill] sm:$0xff] }
 0x384   : > { %v8750_v32 = vpop.permute.xlu1 %2668  ;;  %v3231_v40 = vsel %vm3216_vm4, %v3198_v23, %v11244_v38 }
 0x385   : > { %2932 = vrot.lane.b32.xlu0 %v1089_v16, %s6564_s29 }
 0x386   : > { %3058 = vrot.lane.b32.xlu1 %v1120_v29, %s6565_s17 }
 0x387   : > { %v2795_v13 = vpop.permute.xlu0 %2794 }
 0x388   : > { %v8754_v6 = vpop.permute.xlu1 %3700 }
 0x389   : > { %2040 = vrot.lane.b32.xlu0 %v1057_v25, %s6557_s21  ;;  %v4413_v37 = vld [vmem:[#allocation4 + $0x48] sm:$0xff]  ;;  %v4414_v34 = vld [vmem:[#allocation4 + $0x50] sm:$0xff]  ;;  %v3264_v25 = vsel %vm3249_vm5, %v3231_v40, %v11245_v8 }
 0x38a   : > { %4935 = vmatmul.mubr.f32.gmra.mxu1 %v4413_v37  ;;  %2166 = vrot.lane.b32.xlu1 %v1088_v59, %s6558_s22  ;;  %v3297_v36 = vsel %vm11246_vm6, %v3264_v25, %v8630_v21  ;;  %v3133_v59 = vsel %vm326_vm0, %v635_v22, %v11247_v57  ;;  %v992_v37 = vld [vmem:[#allocation3 + $0x10a] sm:$0xff]  ;;  %v1026_v40 = vld [vmem:[#allocation2 + $0x128] sm:$0xff] }
 0x38b   : > { %v8758_v43 = vpop.permute.xlu0 %1902  ;;  %4939 = vmatprep.mubr.f32.mxu1 %v4347_v53  ;;  %v3330_v53 = vsel %vm3315_vm7, %v3297_v36, %v8654_v30  ;;  %v11250_v30 = vld [vmem:[#allocation98_spill] sm:$0xff] }
 0x38c   : > { %v8760_v35 = vpop.permute.xlu1 %2796 }
 0x38d   : > { %3060 = vrot.lane.b32.xlu0 %v1121_v5, %s6565_s17 }
 0x38e   : > { %4940 = vmatmul.mubr.f32.gmra.mxu1 %v4414_v34  ;;  %3840 = vrot.lane.b32.xlu1 %v3758_v41, %s6566_s18 }
 0x38f   : > { %v2923_v33 = vpop.permute.xlu0 %2922 }
 0x390   : > { %v8766_v18 = vpop.permute.xlu1 %3702 }
 0x391   : > { %2168 = vrot.lane.b32.xlu0 %v1089_v16, %s6558_s22  ;;  %v3166_v16 = vsel %vm3150_vm2, %v3133_v59, %v11248_v46 }
 0x392   : > { %2294 = vrot.lane.b32.xlu1 %v1120_v29, %s6559_s23  ;;  %v3363_v29 = vsel %vm3348_vm8, %v3330_v53, %v8690_v31 }
 0x393   : > { %v8772_v19 = vpop.permute.xlu0 %1904  ;;  %v3396_v54 = vsel %vm3381_vm9, %v3363_v29, %v8722_v1 }
 0x394   : > { %v8780_v39 = vpop.permute.xlu1 %2030  ;;  %v3429_v51 = vsel %vm3414_vm10, %v3396_v54, %v8735_v50 }
 0x395   : > { %3842 = vrot.lane.b32.xlu0 %v3759_v62, %s6566_s18  ;;  %v3462_v45 = vsel %vm3447_vm11, %v3429_v51, %v8744_v60  ;;  %v1025_v62 = vld [vmem:[#allocation2 + $0x120] sm:$0xff] }
 0x396   : > { %2296 = vrot.lane.b32.xlu1 %v1121_v5, %s6559_s23  ;;  %v11249_v5 = vld [vmem:[#allocation70_spill] sm:$0xff]  ;;  %v3495_v52 = vsel %vm3480_vm12, %v3462_v45, %v2667_v2 }
 0x397   : > { %v2925_v44 = vpop.permute.xlu0 %2924  ;;  %v3199_v21 = vsel %vm11045_vm3, %v3166_v16, %v11249_v5  ;;  %v3528_v12 = vsel %vm3513_vm13, %v3495_v52, %v2795_v13  ;;  %v1059_v16 = vld [vmem:[#allocation3 + $0x128] sm:$0xff] }
 0x398   : > { %v3051_v11 = vpop.permute.xlu1 %3050  ;;  %v3232_v41 = vsel %vm3216_vm4, %v3199_v21, %v11250_v30  ;;  %v3561_v22 = vsel %vm3546_vm14, %v3528_v12, %v2923_v33  ;;  %v1058_v33 = vld [vmem:[#allocation3 + $0x120] sm:$0xff]  ;;  %v1090_v21 = vld [vmem:[#allocation2 + $0x121] sm:$0xff] }
 0x399   : > { %2422 = vrot.lane.b32.xlu0 %v960_v58, %s6560_s24  ;;  %v3265_v31 = vsel %vm3249_vm5, %v3232_v41, %v11251_v49  ;;  %v1197_v41 = vld [vmem:[#allocation3 + $0x1a2] sm:$0xff] }
 0x39a   : > { %2424 = vrot.lane.b32.xlu1 %v961_v3, %s6560_s24  ;;  %v3298_v1 = vsel %vm11246_vm6, %v3265_v31, %v8646_v63  ;;  %v3594_v63 = vsel %vm3579_vm15, %v3561_v22, %v3051_v11  ;;  %vm11252_vm6 = vcmask 588800   ;;  %v1091_v31 = vld [vmem:[#allocation2 + $0x129] sm:$0xff] }
 0x39b   : > { %v8804_v34 = vpop.permute.xlu0 %2032  ;;  %v3331_v50 = vsel %vm3315_vm7, %v3298_v1, %v8680_v61  ;;  %v1122_v1 = vld [vmem:[#allocation3 + $0x121] sm:$0xff]  ;;  %v1154_v22 = vld [vmem:[#allocation2 + $0x122] sm:$0xff] }
 0x39c   : > { %v8814_v24 = vpop.permute.xlu1 %2158  ;;  %v3364_v60 = vsel %vm3348_vm8, %v3331_v50, %v8715_v27 }
 0x39d   : > { %2550 = vrot.lane.b32.xlu0 %v992_v37, %s6561_s25  ;;  %v3397_v38 = vsel %vm3381_vm9, %v3364_v60, %v8729_v42  ;;  %v1123_v60 = vld [vmem:[#allocation3 + $0x129] sm:$0xff] }
 0x39e   : > { %2552 = vrot.lane.b32.xlu1 %v993_v0, %s6561_s25  ;;  %v3430_v61 = vsel %vm3414_vm10, %v3397_v38, %v8739_v15 }
 0x39f   : > { %v3053_v23 = vpop.permute.xlu0 %3052  ;;  %v3463_v58 = vsel %vm3447_vm11, %v3430_v61, %v8746_v47  ;;  %v1196_v47 = vld [vmem:[#allocation3 + $0x19a] sm:$0xff]  ;;  %v3760_v61 = vsel %vm326_vm0, %v1154_v22, %v8251_v28 }
 0x3a0   : > { %v3833_v2 = vpop.permute.xlu1 %3832  ;;  %v3496_v42 = vsel %vm3480_vm12, %v3463_v58, %v8750_v32  ;;  %v11256_v28 = vld [vmem:[#allocation97_spill] sm:$0xff] }
 0x3a1   : > { %2678 = vrot.lane.b32.xlu0 %v1025_v62, %s6562_s26  ;;  %v3915_v13 = vsel %vm3900_vm1, %v3594_v63, %v3833_v2  ;;  %v3529_v8 = vsel %vm3513_vm13, %v3496_v42, %v8760_v35  ;;  %v636_v63 = vld [vmem:[#allocation2 + $0xc0] sm:$0xff]  ;;  %v11254_v42 = vld [vmem:[#allocation42_spill] sm:$0xff] }
 0x3a2   : > { %1786 = vrot.lane.b32.xlu1 %v992_v37, %s6555_s19  ;;  %6354 = vmatprep.mubr.msk.f32.mxu0 %vm11252_vm6, %v3915_v13  ;;  %v3562_v25 = vsel %vm3546_vm14, %v3529_v8, %v2925_v44  ;;  %v11253_v13 = vld [vmem:[#allocation15_spill] sm:$0xff]  ;;  %v11255_v8 = vld [vmem:[#allocation69_spill] sm:$0xff] }
 0x3a3   : > { %v8837_v27 = vpop.permute.xlu0 %2160  ;;  %v3595_v36 = vsel %vm3579_vm15, %v3562_v25, %v3053_v23 }
 0x3a4   : > { %v8844_v15 = vpop.permute.xlu1 %2286 }
 0x3a5   : > { %2680 = vrot.lane.b32.xlu0 %v1026_v40, %s6562_s26 }
 0x3a6   : > { %2806 = vrot.lane.b32.xlu1 %v1058_v33, %s6563_s28 }
 0x3a7   : > { %v3835_v3 = vpop.permute.xlu0 %3834 }
 0x3a8   : > { %v3916_v57 = vsel %vm3900_vm1, %v3595_v36, %v3835_v3  ;;  %v8851_v59 = vpop.permute.xlu1 %2288  ;;  %v637_v3 = vld [vmem:[#allocation2 + $0xc8] sm:$0xff] }
 0x3a9   : > { %3704 = vrot.lane.b32.xlu0 %v1196_v47, %s6551_s12  ;;  %v6344_v32 = vpop.f32.mrf.mxu0  ;;  %6355 = vmatmul.mubr.msk.f32.gmra.mxu0 %vm11252_vm6, %v3916_v57  ;;  %v1155_v47 = vld [vmem:[#allocation2 + $0x12a] sm:$0xff]  ;;  %vm11258_vm6 = vcmask 195584  }
 0x3aa   : > { %v4278_v35 = vmul.f32 %v6344_v32, %v8467_v10  ;;  %1788 = vrot.lane.b32.xlu1 %v993_v0, %s6555_s19  ;;  %v11257_v32 = vld [vmem:[#allocation127_spill] sm:$0xff] }
 0x3ab   : > { %v8857_v44 = vpop.permute.xlu0 %2414  ;;  %v4135_v53 = vpop.f32.mrf.mxu0 }
 0x3ac   : > { %v4317_v11 = vadd.f32 %v8475_v48, %v4278_v35  ;;  %v4277_v46 = vmul.f32 %v8467_v10, %v4135_v53  ;;  %v8861_v29 = vpop.permute.xlu1 %2416 }
 0x3ad   : > { %1914 = vrot.lane.b32.xlu0 %v1025_v62, %s6556_s20 }
 0x3ae   : > { %v4349_v37 = vmax.f32 %v4317_v11, 0.0  ;;  %v4316_v5 = vadd.f32 %v8475_v48, %v4277_v46  ;;  %2808 = vrot.lane.b32.xlu1 %v1059_v16, %s6563_s28  ;;  %v3761_v11 = vsel %vm326_vm0, %v1155_v47, %v8263_v56  ;;  %v11261_v56 = vld [vmem:[#allocation72_spill] sm:$0xff] }
 0x3af   : > { %v8866_v54 = vpop.permute.xlu0 %2542 }
 0x3b0   : > { %4382 = vst [vmem:[#allocation4 + $0x69] sm:$0xff] %v4349_v37  ;;  %v4348_v30 = vmax.f32 %v4316_v5, 0.0  ;;  %v8868_v51 = vpop.permute.xlu1 %2544 }
 0x3b1   : > { %2934 = vrot.lane.b32.xlu0 %v1090_v21, %s6564_s29 }
 0x3b2   : > { %4381 = vst [vmem:[#allocation4 + $0x61] sm:$0xff] %v4348_v30  ;;  %4944 = vmatprep.mubr.f32.mxu1 %v4348_v30  ;;  %3706 = vrot.lane.b32.xlu1 %v1197_v41, %s6551_s12  ;;  %v11260_v30 = vld [vmem:[#allocation45_spill] sm:$0xff] }
 0x3b3   : > { %v2671_v0 = vpop.permute.xlu0 %2670 }
 0x3b4   : > { %v8872_v49 = vpop.permute.xlu1 %1778 }
 0x3b5   : > { %1916 = vrot.lane.b32.xlu0 %v1026_v40, %s6556_s20  ;;  %v3134_v40 = vsel %vm326_vm0, %v636_v63, %v11253_v13  ;;  %v11263_v13 = vld [vmem:[#allocation130_spill] sm:$0xff] }
 0x3b6   : > { %2042 = vrot.lane.b32.xlu1 %v1058_v33, %s6557_s21  ;;  %v3167_v33 = vsel %vm3150_vm2, %v3134_v40, %v11254_v42 }
 0x3b7   : > { %v8876_v45 = vpop.permute.xlu0 %2672  ;;  %v3200_v25 = vsel %vm11045_vm3, %v3167_v33, %v11255_v8  ;;  %v994_v33 = vld [vmem:[#allocation3 + $0x122] sm:$0xff] }
 0x3b8   : > { %v2799_v52 = vpop.permute.xlu1 %2798  ;;  %v3233_v57 = vsel %vm3216_vm4, %v3200_v25, %v11256_v28 }
 0x3b9   : > { %2936 = vrot.lane.b32.xlu0 %v1091_v31, %s6564_s29  ;;  %v4415_v62 = vld [vmem:[#allocation4 + $0x60] sm:$0xff]  ;;  %v4416_v23 = vld [vmem:[#allocation4 + $0x68] sm:$0xff]  ;;  %v3266_v35 = vsel %vm3249_vm5, %v3233_v57, %v11257_v32  ;;  %v1027_v57 = vld [vmem:[#allocation2 + $0x138] sm:$0xff] }
 0x3ba   : > { %4945 = vmatmul.mubr.f32.gmra.mxu1 %v4415_v62  ;;  %3062 = vrot.lane.b32.xlu1 %v1122_v1, %s6565_s17  ;;  %v3299_v46 = vsel %vm11258_vm6, %v3266_v35, %v8758_v43 }
 0x3bb   : > { %v8880_v50 = vpop.permute.xlu0 %1780  ;;  %4949 = vmatprep.mubr.f32.mxu1 %v4349_v37  ;;  %v3332_v5 = vsel %vm3315_vm7, %v3299_v46, %v8780_v39  ;;  %v11262_v39 = vld [vmem:[#allocation100_spill] sm:$0xff] }
 0x3bc   : > { %v8882_v12 = vpop.permute.xlu1 %1906 }
 0x3bd   : > { %2044 = vrot.lane.b32.xlu0 %v1059_v16, %s6557_s21  ;;  %v11259_v16 = vld [vmem:[#allocation18_spill] sm:$0xff] }
 0x3be   : > { %4950 = vmatmul.mubr.f32.gmra.mxu1 %v4416_v23  ;;  %2170 = vrot.lane.b32.xlu1 %v1090_v21, %s6558_s22  ;;  %v3135_v37 = vsel %vm326_vm0, %v637_v3, %v11259_v16  ;;  %v995_v3 = vld [vmem:[#allocation3 + $0x12a] sm:$0xff] }
 0x3bf   : > { %v2801_v38 = vpop.permute.xlu0 %2800  ;;  %v3168_v41 = vsel %vm3150_vm2, %v3135_v37, %v11260_v30  ;;  %v1060_v37 = vld [vmem:[#allocation3 + $0x138] sm:$0xff] }
 0x3c0   : > { %v2927_v2 = vpop.permute.xlu1 %2926  ;;  %v3201_v62 = vsel %vm11045_vm3, %v3168_v41, %v11261_v56 }
 0x3c1   : > { %3064 = vrot.lane.b32.xlu0 %v1123_v60, %s6565_s17  ;;  %v3234_v22 = vsel %vm3216_vm4, %v3201_v62, %v11262_v39  ;;  %v1061_v62 = vld [vmem:[#allocation3 + $0x140] sm:$0xff] }
 0x3c2   : > { %3844 = vrot.lane.b32.xlu1 %v3760_v61, %s6566_s18  ;;  %v963_v61 = vld [vmem:[#allocation2 + $0x12a] sm:$0xff] }
 0x3c3   : > { %v8892_v58 = vpop.permute.xlu0 %1908 }
 0x3c4   : > { %v8898_v36 = vpop.permute.xlu1 %2034 }
 0x3c5   : > { %2172 = vrot.lane.b32.xlu0 %v1091_v31, %s6558_s22  ;;  %v3365_v31 = vsel %vm3348_vm8, %v3332_v5, %v8814_v24  ;;  %v3267_v24 = vsel %vm3249_vm5, %v3234_v22, %v11263_v13  ;;  %v1092_v22 = vld [vmem:[#allocation2 + $0x139] sm:$0xff] }
 0x3c6   : > { %2298 = vrot.lane.b32.xlu1 %v1122_v1, %s6559_s23  ;;  %v962_v1 = vld [vmem:[#allocation2 + $0x122] sm:$0xff]  ;;  %v3398_v43 = vsel %vm3381_vm9, %v3365_v31, %v8844_v15  ;;  %v3300_v15 = vsel %vm11258_vm6, %v3267_v24, %v8772_v19  ;;  %vm11264_vm6 = vcmask 588800  }
 0x3c7   : > { %v2929_v53 = vpop.permute.xlu0 %2928  ;;  %v3431_v63 = vsel %vm3414_vm10, %v3398_v43, %v8857_v44  ;;  %v3333_v44 = vsel %vm3315_vm7, %v3300_v15, %v8804_v34  ;;  %v1124_v24 = vld [vmem:[#allocation3 + $0x139] sm:$0xff] }
 0x3c8   : > { %v3055_v21 = vpop.permute.xlu1 %3054  ;;  %v3464_v40 = vsel %vm3447_vm11, %v3431_v63, %v8866_v54  ;;  %v3366_v54 = vsel %vm3348_vm8, %v3333_v44, %v8837_v27 }
 0x3c9   : > { %3846 = vrot.lane.b32.xlu0 %v3761_v11, %s6566_s18  ;;  %v3399_v19 = vsel %vm3381_vm9, %v3366_v54, %v8851_v59  ;;  %v1028_v11 = vld [vmem:[#allocation2 + $0x140] sm:$0xff] }
 0x3ca   : > { %2300 = vrot.lane.b32.xlu1 %v1123_v60, %s6559_s23  ;;  %v3497_v60 = vsel %vm3480_vm12, %v3464_v40, %v2671_v0  ;;  %v3432_v34 = vsel %vm3414_vm10, %v3399_v19, %v8861_v29 }
 0x3cb   : > { %v8924_v23 = vpop.permute.xlu0 %2036  ;;  %v3530_v8 = vsel %vm3513_vm13, %v3497_v60, %v2799_v52  ;;  %v3465_v27 = vsel %vm3447_vm11, %v3432_v34, %v8868_v51 }
 0x3cc   : > { %v8934_v42 = vpop.permute.xlu1 %2162  ;;  %v3563_v47 = vsel %vm3546_vm14, %v3530_v8, %v2927_v2  ;;  %v3498_v59 = vsel %vm3480_vm12, %v3465_v27, %v8876_v45 }
 0x3cd   : > { %2426 = vrot.lane.b32.xlu0 %v962_v1, %s6560_s24  ;;  %v3596_v0 = vsel %vm3579_vm15, %v3563_v47, %v3055_v21  ;;  %v3531_v32 = vsel %vm3513_vm13, %v3498_v59, %v2801_v38  ;;  %v1125_v47 = vld [vmem:[#allocation3 + $0x141] sm:$0xff] }
 0x3ce   : > { %2428 = vrot.lane.b32.xlu1 %v963_v61, %s6560_s24  ;;  %v3564_v29 = vsel %vm3546_vm14, %v3531_v32, %v2929_v53  ;;  %v11267_v32 = vld [vmem:[#allocation44_spill] sm:$0xff] }
 0x3cf   : > { %v3057_v25 = vpop.permute.xlu0 %3056 }
 0x3d0   : > { %v3837_v28 = vpop.permute.xlu1 %3836  ;;  %v3597_v51 = vsel %vm3579_vm15, %v3564_v29, %v3057_v25 }
 0x3d1   : > { %2554 = vrot.lane.b32.xlu0 %v994_v33, %s6561_s25  ;;  %v3917_v52 = vsel %vm3900_vm1, %v3596_v0, %v3837_v28  ;;  %v638_v0 = vld [vmem:[#allocation2 + $0xd8] sm:$0xff] }
 0x3d2   : > { %2556 = vrot.lane.b32.xlu1 %v995_v3, %s6561_s25  ;;  %6357 = vmatprep.mubr.msk.f32.mxu0 %vm11264_vm6, %v3917_v52 }
 0x3d3   : > { %v8957_v2 = vpop.permute.xlu0 %2164 }
 0x3d4   : > { %v8963_v35 = vpop.permute.xlu1 %2290 }
 0x3d5   : > { %2682 = vrot.lane.b32.xlu0 %v1027_v57, %s6562_s26 }
 0x3d6   : > { %1790 = vrot.lane.b32.xlu1 %v994_v33, %s6555_s19 }
 0x3d7   : > { %v3839_v46 = vpop.permute.xlu0 %3838 }
 0x3d8   : > { %v3918_v16 = vsel %vm3900_vm1, %v3597_v51, %v3839_v46  ;;  %v8970_v5 = vpop.permute.xlu1 %2292  ;;  %v1157_v46 = vld [vmem:[#allocation2 + $0x142] sm:$0xff] }
 0x3d9   : > { %2684 = vrot.lane.b32.xlu0 %v1028_v11, %s6562_s26  ;;  %v6347_v45 = vpop.f32.mrf.mxu0  ;;  %6358 = vmatmul.mubr.msk.f32.gmra.mxu0 %vm11264_vm6, %v3918_v16  ;;  %vm11270_vm6 = vcmask 195584  }
 0x3da   : > { %v4280_v38 = vmul.f32 %v6347_v45, %v8467_v10  ;;  %2810 = vrot.lane.b32.xlu1 %v1060_v37, %s6563_s28 }
 0x3db   : > { %v8976_v53 = vpop.permute.xlu0 %2418  ;;  %v4145_v21 = vpop.f32.mrf.mxu0 }
 0x3dc   : > { %v4319_v30 = vadd.f32 %v8475_v48, %v4280_v38  ;;  %v4279_v41 = vmul.f32 %v8467_v10, %v4145_v21  ;;  %v8980_v31 = vpop.permute.xlu1 %2420 }
 0x3dd   : > { %1792 = vrot.lane.b32.xlu0 %v995_v3, %s6555_s19  ;;  %v1156_v3 = vld [vmem:[#allocation2 + $0x13a] sm:$0xff] }
 0x3de   : > { %v4351_v1 = vmax.f32 %v4319_v30, 0.0  ;;  %v4318_v56 = vadd.f32 %v8475_v48, %v4279_v41  ;;  %1918 = vrot.lane.b32.xlu1 %v1027_v57, %s6556_s20  ;;  %v1093_v48 = vld [vmem:[#allocation2 + $0x141] sm:$0xff]  ;;  %v3762_v52 = vsel %vm326_vm0, %v1156_v3, %v8365_v20  ;;  %v11266_v57 = vld [vmem:[#allocation17_spill] sm:$0xff]  ;;  %v3763_v30 = vsel %vm326_vm0, %v1157_v46, %v8377_v26  ;;  %v11273_v26 = vld [vmem:[#allocation74_spill] sm:$0xff] }
 0x3df   : > { %v8985_v43 = vpop.permute.xlu0 %2546  ;;  %v3136_v27 = vsel %vm326_vm0, %v638_v0, %v11266_v57  ;;  %v11269_v20 = vld [vmem:[#allocation99_spill] sm:$0xff]  ;;  %v996_v57 = vld [vmem:[#allocation3 + $0x13a] sm:$0xff] }
 0x3e0   : > { %4384 = vst [vmem:[#allocation4 + $0x81] sm:$0xff] %v4351_v1  ;;  %v4350_v39 = vmax.f32 %v4318_v56, 0.0  ;;  %v8987_v63 = vpop.permute.xlu1 %2548  ;;  %v3169_v29 = vsel %vm3150_vm2, %v3136_v27, %v11267_v32  ;;  %v965_v0 = vld [vmem:[#allocation2 + $0x142] sm:$0xff] }
 0x3e1   : > { %2812 = vrot.lane.b32.xlu0 %v1061_v62, %s6563_s28 }
 0x3e2   : > { %4383 = vst [vmem:[#allocation4 + $0x79] sm:$0xff] %v4350_v39  ;;  %4954 = vmatprep.mubr.f32.mxu1 %v4350_v39  ;;  %2938 = vrot.lane.b32.xlu1 %v1092_v22, %s6564_s29 }
 0x3e3   : > { %v8991_v10 = vpop.permute.xlu0 %2674 }
 0x3e4   : > { %v8993_v61 = vpop.permute.xlu1 %1782 }
 0x3e5   : > { %1920 = vrot.lane.b32.xlu0 %v1028_v11, %s6556_s20  ;;  %v11268_v11 = vld [vmem:[#allocation71_spill] sm:$0xff] }
 0x3e6   : > { %2046 = vrot.lane.b32.xlu1 %v1060_v37, %s6557_s21  ;;  %v3202_v51 = vsel %vm11045_vm3, %v3169_v29, %v11268_v11  ;;  %v639_v37 = vld [vmem:[#allocation2 + $0xe0] sm:$0xff]  ;;  %v997_v29 = vld [vmem:[#allocation3 + $0x142] sm:$0xff] }
 0x3e7   : > { %v8997_v13 = vpop.permute.xlu0 %2676  ;;  %v3235_v45 = vsel %vm3216_vm4, %v3202_v51, %v11269_v20  ;;  %v1029_v51 = vld [vmem:[#allocation2 + $0x150] sm:$0xff]  ;;  %v1030_v20 = vld [vmem:[#allocation2 + $0x158] sm:$0xff] }
 0x3e8   : > { %v2803_v40 = vpop.permute.xlu1 %2802  ;;  %v3268_v38 = vsel %vm3249_vm5, %v3235_v45, %v8872_v49 }
 0x3e9   : > { %2940 = vrot.lane.b32.xlu0 %v1093_v48, %s6564_s29  ;;  %v4417_v15 = vld [vmem:[#allocation4 + $0x78] sm:$0xff]  ;;  %v4418_v25 = vld [vmem:[#allocation4 + $0x80] sm:$0xff]  ;;  %v3301_v41 = vsel %vm11270_vm6, %v3268_v38, %v8882_v12 }
 0x3ea   : > { %v9000_v60 = vpop.f32.mrf.mxu1  ;;  %4955 = vmatmul.mubr.f32.gmra.mxu1 %v4417_v15  ;;  %3066 = vrot.lane.b32.xlu1 %v1124_v24, %s6565_s17 }
 0x3eb   : > { %v9003_v33 = vpop.permute.xlu0 %1784  ;;  %4959 = vmatprep.mubr.f32.mxu1 %v4351_v1  ;;  %v11271_v1 = vld [vmem:[#allocation20_spill] sm:$0xff] }
 0x3ec   : > { %v4918_v44 = vpop.f32.mrf.mxu1  ;;  %v9005_v8 = vpop.permute.xlu1 %1910  ;;  %v3137_v56 = vsel %vm326_vm0, %v639_v37, %v11271_v1 }
 0x3ed   : > { %2048 = vrot.lane.b32.xlu0 %v1061_v62, %s6557_s21  ;;  %v3334_v62 = vsel %vm3315_vm7, %v3301_v41, %v8898_v36  ;;  %v11274_v36 = vld [vmem:[#allocation102_spill] sm:$0xff] }
 0x3ee   : > { %v9008_v54 = vpop.f32.mrf.mxu1  ;;  %4960 = vmatmul.mubr.f32.gmra.mxu1 %v4418_v25  ;;  %2174 = vrot.lane.b32.xlu1 %v1092_v22, %s6558_s22  ;;  %v11272_v22 = vld [vmem:[#allocation47_spill] sm:$0xff] }
 0x3ef   : > { %11265 = vst [vmem:[#allocation86_spill] sm:$0xff] %v9008_v54  ;;  %v2805_v19 = vpop.permute.xlu0 %2804  ;;  %v3170_v49 = vsel %vm3150_vm2, %v3137_v56, %v11272_v22 }
 0x3f0   : > { %v4923_v28 = vpop.f32.mrf.mxu1  ;;  %v2931_v34 = vpop.permute.xlu1 %2930  ;;  %v3203_v15 = vsel %vm11045_vm3, %v3170_v49, %v11273_v26  ;;  %v1063_v26 = vld [vmem:[#allocation3 + $0x158] sm:$0xff] }
 0x3f1   : > { %3068 = vrot.lane.b32.xlu0 %v1125_v47, %s6565_s17  ;;  %v3236_v25 = vsel %vm3216_vm4, %v3203_v15, %v11274_v36  ;;  %v1094_v36 = vld [vmem:[#allocation2 + $0x151] sm:$0xff] }
 0x3f2   : > { %3848 = vrot.lane.b32.xlu1 %v3762_v52, %s6566_s18 }
 0x3f3   : > { %v9017_v59 = vpop.permute.xlu0 %1912 }
 0x3f4   : > { %v9023_v16 = vpop.permute.xlu1 %2038 }
 0x3f5   : > { %2176 = vrot.lane.b32.xlu0 %v1093_v48, %s6558_s22  ;;  %v3367_v48 = vsel %vm3348_vm8, %v3334_v62, %v8934_v42  ;;  %v3269_v42 = vsel %vm3249_vm5, %v3236_v25, %v8880_v50  ;;  %v9112_v62 = vld [vmem:[%s11038_s4] ss:$0 sm:$0xff] }
 0x3f6   : > { %2302 = vrot.lane.b32.xlu1 %v1124_v24, %s6559_s23  ;;  %v964_v24 = vld [vmem:[#allocation2 + $0x13a] sm:$0xff]  ;;  %v3400_v12 = vsel %vm3381_vm9, %v3367_v48, %v8963_v35  ;;  %v3302_v35 = vsel %vm11270_vm6, %v3269_v42, %v8892_v58  ;;  %vm11275_vm6 = vcmask 588800  }
 0x3f7   : > { %v2933_v21 = vpop.permute.xlu0 %2932  ;;  %v3433_v3 = vsel %vm3414_vm10, %v3400_v12, %v8976_v53  ;;  %v3335_v53 = vsel %vm3315_vm7, %v3302_v35, %v8924_v23  ;;  %v1095_v42 = vld [vmem:[#allocation2 + $0x159] sm:$0xff]  ;;  %v1126_v35 = vld [vmem:[#allocation3 + $0x151] sm:$0xff] }
 0x3f8   : > { %v3059_v39 = vpop.permute.xlu1 %3058  ;;  %v3466_v28 = vsel %vm3447_vm11, %v3433_v3, %v8985_v43  ;;  %v3368_v43 = vsel %vm3348_vm8, %v3335_v53, %v8957_v2 }
 0x3f9   : > { %3850 = vrot.lane.b32.xlu0 %v3763_v30, %s6566_s18  ;;  %v3401_v58 = vsel %vm3381_vm9, %v3368_v43, %v8970_v5  ;;  %v1062_v30 = vld [vmem:[#allocation3 + $0x150] sm:$0xff] }
 0x3fa   : > { %2304 = vrot.lane.b32.xlu1 %v1125_v47, %s6559_s23  ;;  %v3499_v47 = vsel %vm3480_vm12, %v3466_v28, %v8991_v10  ;;  %v3434_v23 = vsel %vm3414_vm10, %v3401_v58, %v8980_v31  ;;  %v1127_v58 = vld [vmem:[#allocation3 + $0x159] sm:$0xff] }
 0x3fb   : > { %v9049_v44 = vpop.permute.xlu0 %2040  ;;  %v3532_v27 = vsel %vm3513_vm13, %v3499_v47, %v2803_v40  ;;  %v3467_v2 = vsel %vm3447_vm11, %v3434_v23, %v8987_v63 }
 0x3fc   : > { %v9059_v52 = vpop.permute.xlu1 %2166  ;;  %v3565_v32 = vsel %vm3546_vm14, %v3532_v27, %v2931_v34  ;;  %v3500_v5 = vsel %vm3480_vm12, %v3467_v2, %v8997_v13 }
 0x3fd   : > { %2430 = vrot.lane.b32.xlu0 %v964_v24, %s6560_s24  ;;  %v3598_v10 = vsel %vm3579_vm15, %v3565_v32, %v3059_v39  ;;  %v3533_v46 = vsel %vm3513_vm13, %v3500_v5, %v2805_v19  ;;  %v9103_v19 = vld [vmem:[%s11037_s3] ss:$0 sm:$0xff]  ;;  %v640_v5 = vld [vmem:[#allocation2 + $0xf0] sm:$0xff] }
 0x3fe   : > { %2432 = vrot.lane.b32.xlu1 %v965_v0, %s6560_s24  ;;  %v3566_v31 = vsel %vm3546_vm14, %v3533_v46, %v2933_v21  ;;  %v1159_v46 = vld [vmem:[#allocation2 + $0x15a] sm:$0xff] }
 0x3ff   : > { %v3061_v50 = vpop.permute.xlu0 %3060 }
 0x400   : > { %v3841_v11 = vpop.permute.xlu1 %3840  ;;  %v3599_v63 = vsel %vm3579_vm15, %v3566_v31, %v3061_v50 }
 0x401   : > { %2558 = vrot.lane.b32.xlu0 %v996_v57, %s6561_s25  ;;  %v3919_v40 = vsel %vm3900_vm1, %v3598_v10, %v3841_v11  ;;  %v1158_v10 = vld [vmem:[#allocation2 + $0x152] sm:$0xff] }
 0x402   : > { %2560 = vrot.lane.b32.xlu1 %v997_v29, %s6561_s25  ;;  %6360 = vmatprep.mubr.msk.f32.mxu0 %vm11275_vm6, %v3919_v40 }
 0x403   : > { %v9083_v34 = vpop.permute.xlu0 %2168 }
 0x404   : > { %v9089_v37 = vpop.permute.xlu1 %2294 }
 0x405   : > { %2686 = vrot.lane.b32.xlu0 %v1029_v51, %s6562_s26 }
 0x406   : > { %1794 = vrot.lane.b32.xlu1 %v996_v57, %s6555_s19 }
 0x407   : > { %v3843_v45 = vpop.permute.xlu0 %3842 }
 0x408   : > { %v3920_v38 = vsel %vm3900_vm1, %v3599_v63, %v3843_v45  ;;  %v9096_v41 = vpop.permute.xlu1 %2296 }
 0x409   : > { %2688 = vrot.lane.b32.xlu0 %v1030_v20, %s6562_s26  ;;  %v6350_v13 = vpop.f32.mrf.mxu0  ;;  %6361 = vmatmul.mubr.msk.f32.gmra.mxu0 %vm11275_vm6, %v3920_v38  ;;  %v11279_v38 = vld [vmem:[#allocation46_spill] sm:$0xff]  ;;  %vm11282_vm6 = vcmask 195584  }
 0x40a   : > { %v4282_v21 = vmul.f32 %v9103_v19, %v6350_v13  ;;  %2814 = vrot.lane.b32.xlu1 %v1062_v30, %s6563_s28  ;;  %v11280_v13 = vld [vmem:[#allocation73_spill] sm:$0xff] }
 0x40b   : > { %v9107_v1 = vpop.permute.xlu0 %2422  ;;  %v4155_v56 = vpop.f32.mrf.mxu0 }
 0x40c   : > { %v4321_v39 = vadd.f32 %v9112_v62, %v4282_v21  ;;  %v4281_v22 = vmul.f32 %v9103_v19, %v4155_v56  ;;  %v9116_v49 = vpop.permute.xlu1 %2424 }
 0x40d   : > { %1796 = vrot.lane.b32.xlu0 %v997_v29, %s6555_s19 }
 0x40e   : > { %v4353_v48 = vmax.f32 %v4321_v39, 0.0  ;;  %v4320_v24 = vadd.f32 %v9112_v62, %v4281_v22  ;;  %1922 = vrot.lane.b32.xlu1 %v1029_v51, %s6556_s20  ;;  %v3764_v51 = vsel %vm326_vm0, %v1158_v10, %v8500_v55  ;;  %v3765_v55 = vsel %vm326_vm0, %v1159_v46, %v8512_v9  ;;  %v641_v39 = vld [vmem:[#allocation2 + $0xf8] sm:$0xff]  ;;  %v11281_v22 = vld [vmem:[#allocation101_spill] sm:$0xff] }
 0x40f   : > { %v9121_v15 = vpop.permute.xlu0 %2550 }
 0x410   : > { %4386 = vst [vmem:[#allocation4 + $0x99] sm:$0xff] %v4353_v48  ;;  %v4352_v12 = vmax.f32 %v4320_v24, 0.0  ;;  %v9123_v25 = vpop.permute.xlu1 %2552  ;;  %v966_v24 = vld [vmem:[#allocation2 + $0x152] sm:$0xff] }
 0x411   : > { %2816 = vrot.lane.b32.xlu0 %v1063_v26, %s6563_s28 }
 0x412   : > { %4385 = vst [vmem:[#allocation4 + $0x91] sm:$0xff] %v4352_v12  ;;  %4964 = vmatprep.mubr.f32.mxu1 %v4352_v12  ;;  %2942 = vrot.lane.b32.xlu1 %v1094_v36, %s6564_s29 }
 0x413   : > { %v9127_v3 = vpop.permute.xlu0 %2678 }
 0x414   : > { %v9129_v0 = vpop.permute.xlu1 %1786 }
 0x415   : > { %1924 = vrot.lane.b32.xlu0 %v1030_v20, %s6556_s20  ;;  %v11278_v20 = vld [vmem:[#allocation19_spill] sm:$0xff] }
 0x416   : > { %2050 = vrot.lane.b32.xlu1 %v1062_v30, %s6557_s21  ;;  %v3138_v63 = vsel %vm326_vm0, %v640_v5, %v11278_v20 }
 0x417   : > { %v9133_v28 = vpop.permute.xlu0 %2680  ;;  %v3171_v30 = vsel %vm3150_vm2, %v3138_v63, %v11279_v38  ;;  %v999_v63 = vld [vmem:[#allocation3 + $0x15a] sm:$0xff] }
 0x418   : > { %v9135_v47 = vpop.permute.xlu1 %2806  ;;  %v3204_v21 = vsel %vm11045_vm3, %v3171_v30, %v11280_v13  ;;  %v1031_v13 = vld [vmem:[#allocation2 + $0x168] sm:$0xff] }
 0x419   : > { %2944 = vrot.lane.b32.xlu0 %v1095_v42, %s6564_s29  ;;  %v4419_v57 = vld [vmem:[#allocation4 + $0x90] sm:$0xff]  ;;  %v4420_v32 = vld [vmem:[#allocation4 + $0x98] sm:$0xff] }
 0x41a   : > { %v9138_v53 = vpop.f32.mrf.mxu1  ;;  %4965 = vmatmul.mubr.f32.gmra.mxu1 %v4419_v57  ;;  %3070 = vrot.lane.b32.xlu1 %v1126_v35, %s6565_s17 }
 0x41b   : > { %11276 = vst [vmem:[#allocation114_spill] sm:$0xff] %v9138_v53  ;;  %v9141_v27 = vpop.permute.xlu0 %3704  ;;  %4969 = vmatprep.mubr.f32.mxu1 %v4353_v48  ;;  %v3237_v48 = vsel %vm3216_vm4, %v3204_v21, %v11281_v22 }
 0x41c   : > { %v4928_v50 = vpop.f32.mrf.mxu1  ;;  %v9143_v43 = vpop.permute.xlu1 %1788 }
 0x41d   : > { %2052 = vrot.lane.b32.xlu0 %v1063_v26, %s6557_s21  ;;  %v3270_v26 = vsel %vm3249_vm5, %v3237_v48, %v8993_v61  ;;  %v1032_v48 = vld [vmem:[#allocation2 + $0x170] sm:$0xff] }
 0x41e   : > { %v9146_v29 = vpop.f32.mrf.mxu1  ;;  %4970 = vmatmul.mubr.f32.gmra.mxu1 %v4420_v32  ;;  %2178 = vrot.lane.b32.xlu1 %v1094_v36, %s6558_s22  ;;  %v3303_v9 = vsel %vm11282_vm6, %v3270_v26, %v9005_v8  ;;  %v967_v36 = vld [vmem:[#allocation2 + $0x15a] sm:$0xff]  ;;  %v11284_v32 = vld [vmem:[#allocation49_spill] sm:$0xff] }
 0x41f   : > { %11277 = vst [vmem:[#allocation6_spill] sm:$0xff] %v9146_v29  ;;  %v9149_v11 = vpop.permute.xlu0 %1914  ;;  %v3336_v57 = vsel %vm3315_vm7, %v3303_v9, %v9023_v16  ;;  %v11286_v16 = vld [vmem:[#allocation104_spill] sm:$0xff]  ;;  %v10511_v29 = vld [vmem:[#allocation4 + $0x91] sm:$0xff] }
 0x420   : > { %v4933_v23 = vpop.f32.mrf.mxu1  ;;  %v9151_v40 = vpop.permute.xlu1 %2808  ;;  %v3369_v61 = vsel %vm3348_vm8, %v3336_v57, %v9059_v52 }
 0x421   : > { %3072 = vrot.lane.b32.xlu0 %v1127_v58, %s6565_s17  ;;  %v11285_v23 = vld [vmem:[#allocation76_spill] sm:$0xff] }
 0x422   : > { %3852 = vrot.lane.b32.xlu1 %v3764_v51, %s6566_s18  ;;  %v3402_v51 = vsel %vm3381_vm9, %v3369_v61, %v9089_v37  ;;  %v1065_v61 = vld [vmem:[#allocation3 + $0x170] sm:$0xff] }
 0x423   : > { %v2935_v2 = vpop.permute.xlu0 %2934  ;;  %v3435_v20 = vsel %vm3414_vm10, %v3402_v51, %v9107_v1 }
 0x424   : > { %v9157_v31 = vpop.permute.xlu1 %3706  ;;  %v3468_v38 = vsel %vm3447_vm11, %v3435_v20, %v9121_v15  ;;  %v1097_v20 = vld [vmem:[#allocation2 + $0x171] sm:$0xff] }
 0x425   : > { %2180 = vrot.lane.b32.xlu0 %v1095_v42, %s6558_s22  ;;  %v11283_v42 = vld [vmem:[#allocation22_spill] sm:$0xff] }
 0x426   : > { %2306 = vrot.lane.b32.xlu1 %v1126_v35, %s6559_s23  ;;  %v3139_v35 = vsel %vm326_vm0, %v641_v39, %v11283_v42 }
 0x427   : > { %v9163_v45 = vpop.permute.xlu0 %1916  ;;  %v3172_v10 = vsel %vm3150_vm2, %v3139_v35, %v11284_v32 }
 0x428   : > { %v9171_v56 = vpop.permute.xlu1 %2042  ;;  %v3205_v8 = vsel %vm11045_vm3, %v3172_v10, %v11285_v23 }
 0x429   : > { %3854 = vrot.lane.b32.xlu0 %v3765_v55, %s6566_s18  ;;  %v3238_v46 = vsel %vm3216_vm4, %v3205_v8, %v11286_v16  ;;  %v3501_v55 = vsel %vm3480_vm12, %v3468_v38, %v9127_v3  ;;  %v1096_v8 = vld [vmem:[#allocation2 + $0x169] sm:$0xff] }
 0x42a   : > { %2308 = vrot.lane.b32.xlu1 %v1127_v58, %s6559_s23  ;;  %v998_v58 = vld [vmem:[#allocation3 + $0x152] sm:$0xff]  ;;  %v3271_v52 = vsel %vm3249_vm5, %v3238_v46, %v9003_v33  ;;  %v3534_v33 = vsel %vm3513_vm13, %v3501_v55, %v9135_v47 }
 0x42b   : > { %v2937_v12 = vpop.permute.xlu0 %2936  ;;  %v3304_v37 = vsel %vm11282_vm6, %v3271_v52, %v9017_v59  ;;  %v3567_v39 = vsel %vm3546_vm14, %v3534_v33, %v2935_v2  ;;  %vm11287_vm6 = vcmask 588800   ;;  %v1064_v2 = vld [vmem:[#allocation3 + $0x168] sm:$0xff] }
 0x42c   : > { %v3063_v50 = vpop.permute.xlu1 %3062  ;;  %v3337_v1 = vsel %vm3315_vm7, %v3304_v37, %v9049_v44  ;;  %v1128_v52 = vld [vmem:[#allocation3 + $0x169] sm:$0xff] }
 0x42d   : > { %2434 = vrot.lane.b32.xlu0 %v966_v24, %s6560_s24  ;;  %v3370_v21 = vsel %vm3348_vm8, %v3337_v1, %v9083_v34  ;;  %v3600_v3 = vsel %vm3579_vm15, %v3567_v39, %v3063_v50  ;;  %v1129_v39 = vld [vmem:[#allocation3 + $0x171] sm:$0xff] }
 0x42e   : > { %2436 = vrot.lane.b32.xlu1 %v967_v36, %s6560_s24  ;;  %v3403_v59 = vsel %vm3381_vm9, %v3370_v21, %v9096_v41 }
 0x42f   : > { %v9195_v5 = vpop.permute.xlu0 %2044  ;;  %v3436_v44 = vsel %vm3414_vm10, %v3403_v59, %v9116_v49  ;;  %v1160_v59 = vld [vmem:[#allocation2 + $0x16a] sm:$0xff] }
 0x430   : > { %v9205_v30 = vpop.permute.xlu1 %2170  ;;  %v3469_v24 = vsel %vm3447_vm11, %v3436_v44, %v9123_v25 }
 0x431   : > { %2562 = vrot.lane.b32.xlu0 %v998_v58, %s6561_s25  ;;  %v3502_v41 = vsel %vm3480_vm12, %v3469_v24, %v9133_v28  ;;  %v642_v24 = vld [vmem:[#allocation2 + $0x108] sm:$0xff] }
 0x432   : > { %2564 = vrot.lane.b32.xlu1 %v999_v63, %s6561_s25  ;;  %v3535_v26 = vsel %vm3513_vm13, %v3502_v41, %v9151_v40  ;;  %v1161_v41 = vld [vmem:[#allocation2 + $0x172] sm:$0xff] }
 0x433   : > { %v3065_v15 = vpop.permute.xlu0 %3064  ;;  %v3568_v25 = vsel %vm3546_vm14, %v3535_v26, %v2937_v12  ;;  %v11290_v26 = vld [vmem:[#allocation21_spill] sm:$0xff] }
 0x434   : > { %v3845_v22 = vpop.permute.xlu1 %3844  ;;  %v3601_v42 = vsel %vm3579_vm15, %v3568_v25, %v3065_v15 }
 0x435   : > { %2690 = vrot.lane.b32.xlu0 %v1031_v13, %s6562_s26  ;;  %v3921_v47 = vsel %vm3900_vm1, %v3600_v3, %v3845_v22 }
 0x436   : > { %1798 = vrot.lane.b32.xlu1 %v998_v58, %s6555_s19  ;;  %6363 = vmatprep.mubr.msk.f32.mxu0 %vm11287_vm6, %v3921_v47  ;;  %v3766_v47 = vsel %vm326_vm0, %v1160_v59, %v8626_v17  ;;  %v3767_v17 = vsel %vm326_vm0, %v1161_v41, %v8638_v14  ;;  %v9324_v59 = vld [vmem:[#allocation3 + $0x16a] sm:$0xff] }
 0x437   : > { %v9230_v34 = vpop.permute.xlu0 %2172  ;;  %v11298_v41 = vld [vmem:[#allocation106_spill] sm:$0xff] }
 0x438   : > { %v9237_v49 = vpop.permute.xlu1 %2298 }
 0x439   : > { %2692 = vrot.lane.b32.xlu0 %v1032_v48, %s6562_s26  ;;  %v6353_v9 = vpop.f32.mrf.mxu0 }
 0x43a   : > { %v4284_v36 = vmul.f32 %v9103_v19, %v6353_v9  ;;  %2818 = vrot.lane.b32.xlu1 %v1064_v2, %s6563_s28  ;;  %v3140_v9 = vsel %vm326_vm0, %v642_v24, %v11290_v26  ;;  %v4743_v24 = vld [vmem:[%s11039_s5 + $0x178] sm:$0xff] }
 0x43b   : > { %v3847_v35 = vpop.permute.xlu0 %3846  ;;  %v4165_v57 = vpop.f32.mrf.mxu0  ;;  %5066 = vmatpush1.msra.mxu0 %v4743_v24  ;;  %v4737_v24 = vld [vmem:[%s11039_s5 + $0x148] sm:$0xff] }
 0x43c   : > { %v4323_v28 = vadd.f32 %v9112_v62, %v4284_v36  ;;  %v3922_v50 = vsel %vm3900_vm1, %v3601_v42, %v3847_v35  ;;  %v4283_v40 = vmul.f32 %v9103_v19, %v4165_v57  ;;  %v9247_v32 = vpop.permute.xlu1 %2300  ;;  %v11291_v36 = vld [vmem:[#allocation48_spill] sm:$0xff]  ;;  %v11292_v35 = vld [vmem:[#allocation75_spill] sm:$0xff] }
 0x43d   : > { %1800 = vrot.lane.b32.xlu0 %v999_v63, %s6555_s19  ;;  %6364 = vmatmul.mubr.msk.f32.gmra.mxu0 %vm11287_vm6, %v3922_v50  ;;  %v3173_v42 = vsel %vm3150_vm2, %v3140_v9, %v11291_v36  ;;  %v643_v50 = vld [vmem:[#allocation2 + $0x110] sm:$0xff]  ;;  %vm11294_vm6 = vcmask 195584   ;;  %v9340_v9 = vld [vmem:[#allocation3 + $0x172] sm:$0xff] }
 0x43e   : > { %v4355_v12 = vmax.f32 %v4323_v28, 0.0  ;;  %v4322_v10 = vadd.f32 %v9112_v62, %v4283_v40  ;;  %1926 = vrot.lane.b32.xlu1 %v1031_v13, %s6556_s20  ;;  %v3206_v57 = vsel %vm11045_vm3, %v3173_v42, %v11292_v35  ;;  %v11293_v40 = vld [vmem:[#allocation103_spill] sm:$0xff] }
 0x43f   : > { %v9253_v58 = vpop.permute.xlu0 %2426 }
 0x440   : > { %4388 = vst [vmem:[#allocation4 + $0xb1] sm:$0xff] %v4355_v12  ;;  %v4354_v23 = vmax.f32 %v4322_v10, 0.0  ;;  %v9255_v51 = vpop.permute.xlu1 %2428  ;;  %v968_v10 = vld [vmem:[#allocation2 + $0x16a] sm:$0xff] }
 0x441   : > { %2820 = vrot.lane.b32.xlu0 %v1065_v61, %s6563_s28 }
 0x442   : > { %4387 = vst [vmem:[#allocation4 + $0xa9] sm:$0xff] %v4354_v23  ;;  %4974 = vmatprep.mubr.f32.mxu1 %v4354_v23  ;;  %2946 = vrot.lane.b32.xlu1 %v1096_v8, %s6564_s29 }
 0x443   : > { %v9259_v16 = vpop.permute.xlu0 %2554 }
 0x444   : > { %v9261_v46 = vpop.permute.xlu1 %2556 }
 0x445   : > { %1928 = vrot.lane.b32.xlu0 %v1032_v48, %s6556_s20 }
 0x446   : > { %2054 = vrot.lane.b32.xlu1 %v1064_v2, %s6557_s21 }
 0x447   : > { %v9265_v63 = vpop.permute.xlu0 %2682 }
 0x448   : > { %v9267_v38 = vpop.permute.xlu1 %1790 }
 0x449   : > { %2948 = vrot.lane.b32.xlu0 %v1097_v20, %s6564_s29  ;;  %v4421_v37 = vld [vmem:[#allocation4 + $0xa8] sm:$0xff]  ;;  %v4422_v15 = vld [vmem:[#allocation4 + $0xb0] sm:$0xff] }
 0x44a   : > { %v9270_v55 = vpop.f32.mrf.mxu1  ;;  %4975 = vmatmul.mubr.f32.gmra.mxu1 %v4421_v37  ;;  %3074 = vrot.lane.b32.xlu1 %v1128_v52, %s6565_s17 }
 0x44b   : > { %11288 = vst [vmem:[#allocation33_spill] sm:$0xff] %v9270_v55  ;;  %v9273_v13 = vpop.permute.xlu0 %2684  ;;  %4979 = vmatprep.mubr.f32.mxu1 %v4355_v12  ;;  %v3239_v12 = vsel %vm3216_vm4, %v3206_v57, %v11293_v40 }
 0x44c   : > { %v4938_v1 = vpop.f32.mrf.mxu1  ;;  %v9275_v33 = vpop.permute.xlu1 %2810 }
 0x44d   : > { %2056 = vrot.lane.b32.xlu0 %v1065_v61, %s6557_s21  ;;  %v3272_v61 = vsel %vm3249_vm5, %v3239_v12, %v9129_v0 }
 0x44e   : > { %v9278_v21 = vpop.f32.mrf.mxu1  ;;  %4980 = vmatmul.mubr.f32.gmra.mxu1 %v4422_v15  ;;  %2182 = vrot.lane.b32.xlu1 %v1096_v8, %s6558_s22  ;;  %v3305_v14 = vsel %vm11294_vm6, %v3272_v61, %v9149_v11  ;;  %v969_v8 = vld [vmem:[#allocation2 + $0x172] sm:$0xff]  ;;  %v11296_v15 = vld [vmem:[#allocation51_spill] sm:$0xff] }
 0x44f   : > { %11289 = vst [vmem:[#allocation60_spill] sm:$0xff] %v9278_v21  ;;  %v9281_v3 = vpop.permute.xlu0 %1792  ;;  %v3338_v37 = vsel %vm3315_vm7, %v3305_v14, %v9171_v56 }
 0x450   : > { %v4943_v22 = vpop.f32.mrf.mxu1  ;;  %v9283_v44 = vpop.permute.xlu1 %1918 }
 0x451   : > { %3076 = vrot.lane.b32.xlu0 %v1129_v39, %s6565_s17  ;;  %v11297_v22 = vld [vmem:[#allocation78_spill] sm:$0xff] }
 0x452   : > { %3856 = vrot.lane.b32.xlu1 %v3766_v47, %s6566_s18 }
 0x453   : > { %v9289_v48 = vpop.permute.xlu0 %2812 }
 0x454   : > { %v2939_v2 = vpop.permute.xlu1 %2938 }
 0x455   : > { %2184 = vrot.lane.b32.xlu0 %v1097_v20, %s6558_s22  ;;  %v11295_v20 = vld [vmem:[#allocation24_spill] sm:$0xff] }
 0x456   : > { %2310 = vrot.lane.b32.xlu1 %v1128_v52, %s6559_s23  ;;  %v3141_v52 = vsel %vm326_vm0, %v643_v50, %v11295_v20 }
 0x457   : > { %v9295_v25 = vpop.permute.xlu0 %1920  ;;  %v3174_v0 = vsel %vm3150_vm2, %v3141_v52, %v11296_v15  ;;  %v4739_v52 = vld [vmem:[%s11039_s5 + $0x158] sm:$0xff] }
 0x458   : > { %v9303_v28 = vpop.permute.xlu1 %2046  ;;  %v3207_v11 = vsel %vm11045_vm3, %v3174_v0, %v11297_v22  ;;  %v4738_v0 = vld [vmem:[%s11039_s5 + $0x150] sm:$0xff]  ;;  %v9418_v22 = vld [vmem:[#allocation2 + $0x181] sm:$0xff] }
 0x459   : > { %3858 = vrot.lane.b32.xlu0 %v3767_v17, %s6566_s18  ;;  %v3240_v26 = vsel %vm3216_vm4, %v3207_v11, %v11298_v41  ;;  %v9350_v17 = vld [vmem:[#allocation4] sm:$0xff] }
 0x45a   : > { %2312 = vrot.lane.b32.xlu1 %v1129_v39, %s6559_s23  ;;  %v3371_v39 = vsel %vm3348_vm8, %v3338_v37, %v9205_v30  ;;  %5067 = vmatprep.subr.mxu0 %v9350_v17  ;;  %v9403_v37 = vld [vmem:[#allocation3 + $0x188] sm:$0xff] }
 0x45b   : > { %v9311_v23 = vpop.permute.xlu0 %2940  ;;  %v3404_v47 = vsel %vm3381_vm9, %v3371_v39, %v9237_v49  ;;  %v3273_v49 = vsel %vm3249_vm5, %v3240_v26, %v9143_v43 }
 0x45c   : > { %v3067_v1 = vpop.permute.xlu1 %3066  ;;  %v3437_v30 = vsel %vm3414_vm10, %v3404_v47, %v9253_v58  ;;  %v4742_v58 = vld [vmem:[%s11039_s5 + $0x170] sm:$0xff]  ;;  %v3306_v35 = vsel %vm11294_vm6, %v3273_v49, %v9163_v45  ;;  %v4741_v45 = vld [vmem:[%s11039_s5 + $0x168] sm:$0xff]  ;;  %vm11299_vm6 = vcmask 588800  }
 0x45d   : > { %2438 = vrot.lane.b32.xlu0 %v968_v10, %s6560_s24  ;;  %v3470_v36 = vsel %vm3447_vm11, %v3437_v30, %v9259_v16  ;;  %v9360_v16 = vld [vmem:[#allocation2 + $0x180] sm:$0xff]  ;;  %5068 = vmatpush1.msra.mxu0 %v4742_v58  ;;  %v3339_v57 = vsel %vm3315_vm7, %v3306_v35, %v9195_v5  ;;  %v9375_v10 = vld [vmem:[#allocation2 + $0x188] sm:$0xff] }
 0x45e   : > { %2440 = vrot.lane.b32.xlu1 %v969_v8, %s6560_s24  ;;  %v3503_v43 = vsel %vm3480_vm12, %v3470_v36, %v9265_v63  ;;  %5069 = vmatprep.subr.mxu0 %v9350_v17  ;;  %v3372_v63 = vsel %vm3348_vm8, %v3339_v57, %v9230_v34  ;;  %v4740_v34 = vld [vmem:[%s11039_s5 + $0x160] sm:$0xff]  ;;  %v9389_v8 = vld [vmem:[#allocation3 + $0x180] sm:$0xff] }
 0x45f   : > { %v9331_v56 = vpop.permute.xlu0 %2048  ;;  %v3536_v50 = vsel %vm3513_vm13, %v3503_v43, %v9275_v33  ;;  %5070 = vmatpush1.msra.mxu0 %v4741_v45  ;;  %v3405_v5 = vsel %vm3381_vm9, %v3372_v63, %v9247_v32  ;;  %v9430_v30 = vld [vmem:[#allocation2 + $0x189] sm:$0xff]  ;;  %v4736_v36 = vld [vmem:[%s11039_s5 + $0x140] sm:$0xff]  ;;  %v9442_v43 = vld [vmem:[#allocation3 + $0x181] sm:$0xff] }
 0x460   : > { %v9346_v42 = vpop.permute.xlu1 %2174  ;;  %v3569_v12 = vsel %vm3546_vm14, %v3536_v50, %v2939_v2  ;;  %5071 = vmatprep.subr.mxu0 %v9350_v17  ;;  %v3438_v2 = vsel %vm3414_vm10, %v3405_v5, %v9255_v51  ;;  %v4735_v50 = vld [vmem:[%s11039_s5 + $0x138] sm:$0xff]  ;;  %v1162_v63 = vld [vmem:[#allocation2 + $0x182] sm:$0xff]  ;;  %v4734_v5 = vld [vmem:[%s11039_s5 + $0x130] sm:$0xff] }
 0x461   : > { %2566 = vrot.lane.b32.xlu0 %v9324_v59, %s6561_s25  ;;  %v3602_v33 = vsel %vm3579_vm15, %v3569_v12, %v3067_v1  ;;  %5072 = vmatpush1.msra.mxu0 %v4740_v34  ;;  %v3471_v32 = vsel %vm3447_vm11, %v3438_v2, %v9261_v46  ;;  %v9452_v45 = vld [vmem:[#allocation3 + $0x189] sm:$0xff]  ;;  %v4733_v34 = vld [vmem:[%s11039_s5 + $0x128] sm:$0xff]  ;;  %v3768_v2 = vsel %vm326_vm0, %v1162_v63, %v8754_v6 }
 0x462   : > { %2568 = vrot.lane.b32.xlu1 %v9340_v9, %s6561_s25  ;;  %v3504_v51 = vsel %vm3480_vm12, %v3471_v32, %v9273_v13  ;;  %5073 = vmatprep.subr.mxu0 %v9350_v17  ;;  %v4732_v32 = vld [vmem:[%s11039_s5 + $0x120] sm:$0xff]  ;;  %v4731_v6 = vld [vmem:[%s11039_s5 + $0x118] sm:$0xff] }
 0x463   : > { %v3069_v40 = vpop.permute.xlu0 %3068  ;;  %v3537_v46 = vsel %vm3513_vm13, %v3504_v51, %v9289_v48  ;;  %5074 = vmatpush1.msra.mxu0 %v4739_v52  ;;  %v11303_v63 = vld [vmem:[#allocation50_spill] sm:$0xff] }
 0x464   : > { %v3849_v61 = vpop.permute.xlu1 %3848  ;;  %v3570_v13 = vsel %vm3546_vm14, %v3537_v46, %v9311_v23  ;;  %5075 = vmatprep.subr.mxu0 %v9350_v17 }
 0x465   : > { %2694 = vrot.lane.b32.xlu0 %v9360_v16, %s6562_s26  ;;  %v3923_v14 = vsel %vm3900_vm1, %v3602_v33, %v3849_v61  ;;  %v3603_v48 = vsel %vm3579_vm15, %v3570_v13, %v3069_v40  ;;  %5076 = vmatpush1.msra.mxu0 %v4738_v0  ;;  %v1163_v33 = vld [vmem:[#allocation2 + $0x18a] sm:$0xff] }
 0x466   : > { %2696 = vrot.lane.b32.xlu1 %v9375_v10, %s6562_s26  ;;  %6366 = vmatprep.mubr.msk.f32.mxu0 %vm11299_vm6, %v3923_v14  ;;  %v3769_v52 = vsel %vm326_vm0, %v1163_v33, %v8766_v18  ;;  %v4730_v0 = vld [vmem:[%s11039_s5 + $0x110] sm:$0xff] }
 0x467   : > { %v9395_v20 = vpop.permute.xlu0 %2176  ;;  %5077 = vmatprep.subr.mxu0 %v9350_v17  ;;  %v11304_v33 = vld [vmem:[#allocation77_spill] sm:$0xff] }
 0x468   : > { %v9408_v1 = vpop.permute.xlu1 %2302  ;;  %5078 = vmatpush1.msra.mxu0 %v4737_v24 }
 0x469   : > { %2822 = vrot.lane.b32.xlu0 %v9389_v8, %s6563_s28  ;;  %v6356_v15 = vpop.f32.mrf.mxu0  ;;  %5079 = vmatprep.subr.mxu0 %v9350_v17 }
 0x46a   : > { %v4286_v39 = vmul.f32 %v9103_v19, %v6356_v15  ;;  %2824 = vrot.lane.b32.xlu1 %v9403_v37, %s6563_s28  ;;  %5080 = vmatpush1.msra.mxu0 %v4736_v36  ;;  %v644_v36 = vld [vmem:[#allocation2 + $0x120] sm:$0xff] }
 0x46b   : > { %v3851_v11 = vpop.permute.xlu0 %3850  ;;  %v4175_v47 = vpop.f32.mrf.mxu0  ;;  %5081 = vmatprep.subr.mxu0 %v9350_v17 }
 0x46c   : > { %v4325_v23 = vadd.f32 %v9112_v62, %v4286_v39  ;;  %v3924_v41 = vsel %vm3900_vm1, %v3603_v48, %v3851_v11  ;;  %v4285_v26 = vmul.f32 %v9103_v19, %v4175_v47  ;;  %v9433_v49 = vpop.permute.xlu1 %2304  ;;  %5082 = vmatpush1.msra.mxu0 %v4735_v50 }
 0x46d   : > { %2950 = vrot.lane.b32.xlu0 %v9418_v22, %s6564_s29  ;;  %6367 = vmatmul.mubr.msk.f32.gmra.mxu0 %vm11299_vm6, %v3924_v41  ;;  %vm11306_vm6 = vcmask 195584  }
 0x46e   : > { %v4357_v58 = vmax.f32 %v4325_v23, 0.0  ;;  %v4324_v35 = vadd.f32 %v9112_v62, %v4285_v26  ;;  %2952 = vrot.lane.b32.xlu1 %v9430_v30, %s6564_s29  ;;  %5083 = vmatprep.subr.mxu0 %v9350_v17 }
 0x46f   : > { %v9446_v57 = vpop.permute.xlu0 %2430  ;;  %5084 = vmatpush1.msra.mxu0 %v4734_v5 }
 0x470   : > { %4390 = vst [vmem:[#allocation4 + $0xc9] sm:$0xff] %v4357_v58  ;;  %v4356_v40 = vmax.f32 %v4324_v35, 0.0  ;;  %v9454_v12 = vpop.permute.xlu1 %2432  ;;  %5085 = vmatprep.subr.mxu0 %v9350_v17  ;;  %v11302_v35 = vld [vmem:[#allocation23_spill] sm:$0xff] }
 0x471   : > { %3078 = vrot.lane.b32.xlu0 %v9442_v43, %s6565_s17  ;;  %5086 = vmatpush1.msra.mxu0 %v4733_v34  ;;  %v3142_v50 = vsel %vm326_vm0, %v644_v36, %v11302_v35  ;;  %v1002_v36 = vld [vmem:[#allocation3 + $0x182] sm:$0xff] }
 0x472   : > { %4389 = vst [vmem:[#allocation4 + $0xc1] sm:$0xff] %v4356_v40  ;;  %4984 = vmatprep.mubr.f32.mxu1 %v4356_v40  ;;  %3080 = vrot.lane.b32.xlu1 %v9452_v45, %s6565_s17  ;;  %v3175_v5 = vsel %vm3150_vm2, %v3142_v50, %v11303_v63  ;;  %v11310_v63 = vld [vmem:[#allocation108_spill] sm:$0xff] }
 0x473   : > { %v9464_v61 = vpop.permute.xlu0 %2558  ;;  %5087 = vmatprep.subr.mxu0 %v9350_v17  ;;  %v3208_v34 = vsel %vm11045_vm3, %v3175_v5, %v11304_v33  ;;  %v4751_v33 = vld [vmem:[%s11039_s5 + $0x1b8] sm:$0xff] }
 0x474   : > { %v9472_v14 = vpop.permute.xlu1 %2560  ;;  %5088 = vmatpush1.msra.mxu0 %v4732_v32  ;;  %v11305_v32 = vld [vmem:[#allocation105_spill] sm:$0xff] }
 0x475   : > { %3860 = vrot.lane.b32.xlu0 %v3768_v2, %s6566_s18  ;;  %5089 = vmatprep.subr.mxu0 %v9350_v17 }
 0x476   : > { %3862 = vrot.lane.b32.xlu1 %v3769_v52, %s6566_s18  ;;  %5090 = vmatpush1.msra.mxu0 %v4731_v6  ;;  %v3241_v52 = vsel %vm3216_vm4, %v3208_v34, %v11305_v32  ;;  %v970_v6 = vld [vmem:[#allocation2 + $0x182] sm:$0xff] }
 0x477   : > { %v9482_v51 = vpop.permute.xlu0 %2686  ;;  %5091 = vmatprep.subr.mxu0 %v9350_v17 }
 0x478   : > { %v9488_v46 = vpop.permute.xlu1 %1794  ;;  %5092 = vmatpush1.msra.mxu0 %v4730_v0  ;;  %v3274_v0 = vsel %vm3249_vm5, %v3241_v52, %v9267_v38  ;;  %v1035_v52 = vld [vmem:[#allocation2 + $0x198] sm:$0xff] }
 0x479   : > { %1802 = vrot.lane.b32.xlu0 %v9324_v59, %s6555_s19  ;;  %v4423_v15 = vld [vmem:[#allocation4 + $0xc0] sm:$0xff]  ;;  %v4729_v59 = vld [vmem:[%s11039_s5 + $0x108] sm:$0xff]  ;;  %5093 = vmatprep.subr.mxu0 %v9350_v17 }
 0x47a   : > { %v9493_v18 = vpop.f32.mrf.mxu1  ;;  %4985 = vmatmul.mubr.f32.gmra.mxu1 %v4423_v15  ;;  %1804 = vrot.lane.b32.xlu1 %v9340_v9, %s6555_s19  ;;  %v4424_v11 = vld [vmem:[#allocation4 + $0xc8] sm:$0xff]  ;;  %v4728_v9 = vld [vmem:[%s11039_s5 + $0x100] sm:$0xff]  ;;  %v4754_v15 = vld [vmem:[%s11039_s5 + $0x1d0] sm:$0xff] }
 0x47b   : > { %11300 = vst [vmem:[#allocation88_spill] sm:$0xff] %v9493_v18  ;;  %v9500_v13 = vpop.permute.xlu0 %2688  ;;  %4989 = vmatprep.mubr.f32.mxu1 %v4357_v58  ;;  %5094 = vmatpush1.msra.mxu0 %v4729_v59  ;;  %v971_v59 = vld [vmem:[#allocation2 + $0x18a] sm:$0xff] }
 0x47c   : > { %v4948_v39 = vpop.f32.mrf.mxu1  ;;  %v9506_v48 = vpop.permute.xlu1 %2814  ;;  %5095 = vmatprep.subr.mxu0 %v9350_v17 }
 0x47d   : > { %1930 = vrot.lane.b32.xlu0 %v9360_v16, %s6556_s20  ;;  %v4759_v16 = vld [vmem:[%s11039_s5 + $0x1f8] sm:$0xff]  ;;  %5096 = vmatpush1.msra.mxu0 %v4728_v9 }
 0x47e   : > { %v9510_v47 = vpop.f32.mrf.mxu1  ;;  %4990 = vmatmul.mubr.f32.gmra.mxu1 %v4424_v11  ;;  %1932 = vrot.lane.b32.xlu1 %v9375_v10, %s6556_s20  ;;  %v4758_v10 = vld [vmem:[%s11039_s5 + $0x1f0] sm:$0xff]  ;;  %v4753_v11 = vld [vmem:[%s11039_s5 + $0x1c8] sm:$0xff]  ;;  %v11307_v9 = vld [vmem:[#allocation26_spill] sm:$0xff] }
 0x47f   : > { %11301 = vst [vmem:[#allocation115_spill] sm:$0xff] %v9510_v47  ;;  %v9518_v24 = vpop.permute.xlu0 %1796  ;;  %5097 = vmatprep.subr.mxu0 %v9350_v17  ;;  %v10475_v47 = vld [vmem:[#allocation4 + $0x69] sm:$0xff] }
 0x480   : > { %v4953_v23 = vpop.f32.mrf.mxu1  ;;  %v9524_v41 = vpop.permute.xlu1 %1922  ;;  %5098 = vmatpush2.msra.mxu0 %v4759_v16  ;;  %v11308_v16 = vld [vmem:[#allocation53_spill] sm:$0xff] }
 0x481   : > { %2058 = vrot.lane.b32.xlu0 %v9389_v8, %s6557_s21  ;;  %5099 = vmatprep.subr.mxu0 %v9350_v17  ;;  %v4757_v8 = vld [vmem:[%s11039_s5 + $0x1e8] sm:$0xff] }
 0x482   : > { %2060 = vrot.lane.b32.xlu1 %v9403_v37, %s6557_s21  ;;  %5100 = vmatpush2.msra.mxu0 %v4758_v10  ;;  %v4756_v37 = vld [vmem:[%s11039_s5 + $0x1e0] sm:$0xff] }
 0x483   : > { %v9534_v26 = vpop.permute.xlu0 %2816  ;;  %5101 = vmatprep.subr.mxu0 %v9350_v17 }
 0x484   : > { %v9540_v58 = vpop.permute.xlu1 %2942  ;;  %5102 = vmatpush2.msra.mxu0 %v4757_v8  ;;  %v4752_v8 = vld [vmem:[%s11039_s5 + $0x1c0] sm:$0xff] }
 0x485   : > { %2186 = vrot.lane.b32.xlu0 %v9418_v22, %s6558_s22  ;;  %5103 = vmatprep.subr.mxu0 %v9350_v17  ;;  %v4755_v22 = vld [vmem:[%s11039_s5 + $0x1d8] sm:$0xff] }
 0x486   : > { %2188 = vrot.lane.b32.xlu1 %v9430_v30, %s6558_s22  ;;  %5104 = vmatpush2.msra.mxu0 %v4756_v37  ;;  %v645_v30 = vld [vmem:[#allocation2 + $0x128] sm:$0xff]  ;;  %s10890_s22 = scalar_lea.vmem %s11042_s8, %s6901_s30 }
 0x487   : > { %v9552_v40 = vpop.permute.xlu0 %1924  ;;  %5105 = vmatprep.subr.mxu0 %v9350_v17  ;;  %v3143_v23 = vsel %vm326_vm0, %v645_v30, %v11307_v9  ;;  %v11309_v37 = vld [vmem:[#allocation80_spill] sm:$0xff] }
 0x488   : > { %v9562_v2 = vpop.permute.xlu1 %2050  ;;  %5106 = vmatpush2.msra.mxu0 %v4755_v22  ;;  %v1003_v22 = vld [vmem:[#allocation3 + $0x18a] sm:$0xff] }
 0x489   : > { %2314 = vrot.lane.b32.xlu0 %v9442_v43, %s6559_s23  ;;  %v3307_v43 = vsel %vm11306_vm6, %v3274_v0, %v9283_v44  ;;  %5107 = vmatprep.subr.mxu0 %v9350_v17  ;;  %v3176_v44 = vsel %vm3150_vm2, %v3143_v23, %v11308_v16  ;;  %v1036_v0 = vld [vmem:[#allocation2 + $0x1a0] sm:$0xff] }
 0x48a   : > { %2316 = vrot.lane.b32.xlu1 %v9452_v45, %s6559_s23  ;;  %v3340_v38 = vsel %vm3315_vm7, %v3307_v43, %v9303_v28  ;;  %5108 = vmatpush2.msra.mxu0 %v4754_v15  ;;  %v3209_v28 = vsel %vm11045_vm3, %v3176_v44, %v11309_v37  ;;  %v4748_v23 = vld [vmem:[%s11039_s5 + $0x1a0] sm:$0xff]  ;;  %v4747_v44 = vld [vmem:[%s11039_s5 + $0x198] sm:$0xff] }
 0x48b   : > { %v9576_v39 = vpop.permute.xlu0 %2944  ;;  %v3373_v10 = vsel %vm3348_vm8, %v3340_v38, %v9346_v42  ;;  %5109 = vmatprep.subr.mxu0 %v9350_v17  ;;  %v3242_v42 = vsel %vm3216_vm4, %v3209_v28, %v11310_v63  ;;  %v1069_v38 = vld [vmem:[#allocation3 + $0x1a0] sm:$0xff] }
 0x48c   : > { %v3071_v45 = vpop.permute.xlu1 %3070  ;;  %v3406_v35 = vsel %vm3381_vm9, %v3373_v10, %v9408_v1  ;;  %5110 = vmatpush2.msra.mxu0 %v4753_v11  ;;  %v3275_v1 = vsel %vm3249_vm5, %v3242_v42, %v9281_v3  ;;  %v4750_v3 = vld [vmem:[%s11039_s5 + $0x1b0] sm:$0xff]  ;;  %v1068_v11 = vld [vmem:[#allocation3 + $0x198] sm:$0xff] }
 0x48d   : > { %2442 = vrot.lane.b32.xlu0 %v970_v6, %s6560_s24  ;;  %v3439_v5 = vsel %vm3414_vm10, %v3406_v35, %v9446_v57  ;;  %5111 = vmatprep.subr.mxu0 %v9350_v17  ;;  %v3308_v57 = vsel %vm11306_vm6, %v3275_v1, %v9295_v25  ;;  %vm11311_vm6 = vcmask 588800   ;;  %v1101_v42 = vld [vmem:[#allocation2 + $0x1a1] sm:$0xff]  ;;  %v1132_v1 = vld [vmem:[#allocation3 + $0x199] sm:$0xff] }
 0x48e   : > { %2444 = vrot.lane.b32.xlu1 %v971_v59, %s6560_s24  ;;  %v3472_v34 = vsel %vm3447_vm11, %v3439_v5, %v9464_v61  ;;  %5112 = vmatpush2.msra.mxu0 %v4752_v8  ;;  %v3341_v61 = vsel %vm3315_vm7, %v3308_v57, %v9331_v56 }
 0x48f   : > { %v9602_v50 = vpop.permute.xlu0 %2052  ;;  %v3505_v32 = vsel %vm3480_vm12, %v3472_v34, %v9482_v51  ;;  %5113 = vmatprep.subr.mxu0 %v9350_v17  ;;  %v3374_v25 = vsel %vm3348_vm8, %v3341_v61, %v9395_v20  ;;  %v1165_v61 = vld [vmem:[#allocation2 + $0x1a2] sm:$0xff] }
 0x490   : > { %v9616_v30 = vpop.permute.xlu1 %2178  ;;  %v3538_v6 = vsel %vm3513_vm13, %v3505_v32, %v9506_v48  ;;  %5114 = vmatpush2.msra.mxu0 %v4751_v33  ;;  %v3407_v43 = vsel %vm3381_vm9, %v3374_v25, %v9433_v49  ;;  %v4749_v48 = vld [vmem:[%s11039_s5 + $0x1a8] sm:$0xff]  ;;  %v1133_v32 = vld [vmem:[#allocation3 + $0x1a1] sm:$0xff] }
 0x491   : > { %2570 = vrot.lane.b32.xlu0 %v1002_v36, %s6561_s25  ;;  %v3571_v51 = vsel %vm3546_vm14, %v3538_v6, %v9540_v58  ;;  %5115 = vmatprep.subr.mxu0 %v9350_v17  ;;  %v3440_v20 = vsel %vm3414_vm10, %v3407_v43, %v9454_v12  ;;  %v1100_v36 = vld [vmem:[#allocation2 + $0x199] sm:$0xff] }
 0x492   : > { %2572 = vrot.lane.b32.xlu1 %v1003_v22, %s6561_s25  ;;  %v3604_v56 = vsel %vm3579_vm15, %v3571_v51, %v3071_v45  ;;  %5116 = vmatpush2.msra.mxu0 %v4750_v3  ;;  %v3473_v49 = vsel %vm3447_vm11, %v3440_v20, %v9472_v14  ;;  %v3771_v51 = vsel %vm326_vm0, %v1165_v61, %v9157_v31  ;;  %v11321_v61 = vld [vmem:[#allocation82_spill] sm:$0xff] }
 0x493   : > { %v3073_v15 = vpop.permute.xlu0 %3072  ;;  %5117 = vmatprep.subr.mxu0 %v9350_v17  ;;  %v3506_v12 = vsel %vm3480_vm12, %v3473_v49, %v9500_v13 }
 0x494   : > { %v3853_v59 = vpop.permute.xlu1 %3852  ;;  %5118 = vmatpush2.msra.mxu0 %v4749_v48  ;;  %v3539_v45 = vsel %vm3513_vm13, %v3506_v12, %v9534_v26 }
 0x495   : > { %2698 = vrot.lane.b32.xlu0 %v1035_v52, %s6562_s26  ;;  %v3925_v58 = vsel %vm3900_vm1, %v3604_v56, %v3853_v59  ;;  %5119 = vmatprep.subr.mxu0 %v9350_v17  ;;  %v3572_v10 = vsel %vm3546_vm14, %v3539_v45, %v9576_v39  ;;  %v4746_v39 = vld [vmem:[%s11039_s5 + $0x190] sm:$0xff]  ;;  %v1164_v52 = vld [vmem:[#allocation2 + $0x19a] sm:$0xff] }
 0x496   : > { %2700 = vrot.lane.b32.xlu1 %v1036_v0, %s6562_s26  ;;  %6369 = vmatprep.mubr.msk.f32.mxu0 %vm11311_vm6, %v3925_v58  ;;  %v3605_v26 = vsel %vm3579_vm15, %v3572_v10, %v3073_v15  ;;  %v3770_v15 = vsel %vm326_vm0, %v1164_v52, %v9141_v27 }
 0x497   : > { %v9651_v9 = vpop.permute.xlu0 %2180  ;;  %5120 = vmatpush2.msra.mxu0 %v4748_v23 }
 0x498   : > { %v9661_v16 = vpop.permute.xlu1 %2306  ;;  %5121 = vmatprep.subr.mxu0 %v9350_v17 }
 0x499   : > { %2826 = vrot.lane.b32.xlu0 %v1068_v11, %s6563_s28  ;;  %v6359_v14 = vpop.f32.mrf.mxu0  ;;  %5122 = vmatpush2.msra.mxu0 %v4747_v44 }
 0x49a   : > { %v4288_v13 = vmul.f32 %v9103_v19, %v6359_v14  ;;  %2828 = vrot.lane.b32.xlu1 %v1069_v38, %s6563_s28  ;;  %5123 = vmatprep.subr.mxu0 %v9350_v17  ;;  %v646_v38 = vld [vmem:[#allocation2 + $0x138] sm:$0xff]  ;;  %v11314_v14 = vld [vmem:[#allocation25_spill] sm:$0xff] }
 0x49b   : > { %v3855_v8 = vpop.permute.xlu0 %3854  ;;  %v4185_v37 = vpop.f32.mrf.mxu0  ;;  %5124 = vmatpush2.msra.mxu0 %v4746_v39  ;;  %v3144_v44 = vsel %vm326_vm0, %v646_v38, %v11314_v14 }
 0x49c   : > { %v4327_v28 = vadd.f32 %v9112_v62, %v4288_v13  ;;  %v3926_v35 = vsel %vm3900_vm1, %v3605_v26, %v3855_v8  ;;  %v4287_v63 = vmul.f32 %v9103_v19, %v4185_v37  ;;  %v9680_v5 = vpop.permute.xlu1 %2308  ;;  %v4745_v19 = vld [vmem:[%s11039_s5 + $0x188] sm:$0xff]  ;;  %5125 = vmatprep.subr.mxu0 %v9350_v17  ;;  %v11316_v26 = vld [vmem:[#allocation79_spill] sm:$0xff] }
 0x49d   : > { %2954 = vrot.lane.b32.xlu0 %v1100_v36, %s6564_s29  ;;  %6370 = vmatmul.mubr.msk.f32.gmra.mxu0 %vm11311_vm6, %v3926_v35  ;;  %v11315_v13 = vld [vmem:[#allocation52_spill] sm:$0xff]  ;;  %v11317_v35 = vld [vmem:[#allocation107_spill] sm:$0xff]  ;;  %vm11318_vm6 = vcmask 195584  }
 0x49e   : > { %v4359_v22 = vmax.f32 %v4327_v28, 0.0  ;;  %v4326_v33 = vadd.f32 %v9112_v62, %v4287_v63  ;;  %2956 = vrot.lane.b32.xlu1 %v1101_v42, %s6564_s29  ;;  %v4744_v62 = vld [vmem:[%s11039_s5 + $0x180] sm:$0xff]  ;;  %5126 = vmatpush2.msra.mxu0 %v4745_v19  ;;  %v3177_v36 = vsel %vm3150_vm2, %v3144_v44, %v11315_v13 }
 0x49f   : > { %v2435_v34 = vpop.permute.xlu0 %2434  ;;  %5127 = vmatprep.subr.mxu0 %v9350_v17  ;;  %v3210_v8 = vsel %vm11045_vm3, %v3177_v36, %v11316_v26  ;;  %v647_v28 = vld [vmem:[#allocation2 + $0x140] sm:$0xff] }
 0x4a0   : > { %4392 = vst [vmem:[#allocation4 + $0xe1] sm:$0xff] %v4359_v22  ;;  %v4358_v57 = vmax.f32 %v4326_v33, 0.0  ;;  %v9694_v3 = vpop.permute.xlu1 %2436  ;;  %5128 = vmatpush2.msra.mxu0 %v4744_v62  ;;  %v3243_v63 = vsel %vm3216_vm4, %v3210_v8, %v11317_v35  ;;  %v11319_v33 = vld [vmem:[#allocation28_spill] sm:$0xff] }
 0x4a1   : > { %3082 = vrot.lane.b32.xlu0 %v1132_v1, %s6565_s17  ;;  %5515 = vmatprep.subr.mxu0 %v9350_v17  ;;  %v3276_v42 = vsel %vm3249_vm5, %v3243_v63, %v9488_v46  ;;  %v3145_v1 = vsel %vm326_vm0, %v647_v28, %v11319_v33  ;;  %v9783_v63 = vld [vmem:[%s11037_s3] ss:$0 sm:$0xff] }
 0x4a2   : > { %4391 = vst [vmem:[#allocation4 + $0xd9] sm:$0xff] %v4358_v57  ;;  %4994 = vmatprep.mubr.f32.mxu1 %v4358_v57  ;;  %3084 = vrot.lane.b32.xlu1 %v1133_v32, %s6565_s17  ;;  %v11320_v32 = vld [vmem:[#allocation55_spill] sm:$0xff] }
 0x4a3   : > { %v2563_v6 = vpop.permute.xlu0 %2562  ;;  %v3178_v62 = vsel %vm3150_vm2, %v3145_v1, %v11320_v32 }
 0x4a4   : > { %v2565_v25 = vpop.permute.xlu1 %2564  ;;  %v3211_v46 = vsel %vm11045_vm3, %v3178_v62, %v11321_v61 }
 0x4a5   : > { %3864 = vrot.lane.b32.xlu0 %v3770_v15, %s6566_s18 }
 0x4a6   : > { %3866 = vrot.lane.b32.xlu1 %v3771_v51, %s6566_s18  ;;  %v11322_v51 = vld [vmem:[#allocation110_spill] sm:$0xff] }
 0x4a7   : > { %v2691_v0 = vpop.permute.xlu0 %2690 }
 0x4a8   : > { %v9706_v43 = vpop.permute.xlu1 %1798 }
 0x4a9   : > { %v9708_v56 = vld [vmem:[#allocation4 + $0xd8] sm:$0xff]  ;;  %v9713_v58 = vld [vmem:[#allocation4 + $0xe0] sm:$0xff] }
 0x4aa   : > { %v9710_v59 = vpop.f32.mrf.mxu1  ;;  %4995 = vmatmul.mubr.f32.gmra.mxu1 %v9708_v56 }
 0x4ab   : > { %11312 = vst [vmem:[#allocation125_spill] sm:$0xff] %v9710_v59  ;;  %v2693_v27 = vpop.permute.xlu0 %2692  ;;  %4999 = vmatprep.mubr.f32.mxu1 %v4359_v22  ;;  %v3309_v22 = vsel %vm11318_vm6, %v3276_v42, %v9524_v41 }
 0x4ac   : > { %v4958_v48 = vpop.f32.mrf.mxu1  ;;  %v2819_v20 = vpop.permute.xlu1 %2818  ;;  %v3342_v19 = vsel %vm3315_vm7, %v3309_v22, %v9562_v2 }
 0x4ad   : > { %v3375_v52 = vsel %vm3348_vm8, %v3342_v19, %v9616_v30  ;;  %v3244_v48 = vsel %vm3216_vm4, %v3211_v46, %v11322_v51 }
 0x4ae   : > { %v9715_v11 = vpop.f32.mrf.mxu1  ;;  %5000 = vmatmul.mubr.f32.gmra.mxu1 %v9713_v58  ;;  %v3408_v15 = vsel %vm3381_vm9, %v3375_v52, %v9661_v16 }
 0x4af   : > { %11313 = vst [vmem:[#allocation5_spill] sm:$0xff] %v9715_v11  ;;  %v9718_v31 = vpop.permute.xlu0 %1800  ;;  %v3441_v2 = vsel %vm3414_vm10, %v3408_v15, %v2435_v34  ;;  %v648_v15 = vld [vmem:[#allocation2 + $0x150] sm:$0xff] }
 0x4b0   : > { %v4963_v49 = vpop.f32.mrf.mxu1  ;;  %v9720_v23 = vpop.permute.xlu1 %1926  ;;  %v3474_v38 = vsel %vm3447_vm11, %v3441_v2, %v2563_v6  ;;  %v11324_v2 = vld [vmem:[#allocation27_spill] sm:$0xff] }
 0x4b1   : > { %v3277_v49 = vsel %vm3249_vm5, %v3244_v48, %v9518_v24  ;;  %v3507_v44 = vsel %vm3480_vm12, %v3474_v38, %v2691_v0  ;;  %v649_v48 = vld [vmem:[#allocation2 + $0x158] sm:$0xff] }
 0x4b2   : > { %v3310_v30 = vsel %vm11318_vm6, %v3277_v49, %v9552_v40  ;;  %v3540_v13 = vsel %vm3513_vm13, %v3507_v44, %v2819_v20  ;;  %vm11323_vm6 = vcmask 588800   ;;  %v3146_v49 = vsel %vm326_vm0, %v648_v15, %v11324_v2  ;;  %v11325_v44 = vld [vmem:[#allocation54_spill] sm:$0xff] }
 0x4b3   : > { %v2821_v12 = vpop.permute.xlu0 %2820  ;;  %v3343_v16 = vsel %vm3315_vm7, %v3310_v30, %v9602_v50 }
 0x4b4   : > { %v2947_v45 = vpop.permute.xlu1 %2946  ;;  %v3376_v34 = vsel %vm3348_vm8, %v3343_v16, %v9651_v9  ;;  %v3179_v16 = vsel %vm3150_vm2, %v3146_v49, %v11325_v44 }
 0x4b5   : > { %v3573_v24 = vsel %vm3546_vm14, %v3540_v13, %v2947_v45  ;;  %v3409_v6 = vsel %vm3381_vm9, %v3376_v34, %v9680_v5 }
 0x4b6   : > { %v3442_v40 = vsel %vm3414_vm10, %v3409_v6, %v9694_v3 }
 0x4b7   : > { %v9724_v10 = vpop.permute.xlu0 %1928  ;;  %v3475_v50 = vsel %vm3447_vm11, %v3442_v40, %v2565_v25 }
 0x4b8   : > { %v9730_v37 = vpop.permute.xlu1 %2054  ;;  %v3508_v9 = vsel %vm3480_vm12, %v3475_v50, %v2693_v27  ;;  %v9790_v27 = vld [vmem:[%s11038_s4] ss:$0 sm:$0xff] }
 0x4b9   : > { %v3541_v45 = vsel %vm3513_vm13, %v3508_v9, %v2821_v12 }
 0x4bb   : > { %v2949_v39 = vpop.permute.xlu0 %2948 }
 0x4bc   : > { %v3075_v57 = vpop.permute.xlu1 %3074  ;;  %v3574_v5 = vsel %vm3546_vm14, %v3541_v45, %v2949_v39  ;;  %v11331_v45 = vld [vmem:[#allocation84_spill] sm:$0xff] }
 0x4bd   : > { %v3606_v26 = vsel %vm3579_vm15, %v3573_v24, %v3075_v57  ;;  %v11328_v24 = vld [vmem:[#allocation81_spill] sm:$0xff] }
 0x4be   : > { %v3212_v6 = vsel %vm11045_vm3, %v3179_v16, %v11328_v24 }
 0x4bf   : > { %v9750_v41 = vpop.permute.xlu0 %2056 }
 0x4c0   : > { %v9758_v14 = vpop.permute.xlu1 %2182 }
 0x4c3   : > { %v3077_v36 = vpop.permute.xlu0 %3076 }
 0x4c4   : > { %v3857_v8 = vpop.permute.xlu1 %3856  ;;  %v3607_v25 = vsel %vm3579_vm15, %v3574_v5, %v3077_v36  ;;  %v11327_v36 = vld [vmem:[#allocation30_spill] sm:$0xff] }
 0x4c5   : > { %v3927_v0 = vsel %vm3900_vm1, %v3606_v26, %v3857_v8  ;;  %v3147_v34 = vsel %vm326_vm0, %v649_v48, %v11327_v36  ;;  %v11329_v8 = vld [vmem:[#allocation57_spill] sm:$0xff] }
 0x4c6   : > { %6372 = vmatprep.mubr.msk.f32.mxu0 %vm11323_vm6, %v3927_v0  ;;  %v3180_v40 = vsel %vm3150_vm2, %v3147_v34, %v11329_v8  ;;  %v11330_v0 = vld [vmem:[#allocation109_spill] sm:$0xff] }
 0x4c7   : > { %v2185_v20 = vpop.permute.xlu0 %2184  ;;  %v3245_v50 = vsel %vm3216_vm4, %v3212_v6, %v11330_v0  ;;  %v4772_v6 = vld [vmem:[%s11039_s5 + $0x260] sm:$0xff] }
 0x4c8   : > { %v2311_v28 = vpop.permute.xlu1 %2310  ;;  %v3278_v5 = vsel %vm3249_vm5, %v3245_v50, %v9706_v43  ;;  %v4771_v50 = vld [vmem:[%s11039_s5 + $0x258] sm:$0xff] }
 0x4c9   : > { %v6362_v35 = vpop.f32.mrf.mxu0 }
 0x4ca   : > { %v4290_v3 = vmul.f32 %v9783_v63, %v6362_v35  ;;  %v3213_v35 = vsel %vm11045_vm3, %v3180_v40, %v11331_v45 }
 0x4cb   : > { %v3859_v42 = vpop.permute.xlu0 %3858  ;;  %v4195_v22 = vpop.f32.mrf.mxu0 }
 0x4cc   : > { %v4329_v12 = vadd.f32 %v9790_v27, %v4290_v3  ;;  %v3928_v39 = vsel %vm3900_vm1, %v3607_v25, %v3859_v42  ;;  %v4289_v33 = vmul.f32 %v9783_v63, %v4195_v22  ;;  %v2313_v1 = vpop.permute.xlu1 %2312  ;;  %v11332_v42 = vld [vmem:[#allocation112_spill] sm:$0xff] }
 0x4cd   : > { %6373 = vmatmul.mubr.msk.f32.gmra.mxu0 %vm11323_vm6, %v3928_v39  ;;  %v3246_v22 = vsel %vm3216_vm4, %v3213_v35, %v11332_v42  ;;  %vm11333_vm6 = vcmask 195584   ;;  %v4770_v35 = vld [vmem:[%s11039_s5 + $0x250] sm:$0xff]  ;;  %v4769_v42 = vld [vmem:[%s11039_s5 + $0x248] sm:$0xff] }
 0x4ce   : > { %v4361_v19 = vmax.f32 %v4329_v12, 0.0  ;;  %v4328_v57 = vadd.f32 %v9790_v27, %v4289_v33  ;;  %v3311_v12 = vsel %vm11333_vm6, %v3278_v5, %v9720_v23  ;;  %v3279_v33 = vsel %vm3249_vm5, %v3246_v22, %v9718_v31  ;;  %vm11335_vm3 = vmmov %vm11333_vm6 }
 0x4cf   : > { %v2439_v32 = vpop.permute.xlu0 %2438 }
 0x4d0   : > { %4394 = vst [vmem:[#allocation4 + $0xf9] sm:$0xff] %v4361_v19  ;;  %v4360_v62 = vmax.f32 %v4328_v57, 0.0  ;;  %v2441_v52 = vpop.permute.xlu1 %2440  ;;  %v3312_v57 = vsel %vm11335_vm3, %v3279_v33, %v9724_v10  ;;  %vm11336_vm3 = vcmask 588800   ;;  %v4768_v33 = vld [vmem:[%s11039_s5 + $0x240] sm:$0xff] }
 0x4d1   : > { %v3345_v23 = vsel %vm3315_vm7, %v3312_v57, %v9750_v41  ;;  %v4775_v41 = vld [vmem:[%s11039_s5 + $0x278] sm:$0xff]  ;;  %vm11337_vm6 = vmmov %vm11336_vm3 }
 0x4d2   : > { %4393 = vst [vmem:[#allocation4 + $0xf1] sm:$0xff] %v4360_v62  ;;  %5004 = vmatprep.mubr.f32.mxu1 %v4360_v62  ;;  %v3378_v49 = vsel %vm3348_vm8, %v3345_v23, %v2185_v20  ;;  %5291 = vmatpush1.msra.mxu1 %v4775_v41  ;;  %v4767_v57 = vld [vmem:[%s11039_s5 + $0x238] sm:$0xff]  ;;  %v4765_v41 = vld [vmem:[%s11039_s5 + $0x228] sm:$0xff] }
 0x4d3   : > { %v2567_v61 = vpop.permute.xlu0 %2566  ;;  %5292 = vmatprep.subr.mxu1 %v9350_v17 }
 0x4d4   : > { %v2569_v46 = vpop.permute.xlu1 %2568 }
 0x4d7   : > { %v2695_v51 = vpop.permute.xlu0 %2694 }
 0x4d8   : > { %v2697_v38 = vpop.permute.xlu1 %2696 }
 0x4d9   : > { %v9799_v30 = vld [vmem:[#allocation4 + $0xf0] sm:$0xff]  ;;  %v9818_v25 = vld [vmem:[#allocation4 + $0xf8] sm:$0xff] }
 0x4da   : > { %v9803_v13 = vpop.f32.mrf.mxu1  ;;  %5005 = vmatmul.mubr.f32.gmra.mxu1 %v9799_v30 }
 0x4db   : > { %11326 = vst [vmem:[#allocation32_spill] sm:$0xff] %v9803_v13  ;;  %v2823_v26 = vpop.permute.xlu0 %2822  ;;  %5009 = vmatprep.mubr.f32.mxu1 %v4361_v19  ;;  %v3344_v19 = vsel %vm3315_vm7, %v3311_v12, %v9730_v37  ;;  %v3411_v37 = vsel %vm3381_vm9, %v3378_v49, %v2313_v1  ;;  %v6540_v13 = vld [vmem:[%s11038_s4] ss:$0 sm:$0xff] }
 0x4dc   : > { %v4968_v9 = vpop.f32.mrf.mxu1  ;;  %v2825_v3 = vpop.permute.xlu1 %2824  ;;  %v3377_v62 = vsel %vm3348_vm8, %v3344_v19, %v9758_v14  ;;  %v3444_v10 = vsel %vm3414_vm10, %v3411_v37, %v2441_v52  ;;  %v4774_v52 = vld [vmem:[%s11039_s5 + $0x270] sm:$0xff] }
 0x4dd   : > { %v3410_v48 = vsel %vm3381_vm9, %v3377_v62, %v2311_v28  ;;  %v3477_v28 = vsel %vm3447_vm11, %v3444_v10, %v2569_v46  ;;  %5293 = vmatpush1.msra.mxu1 %v4774_v52  ;;  %v4766_v37 = vld [vmem:[%s11039_s5 + $0x230] sm:$0xff] }
 0x4de   : > { %v9824_v39 = vpop.f32.mrf.mxu1  ;;  %5010 = vmatmul.mubr.f32.gmra.mxu1 %v9818_v25  ;;  %v3443_v31 = vsel %vm3414_vm10, %v3410_v48, %v2439_v32  ;;  %v3510_v32 = vsel %vm3480_vm12, %v3477_v28, %v2697_v38  ;;  %5294 = vmatprep.subr.mxu1 %v9350_v17  ;;  %v4764_v28 = vld [vmem:[%s11039_s5 + $0x220] sm:$0xff]  ;;  %v651_v52 = vld [vmem:[#allocation2 + $0x170] sm:$0xff] }
 0x4df   : > { %11334 = vst [vmem:[#allocation128_spill] sm:$0xff] %v9824_v39  ;;  %v2951_v43 = vpop.permute.xlu0 %2950  ;;  %v3476_v44 = vsel %vm3447_vm11, %v3443_v31, %v2567_v61  ;;  %v4773_v61 = vld [vmem:[%s11039_s5 + $0x268] sm:$0xff]  ;;  %v3543_v46 = vsel %vm3513_vm13, %v3510_v32, %v2825_v3 }
 0x4e0   : > { %v4973_v15 = vpop.f32.mrf.mxu1  ;;  %v2953_v2 = vpop.permute.xlu1 %2952  ;;  %v3509_v14 = vsel %vm3480_vm12, %v3476_v44, %v2695_v51  ;;  %5295 = vmatpush1.msra.mxu1 %v4773_v61  ;;  %v650_v32 = vld [vmem:[#allocation2 + $0x168] sm:$0xff]  ;;  %v11338_v61 = vld [vmem:[#allocation29_spill] sm:$0xff] }
 0x4e1   : > { %v3542_v36 = vsel %vm3513_vm13, %v3509_v14, %v2823_v26  ;;  %v3576_v38 = vsel %vm3546_vm14, %v3543_v46, %v2953_v2  ;;  %5296 = vmatprep.subr.mxu1 %v9350_v17  ;;  %v3148_v46 = vsel %vm326_vm0, %v650_v32, %v11338_v61  ;;  %v10467_v39 = vld [vmem:[%s11039_s5 + $0x408] sm:$0xff] }
 0x4e2   : > { %v3575_v1 = vsel %vm3546_vm14, %v3542_v36, %v2951_v43  ;;  %5297 = vmatpush1.msra.mxu1 %v4772_v6  ;;  %v11341_v6 = vld [vmem:[#allocation31_spill] sm:$0xff] }
 0x4e3   : > { %v3079_v16 = vpop.permute.xlu0 %3078  ;;  %5298 = vmatprep.subr.mxu1 %v9350_v17 }
 0x4e4   : > { %v3081_v20 = vpop.permute.xlu1 %3080  ;;  %v3608_v51 = vsel %vm3579_vm15, %v3575_v1, %v3079_v16  ;;  %5299 = vmatpush1.msra.mxu1 %v4771_v50 }
 0x4e5   : > { %v3609_v26 = vsel %vm3579_vm15, %v3576_v38, %v3081_v20  ;;  %5300 = vmatprep.subr.mxu1 %v9350_v17 }
 0x4e6   : > { %5301 = vmatpush1.msra.mxu1 %v4770_v35  ;;  %v11344_v35 = vld [vmem:[#allocation58_spill] sm:$0xff] }
 0x4e7   : > { %v3861_v34 = vpop.permute.xlu0 %3860  ;;  %5302 = vmatprep.subr.mxu1 %v9350_v17 }
 0x4e8   : > { %v3929_v24 = vsel %vm3900_vm1, %v3608_v51, %v3861_v34  ;;  %v3863_v8 = vpop.permute.xlu1 %3862  ;;  %5303 = vmatpush1.msra.mxu1 %v4769_v42  ;;  %v11339_v34 = vld [vmem:[#allocation56_spill] sm:$0xff]  ;;  %v11345_v42 = vld [vmem:[#allocation111_spill] sm:$0xff] }
 0x4e9   : > { %6375 = vmatprep.mubr.msk.f32.mxu0 %vm11336_vm3, %v3929_v24  ;;  %v3930_v40 = vsel %vm3900_vm1, %v3609_v26, %v3863_v8  ;;  %5304 = vmatprep.subr.mxu1 %v9350_v17  ;;  %v3181_v38 = vsel %vm3150_vm2, %v3148_v46, %v11339_v34  ;;  %v3149_v26 = vsel %vm326_vm0, %v651_v52, %v11341_v6  ;;  %v11342_v8 = vld [vmem:[#allocation83_spill] sm:$0xff]  ;;  %vm11343_vm3 = vcmask 97280  }
 0x4ea   : > { %6376 = vmatmul.mubr.msk.f32.gmra.mxu0 %vm11337_vm6, %v3930_v40  ;;  %5305 = vmatpush1.msra.mxu1 %v4768_v33  ;;  %v3214_v40 = vsel %vm11343_vm3, %v3181_v38, %v11342_v8  ;;  %vm11347_vm6 = vmmov %vm11343_vm3  ;;  %vm11349_vm0 = vcmask 195584  }
 0x4eb   : > { %v9870_v0 = vpop.permute.xlu0 %1802  ;;  %5306 = vmatprep.subr.mxu1 %v9350_v17  ;;  %v3247_v33 = vsel %vm3216_vm4, %v3214_v40, %v11345_v42  ;;  %v4760_v42 = vld [vmem:[%s11039_s5 + $0x200] sm:$0xff] }
 0x4ec   : > { %v9877_v9 = vpop.permute.xlu1 %1804  ;;  %5307 = vmatpush1.msra.mxu1 %v4767_v57 }
 0x4ed   : > { %5308 = vmatprep.subr.mxu1 %v9350_v17 }
 0x4ee   : > { %5309 = vmatpush1.msra.mxu1 %v4766_v37  ;;  %v11348_v37 = vld [vmem:[#allocation113_spill] sm:$0xff] }
 0x4ef   : > { %v9880_v45 = vpop.permute.xlu0 %1930  ;;  %5310 = vmatprep.subr.mxu1 %v9350_v17 }
 0x4f0   : > { %v9885_v5 = vpop.permute.xlu1 %1932  ;;  %5311 = vmatpush1.msra.mxu1 %v4765_v41 }
 0x4f1   : > { %5312 = vmatprep.subr.mxu1 %v9350_v17 }
 0x4f2   : > { %5313 = vmatpush1.msra.mxu1 %v4764_v28 }
 0x4f3   : > { %v2059_v3 = vpop.permute.xlu0 %2058  ;;  %5314 = vmatprep.subr.mxu1 %v9350_v17  ;;  %v3182_v17 = vsel %vm3150_vm2, %v3149_v26, %v11344_v35  ;;  %vm11351_vm2 = vmmov %vm11349_vm0  ;;  %v4763_v26 = vld [vmem:[%s11039_s5 + $0x218] sm:$0xff] }
 0x4f4   : > { %v9891_v22 = vpop.permute.xlu1 %2060  ;;  %5315 = vmatpush1.msra.mxu1 %v4763_v26  ;;  %v4799_v26 = vld [vmem:[%s11039_s5 + $0x338] sm:$0xff] }
 0x4f7   : > { %v2187_v12 = vpop.permute.xlu0 %2186 }
 0x4f8   : > { %v9897_v19 = vpop.permute.xlu1 %2188 }
 0x4fb   : > { %v2315_v43 = vpop.permute.xlu0 %2314 }
 0x4fc   : > { %v9903_v62 = vpop.permute.xlu1 %2316 }
 0x4fd   : > { %v6365_v15 = vpop.f32.mrf.mxu0 }
 0x4fe   : > { %v4292_v23 = vmul.f32 %v9783_v63, %v6365_v15  ;;  %v11346_v15 = vld [vmem:[#allocation85_spill] sm:$0xff] }
 0x4ff   : > { %v2443_v48 = vpop.permute.xlu0 %2442  ;;  %v4205_v2 = vpop.f32.mrf.mxu0 }
 0x500   : > { %v4331_v49 = vadd.f32 %v9790_v27, %v4292_v23  ;;  %v4291_v31 = vmul.f32 %v9783_v63, %v4205_v2  ;;  %v2445_v44 = vpop.permute.xlu1 %2444  ;;  %v3215_v23 = vsel %vm11347_vm6, %v3182_v17, %v11346_v15  ;;  %v3280_v2 = vsel %vm3249_vm5, %v3247_v33, %v9870_v0 }
 0x501   : > { %v3313_v41 = vsel %vm11349_vm0, %v3280_v2, %v9880_v45  ;;  %v4471_v2 = vld [vmem:[#allocation4 + $0x2] sm:$0xff] }
 0x502   : > { %v4363_v16 = vmax.f32 %v4331_v49, 0.0  ;;  %v4330_v10 = vadd.f32 %v9790_v27, %v4291_v31  ;;  %v3346_v32 = vsel %vm3315_vm7, %v3313_v41, %v2059_v3  ;;  %v4806_v41 = vld [vmem:[%s11039_s5 + $0x370] sm:$0xff] }
 0x503   : > { %v2571_v14 = vpop.permute.xlu0 %2570  ;;  %v3379_v61 = vsel %vm3348_vm8, %v3346_v32, %v2187_v12  ;;  %v4790_v32 = vld [vmem:[%s11039_s5 + $0x2f0] sm:$0xff] }
 0x504   : > { %4396 = vst [vmem:[#allocation4 + $0x111] sm:$0xff] %v4363_v16  ;;  %v4362_v36 = vmax.f32 %v4330_v10, 0.0  ;;  %v2573_v20 = vpop.permute.xlu1 %2572  ;;  %v3248_v10 = vsel %vm3216_vm4, %v3215_v23, %v11348_v37  ;;  %v3412_v34 = vsel %vm3381_vm9, %v3379_v61, %v2315_v43  ;;  %vm11352_vm4 = vcmask 588800   ;;  %v4503_v23 = vld [vmem:[#allocation4 + $0x18] sm:$0xff]  ;;  %v4804_v61 = vld [vmem:[%s11039_s5 + $0x360] sm:$0xff] }
 0x505   : > { %v3445_v3 = vsel %vm3414_vm10, %v3412_v34, %v2443_v48  ;;  %v4807_v37 = vld [vmem:[%s11039_s5 + $0x378] sm:$0xff] }
 0x506   : > { %4395 = vst [vmem:[#allocation4 + $0x109] sm:$0xff] %v4362_v36  ;;  %5014 = vmatprep.mubr.f32.mxu1 %v4362_v36  ;;  %v3281_v36 = vsel %vm3249_vm5, %v3248_v10, %v9877_v9  ;;  %v3478_v12 = vsel %vm3447_vm11, %v3445_v3, %v2571_v14  ;;  %v9976_v14 = vld [vmem:[#allocation4] sm:$0xff]  ;;  %vm11353_vm5 = vmmov %vm11352_vm4  ;;  %v4802_v3 = vld [vmem:[%s11039_s5 + $0x350] sm:$0xff] }
 0x507   : > { %v2699_v1 = vpop.permute.xlu0 %2698  ;;  %v3314_v0 = vsel %vm11351_vm2, %v3281_v36, %v9885_v5  ;;  %5316 = vmatprep.subr.mxu1 %v9976_v14  ;;  %v4504_v10 = vld [vmem:[#allocation4 + $0x20] sm:$0xff]  ;;  %v4472_v36 = vld [vmem:[#allocation4 + $0xa] sm:$0xff] }
 0x508   : > { %v2701_v51 = vpop.permute.xlu1 %2700  ;;  %v3347_v45 = vsel %vm3315_vm7, %v3314_v0, %v9891_v22  ;;  %v3511_v43 = vsel %vm3480_vm12, %v3478_v12, %v2699_v1  ;;  %v10017_v0 = vld [vmem:[#allocation4 + $0x30] sm:$0xff]  ;;  %v10031_v34 = vld [vmem:[#allocation4 + $0x1a] sm:$0xff]  ;;  %v10049_v12 = vld [vmem:[#allocation4 + $0x22] sm:$0xff] }
 0x509   : > { %v3380_v9 = vsel %vm3348_vm8, %v3347_v45, %v9897_v19  ;;  %v4803_v45 = vld [vmem:[%s11039_s5 + $0x358] sm:$0xff] }
 0x50a   : > { %v9926_v24 = vpop.f32.mrf.mxu1  ;;  %v3413_v5 = vsel %vm3381_vm9, %v3380_v9, %v9903_v62  ;;  %v10038_v9 = vld [vmem:[#allocation4 + $0x38] sm:$0xff] }
 0x50b   : > { %11340 = vst [vmem:[#allocation59_spill] sm:$0xff] %v9926_v24  ;;  %v2827_v50 = vpop.permute.xlu0 %2826  ;;  %v3446_v22 = vsel %vm3414_vm10, %v3413_v5, %v2445_v44  ;;  %v4762_v44 = vld [vmem:[%s11039_s5 + $0x210] sm:$0xff]  ;;  %v4801_v5 = vld [vmem:[%s11039_s5 + $0x348] sm:$0xff] }
 0x50c   : > { %v4978_v57 = vpop.f32.mrf.mxu1  ;;  %v2829_v49 = vpop.permute.xlu1 %2828  ;;  %v3479_v19 = vsel %vm3447_vm11, %v3446_v22, %v2573_v20  ;;  %v3544_v48 = vsel %vm3513_vm13, %v3511_v43, %v2827_v50  ;;  %v4761_v20 = vld [vmem:[%s11039_s5 + $0x208] sm:$0xff]  ;;  %5317 = vmatpush1.msra.mxu1 %v4762_v44  ;;  %v4800_v22 = vld [vmem:[%s11039_s5 + $0x340] sm:$0xff]  ;;  %v4798_v44 = vld [vmem:[%s11039_s5 + $0x330] sm:$0xff] }
 0x50d   : > { %v9940_v31 = vld [vmem:[#allocation4 + $0x108] sm:$0xff]  ;;  %v9958_v6 = vld [vmem:[#allocation4 + $0x110] sm:$0xff]  ;;  %v3512_v40 = vsel %vm3480_vm12, %v3479_v19, %v2701_v51  ;;  %5318 = vmatprep.subr.mxu1 %v9976_v14  ;;  %v4787_v19 = vld [vmem:[%s11039_s5 + $0x2d8] sm:$0xff] }
 0x50e   : > { %v9946_v28 = vpop.f32.mrf.mxu1  ;;  %5015 = vmatmul.mubr.f32.gmra.mxu1 %v9940_v31  ;;  %v3545_v1 = vsel %vm3513_vm13, %v3512_v40, %v2829_v49  ;;  %v4791_v49 = vld [vmem:[%s11039_s5 + $0x2f8] sm:$0xff] }
 0x50f   : > { %11350 = vst [vmem:[#allocation87_spill] sm:$0xff] %v9946_v28  ;;  %v2955_v52 = vpop.permute.xlu0 %2954  ;;  %5019 = vmatprep.mubr.f32.mxu1 %v4363_v16  ;;  %5319 = vmatpush1.msra.mxu1 %v4761_v20  ;;  %v4786_v20 = vld [vmem:[%s11039_s5 + $0x2d0] sm:$0xff] }
 0x510   : > { %v4983_v46 = vpop.f32.mrf.mxu1  ;;  %v2957_v38 = vpop.permute.xlu1 %2956  ;;  %v3577_v62 = vsel %vm3546_vm14, %v3544_v48, %v2955_v52  ;;  %5320 = vmatprep.subr.mxu1 %v9976_v14  ;;  %v4805_v52 = vld [vmem:[%s11039_s5 + $0x368] sm:$0xff] }
 0x511   : > { %v3578_v51 = vsel %vm3546_vm14, %v3545_v1, %v2957_v38  ;;  %5321 = vmatpush1.msra.mxu1 %v4760_v42  ;;  %v4789_v46 = vld [vmem:[%s11039_s5 + $0x2e8] sm:$0xff]  ;;  %v4788_v38 = vld [vmem:[%s11039_s5 + $0x2e0] sm:$0xff] }
 0x512   : > { %5020 = vmatmul.mubr.f32.gmra.mxu1 %v9958_v6  ;;  %5322 = vmatprep.subr.mxu1 %v9976_v14  ;;  %v10083_v42 = vld [vmem:[#allocation4 + $0x3a] sm:$0xff] }
 0x513   : > { %v3083_v16 = vpop.permute.xlu0 %3082  ;;  %5323 = vmatpush2.msra.mxu1 %v4791_v49  ;;  %v4785_v49 = vld [vmem:[%s11039_s5 + $0x2c8] sm:$0xff] }
 0x514   : > { %v3085_v8 = vpop.permute.xlu1 %3084  ;;  %v3610_v50 = vsel %vm3579_vm15, %v3577_v62, %v3083_v16  ;;  %5324 = vmatprep.subr.mxu1 %v9976_v14  ;;  %v4507_v16 = vld [vmem:[#allocation4 + $0x48] sm:$0xff]  ;;  %v4508_v62 = vld [vmem:[#allocation4 + $0x50] sm:$0xff] }
 0x515   : > { %v3611_v33 = vsel %vm3579_vm15, %v3578_v51, %v3085_v8  ;;  %5325 = vmatpush2.msra.mxu1 %v4790_v32  ;;  %v10065_v8 = vld [vmem:[#allocation4 + $0x32] sm:$0xff] }
 0x516   : > { %5326 = vmatprep.subr.mxu1 %v9976_v14  ;;  %v10111_v32 = vld [vmem:[#allocation4 + $0x52] sm:$0xff] }
 0x517   : > { %v3865_v35 = vpop.permute.xlu0 %3864  ;;  %5327 = vmatpush2.msra.mxu1 %v4789_v46  ;;  %v4792_v46 = vld [vmem:[%s11039_s5 + $0x300] sm:$0xff] }
 0x518   : > { %v3931_v17 = vsel %vm3900_vm1, %v3610_v50, %v3865_v35  ;;  %v3867_v57 = vpop.permute.xlu1 %3866  ;;  %5328 = vmatprep.subr.mxu1 %v9976_v14  ;;  %v4797_v35 = vld [vmem:[%s11039_s5 + $0x328] sm:$0xff] }
 0x519   : > { %6378 = vmatprep.mubr.msk.f32.mxu0 %vm11352_vm4, %v3931_v17  ;;  %v3932_v15 = vsel %vm3900_vm1, %v3611_v33, %v3867_v57  ;;  %5329 = vmatpush2.msra.mxu1 %v4788_v38  ;;  %v4509_v33 = vld [vmem:[#allocation4 + $0x60] sm:$0xff] }
 0x51a   : > { %6379 = vmatmul.mubr.msk.f32.gmra.mxu0 %vm11353_vm5, %v3932_v15  ;;  %5330 = vmatprep.subr.mxu1 %v9976_v14  ;;  %v4796_v57 = vld [vmem:[%s11039_s5 + $0x320] sm:$0xff] }
 0x51b   : > { %5129 = vmatprep.mubr.f32.mxu0 %v4503_v23  ;;  %5331 = vmatpush2.msra.mxu1 %v4787_v19  ;;  %v4795_v23 = vld [vmem:[%s11039_s5 + $0x318] sm:$0xff] }
 0x51c   : > { %5332 = vmatprep.subr.mxu1 %v9976_v14 }
 0x51d   : > { %5333 = vmatpush2.msra.mxu1 %v4786_v20  ;;  %v4781_v20 = vld [vmem:[%s11039_s5 + $0x2a8] sm:$0xff] }
 0x51e   : > { %5130 = vmatmul.mubr.f32.vlgmr.msra.gmra.mxu0 %v4471_v2  ;;  %5334 = vmatprep.subr.mxu1 %v9976_v14  ;;  %v10095_v2 = vld [vmem:[#allocation4 + $0x4a] sm:$0xff] }
 0x51f   : > { %5134 = vmatprep.mubr.f32.mxu0 %v4504_v10  ;;  %5516 = vmatpush1.msra.mxu0 %v4807_v37  ;;  %v4510_v37 = vld [vmem:[#allocation4 + $0x68] sm:$0xff]  ;;  %v4794_v10 = vld [vmem:[%s11039_s5 + $0x310] sm:$0xff] }
 0x520   : > { %5517 = vmatprep.subr.mxu0 %v9976_v14  ;;  %5335 = vmatpush2.msra.mxu1 %v4785_v49  ;;  %v4777_v49 = vld [vmem:[%s11039_s5 + $0x288] sm:$0xff] }
 0x521   : > { %5518 = vmatpush1.msra.mxu0 %v4806_v41  ;;  %v4793_v41 = vld [vmem:[%s11039_s5 + $0x308] sm:$0xff]  ;;  %5336 = vmatprep.subr.mxu1 %v9976_v14 }
 0x522   : > { %5135 = vmatmul.mubr.f32.gmra.mxu0 %v4472_v36  ;;  %5519 = vmatprep.subr.mxu0 %v9976_v14 }
 0x523   : > { %5139 = vmatprep.mubr.f32.mxu0 %v10017_v0  ;;  %5520 = vmatpush1.msra.mxu0 %v4805_v52  ;;  %v4784_v52 = vld [vmem:[%s11039_s5 + $0x2c0] sm:$0xff] }
 0x524   : > { %5521 = vmatprep.subr.mxu0 %v9976_v14  ;;  %5337 = vmatpush2.msra.mxu1 %v4784_v52  ;;  %v4516_v52 = vld [vmem:[#allocation4 + $0xb0] sm:$0xff] }
 0x525   : > { %5522 = vmatpush1.msra.mxu0 %v4804_v61  ;;  %v4511_v61 = vld [vmem:[#allocation4 + $0x78] sm:$0xff]  ;;  %5338 = vmatprep.subr.mxu1 %v9976_v14 }
 0x526   : > { %5140 = vmatmul.mubr.f32.gmra.mxu0 %v10031_v34  ;;  %5523 = vmatprep.subr.mxu0 %v9976_v14 }
 0x527   : > { %5144 = vmatprep.mubr.f32.mxu0 %v10038_v9  ;;  %5524 = vmatpush1.msra.mxu0 %v4803_v45 }
 0x528   : > { %5525 = vmatprep.subr.mxu0 %v9976_v14 }
 0x529   : > { %5526 = vmatpush1.msra.mxu0 %v4802_v3 }
 0x52a   : > { %5145 = vmatmul.mubr.f32.gmra.mxu0 %v10049_v12  ;;  %5527 = vmatprep.subr.mxu0 %v9976_v14 }
 0x52b   : > { %5149 = vmatprep.mubr.f32.mxu0 %v4507_v16  ;;  %5528 = vmatpush1.msra.mxu0 %v4801_v5  ;;  %v10128_v5 = vld [vmem:[#allocation4 + $0x62] sm:$0xff]  ;;  %v4823_v16 = vld [vmem:[%s11039_s5 + $0x3f8] sm:$0xff] }
 0x52c   : > { %5529 = vmatprep.subr.mxu0 %v9976_v14 }
 0x52d   : > { %v6368_v43 = vpop.f32.mrf.mxu0  ;;  %5530 = vmatpush1.msra.mxu0 %v4800_v22  ;;  %v4512_v22 = vld [vmem:[#allocation4 + $0x80] sm:$0xff] }
 0x52e   : > { %v4294_v48 = vmul.f32 %v9783_v63, %v6368_v43  ;;  %5150 = vmatmul.mubr.f32.gmra.mxu0 %v10065_v8  ;;  %5531 = vmatprep.subr.mxu0 %v9976_v14 }
 0x52f   : > { %v4215_v40 = vpop.f32.mrf.mxu0  ;;  %5154 = vmatprep.mubr.f32.mxu0 %v4508_v62  ;;  %5532 = vmatpush1.msra.mxu0 %v4799_v26  ;;  %v4783_v26 = vld [vmem:[%s11039_s5 + $0x2b8] sm:$0xff]  ;;  %v4822_v62 = vld [vmem:[%s11039_s5 + $0x3f0] sm:$0xff] }
 0x530   : > { %v4333_v1 = vadd.f32 %v9790_v27, %v4294_v48  ;;  %v4293_v50 = vmul.f32 %v9783_v63, %v4215_v40  ;;  %5533 = vmatprep.subr.mxu0 %v9976_v14  ;;  %v10142_v48 = vld [vmem:[#allocation4 + $0x6a] sm:$0xff]  ;;  %5339 = vmatpush2.msra.mxu1 %v4783_v26  ;;  %v4815_v26 = vld [vmem:[%s11039_s5 + $0x3b8] sm:$0xff] }
 0x531   : > { %5534 = vmatpush1.msra.mxu0 %v4798_v44  ;;  %v4782_v40 = vld [vmem:[%s11039_s5 + $0x2b0] sm:$0xff]  ;;  %5340 = vmatprep.subr.mxu1 %v9976_v14 }
 0x532   : > { %v4365_v51 = vmax.f32 %v4333_v1, 0.0  ;;  %v4332_v17 = vadd.f32 %v9790_v27, %v4293_v50  ;;  %5155 = vmatmul.mubr.f32.gmra.mxu0 %v10083_v42  ;;  %5535 = vmatprep.subr.mxu0 %v9976_v14  ;;  %v4513_v44 = vld [vmem:[#allocation4 + $0x90] sm:$0xff]  ;;  %v10156_v1 = vld [vmem:[#allocation4 + $0x7a] sm:$0xff] }
 0x533   : > { %5159 = vmatprep.mubr.f32.mxu0 %v4509_v33  ;;  %5536 = vmatpush1.msra.mxu0 %v4797_v35  ;;  %v4780_v50 = vld [vmem:[%s11039_s5 + $0x2a0] sm:$0xff]  ;;  %v4821_v35 = vld [vmem:[%s11039_s5 + $0x3e8] sm:$0xff] }
 0x534   : > { %4398 = vst [vmem:[#allocation4 + $0x129] sm:$0xff] %v4365_v51  ;;  %v4364_v15 = vmax.f32 %v4332_v17, 0.0  ;;  %5537 = vmatprep.subr.mxu0 %v9976_v14  ;;  %5341 = vmatpush2.msra.mxu1 %v4782_v40  ;;  %v4779_v17 = vld [vmem:[%s11039_s5 + $0x298] sm:$0xff]  ;;  %v10171_v33 = vld [vmem:[#allocation4 + $0x82] sm:$0xff] }
 0x535   : > { %5538 = vmatpush1.msra.mxu0 %v4796_v57  ;;  %5342 = vmatprep.subr.mxu1 %v9976_v14  ;;  %v4778_v57 = vld [vmem:[%s11039_s5 + $0x290] sm:$0xff]  ;;  %v6538_v40 = vld [vmem:[#allocation4 + $0xc8] sm:$0xff] }
 0x536   : > { %4397 = vst [vmem:[#allocation4 + $0x121] sm:$0xff] %v4364_v15  ;;  %5024 = vmatprep.mubr.f32.mxu1 %v4364_v15  ;;  %5160 = vmatmul.mubr.f32.gmra.mxu0 %v10095_v2  ;;  %v4820_v15 = vld [vmem:[%s11039_s5 + $0x3e0] sm:$0xff] }
 0x537   : > { %5539 = vmatprep.subr.mxu0 %v9976_v14  ;;  %5164 = vmatprep.mubr.f32.mxu0 %v4510_v37  ;;  %v10186_v37 = vld [vmem:[#allocation4 + $0x92] sm:$0xff] }
 0x538   : > { %5540 = vmatpush1.msra.mxu0 %v4795_v23  ;;  %5343 = vmatpush2.msra.mxu1 %v4781_v20  ;;  %v4515_v23 = vld [vmem:[#allocation4 + $0xa8] sm:$0xff] }
 0x539   : > { %5541 = vmatprep.subr.mxu0 %v9976_v14  ;;  %5344 = vmatprep.subr.mxu1 %v9976_v14 }
 0x53a   : > { %v10109_v36 = vpop.f32.mrf.mxu1  ;;  %5542 = vmatpush1.msra.mxu0 %v4794_v10  ;;  %5345 = vmatpush2.msra.mxu1 %v4780_v50  ;;  %v4776_v10 = vld [vmem:[%s11039_s5 + $0x280] sm:$0xff] }
 0x53b   : > { %11354 = vst [vmem:[#allocation116_spill] sm:$0xff] %v10109_v36  ;;  %5165 = vmatmul.mubr.f32.gmra.mxu0 %v10111_v32  ;;  %5543 = vmatprep.subr.mxu0 %v9976_v14  ;;  %v10455_v36 = vld [vmem:[%s11039_s5 + $0x410] sm:$0xff] }
 0x53c   : > { %5169 = vmatprep.mubr.f32.mxu0 %v4511_v61  ;;  %v4988_v45 = vpop.f32.mrf.mxu1  ;;  %5544 = vmatpush1.msra.mxu0 %v4793_v41  ;;  %v4819_v41 = vld [vmem:[%s11039_s5 + $0x3d8] sm:$0xff]  ;;  %v4818_v61 = vld [vmem:[%s11039_s5 + $0x3d0] sm:$0xff] }
 0x53d   : > { %v10122_v38 = vld [vmem:[#allocation4 + $0x120] sm:$0xff]  ;;  %5545 = vmatprep.subr.mxu0 %v9976_v14  ;;  %v10138_v19 = vld [vmem:[#allocation4 + $0x128] sm:$0xff]  ;;  %5346 = vmatprep.subr.mxu1 %v9976_v14 }
 0x53e   : > { %v10125_v3 = vpop.f32.mrf.mxu1  ;;  %5025 = vmatmul.mubr.f32.gmra.mxu1 %v10122_v38  ;;  %5546 = vmatpush1.msra.mxu0 %v4792_v46  ;;  %v10201_v46 = vld [vmem:[#allocation4 + $0x9a] sm:$0xff]  ;;  %v4817_v45 = vld [vmem:[%s11039_s5 + $0x3c8] sm:$0xff] }
 0x53f   : > { %11355 = vst [vmem:[#allocation8_spill] sm:$0xff] %v10125_v3  ;;  %5170 = vmatmul.mubr.f32.gmra.mxu0 %v10128_v5  ;;  %5029 = vmatprep.mubr.f32.mxu1 %v4365_v51  ;;  %v4514_v51 = vld [vmem:[#allocation4 + $0x98] sm:$0xff]  ;;  %v10449_v3 = vld [vmem:[#allocation4 + $0x61] sm:$0xff] }
 0x540   : > { %5174 = vmatprep.mubr.f32.mxu0 %v4512_v22  ;;  %v4993_v43 = vpop.f32.mrf.mxu1  ;;  %5547 = vmatprep.subr.mxu0 %v9976_v14  ;;  %v4816_v22 = vld [vmem:[%s11039_s5 + $0x3c0] sm:$0xff] }
 0x541   : > { %5548 = vmatpush2.msra.mxu0 %v4823_v16  ;;  %5347 = vmatpush2.msra.mxu1 %v4779_v17  ;;  %v6537_v16 = vld [vmem:[#allocation4 + $0xc0] sm:$0xff]  ;;  %v10212_v43 = vld [vmem:[#allocation4 + $0xaa] sm:$0xff] }
 0x542   : > { %5030 = vmatmul.mubr.f32.gmra.mxu1 %v10138_v19  ;;  %5549 = vmatprep.subr.mxu0 %v9976_v14 }
 0x543   : > { %5175 = vmatmul.mubr.f32.gmra.mxu0 %v10142_v48  ;;  %5348 = vmatprep.subr.mxu1 %v9976_v14 }
 0x544   : > { %5179 = vmatprep.mubr.f32.mxu0 %v4513_v44  ;;  %5550 = vmatpush2.msra.mxu0 %v4822_v62  ;;  %v4814_v62 = vld [vmem:[%s11039_s5 + $0x3b0] sm:$0xff] }
 0x545   : > { %5551 = vmatprep.subr.mxu0 %v9976_v14  ;;  %5349 = vmatpush2.msra.mxu1 %v4778_v57  ;;  %v10223_v44 = vld [vmem:[#allocation4 + $0xb2] sm:$0xff] }
 0x546   : > { %5552 = vmatpush2.msra.mxu0 %v4821_v35  ;;  %5350 = vmatprep.subr.mxu1 %v9976_v14  ;;  %v10230_v35 = vld [vmem:[#allocation4 + $0xc2] sm:$0xff] }
 0x547   : > { %5180 = vmatmul.mubr.f32.gmra.mxu0 %v10156_v1  ;;  %5553 = vmatprep.subr.mxu0 %v9976_v14 }
 0x548   : > { %5184 = vmatprep.mubr.f32.mxu0 %v4514_v51  ;;  %5554 = vmatpush2.msra.mxu0 %v4820_v15 }
 0x549   : > { %5555 = vmatprep.subr.mxu0 %v9976_v14  ;;  %5351 = vmatpush2.msra.mxu1 %v4777_v49  ;;  %v10242_v49 = vld [vmem:[%s11039_s5 + $0x478] sm:$0xff] }
 0x54a   : > { %5352 = vmatprep.subr.mxu1 %v9976_v14  ;;  %5556 = vmatpush2.msra.mxu0 %v4819_v41  ;;  %v4812_v41 = vld [vmem:[%s11039_s5 + $0x3a0] sm:$0xff] }
 0x54b   : > { %5185 = vmatmul.mubr.f32.gmra.mxu0 %v10171_v33  ;;  %5353 = vmatpush2.msra.mxu1 %v4776_v10 }
 0x54c   : > { %5189 = vmatprep.mubr.f32.mxu0 %v4515_v23  ;;  %5557 = vmatprep.subr.mxu0 %v9976_v14  ;;  %v10237_v23 = vld [vmem:[#allocation4 + $0xca] sm:$0xff] }
 0x54d   : > { %5558 = vmatpush2.msra.mxu0 %v4818_v61  ;;  %6461 = vmatprep.subr.mxu1 %v10242_v49  ;;  %v4810_v61 = vld [vmem:[%s11039_s5 + $0x390] sm:$0xff] }
 0x54e   : > { %5559 = vmatprep.subr.mxu0 %v9976_v14 }
 0x54f   : > { %5190 = vmatmul.mubr.f32.gmra.mxu0 %v10186_v37 }
 0x550   : > { %5194 = vmatprep.mubr.f32.mxu0 %v4516_v52  ;;  %5560 = vmatpush2.msra.mxu0 %v4817_v45  ;;  %v10253_v52 = vld [vmem:[#allocation4 + $0xda] sm:$0xff] }
 0x551   : > { %5561 = vmatprep.subr.mxu0 %v9976_v14 }
 0x552   : > { %5562 = vmatpush2.msra.mxu0 %v4816_v22 }
 0x553   : > { %5195 = vmatmul.mubr.f32.gmra.mxu0 %v10201_v46  ;;  %5563 = vmatprep.subr.mxu0 %v9976_v14 }
 0x554   : > { %5199 = vmatprep.mubr.f32.mxu0 %v6537_v16  ;;  %5564 = vmatpush2.msra.mxu0 %v4815_v26  ;;  %v10267_v16 = vld [vmem:[#allocation4 + $0xe2] sm:$0xff] }
 0x555   : > { %5565 = vmatprep.subr.mxu0 %v9976_v14 }
 0x556   : > { %5566 = vmatpush2.msra.mxu0 %v4814_v62  ;;  %v4809_v62 = vld [vmem:[%s11039_s5 + $0x388] sm:$0xff] }
 0x557   : > { %5200 = vmatmul.mubr.f32.gmra.mxu0 %v10212_v43  ;;  %5567 = vmatprep.subr.mxu0 %v9976_v14 }
 0x558   : > { %5204 = vmatprep.mubr.f32.mxu0 %v6538_v40  ;;  %v10275_v40 = vld [vmem:[#allocation4 + $0xf2] sm:$0xff] }
 0x55b   : > { %5205 = vmatmul.mubr.f32.gmra.mxu0 %v10223_v44 }
 0x55c   : > { %5209 = vmatprep.mubr.f32.mxu0 %v9708_v56 }
 0x55d   : > { %v6371_v20 = vpop.f32.mrf.mxu0 }
 0x55e   : > { %v4296_v50 = vmul.f32 %v9783_v63, %v6371_v20 }
 0x55f   : > { %v4225_v51 = vpop.f32.mrf.mxu0  ;;  %5210 = vmatmul.mubr.f32.gmra.mxu0 %v10230_v35 }
 0x560   : > { %v4335_v17 = vadd.f32 %v9790_v27, %v4296_v50  ;;  %v4295_v57 = vmul.f32 %v9783_v63, %v4225_v51  ;;  %5214 = vmatprep.mubr.f32.mxu0 %v9713_v58  ;;  %v4813_v58 = vld [vmem:[%s11039_s5 + $0x3a8] sm:$0xff]  ;;  %v4808_v50 = vld [vmem:[%s11039_s5 + $0x380] sm:$0xff] }
 0x561   : > { %5568 = vmatpush2.msra.mxu0 %v4813_v58  ;;  %v10286_v51 = vld [vmem:[#allocation4 + $0xfa] sm:$0xff] }
 0x562   : > { %v4367_v15 = vmax.f32 %v4335_v17, 0.0  ;;  %v4334_v56 = vadd.f32 %v9790_v27, %v4295_v57  ;;  %5569 = vmatprep.subr.mxu0 %v9976_v14  ;;  %v10298_v17 = vld [vmem:[#allocation4 + $0x122] sm:$0xff]  ;;  %v10301_v57 = vld [vmem:[#allocation4 + $0x12a] sm:$0xff] }
 0x563   : > { %5215 = vmatmul.mubr.f32.gmra.mxu0 %v10237_v23 }
 0x564   : > { %4400 = vst [vmem:[#allocation4 + $0x141] sm:$0xff] %v4367_v15  ;;  %v4366_v10 = vmax.f32 %v4334_v56, 0.0  ;;  %5219 = vmatprep.mubr.f32.mxu0 %v9799_v30  ;;  %v4811_v30 = vld [vmem:[%s11039_s5 + $0x398] sm:$0xff]  ;;  %5570 = vmatpush2.msra.mxu0 %v4812_v41 }
 0x565   : > { %5571 = vmatprep.subr.mxu0 %v9976_v14 }
 0x566   : > { %4399 = vst [vmem:[#allocation4 + $0x139] sm:$0xff] %v4366_v10  ;;  %5034 = vmatprep.mubr.f32.mxu1 %v4366_v10  ;;  %5572 = vmatpush2.msra.mxu0 %v4811_v30 }
 0x567   : > { %5220 = vmatmul.mubr.f32.gmra.mxu0 %v10253_v52  ;;  %5573 = vmatprep.subr.mxu0 %v9976_v14 }
 0x568   : > { %5224 = vmatprep.mubr.f32.mxu0 %v9818_v25  ;;  %5574 = vmatpush2.msra.mxu0 %v4810_v61 }
 0x569   : > { %5575 = vmatprep.subr.mxu0 %v9976_v14 }
 0x56a   : > { %v10265_v45 = vpop.f32.mrf.mxu1  ;;  %5576 = vmatpush2.msra.mxu0 %v4809_v62 }
 0x56b   : > { %11356 = vst [vmem:[#allocation35_spill] sm:$0xff] %v10265_v45  ;;  %5225 = vmatmul.mubr.f32.gmra.mxu0 %v10267_v16  ;;  %5577 = vmatprep.subr.mxu0 %v9976_v14  ;;  %v10295_v14 = vld [vmem:[#allocation4 + $0x112] sm:$0xff] }
 0x56c   : > { %5229 = vmatprep.mubr.f32.mxu0 %v9940_v31  ;;  %v4998_v22 = vpop.f32.mrf.mxu1  ;;  %5578 = vmatpush2.msra.mxu0 %v4808_v50 }
 0x56d   : > { %v4433_v25 = vld [vmem:[#allocation4 + $0x138] sm:$0xff]  ;;  %v4434_v20 = vld [vmem:[#allocation4 + $0x140] sm:$0xff]  ;;  %6381 = vmatprep.subr.mxu0 %v10242_v49 }
 0x56e   : > { %v10273_v26 = vpop.f32.mrf.mxu1  ;;  %5035 = vmatmul.mubr.f32.gmra.mxu1 %v4433_v25 }
 0x56f   : > { %11357 = vst [vmem:[#allocation62_spill] sm:$0xff] %v10273_v26  ;;  %5230 = vmatmul.mubr.f32.gmra.mxu0 %v10275_v40  ;;  %5039 = vmatprep.mubr.f32.mxu1 %v4367_v15  ;;  %v10431_v26 = vld [vmem:[#allocation4 + $0x51] sm:$0xff] }
 0x570   : > { %5234 = vmatprep.mubr.f32.mxu0 %v9958_v6  ;;  %v5003_v31 = vpop.f32.mrf.mxu1  ;;  %v10291_v6 = vld [vmem:[#allocation4 + $0x10a] sm:$0xff] }
 0x571   : > { %v10319_v31 = vld [vmem:[#allocation4 + $0x13a] sm:$0xff] }
 0x572   : > { %5040 = vmatmul.mubr.f32.gmra.mxu1 %v4434_v20 }
 0x573   : > { %5235 = vmatmul.mubr.f32.gmra.mxu0 %v10286_v51 }
 0x574   : > { %5239 = vmatprep.mubr.f32.mxu0 %v10122_v38 }
 0x577   : > { %5240 = vmatmul.mubr.f32.gmra.mxu0 %v10291_v6 }
 0x578   : > { %5244 = vmatprep.mubr.f32.mxu0 %v10138_v19 }
 0x57b   : > { %5245 = vmatmul.mubr.f32.gmra.mxu0 %v10295_v14 }
 0x57c   : > { %5249 = vmatprep.mubr.f32.mxu0 %v4433_v25 }
 0x57f   : > { %5250 = vmatmul.mubr.f32.gmra.mxu0 %v10298_v17 }
 0x580   : > { %5254 = vmatprep.mubr.f32.mxu0 %v4434_v20 }
 0x583   : > { %5255 = vmatmul.mubr.f32.gmra.mxu0 %v10301_v57 }
 0x58d   : > { %v6374_v38 = vpop.f32.mrf.mxu0 }
 0x58e   : > { %v4298_v15 = vmul.f32 %v9783_v63, %v6374_v38  ;;  %v10323_v38 = vld [vmem:[#allocation4 + $0x142] sm:$0xff] }
 0x58f   : > { %v4235_v56 = vpop.f32.mrf.mxu0 }
 0x590   : > { %v4337_v19 = vadd.f32 %v9790_v27, %v4298_v15  ;;  %v4297_v10 = vmul.f32 %v9783_v63, %v4235_v56 }
 0x592   : > { %v10307_v58 = vmax.f32 %v4337_v19, 0.0  ;;  %v4336_v41 = vadd.f32 %v9790_v27, %v4297_v10 }
 0x594   : > { %4402 = vst [vmem:[#allocation4 + $0x159] sm:$0xff] %v10307_v58  ;;  %v10311_v30 = vmax.f32 %v4336_v41, 0.0 }
 0x596   : > { %4401 = vst [vmem:[#allocation4 + $0x151] sm:$0xff] %v10311_v30  ;;  %5044 = vmatprep.mubr.f32.mxu1 %v10311_v30 }
 0x59a   : > { %v10315_v61 = vpop.f32.mrf.mxu1 }
 0x59b   : > { %11358 = vst [vmem:[#allocation90_spill] sm:$0xff] %v10315_v61  ;;  %v10413_v61 = vld [vmem:[#allocation4 + $0x49] sm:$0xff] }
 0x59c   : > { %v5008_v22 = vpop.f32.mrf.mxu1 }
 0x59d   : > { %v4529_v25 = vld [vmem:[#allocation4 + $0x150] sm:$0xff]  ;;  %v4530_v20 = vld [vmem:[#allocation4 + $0x158] sm:$0xff] }
 0x59e   : > { %5259 = vmatprep.mubr.f32.mxu0 %v4529_v25  ;;  %v10317_v62 = vpop.f32.mrf.mxu1  ;;  %5045 = vmatmul.mubr.f32.gmra.mxu1 %v4529_v25 }
 0x59f   : > { %11359 = vst [vmem:[#allocation117_spill] sm:$0xff] %v10317_v62  ;;  %5260 = vmatmul.mubr.f32.gmra.mxu0 %v10319_v31  ;;  %5049 = vmatprep.mubr.f32.mxu1 %v10307_v58 }
 0x5a0   : > { %5264 = vmatprep.mubr.f32.mxu0 %v4530_v20  ;;  %v5013_v50 = vpop.f32.mrf.mxu1 }
 0x5a2   : > { %5050 = vmatmul.mubr.f32.gmra.mxu1 %v4530_v20 }
 0x5a3   : > { %5265 = vmatmul.mubr.f32.gmra.mxu0 %v10323_v38 }
 0x5aa   : > { %v6377_v15 = vpop.f32.mrf.mxu0 }
 0x5ab   : > { %v4300_v56 = vmul.f32 %v9783_v63, %v6377_v15  ;;  %v10337_v15 = vld [vmem:[#allocation4 + $0x152] sm:$0xff] }
 0x5ac   : > { %v4245_v19 = vpop.f32.mrf.mxu0 }
 0x5ad   : > { %v4339_v10 = vadd.f32 %v9790_v27, %v4300_v56  ;;  %v4299_v41 = vmul.f32 %v9783_v63, %v4245_v19  ;;  %v4535_v56 = vld [vmem:[#allocation4 + $0x19] sm:$0xff]  ;;  %v10348_v19 = vld [vmem:[%s11039_s5 + $0x470] sm:$0xff] }
 0x5af   : > { %v10329_v22 = vmax.f32 %v4339_v10, 0.0  ;;  %v4338_v25 = vadd.f32 %v9790_v27, %v4299_v41  ;;  %v10341_v27 = vld [vmem:[#allocation4 + $0x15a] sm:$0xff]  ;;  %v10355_v10 = vld [vmem:[%s11039_s5 + $0x468] sm:$0xff] }
 0x5b0   : > { %v4536_v41 = vld [vmem:[#allocation4 + $0x21] sm:$0xff] }
 0x5b1   : > { %4404 = vst [vmem:[#allocation4 + $0x171] sm:$0xff] %v10329_v22  ;;  %v10333_v50 = vmax.f32 %v4338_v25, 0.0  ;;  %v10373_v25 = vld [vmem:[#allocation4 + $0x31] sm:$0xff] }
 0x5b3   : > { %4403 = vst [vmem:[#allocation4 + $0x169] sm:$0xff] %v10333_v50  ;;  %5054 = vmatprep.mubr.f32.mxu1 %v10333_v50 }
 0x5ba   : > { %v4531_v20 = vld [vmem:[#allocation4 + $0x168] sm:$0xff]  ;;  %v4532_v63 = vld [vmem:[#allocation4 + $0x170] sm:$0xff] }
 0x5bb   : > { %5269 = vmatprep.mubr.f32.mxu0 %v4531_v20  ;;  %5055 = vmatmul.mubr.f32.gmra.mxu1 %v4531_v20  ;;  %v10379_v20 = vld [vmem:[%s11039_s5 + $0x450] sm:$0xff] }
 0x5bc   : > { %5270 = vmatmul.mubr.f32.gmra.mxu0 %v10337_v15  ;;  %5059 = vmatprep.mubr.f32.mxu1 %v10329_v22 }
 0x5bd   : > { %5274 = vmatprep.mubr.f32.mxu0 %v4532_v63 }
 0x5bf   : > { %5060 = vmatmul.mubr.f32.gmra.mxu1 %v4532_v63 }
 0x5c0   : > { %5275 = vmatmul.mubr.f32.gmra.mxu0 %v10341_v27  ;;  %5354 = vmatprep.mubr.f32.mxu1 %v10031_v34  ;;  %v10362_v34 = vld [vmem:[%s11039_s5 + $0x460] sm:$0xff] }
 0x5c3   : > { %5355 = vmatmul.mubr.f32.vlgmr.msra.gmra.mxu1 %v4535_v56  ;;  %v10393_v56 = vld [vmem:[#allocation4 + $0x39] sm:$0xff] }
 0x5c4   : > { %5359 = vmatprep.mubr.f32.mxu1 %v10049_v12  ;;  %6477 = vmatpush3.msra.mxu1 %v10242_v49  ;;  %v10370_v12 = vld [vmem:[%s11039_s5 + $0x458] sm:$0xff] }
 0x5c5   : > { %6462 = vmatprep.subr.mxu1 %v10348_v19 }
 0x5c6   : > { %6478 = vmatpush3.msra.mxu1 %v10348_v19 }
 0x5c7   : > { %5360 = vmatmul.mubr.f32.gmra.mxu1 %v4536_v41  ;;  %6463 = vmatprep.subr.mxu1 %v10355_v10  ;;  %v10399_v41 = vld [vmem:[%s11039_s5 + $0x440] sm:$0xff] }
 0x5c8   : > { %5364 = vmatprep.mubr.f32.mxu1 %v10065_v8  ;;  %6479 = vmatpush3.msra.mxu1 %v10355_v10  ;;  %v10388_v8 = vld [vmem:[%s11039_s5 + $0x448] sm:$0xff] }
 0x5c9   : > { %6464 = vmatprep.subr.mxu1 %v10362_v34 }
 0x5ca   : > { %6480 = vmatpush3.msra.mxu1 %v10362_v34 }
 0x5cb   : > { %5365 = vmatmul.mubr.f32.gmra.mxu1 %v10373_v25  ;;  %6465 = vmatprep.subr.mxu1 %v10370_v12 }
 0x5cc   : > { %5369 = vmatprep.mubr.f32.mxu1 %v10083_v42  ;;  %6481 = vmatpush3.msra.mxu1 %v10370_v12 }
 0x5cd   : > { %6466 = vmatprep.subr.mxu1 %v10379_v20 }
 0x5ce   : > { %v10390_v63 = vpop.f32.mrf.mxu1  ;;  %6482 = vmatpush3.msra.mxu1 %v10379_v20 }
 0x5cf   : > { %11360 = vst [vmem:[#allocation129_spill] sm:$0xff] %v10390_v63  ;;  %5370 = vmatmul.mubr.f32.gmra.mxu1 %v10393_v56  ;;  %6467 = vmatprep.subr.mxu1 %v10388_v8  ;;  %v10408_v63 = vld [vmem:[%s11039_s5 + $0x438] sm:$0xff] }
 0x5d0   : > { %v5018_v42 = vpop.f32.mrf.mxu1  ;;  %5374 = vmatprep.mubr.f32.mxu1 %v10095_v2  ;;  %6483 = vmatpush3.msra.mxu1 %v10388_v8 }
 0x5d1   : > { %6468 = vmatprep.subr.mxu1 %v10399_v41  ;;  %v10419_v42 = vld [vmem:[%s11039_s5 + $0x430] sm:$0xff] }
 0x5d2   : > { %v10410_v62 = vpop.f32.mrf.mxu1  ;;  %6484 = vmatpush3.msra.mxu1 %v10399_v41 }
 0x5d3   : > { %11361 = vst [vmem:[#allocation7_spill] sm:$0xff] %v10410_v62  ;;  %5375 = vmatmul.mubr.f32.gmra.mxu1 %v10413_v61  ;;  %6469 = vmatprep.subr.mxu1 %v10408_v63  ;;  %v10428_v62 = vld [vmem:[%s11039_s5 + $0x428] sm:$0xff] }
 0x5d4   : > { %v5023_v2 = vpop.f32.mrf.mxu1  ;;  %5379 = vmatprep.mubr.f32.mxu1 %v10111_v32  ;;  %6485 = vmatpush3.msra.mxu1 %v10408_v63  ;;  %v10446_v32 = vld [vmem:[%s11039_s5 + $0x418] sm:$0xff] }
 0x5d5   : > { %6470 = vmatprep.subr.mxu1 %v10419_v42  ;;  %v10437_v2 = vld [vmem:[%s11039_s5 + $0x420] sm:$0xff] }
 0x5d6   : > { %6486 = vmatpush3.msra.mxu1 %v10419_v42 }
 0x5d7   : > { %5380 = vmatmul.mubr.f32.gmra.mxu1 %v10431_v26  ;;  %6471 = vmatprep.subr.mxu1 %v10428_v62 }
 0x5d8   : > { %5384 = vmatprep.mubr.f32.mxu1 %v10128_v5  ;;  %6487 = vmatpush3.msra.mxu1 %v10428_v62  ;;  %v6539_v5 = vld [vmem:[%s11037_s3] ss:$0 sm:$0xff] }
 0x5d9   : > { %6472 = vmatprep.subr.mxu1 %v10437_v2 }
 0x5da   : > { %v6380_v45 = vpop.f32.mrf.mxu0  ;;  %6488 = vmatpush3.msra.mxu1 %v10437_v2 }
 0x5db   : > { %v4302_v28 = vmul.f32 %v6539_v5, %v6380_v45  ;;  %5385 = vmatmul.mubr.f32.gmra.mxu1 %v10449_v3  ;;  %6473 = vmatprep.subr.mxu1 %v10446_v32 }
 0x5dc   : > { %v4255_v24 = vpop.f32.mrf.mxu0  ;;  %5389 = vmatprep.mubr.f32.mxu1 %v10142_v48  ;;  %6489 = vmatpush3.msra.mxu1 %v10446_v32  ;;  %v10481_v48 = vld [vmem:[%s11039_s5 + $0x400] sm:$0xff] }
 0x5dd   : > { %v4341_v11 = vadd.f32 %v6540_v13, %v4302_v28  ;;  %v4301_v45 = vmul.f32 %v6539_v5, %v4255_v24  ;;  %6474 = vmatprep.subr.mxu1 %v10455_v36 }
 0x5de   : > { %v10473_v59 = vpop.f32.mrf.mxu0  ;;  %6490 = vmatpush3.msra.mxu1 %v10455_v36 }
 0x5df   : > { %v10483_v18 = vmax.f32 %v4341_v11, 0.0  ;;  %v4340_v21 = vadd.f32 %v6540_v13, %v4301_v45  ;;  %5390 = vmatmul.mubr.f32.gmra.mxu1 %v10475_v47  ;;  %6475 = vmatprep.subr.mxu1 %v10467_v39  ;;  %v10495_v11 = vld [vmem:[#allocation4 + $0x79] sm:$0xff]  ;;  %v10503_v45 = vld [vmem:[#allocation4 + $0x81] sm:$0xff] }
 0x5e0   : > { %v5133_v24 = vpop.f32.mrf.mxu0  ;;  %5394 = vmatprep.mubr.f32.mxu1 %v10156_v1  ;;  %6491 = vmatpush3.msra.mxu1 %v10467_v39 }
 0x5e1   : > { %4406 = vst [vmem:[#allocation4 + $0x189] sm:$0xff] %v10483_v18  ;;  %v10490_v28 = vmax.f32 %v4340_v21, 0.0  ;;  %6476 = vmatprep.subr.mxu1 %v10481_v48 }
 0x5e2   : > { %v10493_v5 = vpop.f32.mrf.mxu0  ;;  %6492 = vmatpush3.msra.mxu1 %v10481_v48 }
 0x5e3   : > { %4405 = vst [vmem:[#allocation4 + $0x181] sm:$0xff] %v10490_v28  ;;  %5395 = vmatmul.mubr.f32.gmra.mxu1 %v10495_v11 }
 0x5e4   : > { %v5138_v13 = vpop.f32.mrf.mxu0  ;;  %5399 = vmatprep.mubr.f32.mxu1 %v10171_v33 }
 0x5e5   : > { %v10514_v13 = vld [vmem:[#allocation4 + $0x16a] sm:$0xff] }
 0x5e6   : > { %v10501_v1 = vpop.f32.mrf.mxu0 }
 0x5e7   : > { %5400 = vmatmul.mubr.f32.gmra.mxu1 %v10503_v45 }
 0x5e8   : > { %v5143_v21 = vpop.f32.mrf.mxu0  ;;  %5404 = vmatprep.mubr.f32.mxu1 %v10186_v37 }
 0x5e9   : > { %v10524_v21 = vld [vmem:[#allocation4 + $0x99] sm:$0xff] }
 0x5ea   : > { %v10507_v24 = vpop.f32.mrf.mxu0  ;;  %v10509_v55 = vld [vmem:[#allocation4 + $0x180] sm:$0xff]  ;;  %v10518_v53 = vld [vmem:[#allocation4 + $0x188] sm:$0xff] }
 0x5eb   : > { %11362 = vst [vmem:[#allocation34_spill] sm:$0xff] %v10507_v24  ;;  %5279 = vmatprep.mubr.f32.mxu0 %v10509_v55  ;;  %5405 = vmatmul.mubr.f32.gmra.mxu1 %v10511_v29  ;;  %v10526_v24 = vld [vmem:[#allocation4 + $0x172] sm:$0xff] }
 0x5ec   : > { %v5148_v33 = vpop.f32.mrf.mxu0  ;;  %5280 = vmatmul.mubr.f32.gmra.mxu0 %v10514_v13  ;;  %5409 = vmatprep.mubr.f32.mxu1 %v10201_v46  ;;  %v10534_v46 = vld [vmem:[#allocation4 + $0xa9] sm:$0xff] }
 0x5ed   : > { %5284 = vmatprep.mubr.f32.mxu0 %v10518_v53 }
 0x5ee   : > { %v10522_v37 = vpop.f32.mrf.mxu0 }
 0x5ef   : > { %11363 = vst [vmem:[#allocation131_spill] sm:$0xff] %v10522_v37  ;;  %5410 = vmatmul.mubr.f32.gmra.mxu1 %v10524_v21 }
 0x5f0   : > { %v5153_v54 = vpop.f32.mrf.mxu0  ;;  %5285 = vmatmul.mubr.f32.gmra.mxu0 %v10526_v24  ;;  %5414 = vmatprep.mubr.f32.mxu1 %v10212_v43  ;;  %v10543_v43 = vld [vmem:[#allocation4 + $0xb1] sm:$0xff] }
 0x5f1   : > { %5579 = vmatprep.mubr.f32.mxu0 %v10373_v25 }
 0x5f2   : > { %v10532_v33 = vpop.f32.mrf.mxu0 }
 0x5f3   : > { %5415 = vmatmul.mubr.f32.gmra.mxu1 %v10534_v46 }
 0x5f4   : > { %v5158_v37 = vpop.f32.mrf.mxu0  ;;  %5580 = vmatmul.mubr.f32.vlgmr.msra.gmra.mxu0 %v10017_v0  ;;  %5419 = vmatprep.mubr.f32.mxu1 %v10223_v44  ;;  %v10554_v44 = vld [vmem:[#allocation4 + $0xc1] sm:$0xff] }
 0x5f5   : > { %6382 = vmatpush3.msra.mxu0 %v10242_v49  ;;  %5584 = vmatprep.mubr.f32.mxu0 %v10393_v56  ;;  %v4602_v49 = vld [vmem:[#allocation4 + $0x48] sm:$0xff]  ;;  %v4603_v56 = vld [vmem:[#allocation4 + $0x50] sm:$0xff] }
 0x5f6   : > { %v10541_v54 = vpop.f32.mrf.mxu0  ;;  %6383 = vmatprep.subr.mxu0 %v10348_v19 }
 0x5f7   : > { %5420 = vmatmul.mubr.f32.gmra.mxu1 %v10543_v43  ;;  %6384 = vmatpush3.msra.mxu0 %v10348_v19 }
 0x5f8   : > { %v5163_v25 = vpop.f32.mrf.mxu0  ;;  %5585 = vmatmul.mubr.f32.gmra.mxu0 %v10038_v9  ;;  %5424 = vmatprep.mubr.f32.mxu1 %v10230_v35 }
 0x5f9   : > { %5589 = vmatprep.mubr.f32.mxu0 %v10413_v61  ;;  %6385 = vmatprep.subr.mxu0 %v10355_v10  ;;  %v10566_v61 = vld [vmem:[#allocation4 + $0xc9] sm:$0xff] }
 0x5fa   : > { %6386 = vmatpush3.msra.mxu0 %v10355_v10 }
 0x5fb   : > { %v10552_v0 = vpop.f32.mrf.mxu0  ;;  %5425 = vmatmul.mubr.f32.gmra.mxu1 %v10554_v44  ;;  %6387 = vmatprep.subr.mxu0 %v10362_v34 }
 0x5fc   : > { %5590 = vmatmul.mubr.f32.gmra.mxu0 %v4602_v49  ;;  %5429 = vmatprep.mubr.f32.mxu1 %v10237_v23 }
 0x5fd   : > { %v5168_v19 = vpop.f32.mrf.mxu0  ;;  %5594 = vmatprep.mubr.f32.mxu0 %v10431_v26  ;;  %6388 = vmatpush3.msra.mxu0 %v10362_v34  ;;  %v10578_v34 = vld [vmem:[#allocation4 + $0xd9] sm:$0xff] }
 0x5fe   : > { %v10561_v9 = vpop.f32.mrf.mxu1  ;;  %6389 = vmatprep.subr.mxu0 %v10370_v12 }
 0x5ff   : > { %v10564_v35 = vpop.f32.mrf.mxu0  ;;  %5430 = vmatmul.mubr.f32.gmra.mxu1 %v10566_v61  ;;  %6390 = vmatpush3.msra.mxu0 %v10370_v12  ;;  %v4604_v12 = vld [vmem:[#allocation4 + $0x60] sm:$0xff] }
 0x600   : > { %v5028_v10 = vpop.f32.mrf.mxu1  ;;  %5595 = vmatmul.mubr.f32.gmra.mxu0 %v4603_v56  ;;  %5434 = vmatprep.mubr.f32.mxu1 %v10253_v52  ;;  %v10588_v52 = vld [vmem:[#allocation4 + $0xe1] sm:$0xff] }
 0x601   : > { %v5173_v37 = vpop.f32.mrf.mxu0  ;;  %5599 = vmatprep.mubr.f32.mxu0 %v10449_v3  ;;  %6391 = vmatprep.subr.mxu0 %v10379_v20 }
 0x602   : > { %v10573_v23 = vpop.f32.mrf.mxu1  ;;  %6392 = vmatpush3.msra.mxu0 %v10379_v20  ;;  %v4605_v20 = vld [vmem:[#allocation4 + $0x68] sm:$0xff] }
 0x603   : > { %v10576_v26 = vpop.f32.mrf.mxu0  ;;  %5435 = vmatmul.mubr.f32.gmra.mxu1 %v10578_v34  ;;  %6393 = vmatprep.subr.mxu0 %v10388_v8 }
 0x604   : > { %v5033_v25 = vpop.f32.mrf.mxu1  ;;  %5600 = vmatmul.mubr.f32.gmra.mxu0 %v4604_v12  ;;  %5439 = vmatprep.mubr.f32.mxu1 %v10267_v16  ;;  %v10598_v16 = vld [vmem:[#allocation4 + $0xf1] sm:$0xff] }
 0x605   : > { %v5178_v49 = vpop.f32.mrf.mxu0  ;;  %5604 = vmatprep.mubr.f32.mxu0 %v10475_v47  ;;  %6394 = vmatpush3.msra.mxu0 %v10388_v8  ;;  %v4606_v8 = vld [vmem:[#allocation4 + $0x78] sm:$0xff] }
 0x606   : > { %6395 = vmatprep.subr.mxu0 %v10399_v41  ;;  %v10662_v49 = vld [vmem:[#allocation4 + $0x141] sm:$0xff] }
 0x607   : > { %v10586_v3 = vpop.f32.mrf.mxu0  ;;  %5440 = vmatmul.mubr.f32.gmra.mxu1 %v10588_v52  ;;  %6396 = vmatpush3.msra.mxu0 %v10399_v41 }
 0x608   : > { %5605 = vmatmul.mubr.f32.gmra.mxu0 %v4605_v20  ;;  %5444 = vmatprep.mubr.f32.mxu1 %v10275_v40 }
 0x609   : > { %v5183_v19 = vpop.f32.mrf.mxu0  ;;  %5609 = vmatprep.mubr.f32.mxu0 %v10495_v11  ;;  %6397 = vmatprep.subr.mxu0 %v10408_v63  ;;  %v10608_v11 = vld [vmem:[#allocation4 + $0xf9] sm:$0xff] }
 0x60a   : > { %6398 = vmatpush3.msra.mxu0 %v10408_v63  ;;  %v4607_v63 = vld [vmem:[#allocation4 + $0x80] sm:$0xff] }
 0x60b   : > { %v10596_v47 = vpop.f32.mrf.mxu0  ;;  %5445 = vmatmul.mubr.f32.gmra.mxu1 %v10598_v16  ;;  %6399 = vmatprep.subr.mxu0 %v10419_v42 }
 0x60c   : > { %5610 = vmatmul.mubr.f32.gmra.mxu0 %v4606_v8  ;;  %5449 = vmatprep.mubr.f32.mxu1 %v10286_v51 }
 0x60d   : > { %v5188_v41 = vpop.f32.mrf.mxu0  ;;  %5614 = vmatprep.mubr.f32.mxu0 %v10503_v45  ;;  %6400 = vmatpush3.msra.mxu0 %v10419_v42  ;;  %v10618_v42 = vld [vmem:[#allocation4 + $0x109] sm:$0xff] }
 0x60e   : > { %6401 = vmatprep.subr.mxu0 %v10428_v62  ;;  %v4608_v45 = vld [vmem:[#allocation4 + $0x90] sm:$0xff] }
 0x60f   : > { %v10606_v40 = vpop.f32.mrf.mxu0  ;;  %5450 = vmatmul.mubr.f32.gmra.mxu1 %v10608_v11  ;;  %6402 = vmatpush3.msra.mxu0 %v10428_v62 }
 0x610   : > { %5615 = vmatmul.mubr.f32.gmra.mxu0 %v4607_v63  ;;  %5454 = vmatprep.mubr.f32.mxu1 %v10291_v6  ;;  %v10628_v6 = vld [vmem:[#allocation4 + $0x111] sm:$0xff] }
 0x611   : > { %v5193_v10 = vpop.f32.mrf.mxu0  ;;  %5619 = vmatprep.mubr.f32.mxu0 %v10511_v29  ;;  %6403 = vmatprep.subr.mxu0 %v10437_v2 }
 0x612   : > { %6404 = vmatpush3.msra.mxu0 %v10437_v2  ;;  %v4609_v2 = vld [vmem:[#allocation4 + $0x98] sm:$0xff] }
 0x613   : > { %v10616_v51 = vpop.f32.mrf.mxu0  ;;  %5455 = vmatmul.mubr.f32.gmra.mxu1 %v10618_v42  ;;  %6405 = vmatprep.subr.mxu0 %v10446_v32 }
 0x614   : > { %5620 = vmatmul.mubr.f32.gmra.mxu0 %v4608_v45  ;;  %5459 = vmatprep.mubr.f32.mxu1 %v10295_v14 }
 0x615   : > { %v5198_v62 = vpop.f32.mrf.mxu0  ;;  %5624 = vmatprep.mubr.f32.mxu0 %v10524_v21  ;;  %6406 = vmatpush3.msra.mxu0 %v10446_v32  ;;  %v10638_v32 = vld [vmem:[#allocation4 + $0x121] sm:$0xff] }
 0x616   : > { %6407 = vmatprep.subr.mxu0 %v10455_v36  ;;  %v4610_v21 = vld [vmem:[#allocation4 + $0xa8] sm:$0xff]  ;;  %v4617_v62 = vld [vmem:[#allocation4 + $0xf8] sm:$0xff] }
 0x617   : > { %v10626_v29 = vpop.f32.mrf.mxu0  ;;  %5460 = vmatmul.mubr.f32.gmra.mxu1 %v10628_v6  ;;  %6408 = vmatpush3.msra.mxu0 %v10455_v36 }
 0x618   : > { %5625 = vmatmul.mubr.f32.gmra.mxu0 %v4609_v2  ;;  %5464 = vmatprep.mubr.f32.mxu1 %v10298_v17 }
 0x619   : > { %v5203_v56 = vpop.f32.mrf.mxu0  ;;  %5629 = vmatprep.mubr.f32.mxu0 %v10534_v46  ;;  %6409 = vmatprep.subr.mxu0 %v10467_v39  ;;  %v10648_v46 = vld [vmem:[#allocation4 + $0x129] sm:$0xff] }
 0x61a   : > { %6410 = vmatpush3.msra.mxu0 %v10467_v39  ;;  %v4611_v39 = vld [vmem:[#allocation4 + $0xb0] sm:$0xff]  ;;  %v4618_v56 = vld [vmem:[#allocation4 + $0x108] sm:$0xff] }
 0x61b   : > { %v10636_v14 = vpop.f32.mrf.mxu0  ;;  %5465 = vmatmul.mubr.f32.gmra.mxu1 %v10638_v32  ;;  %6411 = vmatprep.subr.mxu0 %v10481_v48 }
 0x61c   : > { %5630 = vmatmul.mubr.f32.gmra.mxu0 %v4610_v21  ;;  %5469 = vmatprep.mubr.f32.mxu1 %v10301_v57  ;;  %v10655_v57 = vld [vmem:[#allocation4 + $0x139] sm:$0xff]  ;;  %v10696_v21 = vld [vmem:[#allocation4 + $0x18a] sm:$0xff] }
 0x61d   : > { %v5208_v36 = vpop.f32.mrf.mxu0  ;;  %5634 = vmatprep.mubr.f32.mxu0 %v10543_v43  ;;  %6412 = vmatpush3.msra.mxu0 %v10481_v48  ;;  %v4612_v48 = vld [vmem:[#allocation4 + $0xc0] sm:$0xff] }
 0x61f   : > { %v10646_v17 = vpop.f32.mrf.mxu0  ;;  %5470 = vmatmul.mubr.f32.gmra.mxu1 %v10648_v46 }
 0x620   : > { %5635 = vmatmul.mubr.f32.gmra.mxu0 %v4611_v39  ;;  %5474 = vmatprep.mubr.f32.mxu1 %v10319_v31  ;;  %v4613_v31 = vld [vmem:[#allocation4 + $0xc8] sm:$0xff] }
 0x621   : > { %v5213_v37 = vpop.f32.mrf.mxu0  ;;  %5639 = vmatprep.mubr.f32.mxu0 %v10554_v44  ;;  %v4674_v39 = vld [vmem:[#allocation4 + $0xaa] sm:$0xff] }
 0x623   : > { %v10653_v25 = vpop.f32.mrf.mxu0  ;;  %5475 = vmatmul.mubr.f32.gmra.mxu1 %v10655_v57 }
 0x624   : > { %5640 = vmatmul.mubr.f32.gmra.mxu0 %v4612_v48  ;;  %5479 = vmatprep.mubr.f32.mxu1 %v10323_v38  ;;  %v4614_v38 = vld [vmem:[#allocation4 + $0xd8] sm:$0xff] }
 0x625   : > { %v5218_v43 = vpop.f32.mrf.mxu0  ;;  %5644 = vmatprep.mubr.f32.mxu0 %v10566_v61 }
 0x626   : > { %v4675_v43 = vld [vmem:[#allocation4 + $0xb2] sm:$0xff] }
 0x627   : > { %v10660_v12 = vpop.f32.mrf.mxu0  ;;  %5480 = vmatmul.mubr.f32.gmra.mxu1 %v10662_v49 }
 0x628   : > { %5645 = vmatmul.mubr.f32.gmra.mxu0 %v4613_v31  ;;  %5484 = vmatprep.mubr.f32.mxu1 %v10337_v15  ;;  %v4615_v15 = vld [vmem:[#allocation4 + $0xe0] sm:$0xff] }
 0x629   : > { %v5223_v44 = vpop.f32.mrf.mxu0  ;;  %5649 = vmatprep.mubr.f32.mxu0 %v10578_v34 }
 0x62a   : > { %v4620_v44 = vld [vmem:[#allocation4 + $0x120] sm:$0xff] }
 0x62b   : > { %v10667_v20 = vpop.f32.mrf.mxu0  ;;  %5485 = vmatmul.mubr.f32.gmra.mxu1 %v10311_v30 }
 0x62c   : > { %5650 = vmatmul.mubr.f32.gmra.mxu0 %v4614_v38  ;;  %5489 = vmatprep.mubr.f32.mxu1 %v10341_v27 }
 0x62d   : > { %v5228_v19 = vpop.f32.mrf.mxu0  ;;  %5654 = vmatprep.mubr.f32.mxu0 %v10588_v52  ;;  %v4616_v52 = vld [vmem:[#allocation4 + $0xf0] sm:$0xff] }
 0x62e   : > { %v10672_v61 = vpop.f32.mrf.mxu1  ;;  %v4621_v19 = vld [vmem:[#allocation4 + $0x128] sm:$0xff] }
 0x62f   : > { %v10674_v8 = vpop.f32.mrf.mxu0  ;;  %5490 = vmatmul.mubr.f32.gmra.mxu1 %v10307_v58 }
 0x630   : > { %v5038_v41 = vpop.f32.mrf.mxu1  ;;  %5655 = vmatmul.mubr.f32.gmra.mxu0 %v4615_v15  ;;  %5494 = vmatprep.mubr.f32.mxu1 %v10514_v13  ;;  %v4622_v15 = vld [vmem:[#allocation4 + $0x138] sm:$0xff] }
 0x631   : > { %v5233_v34 = vpop.f32.mrf.mxu0  ;;  %5659 = vmatprep.mubr.f32.mxu0 %v10598_v16  ;;  %v10689_v16 = vld [vmem:[#allocation4 + $0x182] sm:$0xff]  ;;  %v4678_v41 = vld [vmem:[#allocation4 + $0xda] sm:$0xff] }
 0x632   : > { %v10679_v30 = vpop.f32.mrf.mxu1  ;;  %v4681_v34 = vld [vmem:[#allocation4 + $0xfa] sm:$0xff] }
 0x633   : > { %v10681_v63 = vpop.f32.mrf.mxu0  ;;  %5495 = vmatmul.mubr.f32.gmra.mxu1 %v10333_v50 }
 0x634   : > { %v5043_v10 = vpop.f32.mrf.mxu1  ;;  %5660 = vmatmul.mubr.f32.gmra.mxu0 %v4616_v52  ;;  %5499 = vmatprep.mubr.f32.mxu1 %v10526_v24  ;;  %v4656_v52 = vld [vmem:[#allocation4 + $0x151] sm:$0xff] }
 0x635   : > { %v5238_v45 = vpop.f32.mrf.mxu0  ;;  %5664 = vmatprep.mubr.f32.mxu0 %v10608_v11  ;;  %v4623_v10 = vld [vmem:[#allocation4 + $0x140] sm:$0xff] }
 0x636   : > { %v4683_v45 = vld [vmem:[#allocation4 + $0x112] sm:$0xff] }
 0x637   : > { %v10686_v58 = vpop.f32.mrf.mxu0  ;;  %5500 = vmatmul.mubr.f32.gmra.mxu1 %v10329_v22 }
 0x638   : > { %5665 = vmatmul.mubr.f32.gmra.mxu0 %v4617_v62  ;;  %5504 = vmatprep.mubr.f32.mxu1 %v10689_v16  ;;  %v4624_v62 = vld [vmem:[#allocation4 + $0x150] sm:$0xff] }
 0x639   : > { %v5243_v2 = vpop.f32.mrf.mxu0  ;;  %5669 = vmatprep.mubr.f32.mxu0 %v10618_v42  ;;  %v4619_v42 = vld [vmem:[#allocation4 + $0x110] sm:$0xff] }
 0x63a   : > { %v4657_v2 = vld [vmem:[#allocation4 + $0x159] sm:$0xff] }
 0x63b   : > { %v10693_v50 = vpop.f32.mrf.mxu0  ;;  %5505 = vmatmul.mubr.f32.gmra.mxu1 %v10490_v28 }
 0x63c   : > { %5670 = vmatmul.mubr.f32.gmra.mxu0 %v4618_v56  ;;  %5509 = vmatprep.mubr.f32.mxu1 %v10696_v21  ;;  %v4685_v56 = vld [vmem:[#allocation4 + $0x12a] sm:$0xff] }
 0x63d   : > { %v5248_v11 = vpop.f32.mrf.mxu0  ;;  %5674 = vmatprep.mubr.f32.mxu0 %v10628_v6  ;;  %v4676_v6 = vld [vmem:[#allocation4 + $0xc2] sm:$0xff] }
 0x63e   : > { %v4625_v11 = vld [vmem:[#allocation4 + $0x158] sm:$0xff] }
 0x63f   : > { %v5251_v22 = vpop.f32.mrf.mxu0  ;;  %5510 = vmatmul.mubr.f32.gmra.mxu1 %v10483_v18 }
 0x640   : > { %v10701_v36 = vadd.f32 %v5251_v22, %v10561_v9  ;;  %5675 = vmatmul.mubr.f32.gmra.mxu0 %v4619_v42  ;;  %6428 = vmatprep.mubr.f32.mxu1 %v4674_v39  ;;  %v4677_v9 = vld [vmem:[#allocation4 + $0xca] sm:$0xff]  ;;  %v4687_v42 = vld [vmem:[#allocation4 + $0x142] sm:$0xff] }
 0x641   : > { %v5253_v37 = vpop.f32.mrf.mxu0  ;;  %5679 = vmatprep.mubr.f32.mxu0 %v10638_v32  ;;  %v4679_v32 = vld [vmem:[#allocation4 + $0xe2] sm:$0xff] }
 0x642   : > { %v4658_v22 = vld [vmem:[#allocation4 + $0x169] sm:$0xff]  ;;  %v4688_v37 = vld [vmem:[#allocation4 + $0x152] sm:$0xff] }
 0x643   : > { %v5256_v48 = vpop.f32.mrf.mxu0  ;;  %6429 = vmatmul.mubr.f32.vlgmr.msra.gmra.mxu1 %v4675_v43  ;;  %v4626_v39 = vld [vmem:[#allocation4 + $0x168] sm:$0xff] }
 0x644   : > { %v10706_v31 = vadd.f32 %v5256_v48, %v10573_v23  ;;  %5680 = vmatmul.mubr.f32.gmra.mxu0 %v4620_v44  ;;  %6431 = vmatprep.mubr.f32.mxu1 %v4676_v6  ;;  %v4680_v23 = vld [vmem:[#allocation4 + $0xf2] sm:$0xff] }
 0x645   : > { %v5258_v38 = vpop.f32.mrf.mxu0  ;;  %5684 = vmatprep.mubr.f32.mxu0 %v10648_v46  ;;  %v4682_v46 = vld [vmem:[#allocation4 + $0x10a] sm:$0xff] }
 0x646   : > { %v4659_v48 = vld [vmem:[#allocation4 + $0x171] sm:$0xff] }
 0x647   : > { %6432 = vmatmul.mubr.f32.gmra.mxu1 %v4677_v9  ;;  %v4627_v9 = vld [vmem:[#allocation4 + $0x170] sm:$0xff] }
 0x648   : > { %5685 = vmatmul.mubr.f32.gmra.mxu0 %v4621_v19  ;;  %6434 = vmatprep.mubr.f32.mxu1 %v4678_v41 }
 0x649   : > { %5689 = vmatprep.mubr.f32.mxu0 %v10655_v57  ;;  %v4684_v57 = vld [vmem:[#allocation4 + $0x122] sm:$0xff] }
 0x64b   : > { %6435 = vmatmul.mubr.f32.gmra.mxu1 %v4679_v32 }
 0x64c   : > { %5690 = vmatmul.mubr.f32.gmra.mxu0 %v4622_v15  ;;  %6437 = vmatprep.mubr.f32.mxu1 %v4680_v23 }
 0x64d   : > { %5694 = vmatprep.mubr.f32.mxu0 %v10662_v49  ;;  %v4686_v49 = vld [vmem:[#allocation4 + $0x13a] sm:$0xff] }
 0x64f   : > { %6438 = vmatmul.mubr.f32.gmra.mxu1 %v4681_v34  ;;  %v4662_v34 = vld [vmem:[#allocation4 + $0x199] sm:$0xff] }
 0x650   : > { %5695 = vmatmul.mubr.f32.gmra.mxu0 %v4623_v10  ;;  %6440 = vmatprep.mubr.f32.mxu1 %v4682_v46  ;;  %v4669_v10 = vld [vmem:[#allocation4 + $0x6a] sm:$0xff] }
 0x651   : > { %5699 = vmatprep.mubr.f32.mxu0 %v4656_v52  ;;  %v4670_v52 = vld [vmem:[#allocation4 + $0x7a] sm:$0xff] }
 0x653   : > { %6441 = vmatmul.mubr.f32.gmra.mxu1 %v4683_v45 }
 0x654   : > { %5700 = vmatmul.mubr.f32.gmra.mxu0 %v4624_v62  ;;  %6443 = vmatprep.mubr.f32.mxu1 %v4684_v57 }
 0x655   : > { %5704 = vmatprep.mubr.f32.mxu0 %v4657_v2 }
 0x657   : > { %6444 = vmatmul.mubr.f32.gmra.mxu1 %v4685_v56  ;;  %v4671_v56 = vld [vmem:[#allocation4 + $0x82] sm:$0xff] }
 0x658   : > { %5705 = vmatmul.mubr.f32.gmra.mxu0 %v4625_v11  ;;  %6446 = vmatprep.mubr.f32.mxu1 %v4686_v49  ;;  %v4672_v49 = vld [vmem:[#allocation4 + $0x92] sm:$0xff] }
 0x659   : > { %5709 = vmatprep.mubr.f32.mxu0 %v4658_v22 }
 0x65b   : > { %6447 = vmatmul.mubr.f32.gmra.mxu1 %v4687_v42 }
 0x65c   : > { %5710 = vmatmul.mubr.f32.gmra.mxu0 %v4626_v39  ;;  %6449 = vmatprep.mubr.f32.mxu1 %v4688_v37  ;;  %v5132_v39 = vadd.f32 %v10473_v59, %v8641_v4  ;;  %v11365_v4 = vld [vmem:[#allocation34_spill] sm:$0xff] }
 0x65d   : > { %5714 = vmatprep.mubr.f32.mxu0 %v4659_v48 }
 0x65e   : > { %v5046_v43 = vpop.f32.mrf.mxu1 }
 0x65f   : > { %v5261_v44 = vpop.f32.mrf.mxu0  ;;  %6450 = vmatmul.mubr.f32.gmra.mxu1 %v10341_v27  ;;  %v4694_v27 = vld [vmem:[#allocation4 + $0x19a] sm:$0xff] }
 0x660   : > { %v10712_v6 = vadd.f32 %v5261_v44, %v10672_v61  ;;  %v5048_v38 = vpop.f32.mrf.mxu1  ;;  %5715 = vmatmul.mubr.f32.gmra.mxu0 %v4627_v9  ;;  %6452 = vmatprep.mubr.f32.mxu1 %v10514_v13  ;;  %v4663_v13 = vld [vmem:[#allocation4 + $0x1a1] sm:$0xff]  ;;  %v5137_v9 = vadd.f32 %v10493_v5, %v8659_v7 }
 0x661   : > { %v5263_v19 = vpop.f32.mrf.mxu0  ;;  %5719 = vmatprep.mubr.f32.mxu0 %v10490_v28  ;;  %v4695_v28 = vld [vmem:[#allocation4 + $0x1a2] sm:$0xff]  ;;  %v4673_v44 = vld [vmem:[#allocation4 + $0x9a] sm:$0xff] }
 0x662   : > { %v5051_v41 = vpop.f32.mrf.mxu1 }
 0x663   : > { %v5266_v32 = vpop.f32.mrf.mxu0  ;;  %6453 = vmatmul.mubr.f32.gmra.mxu1 %v10526_v24  ;;  %v4665_v24 = vld [vmem:[#allocation4 + $0x3a] sm:$0xff] }
 0x664   : > { %v10718_v15 = vadd.f32 %v5266_v32, %v10679_v30  ;;  %v5053_v23 = vpop.f32.mrf.mxu1  ;;  %5720 = vmatmul.mubr.f32.gmra.mxu0 %v10509_v55  ;;  %6455 = vmatprep.mubr.f32.mxu1 %v10689_v16  ;;  %v6541_v30 = vld [vmem:[#allocation4] sm:$0xff]  ;;  %v4664_v55 = vld [vmem:[#allocation4 + $0x32] sm:$0xff] }
 0x665   : > { %v5268_v61 = vpop.f32.mrf.mxu0  ;;  %5724 = vmatprep.mubr.f32.mxu0 %v10483_v18  ;;  %v4666_v18 = vld [vmem:[#allocation4 + $0x4a] sm:$0xff]  ;;  %v4667_v16 = vld [vmem:[#allocation4 + $0x52] sm:$0xff] }
 0x667   : > { %6456 = vmatmul.mubr.f32.gmra.mxu1 %v10696_v21  ;;  %v4668_v21 = vld [vmem:[#allocation4 + $0x62] sm:$0xff] }
 0x668   : > { %5725 = vmatmul.mubr.f32.gmra.mxu0 %v10518_v53  ;;  %6458 = vmatprep.mubr.f32.mxu1 %v4694_v27 }
 0x669   : > { %5729 = vmatprep.mubr.f32.mxu0 %v4662_v34 }
 0x66b   : > { %6459 = vmatmul.mubr.f32.gmra.mxu1 %v4695_v28  ;;  %v11364_v28 = vld [vmem:[#allocation86_spill] sm:$0xff] }
 0x66c   : > { %5730 = vmatmul.mubr.f32.gmra.mxu0 %v6541_v30  ;;  %v5147_v59 = vadd.f32 %v11365_v4, %v11364_v28  ;;  %v11373_v4 = vld [vmem:[#allocation125_spill] sm:$0xff] }
 0x66d   : > { %5734 = vmatprep.mubr.f32.mxu0 %v4663_v13 }
 0x670   : > { %5735 = vmatmul.mubr.f32.gmra.mxu0 %v6541_v30 }
 0x671   : > { %6413 = vmatprep.mubr.f32.mxu0 %v4664_v55 }
 0x674   : > { %6414 = vmatmul.mubr.f32.vlgmr.msra.gmra.mxu0 %v4665_v24  ;;  %v11366_v24 = vld [vmem:[#allocation114_spill] sm:$0xff] }
 0x675   : > { %6416 = vmatprep.mubr.f32.mxu0 %v4666_v18  ;;  %v11367_v18 = vld [vmem:[#allocation131_spill] sm:$0xff] }
 0x678   : > { %6417 = vmatmul.mubr.f32.gmra.mxu0 %v4667_v16  ;;  %v5152_v16 = vadd.f32 %v11367_v18, %v11366_v24  ;;  %v11374_v18 = vld [vmem:[#allocation5_spill] sm:$0xff] }
 0x679   : > { %6419 = vmatprep.mubr.f32.mxu0 %v4668_v21 }
 0x67b   : > { %v10726_v53 = vpop.f32.mrf.mxu1 }
 0x67c   : > { %v5271_v46 = vpop.f32.mrf.mxu0  ;;  %6420 = vmatmul.mubr.f32.gmra.mxu0 %v4669_v10  ;;  %v11368_v10 = vld [vmem:[#allocation6_spill] sm:$0xff] }
 0x67d   : > { %v10728_v45 = vadd.f32 %v5271_v46, %v5046_v43  ;;  %6422 = vmatprep.mubr.f32.mxu0 %v4670_v52  ;;  %v5058_v62 = vpop.f32.mrf.mxu1 }
 0x67e   : > { %v5273_v57 = vpop.f32.mrf.mxu0  ;;  %v11369_v62 = vld [vmem:[#allocation33_spill] sm:$0xff] }
 0x67f   : > { %v5061_v2 = vpop.f32.mrf.mxu1  ;;  %v5162_v57 = vadd.f32 %v10541_v54, %v11369_v62 }
 0x680   : > { %v5276_v11 = vpop.f32.mrf.mxu0  ;;  %6423 = vmatmul.mubr.f32.gmra.mxu0 %v4671_v56 }
 0x681   : > { %v10730_v22 = vadd.f32 %v5276_v11, %v5051_v41  ;;  %6425 = vmatprep.mubr.f32.mxu0 %v4672_v49  ;;  %v5063_v42 = vpop.f32.mrf.mxu1  ;;  %v5142_v41 = vadd.f32 %v10501_v1, %v9000_v60  ;;  %v5157_v60 = vadd.f32 %v10532_v33, %v11368_v10 }
 0x682   : > { %v5278_v37 = vpop.f32.mrf.mxu0  ;;  %v11370_v42 = vld [vmem:[#allocation60_spill] sm:$0xff] }
 0x683   : > { %v5356_v48 = vpop.f32.mrf.mxu1 }
 0x684   : > { %v5357_v43 = vadd.f32 %v5356_v48, %v5132_v39  ;;  %6426 = vmatmul.mubr.f32.gmra.mxu0 %v4673_v44  ;;  %v5167_v39 = vadd.f32 %v10552_v0, %v11370_v42  ;;  %v5182_v0 = vadd.f32 %v10586_v3, %v11373_v4  ;;  %v11375_v3 = vld [vmem:[#allocation32_spill] sm:$0xff] }
 0x685   : > { %v5358_v38 = vpop.f32.mrf.mxu1 }
 0x686   : > { %v11371_v38 = vld [vmem:[#allocation88_spill] sm:$0xff] }
 0x687   : > { %v5361_v19 = vpop.f32.mrf.mxu1  ;;  %v5172_v33 = vadd.f32 %v10564_v35, %v11371_v38 }
 0x688   : > { %v5362_v32 = vadd.f32 %v5361_v19, %v5137_v9 }
 0x689   : > { %v5363_v23 = vpop.f32.mrf.mxu1 }
 0x68b   : > { %v5366_v61 = vpop.f32.mrf.mxu1 }
 0x68c   : > { %v5367_v27 = vadd.f32 %v5366_v61, %v5142_v41  ;;  %v11372_v41 = vld [vmem:[#allocation115_spill] sm:$0xff] }
 0x68d   : > { %v5368_v34 = vpop.f32.mrf.mxu1  ;;  %v5177_v54 = vadd.f32 %v10576_v26, %v11372_v41 }
 0x68f   : > { %v5371_v13 = vpop.f32.mrf.mxu1 }
 0x690   : > { %v10740_v30 = vadd.f32 %v5371_v13, %v5147_v59 }
 0x691   : > { %v5373_v55 = vpop.f32.mrf.mxu1 }
 0x693   : > { %v5376_v7 = vpop.f32.mrf.mxu1 }
 0x694   : > { %v10744_v5 = vadd.f32 %v5376_v7, %v5152_v16  ;;  %v5187_v16 = vadd.f32 %v10596_v47, %v11374_v18  ;;  %v11376_v47 = vld [vmem:[#allocation128_spill] sm:$0xff] }
 0x695   : > { %v5378_v21 = vpop.f32.mrf.mxu1 }
 0x697   : > { %v5381_v1 = vpop.f32.mrf.mxu1 }
 0x698   : > { %v10748_v46 = vadd.f32 %v5381_v1, %v5157_v60 }
 0x699   : > { %v5383_v52 = vpop.f32.mrf.mxu1 }
 0x69a   : > { %v5192_v52 = vadd.f32 %v10606_v40, %v11375_v3  ;;  %v11377_v40 = vld [vmem:[#allocation59_spill] sm:$0xff] }
 0x69b   : > { %v5386_v56 = vpop.f32.mrf.mxu1 }
 0x69c   : > { %v10752_v11 = vadd.f32 %v5386_v56, %v5162_v57 }
 0x69d   : > { %v5388_v49 = vpop.f32.mrf.mxu1 }
 0x69f   : > { %v5391_v37 = vpop.f32.mrf.mxu1 }
 0x6a0   : > { %v10756_v48 = vadd.f32 %v5391_v37, %v5167_v39  ;;  %v5197_v39 = vadd.f32 %v10616_v51, %v11376_v47  ;;  %v11378_v51 = vld [vmem:[#allocation87_spill] sm:$0xff] }
 0x6a1   : > { %v5393_v44 = vpop.f32.mrf.mxu1 }
 0x6a3   : > { %v5396_v9 = vpop.f32.mrf.mxu1 }
 0x6a4   : > { %v10760_v19 = vadd.f32 %v5396_v9, %v5172_v33 }
 0x6a5   : > { %v5398_v23 = vpop.f32.mrf.mxu1 }
 0x6a6   : > { %v5202_v23 = vadd.f32 %v10626_v29, %v11377_v40 }
 0x6a7   : > { %v5401_v61 = vpop.f32.mrf.mxu1 }
 0x6a8   : > { %v10764_v34 = vadd.f32 %v5401_v61, %v5177_v54 }
 0x6a9   : > { %v5403_v28 = vpop.f32.mrf.mxu1 }
 0x6ab   : > { %v5406_v59 = vpop.f32.mrf.mxu1 }
 0x6ac   : > { %v5281_v13 = vpop.f32.mrf.mxu0  ;;  %v10768_v55 = vadd.f32 %v5406_v59, %v5182_v0  ;;  %v5207_v0 = vadd.f32 %v10636_v14, %v11378_v51 }
 0x6ad   : > { %v10771_v35 = vadd.f32 %v5281_v13, %v10726_v53  ;;  %v5408_v24 = vpop.f32.mrf.mxu1 }
 0x6ae   : > { %v5283_v7 = vpop.f32.mrf.mxu0 }
 0x6af   : > { %v5411_v26 = vpop.f32.mrf.mxu1 }
 0x6b0   : > { %v5286_v21 = vpop.f32.mrf.mxu0  ;;  %v10775_v10 = vadd.f32 %v5411_v26, %v5187_v16  ;;  %v11379_v16 = vld [vmem:[#allocation116_spill] sm:$0xff] }
 0x6b1   : > { %v10777_v60 = vadd.f32 %v5286_v21, %v5061_v2  ;;  %v5413_v1 = vpop.f32.mrf.mxu1  ;;  %v5212_v7 = vadd.f32 %v10646_v17, %v11379_v16 }
 0x6b2   : > { %v5288_v62 = vpop.f32.mrf.mxu0 }
 0x6b3   : > { %v5416_v57 = vpop.f32.mrf.mxu1 }
 0x6b4   : > { %v10781_v56 = vadd.f32 %v5416_v57, %v5192_v52  ;;  %v5581_v53 = vpop.f32.mrf.mxu0  ;;  %v11380_v52 = vld [vmem:[#allocation8_spill] sm:$0xff] }
 0x6b5   : > { %v10783_v49 = vadd.f32 %v5581_v53, %v5357_v43  ;;  %v5418_v42 = vpop.f32.mrf.mxu1  ;;  %v5217_v62 = vadd.f32 %v10653_v25, %v11380_v52 }
 0x6b6   : > { %v5583_v37 = vpop.f32.mrf.mxu0 }
 0x6b7   : > { %v5421_v44 = vpop.f32.mrf.mxu1 }
 0x6b8   : > { %v10787_v38 = vadd.f32 %v5421_v44, %v5197_v39  ;;  %v5586_v2 = vpop.f32.mrf.mxu0  ;;  %v11381_v39 = vld [vmem:[#allocation35_spill] sm:$0xff] }
 0x6b9   : > { %v10789_v33 = vadd.f32 %v5586_v2, %v5362_v32  ;;  %v5423_v9 = vpop.f32.mrf.mxu1  ;;  %v5222_v37 = vadd.f32 %v10660_v12, %v11381_v39 }
 0x6ba   : > { %v5588_v41 = vpop.f32.mrf.mxu0 }
 0x6bb   : > { %v5426_v54 = vpop.f32.mrf.mxu1 }
 0x6bc   : > { %v10793_v61 = vadd.f32 %v5426_v54, %v5202_v23  ;;  %v5591_v43 = vpop.f32.mrf.mxu0  ;;  %v11382_v23 = vld [vmem:[#allocation62_spill] sm:$0xff] }
 0x6bd   : > { %v10795_v28 = vadd.f32 %v5591_v43, %v5367_v27  ;;  %v5428_v4 = vpop.f32.mrf.mxu1  ;;  %v5227_v41 = vadd.f32 %v10667_v20, %v11382_v23 }
 0x6be   : > { %v5593_v59 = vpop.f32.mrf.mxu0 }
 0x6bf   : > { %v5431_v13 = vpop.f32.mrf.mxu1 }
 0x6c0   : > { %v10799_v24 = vadd.f32 %v5431_v13, %v5207_v0  ;;  %v5596_v32 = vpop.f32.mrf.mxu0  ;;  %v11383_v0 = vld [vmem:[#allocation90_spill] sm:$0xff] }
 0x6c1   : > { %v10802_v18 = vadd.f32 %v5596_v32, %v10740_v30  ;;  %v5433_v29 = vpop.f32.mrf.mxu1  ;;  %v5232_v59 = vadd.f32 %v10674_v8, %v11383_v0 }
 0x6c2   : > { %v5598_v26 = vpop.f32.mrf.mxu0 }
 0x6c3   : > { %v5436_v21 = vpop.f32.mrf.mxu1 }
 0x6c4   : > { %v10806_v27 = vadd.f32 %v5436_v21, %v5212_v7  ;;  %v5601_v1 = vpop.f32.mrf.mxu0 }
 0x6c5   : > { %v10809_v3 = vadd.f32 %v5601_v1, %v10744_v5  ;;  %v5438_v14 = vpop.f32.mrf.mxu1 }
 0x6c6   : > { %v5603_v57 = vpop.f32.mrf.mxu0 }
 0x6c7   : > { %v5441_v53 = vpop.f32.mrf.mxu1 }
 0x6c8   : > { %v10813_v30 = vadd.f32 %v5441_v53, %v5217_v62  ;;  %v5606_v42 = vpop.f32.mrf.mxu0 }
 0x6c9   : > { %v10816_v47 = vadd.f32 %v5606_v42, %v10748_v46  ;;  %v5443_v17 = vpop.f32.mrf.mxu1 }
 0x6ca   : > { %v5608_v44 = vpop.f32.mrf.mxu0 }
 0x6cb   : > { %v5446_v2 = vpop.f32.mrf.mxu1 }
 0x6cc   : > { %v10820_v5 = vadd.f32 %v5446_v2, %v5222_v37  ;;  %v5611_v9 = vpop.f32.mrf.mxu0 }
 0x6cd   : > { %v10823_v40 = vadd.f32 %v5611_v9, %v10752_v11  ;;  %v5448_v25 = vpop.f32.mrf.mxu1 }
 0x6ce   : > { %v5613_v54 = vpop.f32.mrf.mxu0 }
 0x6cf   : > { %v5451_v43 = vpop.f32.mrf.mxu1 }
 0x6d0   : > { %v10827_v46 = vadd.f32 %v5451_v43, %v5227_v41  ;;  %v5616_v4 = vpop.f32.mrf.mxu0 }
 0x6d1   : > { %v10830_v51 = vadd.f32 %v5616_v4, %v10756_v48  ;;  %v5453_v12 = vpop.f32.mrf.mxu1 }
 0x6d2   : > { %v5618_v13 = vpop.f32.mrf.mxu0 }
 0x6d3   : > { %v5456_v32 = vpop.f32.mrf.mxu1 }
 0x6d4   : > { %v10834_v11 = vadd.f32 %v5456_v32, %v5232_v59  ;;  %v5621_v29 = vpop.f32.mrf.mxu0 }
 0x6d5   : > { %v10837_v16 = vadd.f32 %v5621_v29, %v10760_v19  ;;  %v5458_v20 = vpop.f32.mrf.mxu1 }
 0x6d6   : > { %v5623_v7 = vpop.f32.mrf.mxu0 }
 0x6d7   : > { %11384 = vst [vmem:[#allocation61_spill] sm:$0xff] %v10837_v16  ;;  %v10839_v26 = vpop.f32.mrf.mxu1 }
 0x6d8   : > { %v5626_v21 = vpop.f32.mrf.mxu0 }
 0x6d9   : > { %v10842_v48 = vadd.f32 %v5626_v21, %v10764_v34  ;;  %v5463_v1 = vpop.f32.mrf.mxu1 }
 0x6da   : > { %v5628_v14 = vpop.f32.mrf.mxu0 }
 0x6db   : > { %11385 = vst [vmem:[#allocation89_spill] sm:$0xff] %v10842_v48  ;;  %v10844_v52 = vpop.f32.mrf.mxu1 }
 0x6dc   : > { %v5631_v8 = vpop.f32.mrf.mxu0 }
 0x6dd   : > { %v5468_v62 = vpop.f32.mrf.mxu1 }
 0x6de   : > { %v5633_v57 = vpop.f32.mrf.mxu0 }
 0x6df   : > { %v10846_v53 = vpop.f32.mrf.mxu1 }
 0x6e0   : > { %v5636_v42 = vpop.f32.mrf.mxu0 }
 0x6e1   : > { %v5473_v19 = vpop.f32.mrf.mxu1 }
 0x6e2   : > { %v5638_v17 = vpop.f32.mrf.mxu0 }
 0x6e3   : > { %v10848_v39 = vpop.f32.mrf.mxu1 }
 0x6e4   : > { %v5641_v37 = vpop.f32.mrf.mxu0 }
 0x6e5   : > { %v5478_v44 = vpop.f32.mrf.mxu1  ;;  %v5642_v16 = vadd.f32 %v5641_v37, %v10781_v56 }
 0x6e6   : > { %v5643_v2 = vpop.f32.mrf.mxu0 }
 0x6e7   : > { %v10850_v9 = vpop.f32.mrf.mxu1 }
 0x6e8   : > { %v5646_v34 = vpop.f32.mrf.mxu0 }
 0x6e9   : > { %v5483_v25 = vpop.f32.mrf.mxu1 }
 0x6ea   : > { %v5648_v23 = vpop.f32.mrf.mxu0 }
 0x6eb   : > { %v10852_v41 = vpop.f32.mrf.mxu1 }
 0x6ec   : > { %v5651_v54 = vpop.f32.mrf.mxu0 }
 0x6ed   : > { %v5488_v43 = vpop.f32.mrf.mxu1 }
 0x6ee   : > { %v5653_v4 = vpop.f32.mrf.mxu0  ;;  %v5637_v43 = vadd.f32 %v5636_v42, %v10775_v10  ;;  %v5647_v10 = vadd.f32 %v5646_v34, %v10787_v38 }
 0x6ef   : > { %v10854_v12 = vpop.f32.mrf.mxu1 }
 0x6f0   : > { %v5656_v0 = vpop.f32.mrf.mxu0 }
 0x6f1   : > { %v5493_v59 = vpop.f32.mrf.mxu1  ;;  %v5657_v48 = vadd.f32 %v5656_v0, %v10799_v24 }
 0x6f2   : > { %v5658_v13 = vpop.f32.mrf.mxu0 }
 0x6f3   : > { %v10856_v32 = vpop.f32.mrf.mxu1  ;;  %v10870_v13 = vld [vmem:[%s11040_s6] ss:$0 sm:$0xff] }
 0x6f4   : > { %v5661_v29 = vpop.f32.mrf.mxu0 }
 0x6f5   : > { %v5498_v20 = vpop.f32.mrf.mxu1 }
 0x6f6   : > { %v5663_v7 = vpop.f32.mrf.mxu0  ;;  %v5632_v20 = vadd.f32 %v5631_v8, %v10768_v55 }
 0x6f7   : > { %v10858_v21 = vpop.f32.mrf.mxu1 }
 0x6f8   : > { %v5666_v1 = vpop.f32.mrf.mxu0 }
 0x6f9   : > { %v5503_v14 = vpop.f32.mrf.mxu1 }
 0x6fa   : > { %v5668_v62 = vpop.f32.mrf.mxu0 }
 0x6fb   : > { %v10860_v57 = vpop.f32.mrf.mxu1  ;;  %v10878_v62 = vld [vmem:[%s11041_s7] ss:$0 sm:$0xff] }
 0x6fc   : > { %v10862_v19 = vpop.f32.mrf.mxu0 }
 0x6fd   : > { %v5508_v17 = vpop.f32.mrf.mxu1 }
 0x6fe   : > { %v5673_v44 = vpop.f32.mrf.mxu0 }
 0x6ff   : > { %v10864_v2 = vpop.f32.mrf.mxu1 }
 0x700   : > { %v5676_v25 = vpop.f32.mrf.mxu0 }
 0x701   : > { %v5513_v23 = vpop.f32.mrf.mxu1 }
 0x702   : > { %v5678_v4 = vpop.f32.mrf.mxu0 }
 0x703   : > { %v6430_v59 = vpop.f32.mrf.mxu1 }
 0x704   : > { %v10873_v7 = vpop.f32.mrf.mxu0  ;;  %v5862_v14 = vadd.f32 %v6430_v59, %v5637_v43 }
 0x705   : > { %v5856_v17 = vpop.f32.mrf.mxu1 }
 0x706   : > { %v5983_v42 = vmul.f32 %v10870_v13, %v5862_v14  ;;  %v5683_v44 = vpop.f32.mrf.mxu0  ;;  %v5857_v23 = vadd.f32 %v5856_v17, %v5632_v20  ;;  %v5652_v17 = vadd.f32 %v5651_v54, %v10793_v61 }
 0x707   : > { %v6433_v4 = vpop.f32.mrf.mxu1 }
 0x708   : > { %v6022_v55 = vadd.f32 %v10878_v62, %v5983_v42  ;;  %v5982_v8 = vmul.f32 %v10870_v13, %v5857_v23  ;;  %v5686_v43 = vpop.f32.mrf.mxu0  ;;  %v5872_v59 = vadd.f32 %v6433_v4, %v5647_v10  ;;  %v5667_v4 = vadd.f32 %v5666_v1, %v10813_v30 }
 0x709   : > { %v5866_v38 = vpop.f32.mrf.mxu1 }
 0x70a   : > { %v6054_v34 = vmax.f32 %v6022_v55, 0.0  ;;  %v6021_v20 = vadd.f32 %v10878_v62, %v5982_v8  ;;  %v5985_v56 = vmul.f32 %v10870_v13, %v5872_v59  ;;  %v5688_v37 = vpop.f32.mrf.mxu0  ;;  %v5867_v14 = vadd.f32 %v5866_v38, %v5642_v16 }
 0x70b   : > { %v6436_v10 = vpop.f32.mrf.mxu1  ;;  %v5662_v38 = vadd.f32 %v5661_v29, %v10806_v27  ;;  %v11386_v37 = vld [vmem:[#allocation117_spill] sm:$0xff] }
 0x70c   : > { %6086 = vst [vmem:[%s10890_s22 + $0x58] sm:$0xff] %v6054_v34  ;;  %v6053_v24 = vmax.f32 %v6021_v20, 0.0  ;;  %v6024_v0 = vadd.f32 %v10878_v62, %v5985_v56  ;;  %v5984_v42 = vmul.f32 %v10870_v13, %v5867_v14  ;;  %v10898_v44 = vpop.f32.mrf.mxu0  ;;  %v5882_v23 = vadd.f32 %v6436_v10, %v5657_v48 }
 0x70d   : > { %v5876_v55 = vpop.f32.mrf.mxu1  ;;  %v5237_v14 = vadd.f32 %v10681_v63, %v11386_v37  ;;  %v5677_v10 = vadd.f32 %v5676_v25, %v10827_v46  ;;  %v5682_v37 = vadd.f32 %v10873_v7, %v10834_v11 }
 0x70e   : > { %6085 = vst [vmem:[%s10890_s22 + $0x50] sm:$0xff] %v6053_v24  ;;  %v6056_v8 = vmax.f32 %v6024_v0, 0.0  ;;  %v6023_v16 = vadd.f32 %v10878_v62, %v5984_v42  ;;  %v5987_v61 = vmul.f32 %v10870_v13, %v5882_v23  ;;  %v5693_v54 = vpop.f32.mrf.mxu0  ;;  %v5877_v59 = vadd.f32 %v5876_v55, %v5652_v17 }
 0x70f   : > { %v6439_v34 = vpop.f32.mrf.mxu1  ;;  %v5462_v23 = vadd.f32 %v10839_v26, %v5237_v14 }
 0x710   : > { %6088 = vst [vmem:[%s10890_s22 + $0x68] sm:$0xff] %v6056_v8  ;;  %v6055_v20 = vmax.f32 %v6023_v16, 0.0  ;;  %v6026_v56 = vadd.f32 %v10878_v62, %v5987_v61  ;;  %v5986_v30 = vmul.f32 %v10870_v13, %v5877_v59  ;;  %v5696_v48 = vpop.f32.mrf.mxu0  ;;  %v5892_v1 = vadd.f32 %v6439_v34, %v5667_v4  ;;  %v11387_v61 = vld [vmem:[#allocation7_spill] sm:$0xff] }
 0x711   : > { %v5886_v24 = vpop.f32.mrf.mxu1  ;;  %v5672_v4 = vadd.f32 %v10862_v19, %v10820_v5  ;;  %v5247_v54 = vadd.f32 %v10693_v50, %v11387_v61  ;;  %v5687_v59 = vadd.f32 %v5686_v43, %v5462_v23  ;;  %v5482_v23 = vadd.f32 %v10850_v9, %v10706_v31 }
 0x712   : > { %6087 = vst [vmem:[%s10890_s22 + $0x60] sm:$0xff] %v6055_v20  ;;  %v6058_v17 = vmax.f32 %v6026_v56, 0.0  ;;  %v6025_v27 = vadd.f32 %v10878_v62, %v5986_v30  ;;  %v5989_v29 = vmul.f32 %v10870_v13, %v5892_v1  ;;  %v5698_v0 = vpop.f32.mrf.mxu0  ;;  %v5887_v42 = vadd.f32 %v5886_v24, %v5662_v38  ;;  %v11388_v56 = vld [vmem:[#allocation129_spill] sm:$0xff] }
 0x713   : > { %v6442_v55 = vpop.f32.mrf.mxu1  ;;  %v5242_v30 = vadd.f32 %v10686_v58, %v11388_v56  ;;  %v5472_v1 = vadd.f32 %v10846_v53, %v5247_v54 }
 0x714   : > { %6090 = vst [vmem:[%s10890_s22 + $0x78] sm:$0xff] %v6058_v17  ;;  %v6057_v63 = vmax.f32 %v6025_v27, 0.0  ;;  %v6028_v46 = vadd.f32 %v10878_v62, %v5989_v29  ;;  %v5988_v25 = vmul.f32 %v10870_v13, %v5887_v42  ;;  %v5701_v8 = vpop.f32.mrf.mxu0  ;;  %v5902_v16 = vadd.f32 %v6442_v55, %v5677_v10 }
 0x715   : > { %v5896_v38 = vpop.f32.mrf.mxu1  ;;  %v5467_v27 = vadd.f32 %v10844_v52, %v5242_v30  ;;  %v5697_v29 = vadd.f32 %v5696_v48, %v5472_v1  ;;  %v5487_v30 = vadd.f32 %v10852_v41, %v10712_v6 }
 0x716   : > { %6089 = vst [vmem:[%s10890_s22 + $0x70] sm:$0xff] %v6057_v63  ;;  %v6060_v26 = vmax.f32 %v6028_v46, 0.0  ;;  %v6027_v34 = vadd.f32 %v10878_v62, %v5988_v25  ;;  %v5991_v5 = vmul.f32 %v10870_v13, %v5902_v16  ;;  %v5703_v19 = vpop.f32.mrf.mxu0  ;;  %v5897_v20 = vadd.f32 %v5896_v38, %v5672_v4 }
 0x717   : > { %v6445_v50 = vpop.f32.mrf.mxu1  ;;  %v5692_v4 = vadd.f32 %v10898_v44, %v5467_v27  ;;  %v5477_v16 = vadd.f32 %v10848_v39, %v10701_v36 }
 0x718   : > { %6092 = vst [vmem:[%s10890_s22 + $0x88] sm:$0xff] %v6060_v26  ;;  %v6059_v43 = vmax.f32 %v6027_v34, 0.0  ;;  %v6030_v14 = vadd.f32 %v10878_v62, %v5991_v5  ;;  %v5990_v10 = vmul.f32 %v10870_v13, %v5897_v20  ;;  %v5706_v24 = vpop.f32.mrf.mxu0  ;;  %v5912_v17 = vadd.f32 %v6445_v50, %v5687_v59 }
 0x719   : > { %v5906_v0 = vpop.f32.mrf.mxu1  ;;  %v5707_v61 = vadd.f32 %v5706_v24, %v5482_v23  ;;  %v5492_v26 = vadd.f32 %v10854_v12, %v10718_v15  ;;  %v5702_v34 = vadd.f32 %v5701_v8, %v5477_v16  ;;  %v5502_v23 = vadd.f32 %v10858_v21, %v10730_v22 }
 0x71a   : > { %6091 = vst [vmem:[%s10890_s22 + $0x80] sm:$0xff] %v6059_v43  ;;  %v6062_v58 = vmax.f32 %v6030_v14, 0.0  ;;  %v6029_v53 = vadd.f32 %v10878_v62, %v5990_v10  ;;  %v5993_v11 = vmul.f32 %v10870_v13, %v5912_v17  ;;  %v5708_v7 = vpop.f32.mrf.mxu0  ;;  %v5907_v42 = vadd.f32 %v5906_v0, %v5682_v37 }
 0x71b   : > { %v6448_v55 = vpop.f32.mrf.mxu1  ;;  %v5507_v22 = vadd.f32 %v10860_v57, %v10771_v35  ;;  %v5512_v35 = vadd.f32 %v10864_v2, %v10777_v60 }
 0x71c   : > { %6094 = vst [vmem:[%s10890_s22 + $0x98] sm:$0xff] %v6062_v58  ;;  %v6061_v63 = vmax.f32 %v6029_v53, 0.0  ;;  %v6032_v52 = vadd.f32 %v10878_v62, %v5993_v11  ;;  %v5992_v48 = vmul.f32 %v10870_v13, %v5907_v42  ;;  %v5711_v46 = vpop.f32.mrf.mxu0  ;;  %v5922_v25 = vadd.f32 %v6448_v55, %v5697_v29 }
 0x71d   : > { %v5916_v54 = vpop.f32.mrf.mxu1  ;;  %v5712_v14 = vadd.f32 %v5711_v46, %v5487_v30  ;;  %v5497_v29 = vadd.f32 %v10856_v32, %v10728_v45 }
 0x71e   : > { %6093 = vst [vmem:[%s10890_s22 + $0x90] sm:$0xff] %v6061_v63  ;;  %v6064_v59 = vmax.f32 %v6032_v52, 0.0  ;;  %v6031_v31 = vadd.f32 %v10878_v62, %v5992_v48  ;;  %v5995_v9 = vmul.f32 %v10870_v13, %v5922_v25  ;;  %v5713_v44 = vpop.f32.mrf.mxu0  ;;  %v5917_v38 = vadd.f32 %v5916_v54, %v5692_v4 }
 0x71f   : > { %v6451_v5 = vpop.f32.mrf.mxu1 }
 0x720   : > { %6096 = vst [vmem:[%s10890_s22 + $0xa8] sm:$0xff] %v6064_v59  ;;  %v6063_v19 = vmax.f32 %v6031_v31, 0.0  ;;  %v6034_v36 = vadd.f32 %v10878_v62, %v5995_v9  ;;  %v5994_v39 = vmul.f32 %v10870_v13, %v5917_v38  ;;  %v5716_v20 = vpop.f32.mrf.mxu0  ;;  %v5932_v56 = vadd.f32 %v6451_v5, %v5707_v61 }
 0x721   : > { %v5717_v1 = vadd.f32 %v5716_v20, %v5492_v26  ;;  %v5926_v37 = vpop.f32.mrf.mxu1 }
 0x722   : > { %6095 = vst [vmem:[%s10890_s22 + $0xa0] sm:$0xff] %v6063_v19  ;;  %v6066_v50 = vmax.f32 %v6034_v36, 0.0  ;;  %v6033_v15 = vadd.f32 %v10878_v62, %v5994_v39  ;;  %v5997_v12 = vmul.f32 %v10870_v13, %v5932_v56  ;;  %v5718_v8 = vpop.f32.mrf.mxu0  ;;  %v5927_v43 = vadd.f32 %v5926_v37, %v5702_v34 }
 0x723   : > { %v6454_v10 = vpop.f32.mrf.mxu1 }
 0x724   : > { %6098 = vst [vmem:[%s10890_s22 + $0xb8] sm:$0xff] %v6066_v50  ;;  %v6065_v24 = vmax.f32 %v6033_v15, 0.0  ;;  %v6036_v17 = vadd.f32 %v10878_v62, %v5997_v12  ;;  %v5996_v6 = vmul.f32 %v10870_v13, %v5927_v43  ;;  %v5721_v41 = vpop.f32.mrf.mxu0  ;;  %v5942_v27 = vadd.f32 %v6454_v10, %v5717_v1 }
 0x725   : > { %v5936_v0 = vpop.f32.mrf.mxu1  ;;  %v5722_v63 = vadd.f32 %v5721_v41, %v5497_v29 }
 0x726   : > { %6097 = vst [vmem:[%s10890_s22 + $0xb0] sm:$0xff] %v6065_v24  ;;  %v6068_v58 = vmax.f32 %v6036_v17, 0.0  ;;  %v6035_v53 = vadd.f32 %v10878_v62, %v5996_v6  ;;  %v5999_v11 = vmul.f32 %v10870_v13, %v5942_v27  ;;  %v5723_v7 = vpop.f32.mrf.mxu0  ;;  %v5937_v42 = vadd.f32 %v5936_v0, %v5712_v14 }
 0x727   : > { %v6457_v4 = vpop.f32.mrf.mxu1 }
 0x728   : > { %6100 = vst [vmem:[%s10890_s22 + $0xc8] sm:$0xff] %v6068_v58  ;;  %v6067_v55 = vmax.f32 %v6035_v53, 0.0  ;;  %v6038_v45 = vadd.f32 %v10878_v62, %v5999_v11  ;;  %v5998_v32 = vmul.f32 %v10870_v13, %v5937_v42  ;;  %v5726_v52 = vpop.f32.mrf.mxu0 }
 0x729   : > { %v5727_v48 = vadd.f32 %v5726_v52, %v5502_v23  ;;  %v5946_v46 = vpop.f32.mrf.mxu1 }
 0x72a   : > { %6099 = vst [vmem:[%s10890_s22 + $0xc0] sm:$0xff] %v6067_v55  ;;  %v6070_v25 = vmax.f32 %v6038_v45, 0.0  ;;  %v6037_v16 = vadd.f32 %v10878_v62, %v5998_v32  ;;  %v5728_v61 = vpop.f32.mrf.mxu0  ;;  %v5947_v54 = vadd.f32 %v5946_v46, %v5722_v63 }
 0x72b   : > { %v5952_v21 = vadd.f32 %v6457_v4, %v5727_v48  ;;  %v6460_v59 = vpop.f32.mrf.mxu1 }
 0x72c   : > { %6102 = vst [vmem:[%s10890_s22 + $0xd8] sm:$0xff] %v6070_v25  ;;  %v6069_v31 = vmax.f32 %v6037_v16, 0.0  ;;  %v6000_v9 = vmul.f32 %v10870_v13, %v5947_v54  ;;  %v5731_v44 = vpop.f32.mrf.mxu0 }
 0x72d   : > { %v6001_v38 = vmul.f32 %v10870_v13, %v5952_v21  ;;  %v5732_v26 = vadd.f32 %v5731_v44, %v5507_v22  ;;  %v5956_v34 = vpop.f32.mrf.mxu1 }
 0x72e   : > { %6101 = vst [vmem:[%s10890_s22 + $0xd0] sm:$0xff] %v6069_v31  ;;  %v6039_v5 = vadd.f32 %v10878_v62, %v6000_v9  ;;  %v5733_v19 = vpop.f32.mrf.mxu0 }
 0x72f   : > { %v6040_v57 = vadd.f32 %v10878_v62, %v6001_v38  ;;  %v5957_v36 = vadd.f32 %v5956_v34, %v5732_v26 }
 0x730   : > { %v6071_v39 = vmax.f32 %v6039_v5, 0.0  ;;  %v5736_v20 = vpop.f32.mrf.mxu0 }
 0x731   : > { %v6072_v56 = vmax.f32 %v6040_v57, 0.0  ;;  %v6002_v30 = vmul.f32 %v10870_v13, %v5957_v36  ;;  %v5737_v1 = vadd.f32 %v5736_v20, %v5512_v35 }
 0x732   : > { %6103 = vst [vmem:[%s10890_s22 + $0xe0] sm:$0xff] %v6071_v39  ;;  %v5738_v37 = vpop.f32.mrf.mxu0 }
 0x733   : > { %6104 = vst [vmem:[%s10890_s22 + $0xe8] sm:$0xff] %v6072_v56  ;;  %v6041_v50 = vadd.f32 %v10878_v62, %v6002_v30  ;;  %v5962_v15 = vadd.f32 %v6460_v59, %v5737_v1 }
 0x734   : > { %v6415_v12 = vpop.f32.mrf.mxu0 }
 0x735   : > { %v6073_v8 = vmax.f32 %v6041_v50, 0.0  ;;  %v6003_v60 = vmul.f32 %v10870_v13, %v5962_v15  ;;  %v5812_v2 = vadd.f32 %v6415_v12, %v10789_v33 }
 0x736   : > { %v5806_v43 = vpop.f32.mrf.mxu0 }
 0x737   : > { %6105 = vst [vmem:[%s10890_s22 + $0xf0] sm:$0xff] %v6073_v8  ;;  %v6042_v14 = vadd.f32 %v10878_v62, %v6003_v60  ;;  %v5973_v10 = vmul.f32 %v10870_v13, %v5812_v2  ;;  %v5807_v24 = vadd.f32 %v5806_v43, %v10783_v49 }
 0x738   : > { %v6418_v17 = vpop.f32.mrf.mxu0 }
 0x739   : > { %v6074_v6 = vmax.f32 %v6042_v14, 0.0  ;;  %v6012_v41 = vadd.f32 %v10878_v62, %v5973_v10  ;;  %v5972_v27 = vmul.f32 %v10870_v13, %v5807_v24  ;;  %v5822_v29 = vadd.f32 %v6418_v17, %v10802_v18 }
 0x73a   : > { %v5816_v0 = vpop.f32.mrf.mxu0 }
 0x73b   : > { %6106 = vst [vmem:[%s10890_s22 + $0xf8] sm:$0xff] %v6074_v6  ;;  %v6044_v33 = vmax.f32 %v6012_v41, 0.0  ;;  %v6011_v58 = vadd.f32 %v10878_v62, %v5972_v27  ;;  %v5975_v53 = vmul.f32 %v10870_v13, %v5822_v29  ;;  %v5817_v11 = vadd.f32 %v5816_v0, %v10795_v28 }
 0x73c   : > { %v6421_v49 = vpop.f32.mrf.mxu0 }
 0x73d   : > { %6076 = vst [vmem:[%s10890_s22 + $0x8] sm:$0xff] %v6044_v33  ;;  %v6043_v7 = vmax.f32 %v6011_v58, 0.0  ;;  %v6014_v42 = vadd.f32 %v10878_v62, %v5975_v53  ;;  %v5974_v23 = vmul.f32 %v10870_v13, %v5817_v11  ;;  %v5832_v18 = vadd.f32 %v6421_v49, %v10816_v47 }
 0x73e   : > { %v5826_v4 = vpop.f32.mrf.mxu0 }
 0x73f   : > { %6075 = vst [vmem:[%s10890_s22] sm:$0xff] %v6043_v7  ;;  %v6046_v55 = vmax.f32 %v6014_v42, 0.0  ;;  %v6013_v63 = vadd.f32 %v10878_v62, %v5974_v23  ;;  %v5977_v45 = vmul.f32 %v10870_v13, %v5832_v18  ;;  %v5827_v28 = vadd.f32 %v5826_v4, %v10809_v3 }
 0x740   : > { %v6424_v32 = vpop.f32.mrf.mxu0 }
 0x741   : > { %6078 = vst [vmem:[%s10890_s22 + $0x18] sm:$0xff] %v6046_v55  ;;  %v6045_v52 = vmax.f32 %v6013_v63, 0.0  ;;  %v6016_v48 = vadd.f32 %v10878_v62, %v5977_v45  ;;  %v5976_v46 = vmul.f32 %v10870_v13, %v5827_v28  ;;  %v5842_v47 = vadd.f32 %v6424_v32, %v10830_v51  ;;  %v11389_v51 = vld [vmem:[#allocation89_spill] sm:$0xff] }
 0x742   : > { %v5836_v25 = vpop.f32.mrf.mxu0 }
 0x743   : > { %6077 = vst [vmem:[%s10890_s22 + $0x10] sm:$0xff] %v6045_v52  ;;  %v6048_v16 = vmax.f32 %v6016_v48, 0.0  ;;  %v6015_v61 = vadd.f32 %v10878_v62, %v5976_v46  ;;  %v5979_v54 = vmul.f32 %v10870_v13, %v5842_v47  ;;  %v5837_v3 = vadd.f32 %v5836_v25, %v10823_v40  ;;  %v11390_v40 = vld [vmem:[#allocation61_spill] sm:$0xff] }
 0x744   : > { %v6427_v22 = vpop.f32.mrf.mxu0 }
 0x745   : > { %6080 = vst [vmem:[%s10890_s22 + $0x28] sm:$0xff] %v6048_v16  ;;  %v6047_v21 = vmax.f32 %v6015_v61, 0.0  ;;  %v6018_v59 = vadd.f32 %v10878_v62, %v5979_v54  ;;  %v5978_v31 = vmul.f32 %v10870_v13, %v5837_v3  ;;  %v5852_v9 = vadd.f32 %v6427_v22, %v11389_v51 }
 0x746   : > { %v5846_v44 = vpop.f32.mrf.mxu0 }
 0x747   : > { %6079 = vst [vmem:[%s10890_s22 + $0x20] sm:$0xff] %v6047_v21  ;;  %v6050_v38 = vmax.f32 %v6018_v59, 0.0  ;;  %v6017_v26 = vadd.f32 %v10878_v62, %v5978_v31  ;;  %v5981_v34 = vmul.f32 %v10870_v13, %v5852_v9  ;;  %v5847_v5 = vadd.f32 %v5846_v44, %v11390_v40 }
 0x749   : > { %6082 = vst [vmem:[%s10890_s22 + $0x38] sm:$0xff] %v6050_v38  ;;  %v6049_v19 = vmax.f32 %v6017_v26, 0.0  ;;  %v6020_v35 = vadd.f32 %v10878_v62, %v5981_v34  ;;  %v5980_v57 = vmul.f32 %v10870_v13, %v5847_v5 }
 0x74b   : > { %6081 = vst [vmem:[%s10890_s22 + $0x30] sm:$0xff] %v6049_v19  ;;  %v6052_v36 = vmax.f32 %v6020_v35, 0.0  ;;  %v6019_v39 = vadd.f32 %v10878_v62, %v5980_v57 }
 0x74d   : > { %6084 = vst [vmem:[%s10890_s22 + $0x48] sm:$0xff] %v6052_v36  ;;  %v6051_v20 = vmax.f32 %v6019_v39, 0.0 }
 0x74f   : > { %6083 = vst [vmem:[%s10890_s22 + $0x40] sm:$0xff] %v6051_v20 }
 0x750 PF: > { %s18_s27 = sadd.s32 1, %s6548_s27  }
 0x751   : > { %p15_p4 = scmp.ge.s32.totalorder %s18_s27, 4  }
 0x753   :  { %17 = sbr.rel (!%p15_p4) target bundleno = 1 (0x1), region = 91 }

</bundles_post_ra>
